<compile_context>
chip_gen: v7x
topology: tpu7x:2x2x1
jax: 0.10.0
libtpu: 0.0.40
codegen_flags: <defaults>
</compile_context>

<pallas_src>
import numpy as np

import jax
import jax.numpy as jnp
from jax import lax
from jax.experimental import pallas as pl
from jax.experimental.pallas import tpu as pltpu

BN_EPS = 1e-5

H, W = 6, 7                     # Connect-4 board
HP, WP = H + 2, W + 2           # zero-padded board: 8 x 9
NPOS = HP * WP                  # 72 flattened padded positions
MPOS = 10                       # margin positions (max |3x3 tap shift| = 10)
C1_IN = 8                       # conv1 input channels padded 4 -> 8
MAX_B_TILE = 64                 # boards per grid step (VMEM-sized for v7x)

# 3x3 "same" conv tap offsets on the flattened padded grid (kh-major).
_TAP_OFFS = tuple((kh - 1) * WP + (kw - 1) for kh in range(3) for kw in range(3))

# Interior mask over the 72 padded positions (1 inside the 6x7 board).
_r = np.arange(NPOS)
_INTERIOR = (((_r // WP >= 1) & (_r // WP <= H) &
              (_r % WP >= 1) & (_r % WP <= W))).astype(np.float32)


# ----------------------------------------------------------------------------
# Static tiling choices
# ----------------------------------------------------------------------------
def _tile_config(batch):
    """Boards per grid step.  Prefer >= 2 grid steps (v7x has 2 TensorCores),
    keep the tile a multiple of 8 boards when possible (sublane-aligned tap
    reads), cap at MAX_B_TILE so scratch slabs stay small vs. v7x's 64 MiB."""
    if batch >= 2 * MAX_B_TILE:
        b_tile = MAX_B_TILE
    else:
        b_tile = max(1, (batch + 1) // 2)
        if b_tile >= 8:
            b_tile = ((b_tile + 7) // 8) * 8
        b_tile = min(b_tile, MAX_B_TILE)
    n_tiles = (batch + b_tile - 1) // b_tile
    return b_tile, n_tiles


def _chunk_positions(b_tile):
    """Positions per conv M-chunk: a divisor of 72 giving >= 512 rows/chunk
    (amortizes the per-dot weight push) with a modest im2col scratch."""
    for cp in (8, 9, 12, 18, 24, 36, 72):
        if cp * b_tile >= 512:
            return cp
    return NPOS


# ----------------------------------------------------------------------------
# Fused kernel: conv1/bn1/relu -> conv2/bn2/relu -> conv3/bn3/relu -> fc1 -> fc2
# One grid step == one sub-batch of b_tile boards.
# ----------------------------------------------------------------------------
def _make_kernel(b_tile, cp):
    margin = MPOS * b_tile          # zero-margin rows each side of the slab
    m_rows = NPOS * b_tile          # "interior" (all 72 padded positions) rows
    mc = cp * b_tile                # rows per conv M-chunk
    n_chunks = NPOS // cp

    def conv3x3(src_ref, col_ref, w_ref, sc_ref, sh_ref, dst_ref, mask_ref,
                c_in, c_out):
        # Per M-chunk: build an im2col LHS (mc, 9*c_in) from 9 shifted slab
        # reads (fills the MXU contraction depth), ONE matmul, folded BN
        # affine + ReLU, then a select that zeroes the padded-border rows so
        # they double as the next layer's zero padding.  The select (not a
        # multiply) guarantees garbage in the never-written margins can never
        # propagate as NaN/Inf.
        for ci in range(n_chunks):
            m0 = ci * mc
            for t, off in enumerate(_TAP_OFFS):
                col_ref[:, t * c_in:(t + 1) * c_in] = (
                    src_ref[pl.ds(margin + off * b_tile + m0, mc), :])
            y = jnp.dot(col_ref[...], w_ref[...],
                        preferred_element_type=jnp.float32)
            y = y * sc_ref[...] + sh_ref[...]
            keep = mask_ref[pl.ds(m0, mc), :] > 0.5
            dst_ref[pl.ds(margin + m0, mc), :] = jnp.where(
                keep, jnp.maximum(y, 0.0), 0.0)

    def kernel(xs_ref, mask_ref,
               wc1_ref, sc1_ref, sh1_ref,
               wc2_ref, sc2_ref, sh2_ref,
               wc3_ref, sc3_ref, sh3_ref,
               wf1_ref, bf1_ref, wf2_ref, bf2_ref,
               out_ref,
               s1_ref, s2_ref, s3_ref, c1_ref, c2_ref, c3_ref):
        # Margin rows of the persistent scratch slabs are never written by the
        # conv stores; zero them once.  Correctness does NOT depend on this
        # (border rows are produced with a select), so it is safe even when
        # the "parallel" grid axis is sharded across both v7x TensorCores.
        @pl.when(pl.program_id(0) == 0)
        def _init_margins():
            for ref, c in ((s1_ref, 32), (s2_ref, 64), (s3_ref, 128)):
                z = jnp.zeros((margin, c), jnp.float32)
                ref[pl.ds(0, margin), :] = z
                ref[pl.ds(margin + m_rows, margin), :] = z

        conv3x3(xs_ref, c1_ref, wc1_ref, sc1_ref, sh1_ref, s1_ref, mask_ref,
                C1_IN, 32)
        conv3x3(s1_ref, c2_ref, wc2_ref, sc2_ref, sh2_ref, s2_ref, mask_ref,
                32, 64)
        conv3x3(s2_ref, c3_ref, wc3_ref, sc3_ref, sh3_ref, s3_ref, mask_ref,
                64, 128)

        # fc1: 42 accumulating (b_tile,128)@(128,128) matmuls -- each board
        # position is a contiguous row block in the position-major slab.
        acc = jnp.zeros((b_tile, 128), jnp.float32)
        for h in range(H):
            for w in range(W):
                j = h * W + w
                rp = (h + 1) * WP + (w + 1)
                a = s3_ref[pl.ds(margin + rp * b_tile, b_tile), :]
                acc = acc + jnp.dot(a, wf1_ref[pl.ds(j * 128, 128), :],
                                    preferred_element_type=jnp.float32)
        h1 = jnp.maximum(acc + bf1_ref[...], 0.0)

        # fc2 fused; output padded 7 -> 128 lanes for an unmasked store.
        out_ref[...] = (jnp.dot(h1, wf2_ref[...],
                                preferred_element_type=jnp.float32)
                        + bf2_ref[...])

    return kernel


# ----------------------------------------------------------------------------
# One-time parameter preparation (weight re-layout + BN/bias folding)
# ----------------------------------------------------------------------------
def prepare_params(p):
    def conv_prep(w, b, gamma, beta, mean, var, pad_cin=None):
        c_out, c_in = w.shape[0], w.shape[1]
        wt = jnp.transpose(w, (2, 3, 1, 0))                    # (3,3,cin,cout)
        if pad_cin is not None and pad_cin > c_in:
            wt = jnp.pad(wt, ((0, 0), (0, 0), (0, pad_cin - c_in), (0, 0)))
            c_in = pad_cin
        w2d = wt.reshape(9 * c_in, c_out)                      # row = tap*cin + c
        scale = gamma / jnp.sqrt(var + BN_EPS)
        shift = beta + (b - mean) * scale                      # conv bias folded in
        return w2d, scale.reshape(1, c_out), shift.reshape(1, c_out)

    q = {}
    q["wc1"], q["sc1"], q["sh1"] = conv_prep(
        p["conv1_w"], p["conv1_b"], p["bn1_gamma"], p["bn1_beta"],
        p["bn1_mean"], p["bn1_var"], pad_cin=C1_IN)
    q["wc2"], q["sc2"], q["sh2"] = conv_prep(
        p["conv2_w"], p["conv2_b"], p["bn2_gamma"], p["bn2_beta"],
        p["bn2_mean"], p["bn2_var"])
    q["wc3"], q["sc3"], q["sh3"] = conv_prep(
        p["conv3_w"], p["conv3_b"], p["bn3_gamma"], p["bn3_beta"],
        p["bn3_mean"], p["bn3_var"])

    # fc1: PyTorch weight (128, 5376), input index c*42 + h*7 + w.
    # Re-layout to (42*128, 128): row = (h*7 + w)*128 + c, col = output unit.
    q["wf1"] = (p["fc1_w"].reshape(128, 128, H, W)
                .transpose(2, 3, 1, 0).reshape(H * W * 128, 128))
    q["bf1"] = p["fc1_b"].reshape(1, 128)

    # fc2: pre-transposed and padded 7 -> 128 output lanes.
    q["wf2"] = jnp.zeros((128, 128), jnp.float32).at[:, :7].set(p["fc2_w"].T)
    q["bf2"] = jnp.zeros((1, 128), jnp.float32).at[:, :7].set(
        p["fc2_b"].reshape(1, 7))
    # TODO(synk): cast MXU operands to bf16 here (and at the dot sites) for the
    # extra ~2x on v6e/v7x once a ~1e-2 tolerance is acceptable.
    return jax.tree_util.tree_map(lambda a: jnp.asarray(a, jnp.float32), q)


def _input_slab(x, b_tile, n_tiles):
    """(B,4,6,7) NCHW -> (n_tiles, slab_rows, 8) position-major packed slabs.
    Row layout inside a tile: row = margin + padded_pos * b_tile + board."""
    B, C = x.shape[0], x.shape[1]
    bp = n_tiles * b_tile
    margin = MPOS * b_tile
    xt = jnp.transpose(x, (0, 2, 3, 1))                               # (B,6,7,4)
    xt = jnp.pad(xt, ((0, bp - B), (1, 1), (1, 1), (0, C1_IN - C)))   # (bp,8,9,8)
    xs = xt.reshape(n_tiles, b_tile, NPOS, C1_IN)
    xs = jnp.transpose(xs, (0, 2, 1, 3)).reshape(n_tiles, NPOS * b_tile, C1_IN)
    return jnp.pad(xs, ((0, 0), (margin, margin), (0, 0)))


# ----------------------------------------------------------------------------
# Forward pass (single fused pallas_call)
# ----------------------------------------------------------------------------
def connect4_cnn_forward(q, x):
    B = x.shape[0]
    b_tile, n_tiles = _tile_config(B)
    cp = _chunk_positions(b_tile)
    margin = MPOS * b_tile
    m_rows = NPOS * b_tile
    slab_rows = m_rows + 2 * margin
    mc = cp * b_tile

    xs = _input_slab(x, b_tile, n_tiles)                         # (nt, slab, 8)
    mask = jnp.asarray(np.repeat(_INTERIOR, b_tile).reshape(m_rows, 1))

    flops = 2 * n_tiles * b_tile * (
        H * W * 9 * (4 * 32 + 32 * 64 + 64 * 128)
        + H * W * 128 * 128 + 128 * 128)
    bytes_accessed = 4 * (xs.size + mask.size
                          + 9 * (C1_IN * 32 + 32 * 64 + 64 * 128)
                          + H * W * 128 * 128 + 128 * 128 + 8 * 128
                          + n_tiles * b_tile * 128)

    out = pl.pallas_call(
        _make_kernel(b_tile, cp),
        out_shape=jax.ShapeDtypeStruct((n_tiles, b_tile, 128), jnp.float32),
        grid_spec=pltpu.PrefetchScalarGridSpec(
            num_scalar_prefetch=0,
            grid=(n_tiles,),
            in_specs=[
                pl.BlockSpec((None, slab_rows, C1_IN), lambda b: (b, 0, 0)),  # xs
                pl.BlockSpec((m_rows, 1), lambda b: (0, 0)),                  # mask
                pl.BlockSpec((9 * C1_IN, 32), lambda b: (0, 0)),              # wc1
                pl.BlockSpec((1, 32), lambda b: (0, 0)),                      # sc1
                pl.BlockSpec((1, 32), lambda b: (0, 0)),                      # sh1
                pl.BlockSpec((9 * 32, 64), lambda b: (0, 0)),                 # wc2
                pl.BlockSpec((1, 64), lambda b: (0, 0)),                      # sc2
                pl.BlockSpec((1, 64), lambda b: (0, 0)),                      # sh2
                pl.BlockSpec((9 * 64, 128), lambda b: (0, 0)),                # wc3
                pl.BlockSpec((1, 128), lambda b: (0, 0)),                     # sc3
                pl.BlockSpec((1, 128), lambda b: (0, 0)),                     # sh3
                pl.BlockSpec((H * W * 128, 128), lambda b: (0, 0)),           # wf1
                pl.BlockSpec((1, 128), lambda b: (0, 0)),                     # bf1
                pl.BlockSpec((128, 128), lambda b: (0, 0)),                   # wf2
                pl.BlockSpec((1, 128), lambda b: (0, 0)),                     # bf2
            ],
            out_specs=pl.BlockSpec((None, b_tile, 128), lambda b: (b, 0, 0)),
            scratch_shapes=[
                pltpu.VMEM((slab_rows, 32), jnp.float32),     # s1 slab
                pltpu.VMEM((slab_rows, 64), jnp.float32),     # s2 slab
                pltpu.VMEM((slab_rows, 128), jnp.float32),    # s3 slab
                pltpu.VMEM((mc, 9 * C1_IN), jnp.float32),     # im2col conv1
                pltpu.VMEM((mc, 9 * 32), jnp.float32),        # im2col conv2
                pltpu.VMEM((mc, 9 * 64), jnp.float32),        # im2col conv3
            ],
        ),
        compiler_params=pltpu.CompilerParams(
            dimension_semantics=("parallel",)),
        cost_estimate=pl.CostEstimate(
            flops=int(flops), transcendentals=0,
            bytes_accessed=int(bytes_accessed)),
    )(xs, mask,
      q["wc1"], q["sc1"], q["sh1"],
      q["wc2"], q["sc2"], q["sh2"],
      q["wc3"], q["sc3"], q["sh3"],
      q["wf1"], q["bf1"], q["wf2"], q["bf2"])

    return out.reshape(n_tiles * b_tile, 128)[:B, :7]


# ----------------------------------------------------------------------------
# Parameters (deterministic, synthetic) — same structure as the PyTorch module
# ----------------------------------------------------------------------------
def init_params(key):
    ks = jax.random.split(key, 16)
    p = {}
    for i, (cin, cout) in enumerate([(4, 32), (32, 64), (64, 128)], start=1):
        p[f"conv{i}_w"] = 0.05 * jax.random.normal(ks[3 * i - 3], (cout, cin, 3, 3), jnp.float32)
        p[f"conv{i}_b"] = 0.05 * jax.random.normal(ks[3 * i - 2], (cout,), jnp.float32)
        bn_key = jax.random.split(ks[3 * i - 1], 4)
        p[f"bn{i}_gamma"] = 1.0 + 0.05 * jax.random.normal(bn_key[0], (cout,), jnp.float32)
        p[f"bn{i}_beta"] = 0.05 * jax.random.normal(bn_key[1], (cout,), jnp.float32)
        p[f"bn{i}_mean"] = 0.05 * jax.random.normal(bn_key[2], (cout,), jnp.float32)
        p[f"bn{i}_var"] = 0.5 + jnp.abs(jax.random.normal(bn_key[3], (cout,), jnp.float32))
    p["fc1_w"] = 0.02 * jax.random.normal(ks[9], (128, 128 * H * W), jnp.float32)
    p["fc1_b"] = 0.02 * jax.random.normal(ks[10], (128,), jnp.float32)
    p["fc2_w"] = 0.02 * jax.random.normal(ks[11], (7, 128), jnp.float32)
    p["fc2_b"] = 0.02 * jax.random.normal(ks[12], (7,), jnp.float32)
    return p


# ----------------------------------------------------------------------------
# Pure-JAX reference (for correctness check)
# ----------------------------------------------------------------------------
def reference_forward(p, x):
    def cbr(x, w, b, g, be, m, v):
        y = lax.conv_general_dilated(x, w, (1, 1), "SAME",
                                     dimension_numbers=("NCHW", "OIHW", "NCHW"))
        y = y + b[None, :, None, None]
        y = (y - m[None, :, None, None]) / jnp.sqrt(v[None, :, None, None] + BN_EPS)
        y = y * g[None, :, None, None] + be[None, :, None, None]
        return jnp.maximum(y, 0.0)

    h = cbr(x, p["conv1_w"], p["conv1_b"], p["bn1_gamma"], p["bn1_beta"], p["bn1_mean"], p["bn1_var"])
    h = cbr(h, p["conv2_w"], p["conv2_b"], p["bn2_gamma"], p["bn2_beta"], p["bn2_mean"], p["bn2_var"])
    h = cbr(h, p["conv3_w"], p["conv3_b"], p["bn3_gamma"], p["bn3_beta"], p["bn3_mean"], p["bn3_var"])
    flat = h.reshape(x.shape[0], -1)
    h = jnp.maximum(flat @ p["fc1_w"].T + p["fc1_b"], 0.0)
    return h @ p["fc2_w"].T + p["fc2_b"]


if __name__ == "__main__":
    key = jax.random.PRNGKey(0)
    pkey, xkey1, xkey2 = jax.random.split(key, 3)
    params = init_params(pkey)
    prepped = prepare_params(params)            # one-time weight prep

    fwd = jax.jit(connect4_cnn_forward)

    # Canonical tiny case: batch=2 Connect-4 boards (4 planes, 6x7), NCHW.
    x = jax.random.normal(xkey1, (2, 4, 6, 7), jnp.float32)
    out = jax.block_until_ready(fwd(prepped, x))
    ref = reference_forward(params, x)
    assert out.shape == (2, 7), out.shape
    assert jnp.allclose(out, ref, atol=1e-4, rtol=1e-4), (out, ref)

    # Batched path: multiple boards per grid step (exercises packing/padding).
    xb = jax.random.normal(xkey2, (20, 4, 6, 7), jnp.float32)
    outb = jax.block_until_ready(fwd(prepped, xb))
    refb = reference_forward(params, xb)
    assert outb.shape == (20, 7), outb.shape
    assert jnp.allclose(outb, refb, atol=1e-4, rtol=1e-4)

    print("KERNEL_OK")
</pallas_src>

<mosaic_0001>
module attributes {stable_mosaic.version = 11 : i64} {
  func.func @kernel(%arg0: i32, %arg1: memref<1x92x8xf32, #tpu.memory_space<vmem>>, %arg2: memref<72x1xf32, #tpu.memory_space<vmem>>, %arg3: memref<72x32xf32, #tpu.memory_space<vmem>>, %arg4: memref<1x32xf32, #tpu.memory_space<vmem>>, %arg5: memref<1x32xf32, #tpu.memory_space<vmem>>, %arg6: memref<288x64xf32, #tpu.memory_space<vmem>>, %arg7: memref<1x64xf32, #tpu.memory_space<vmem>>, %arg8: memref<1x64xf32, #tpu.memory_space<vmem>>, %arg9: memref<576x128xf32, #tpu.memory_space<vmem>>, %arg10: memref<1x128xf32, #tpu.memory_space<vmem>>, %arg11: memref<1x128xf32, #tpu.memory_space<vmem>>, %arg12: memref<5376x128xf32, #tpu.memory_space<vmem>>, %arg13: memref<1x128xf32, #tpu.memory_space<vmem>>, %arg14: memref<128x128xf32, #tpu.memory_space<vmem>>, %arg15: memref<1x128xf32, #tpu.memory_space<vmem>>, %arg16: memref<1x1x128xf32, #tpu.memory_space<vmem>>, %arg17: memref<92x32xf32, #tpu.memory_space<vmem>>, %arg18: memref<92x64xf32, #tpu.memory_space<vmem>>, %arg19: memref<92x128xf32, #tpu.memory_space<vmem>>, %arg20: memref<72x72xf32, #tpu.memory_space<vmem>>, %arg21: memref<72x288xf32, #tpu.memory_space<vmem>>, %arg22: memref<72x576xf32, #tpu.memory_space<vmem>>) attributes {dimension_semantics = [#tpu.dimension_semantics<parallel>], iteration_bounds = array<i64: 2>, scalar_prefetch = 0 : i64, scratch_operands = 6 : i64, tpu.core_type = #tpu.core_type<tc>, window_params = [{transform_indices = @transform_0, window_bounds = array<i64: 1, 92, 8>}, {pipeline_mode = #tpu.pipeline_mode<synchronous>, transform_indices = @transform_1, window_bounds = array<i64: 72, 1>}, {pipeline_mode = #tpu.pipeline_mode<synchronous>, transform_indices = @transform_2, window_bounds = array<i64: 72, 32>}, {pipeline_mode = #tpu.pipeline_mode<synchronous>, transform_indices = @transform_3, window_bounds = array<i64: 1, 32>}, {pipeline_mode = #tpu.pipeline_mode<synchronous>, transform_indices = @transform_4, window_bounds = array<i64: 1, 32>}, {pipeline_mode = #tpu.pipeline_mode<synchronous>, transform_indices = @transform_5, window_bounds = array<i64: 288, 64>}, {pipeline_mode = #tpu.pipeline_mode<synchronous>, transform_indices = @transform_6, window_bounds = array<i64: 1, 64>}, {pipeline_mode = #tpu.pipeline_mode<synchronous>, transform_indices = @transform_7, window_bounds = array<i64: 1, 64>}, {pipeline_mode = #tpu.pipeline_mode<synchronous>, transform_indices = @transform_8, window_bounds = array<i64: 576, 128>}, {pipeline_mode = #tpu.pipeline_mode<synchronous>, transform_indices = @transform_9, window_bounds = array<i64: 1, 128>}, {pipeline_mode = #tpu.pipeline_mode<synchronous>, transform_indices = @transform_10, window_bounds = array<i64: 1, 128>}, {pipeline_mode = #tpu.pipeline_mode<synchronous>, transform_indices = @transform_11, window_bounds = array<i64: 5376, 128>}, {pipeline_mode = #tpu.pipeline_mode<synchronous>, transform_indices = @transform_12, window_bounds = array<i64: 1, 128>}, {pipeline_mode = #tpu.pipeline_mode<synchronous>, transform_indices = @transform_13, window_bounds = array<i64: 128, 128>}, {pipeline_mode = #tpu.pipeline_mode<synchronous>, transform_indices = @transform_14, window_bounds = array<i64: 1, 128>}, {transform_indices = @transform_15, window_bounds = array<i64: 1, 1, 128>}]} {
    %c0_i32 = arith.constant 0 : i32
    %0 = arith.cmpi eq, %arg0, %c0_i32 : i32
    %1 = arith.extui %0 : i1 to i32
    %c0_i32_0 = arith.constant 0 : i32
    %2 = arith.cmpi ne, %1, %c0_i32_0 : i32
    scf.if %2 {
      %cst_287 = arith.constant 0.000000e+00 : f32
      %303 = vector.broadcast %cst_287 : f32 to vector<10x32xf32>
      %c0_288 = arith.constant 0 : index
      %c0_289 = arith.constant 0 : index
      %304 = vector.load %arg17[%c0_288, %c0_289] : memref<92x32xf32, #tpu.memory_space<vmem>>, vector<10x32xf32>
      tpu.vector_store %arg17[%c0_288, %c0_289], %303 {strides = array<i32>} : memref<92x32xf32, #tpu.memory_space<vmem>>, vector<10x32xf32>,
      %c82 = arith.constant 82 : index
      %c0_290 = arith.constant 0 : index
      %305 = vector.load %arg17[%c82, %c0_290] : memref<92x32xf32, #tpu.memory_space<vmem>>, vector<10x32xf32>
      tpu.vector_store %arg17[%c82, %c0_290], %303 {strides = array<i32>} : memref<92x32xf32, #tpu.memory_space<vmem>>, vector<10x32xf32>,
      %cst_291 = arith.constant 0.000000e+00 : f32
      %306 = vector.broadcast %cst_291 : f32 to vector<10x64xf32>
      %c0_292 = arith.constant 0 : index
      %c0_293 = arith.constant 0 : index
      %307 = vector.load %arg18[%c0_292, %c0_293] : memref<92x64xf32, #tpu.memory_space<vmem>>, vector<10x64xf32>
      tpu.vector_store %arg18[%c0_292, %c0_293], %306 {strides = array<i32>} : memref<92x64xf32, #tpu.memory_space<vmem>>, vector<10x64xf32>,
      %c82_294 = arith.constant 82 : index
      %c0_295 = arith.constant 0 : index
      %308 = vector.load %arg18[%c82_294, %c0_295] : memref<92x64xf32, #tpu.memory_space<vmem>>, vector<10x64xf32>
      tpu.vector_store %arg18[%c82_294, %c0_295], %306 {strides = array<i32>} : memref<92x64xf32, #tpu.memory_space<vmem>>, vector<10x64xf32>,
      %cst_296 = arith.constant 0.000000e+00 : f32
      %309 = vector.broadcast %cst_296 : f32 to vector<10x128xf32>
      %c0_297 = arith.constant 0 : index
      %c0_298 = arith.constant 0 : index
      %310 = vector.load %arg19[%c0_297, %c0_298] : memref<92x128xf32, #tpu.memory_space<vmem>>, vector<10x128xf32>
      tpu.vector_store %arg19[%c0_297, %c0_298], %309 {strides = array<i32>} : memref<92x128xf32, #tpu.memory_space<vmem>>, vector<10x128xf32>,
      %c82_299 = arith.constant 82 : index
      %c0_300 = arith.constant 0 : index
      %311 = vector.load %arg19[%c82_299, %c0_300] : memref<92x128xf32, #tpu.memory_space<vmem>>, vector<10x128xf32>
      tpu.vector_store %arg19[%c82_299, %c0_300], %309 {strides = array<i32>} : memref<92x128xf32, #tpu.memory_space<vmem>>, vector<10x128xf32>,
    } else {
    }
    %c0 = arith.constant 0 : index
    %c0_1 = arith.constant 0 : index
    %c0_2 = arith.constant 0 : index
    %3 = vector.load %arg1[%c0, %c0_1, %c0_2] : memref<1x92x8xf32, #tpu.memory_space<vmem>>, vector<1x72x8xf32>
    %4 = vector.shape_cast %3 : vector<1x72x8xf32> to vector<72x8xf32>
    %c0_3 = arith.constant 0 : index
    %c0_4 = arith.constant 0 : index
    %5 = vector.load %arg20[%c0_3, %c0_4] : memref<72x72xf32, #tpu.memory_space<vmem>>, vector<72x8xf32>
    tpu.vector_store %arg20[%c0_3, %c0_4], %4 {strides = array<i32>} : memref<72x72xf32, #tpu.memory_space<vmem>>, vector<72x8xf32>,
    %c0_5 = arith.constant 0 : index
    %c1 = arith.constant 1 : index
    %c0_6 = arith.constant 0 : index
    %6 = vector.load %arg1[%c0_5, %c1, %c0_6] : memref<1x92x8xf32, #tpu.memory_space<vmem>>, vector<1x72x8xf32>
    %7 = vector.shape_cast %6 : vector<1x72x8xf32> to vector<72x8xf32>
    %c0_7 = arith.constant 0 : index
    %c8 = arith.constant 8 : index
    %8 = vector.load %arg20[%c0_7, %c8] : memref<72x72xf32, #tpu.memory_space<vmem>>, vector<72x8xf32>
    tpu.vector_store %arg20[%c0_7, %c8], %7 {strides = array<i32>} : memref<72x72xf32, #tpu.memory_space<vmem>>, vector<72x8xf32>,
    %c0_8 = arith.constant 0 : index
    %c2 = arith.constant 2 : index
    %c0_9 = arith.constant 0 : index
    %9 = vector.load %arg1[%c0_8, %c2, %c0_9] : memref<1x92x8xf32, #tpu.memory_space<vmem>>, vector<1x72x8xf32>
    %10 = vector.shape_cast %9 : vector<1x72x8xf32> to vector<72x8xf32>
    %c0_10 = arith.constant 0 : index
    %c16 = arith.constant 16 : index
    %11 = vector.load %arg20[%c0_10, %c16] : memref<72x72xf32, #tpu.memory_space<vmem>>, vector<72x8xf32>
    tpu.vector_store %arg20[%c0_10, %c16], %10 {strides = array<i32>} : memref<72x72xf32, #tpu.memory_space<vmem>>, vector<72x8xf32>,
    %c0_11 = arith.constant 0 : index
    %c9 = arith.constant 9 : index
    %c0_12 = arith.constant 0 : index
    %12 = vector.load %arg1[%c0_11, %c9, %c0_12] : memref<1x92x8xf32, #tpu.memory_space<vmem>>, vector<1x72x8xf32>
    %13 = vector.shape_cast %12 : vector<1x72x8xf32> to vector<72x8xf32>
    %c0_13 = arith.constant 0 : index
    %c24 = arith.constant 24 : index
    %14 = vector.load %arg20[%c0_13, %c24] : memref<72x72xf32, #tpu.memory_space<vmem>>, vector<72x8xf32>
    tpu.vector_store %arg20[%c0_13, %c24], %13 {strides = array<i32>} : memref<72x72xf32, #tpu.memory_space<vmem>>, vector<72x8xf32>,
    %c0_14 = arith.constant 0 : index
    %c10 = arith.constant 10 : index
    %c0_15 = arith.constant 0 : index
    %15 = vector.load %arg1[%c0_14, %c10, %c0_15] : memref<1x92x8xf32, #tpu.memory_space<vmem>>, vector<1x72x8xf32>
    %16 = vector.shape_cast %15 : vector<1x72x8xf32> to vector<72x8xf32>
    %c0_16 = arith.constant 0 : index
    %c32 = arith.constant 32 : index
    %17 = vector.load %arg20[%c0_16, %c32] : memref<72x72xf32, #tpu.memory_space<vmem>>, vector<72x8xf32>
    tpu.vector_store %arg20[%c0_16, %c32], %16 {strides = array<i32>} : memref<72x72xf32, #tpu.memory_space<vmem>>, vector<72x8xf32>,
    %c0_17 = arith.constant 0 : index
    %c11 = arith.constant 11 : index
    %c0_18 = arith.constant 0 : index
    %18 = vector.load %arg1[%c0_17, %c11, %c0_18] : memref<1x92x8xf32, #tpu.memory_space<vmem>>, vector<1x72x8xf32>
    %19 = vector.shape_cast %18 : vector<1x72x8xf32> to vector<72x8xf32>
    %c0_19 = arith.constant 0 : index
    %c40 = arith.constant 40 : index
    %20 = vector.load %arg20[%c0_19, %c40] : memref<72x72xf32, #tpu.memory_space<vmem>>, vector<72x8xf32>
    tpu.vector_store %arg20[%c0_19, %c40], %19 {strides = array<i32>} : memref<72x72xf32, #tpu.memory_space<vmem>>, vector<72x8xf32>,
    %c0_20 = arith.constant 0 : index
    %c18 = arith.constant 18 : index
    %c0_21 = arith.constant 0 : index
    %21 = vector.load %arg1[%c0_20, %c18, %c0_21] : memref<1x92x8xf32, #tpu.memory_space<vmem>>, vector<1x72x8xf32>
    %22 = vector.shape_cast %21 : vector<1x72x8xf32> to vector<72x8xf32>
    %c0_22 = arith.constant 0 : index
    %c48 = arith.constant 48 : index
    %23 = vector.load %arg20[%c0_22, %c48] : memref<72x72xf32, #tpu.memory_space<vmem>>, vector<72x8xf32>
    tpu.vector_store %arg20[%c0_22, %c48], %22 {strides = array<i32>} : memref<72x72xf32, #tpu.memory_space<vmem>>, vector<72x8xf32>,
    %c0_23 = arith.constant 0 : index
    %c19 = arith.constant 19 : index
    %c0_24 = arith.constant 0 : index
    %24 = vector.load %arg1[%c0_23, %c19, %c0_24] : memref<1x92x8xf32, #tpu.memory_space<vmem>>, vector<1x72x8xf32>
    %25 = vector.shape_cast %24 : vector<1x72x8xf32> to vector<72x8xf32>
    %c0_25 = arith.constant 0 : index
    %c56 = arith.constant 56 : index
    %26 = vector.load %arg20[%c0_25, %c56] : memref<72x72xf32, #tpu.memory_space<vmem>>, vector<72x8xf32>
    tpu.vector_store %arg20[%c0_25, %c56], %25 {strides = array<i32>} : memref<72x72xf32, #tpu.memory_space<vmem>>, vector<72x8xf32>,
    %c0_26 = arith.constant 0 : index
    %c20 = arith.constant 20 : index
    %c0_27 = arith.constant 0 : index
    %27 = vector.load %arg1[%c0_26, %c20, %c0_27] : memref<1x92x8xf32, #tpu.memory_space<vmem>>, vector<1x72x8xf32>
    %28 = vector.shape_cast %27 : vector<1x72x8xf32> to vector<72x8xf32>
    %c0_28 = arith.constant 0 : index
    %c64 = arith.constant 64 : index
    %29 = vector.load %arg20[%c0_28, %c64] : memref<72x72xf32, #tpu.memory_space<vmem>>, vector<72x8xf32>
    tpu.vector_store %arg20[%c0_28, %c64], %28 {strides = array<i32>} : memref<72x72xf32, #tpu.memory_space<vmem>>, vector<72x8xf32>,
    %c0_29 = arith.constant 0 : index
    %c0_30 = arith.constant 0 : index
    %30 = vector.load %arg20[%c0_29, %c0_30] : memref<72x72xf32, #tpu.memory_space<vmem>>, vector<72x72xf32>
    %c0_31 = arith.constant 0 : index
    %c0_32 = arith.constant 0 : index
    %31 = vector.load %arg3[%c0_31, %c0_32] : memref<72x32xf32, #tpu.memory_space<vmem>>, vector<72x32xf32>
    %cst = arith.constant dense<0.000000e+00> : vector<72x32xf32>
    %32 = tpu.matmul %30, %31, %cst {dimension_numbers = #tpu.dot_dimension_numbers<[1], [0], [0], [1], [0, 0, 1, 1], [], []>} : vector<72x72xf32>, vector<72x32xf32>, vector<72x32xf32> -> vector<72x32xf32>
    %c0_33 = arith.constant 0 : index
    %c0_34 = arith.constant 0 : index
    %33 = vector.load %arg4[%c0_33, %c0_34] : memref<1x32xf32, #tpu.memory_space<vmem>>, vector<1x32xf32>
    %34 = vector.broadcast %33 : vector<1x32xf32> to vector<72x32xf32>
    %35 = arith.mulf %32, %34 : vector<72x32xf32>
    %c0_35 = arith.constant 0 : index
    %c0_36 = arith.constant 0 : index
    %36 = vector.load %arg5[%c0_35, %c0_36] : memref<1x32xf32, #tpu.memory_space<vmem>>, vector<1x32xf32>
    %37 = vector.broadcast %36 : vector<1x32xf32> to vector<72x32xf32>
    %38 = arith.addf %35, %37 : vector<72x32xf32>
    %c0_37 = arith.constant 0 : index
    %c0_38 = arith.constant 0 : index
    %39 = vector.load %arg2[%c0_37, %c0_38] : memref<72x1xf32, #tpu.memory_space<vmem>>, vector<72x1xf32>
    %cst_39 = arith.constant 5.000000e-01 : f32
    %40 = vector.broadcast %cst_39 : f32 to vector<72x1xf32>
    %41 = arith.cmpf ogt, %39, %40 : vector<72x1xf32>
    %cst_40 = arith.constant 0.000000e+00 : f32
    %42 = vector.broadcast %cst_40 : f32 to vector<72x32xf32>
    %43 = arith.maximumf %38, %42 : vector<72x32xf32>
    %cst_41 = arith.constant 0.000000e+00 : f32
    %44 = vector.shape_cast %41 : vector<72x1xi1> to vector<72x1xi1>
    %45 = vector.broadcast %44 : vector<72x1xi1> to vector<72x32xi1>
    %46 = vector.broadcast %cst_41 : f32 to vector<72x32xf32>
    %47 = arith.select %45, %43, %46 : vector<72x32xi1>, vector<72x32xf32>
    %c10_42 = arith.constant 10 : index
    %c0_43 = arith.constant 0 : index
    %48 = vector.load %arg17[%c10_42, %c0_43] : memref<92x32xf32, #tpu.memory_space<vmem>>, vector<72x32xf32>
    tpu.vector_store %arg17[%c10_42, %c0_43], %47 {strides = array<i32>} : memref<92x32xf32, #tpu.memory_space<vmem>>, vector<72x32xf32>,
    %c0_44 = arith.constant 0 : index
    %c0_45 = arith.constant 0 : index
    %49 = vector.load %arg17[%c0_44, %c0_45] : memref<92x32xf32, #tpu.memory_space<vmem>>, vector<72x32xf32>
    %c0_46 = arith.constant 0 : index
    %c0_47 = arith.constant 0 : index
    %50 = vector.load %arg21[%c0_46, %c0_47] : memref<72x288xf32, #tpu.memory_space<vmem>>, vector<72x32xf32>
    tpu.vector_store %arg21[%c0_46, %c0_47], %49 {strides = array<i32>} : memref<72x288xf32, #tpu.memory_space<vmem>>, vector<72x32xf32>,
    %c1_48 = arith.constant 1 : index
    %c0_49 = arith.constant 0 : index
    %51 = vector.load %arg17[%c1_48, %c0_49] : memref<92x32xf32, #tpu.memory_space<vmem>>, vector<72x32xf32>
    %c0_50 = arith.constant 0 : index
    %c32_51 = arith.constant 32 : index
    %52 = vector.load %arg21[%c0_50, %c32_51] : memref<72x288xf32, #tpu.memory_space<vmem>>, vector<72x32xf32>
    tpu.vector_store %arg21[%c0_50, %c32_51], %51 {strides = array<i32>} : memref<72x288xf32, #tpu.memory_space<vmem>>, vector<72x32xf32>,
    %c2_52 = arith.constant 2 : index
    %c0_53 = arith.constant 0 : index
    %53 = vector.load %arg17[%c2_52, %c0_53] : memref<92x32xf32, #tpu.memory_space<vmem>>, vector<72x32xf32>
    %c0_54 = arith.constant 0 : index
    %c64_55 = arith.constant 64 : index
    %54 = vector.load %arg21[%c0_54, %c64_55] : memref<72x288xf32, #tpu.memory_space<vmem>>, vector<72x32xf32>
    tpu.vector_store %arg21[%c0_54, %c64_55], %53 {strides = array<i32>} : memref<72x288xf32, #tpu.memory_space<vmem>>, vector<72x32xf32>,
    %c9_56 = arith.constant 9 : index
    %c0_57 = arith.constant 0 : index
    %55 = vector.load %arg17[%c9_56, %c0_57] : memref<92x32xf32, #tpu.memory_space<vmem>>, vector<72x32xf32>
    %c0_58 = arith.constant 0 : index
    %c96 = arith.constant 96 : index
    %56 = vector.load %arg21[%c0_58, %c96] : memref<72x288xf32, #tpu.memory_space<vmem>>, vector<72x32xf32>
    tpu.vector_store %arg21[%c0_58, %c96], %55 {strides = array<i32>} : memref<72x288xf32, #tpu.memory_space<vmem>>, vector<72x32xf32>,
    %c10_59 = arith.constant 10 : index
    %c0_60 = arith.constant 0 : index
    %57 = vector.load %arg17[%c10_59, %c0_60] : memref<92x32xf32, #tpu.memory_space<vmem>>, vector<72x32xf32>
    %c0_61 = arith.constant 0 : index
    %c128 = arith.constant 128 : index
    %58 = vector.load %arg21[%c0_61, %c128] : memref<72x288xf32, #tpu.memory_space<vmem>>, vector<72x32xf32>
    tpu.vector_store %arg21[%c0_61, %c128], %57 {strides = array<i32>} : memref<72x288xf32, #tpu.memory_space<vmem>>, vector<72x32xf32>,
    %c11_62 = arith.constant 11 : index
    %c0_63 = arith.constant 0 : index
    %59 = vector.load %arg17[%c11_62, %c0_63] : memref<92x32xf32, #tpu.memory_space<vmem>>, vector<72x32xf32>
    %c0_64 = arith.constant 0 : index
    %c160 = arith.constant 160 : index
    %60 = vector.load %arg21[%c0_64, %c160] : memref<72x288xf32, #tpu.memory_space<vmem>>, vector<72x32xf32>
    tpu.vector_store %arg21[%c0_64, %c160], %59 {strides = array<i32>} : memref<72x288xf32, #tpu.memory_space<vmem>>, vector<72x32xf32>,
    %c18_65 = arith.constant 18 : index
    %c0_66 = arith.constant 0 : index
    %61 = vector.load %arg17[%c18_65, %c0_66] : memref<92x32xf32, #tpu.memory_space<vmem>>, vector<72x32xf32>
    %c0_67 = arith.constant 0 : index
    %c192 = arith.constant 192 : index
    %62 = vector.load %arg21[%c0_67, %c192] : memref<72x288xf32, #tpu.memory_space<vmem>>, vector<72x32xf32>
    tpu.vector_store %arg21[%c0_67, %c192], %61 {strides = array<i32>} : memref<72x288xf32, #tpu.memory_space<vmem>>, vector<72x32xf32>,
    %c19_68 = arith.constant 19 : index
    %c0_69 = arith.constant 0 : index
    %63 = vector.load %arg17[%c19_68, %c0_69] : memref<92x32xf32, #tpu.memory_space<vmem>>, vector<72x32xf32>
    %c0_70 = arith.constant 0 : index
    %c224 = arith.constant 224 : index
    %64 = vector.load %arg21[%c0_70, %c224] : memref<72x288xf32, #tpu.memory_space<vmem>>, vector<72x32xf32>
    tpu.vector_store %arg21[%c0_70, %c224], %63 {strides = array<i32>} : memref<72x288xf32, #tpu.memory_space<vmem>>, vector<72x32xf32>,
    %c20_71 = arith.constant 20 : index
    %c0_72 = arith.constant 0 : index
    %65 = vector.load %arg17[%c20_71, %c0_72] : memref<92x32xf32, #tpu.memory_space<vmem>>, vector<72x32xf32>
    %c0_73 = arith.constant 0 : index
    %c256 = arith.constant 256 : index
    %66 = vector.load %arg21[%c0_73, %c256] : memref<72x288xf32, #tpu.memory_space<vmem>>, vector<72x32xf32>
    tpu.vector_store %arg21[%c0_73, %c256], %65 {strides = array<i32>} : memref<72x288xf32, #tpu.memory_space<vmem>>, vector<72x32xf32>,
    %c0_74 = arith.constant 0 : index
    %c0_75 = arith.constant 0 : index
    %67 = vector.load %arg21[%c0_74, %c0_75] : memref<72x288xf32, #tpu.memory_space<vmem>>, vector<72x288xf32>
    %c0_76 = arith.constant 0 : index
    %c0_77 = arith.constant 0 : index
    %68 = vector.load %arg6[%c0_76, %c0_77] : memref<288x64xf32, #tpu.memory_space<vmem>>, vector<288x64xf32>
    %cst_78 = arith.constant dense<0.000000e+00> : vector<72x64xf32>
    %69 = tpu.matmul %67, %68, %cst_78 {dimension_numbers = #tpu.dot_dimension_numbers<[1], [0], [0], [1], [0, 0, 1, 1], [], []>} : vector<72x288xf32>, vector<288x64xf32>, vector<72x64xf32> -> vector<72x64xf32>
    %c0_79 = arith.constant 0 : index
    %c0_80 = arith.constant 0 : index
    %70 = vector.load %arg7[%c0_79, %c0_80] : memref<1x64xf32, #tpu.memory_space<vmem>>, vector<1x64xf32>
    %71 = vector.broadcast %70 : vector<1x64xf32> to vector<72x64xf32>
    %72 = arith.mulf %69, %71 : vector<72x64xf32>
    %c0_81 = arith.constant 0 : index
    %c0_82 = arith.constant 0 : index
    %73 = vector.load %arg8[%c0_81, %c0_82] : memref<1x64xf32, #tpu.memory_space<vmem>>, vector<1x64xf32>
    %74 = vector.broadcast %73 : vector<1x64xf32> to vector<72x64xf32>
    %75 = arith.addf %72, %74 : vector<72x64xf32>
    %c0_83 = arith.constant 0 : index
    %c0_84 = arith.constant 0 : index
    %76 = vector.load %arg2[%c0_83, %c0_84] : memref<72x1xf32, #tpu.memory_space<vmem>>, vector<72x1xf32>
    %cst_85 = arith.constant 5.000000e-01 : f32
    %77 = vector.broadcast %cst_85 : f32 to vector<72x1xf32>
    %78 = arith.cmpf ogt, %76, %77 : vector<72x1xf32>
    %cst_86 = arith.constant 0.000000e+00 : f32
    %79 = vector.broadcast %cst_86 : f32 to vector<72x64xf32>
    %80 = arith.maximumf %75, %79 : vector<72x64xf32>
    %cst_87 = arith.constant 0.000000e+00 : f32
    %81 = vector.shape_cast %78 : vector<72x1xi1> to vector<72x1xi1>
    %82 = vector.broadcast %81 : vector<72x1xi1> to vector<72x64xi1>
    %83 = vector.broadcast %cst_87 : f32 to vector<72x64xf32>
    %84 = arith.select %82, %80, %83 : vector<72x64xi1>, vector<72x64xf32>
    %c10_88 = arith.constant 10 : index
    %c0_89 = arith.constant 0 : index
    %85 = vector.load %arg18[%c10_88, %c0_89] : memref<92x64xf32, #tpu.memory_space<vmem>>, vector<72x64xf32>
    tpu.vector_store %arg18[%c10_88, %c0_89], %84 {strides = array<i32>} : memref<92x64xf32, #tpu.memory_space<vmem>>, vector<72x64xf32>,
    %c0_90 = arith.constant 0 : index
    %c0_91 = arith.constant 0 : index
    %86 = vector.load %arg18[%c0_90, %c0_91] : memref<92x64xf32, #tpu.memory_space<vmem>>, vector<72x64xf32>
    %c0_92 = arith.constant 0 : index
    %c0_93 = arith.constant 0 : index
    %87 = vector.load %arg22[%c0_92, %c0_93] : memref<72x576xf32, #tpu.memory_space<vmem>>, vector<72x64xf32>
    tpu.vector_store %arg22[%c0_92, %c0_93], %86 {strides = array<i32>} : memref<72x576xf32, #tpu.memory_space<vmem>>, vector<72x64xf32>,
    %c1_94 = arith.constant 1 : index
    %c0_95 = arith.constant 0 : index
    %88 = vector.load %arg18[%c1_94, %c0_95] : memref<92x64xf32, #tpu.memory_space<vmem>>, vector<72x64xf32>
    %c0_96 = arith.constant 0 : index
    %c64_97 = arith.constant 64 : index
    %89 = vector.load %arg22[%c0_96, %c64_97] : memref<72x576xf32, #tpu.memory_space<vmem>>, vector<72x64xf32>
    tpu.vector_store %arg22[%c0_96, %c64_97], %88 {strides = array<i32>} : memref<72x576xf32, #tpu.memory_space<vmem>>, vector<72x64xf32>,
    %c2_98 = arith.constant 2 : index
    %c0_99 = arith.constant 0 : index
    %90 = vector.load %arg18[%c2_98, %c0_99] : memref<92x64xf32, #tpu.memory_space<vmem>>, vector<72x64xf32>
    %c0_100 = arith.constant 0 : index
    %c128_101 = arith.constant 128 : index
    %91 = vector.load %arg22[%c0_100, %c128_101] : memref<72x576xf32, #tpu.memory_space<vmem>>, vector<72x64xf32>
    tpu.vector_store %arg22[%c0_100, %c128_101], %90 {strides = array<i32>} : memref<72x576xf32, #tpu.memory_space<vmem>>, vector<72x64xf32>,
    %c9_102 = arith.constant 9 : index
    %c0_103 = arith.constant 0 : index
    %92 = vector.load %arg18[%c9_102, %c0_103] : memref<92x64xf32, #tpu.memory_space<vmem>>, vector<72x64xf32>
    %c0_104 = arith.constant 0 : index
    %c192_105 = arith.constant 192 : index
    %93 = vector.load %arg22[%c0_104, %c192_105] : memref<72x576xf32, #tpu.memory_space<vmem>>, vector<72x64xf32>
    tpu.vector_store %arg22[%c0_104, %c192_105], %92 {strides = array<i32>} : memref<72x576xf32, #tpu.memory_space<vmem>>, vector<72x64xf32>,
    %c10_106 = arith.constant 10 : index
    %c0_107 = arith.constant 0 : index
    %94 = vector.load %arg18[%c10_106, %c0_107] : memref<92x64xf32, #tpu.memory_space<vmem>>, vector<72x64xf32>
    %c0_108 = arith.constant 0 : index
    %c256_109 = arith.constant 256 : index
    %95 = vector.load %arg22[%c0_108, %c256_109] : memref<72x576xf32, #tpu.memory_space<vmem>>, vector<72x64xf32>
    tpu.vector_store %arg22[%c0_108, %c256_109], %94 {strides = array<i32>} : memref<72x576xf32, #tpu.memory_space<vmem>>, vector<72x64xf32>,
    %c11_110 = arith.constant 11 : index
    %c0_111 = arith.constant 0 : index
    %96 = vector.load %arg18[%c11_110, %c0_111] : memref<92x64xf32, #tpu.memory_space<vmem>>, vector<72x64xf32>
    %c0_112 = arith.constant 0 : index
    %c320 = arith.constant 320 : index
    %97 = vector.load %arg22[%c0_112, %c320] : memref<72x576xf32, #tpu.memory_space<vmem>>, vector<72x64xf32>
    tpu.vector_store %arg22[%c0_112, %c320], %96 {strides = array<i32>} : memref<72x576xf32, #tpu.memory_space<vmem>>, vector<72x64xf32>,
    %c18_113 = arith.constant 18 : index
    %c0_114 = arith.constant 0 : index
    %98 = vector.load %arg18[%c18_113, %c0_114] : memref<92x64xf32, #tpu.memory_space<vmem>>, vector<72x64xf32>
    %c0_115 = arith.constant 0 : index
    %c384 = arith.constant 384 : index
    %99 = vector.load %arg22[%c0_115, %c384] : memref<72x576xf32, #tpu.memory_space<vmem>>, vector<72x64xf32>
    tpu.vector_store %arg22[%c0_115, %c384], %98 {strides = array<i32>} : memref<72x576xf32, #tpu.memory_space<vmem>>, vector<72x64xf32>,
    %c19_116 = arith.constant 19 : index
    %c0_117 = arith.constant 0 : index
    %100 = vector.load %arg18[%c19_116, %c0_117] : memref<92x64xf32, #tpu.memory_space<vmem>>, vector<72x64xf32>
    %c0_118 = arith.constant 0 : index
    %c448 = arith.constant 448 : index
    %101 = vector.load %arg22[%c0_118, %c448] : memref<72x576xf32, #tpu.memory_space<vmem>>, vector<72x64xf32>
    tpu.vector_store %arg22[%c0_118, %c448], %100 {strides = array<i32>} : memref<72x576xf32, #tpu.memory_space<vmem>>, vector<72x64xf32>,
    %c20_119 = arith.constant 20 : index
    %c0_120 = arith.constant 0 : index
    %102 = vector.load %arg18[%c20_119, %c0_120] : memref<92x64xf32, #tpu.memory_space<vmem>>, vector<72x64xf32>
    %c0_121 = arith.constant 0 : index
    %c512 = arith.constant 512 : index
    %103 = vector.load %arg22[%c0_121, %c512] : memref<72x576xf32, #tpu.memory_space<vmem>>, vector<72x64xf32>
    tpu.vector_store %arg22[%c0_121, %c512], %102 {strides = array<i32>} : memref<72x576xf32, #tpu.memory_space<vmem>>, vector<72x64xf32>,
    %c0_122 = arith.constant 0 : index
    %c0_123 = arith.constant 0 : index
    %104 = vector.load %arg22[%c0_122, %c0_123] : memref<72x576xf32, #tpu.memory_space<vmem>>, vector<72x576xf32>
    %c0_124 = arith.constant 0 : index
    %c0_125 = arith.constant 0 : index
    %105 = vector.load %arg9[%c0_124, %c0_125] : memref<576x128xf32, #tpu.memory_space<vmem>>, vector<576x128xf32>
    %cst_126 = arith.constant dense<0.000000e+00> : vector<72x128xf32>
    %106 = tpu.matmul %104, %105, %cst_126 {dimension_numbers = #tpu.dot_dimension_numbers<[1], [0], [0], [1], [0, 0, 1, 1], [], []>} : vector<72x576xf32>, vector<576x128xf32>, vector<72x128xf32> -> vector<72x128xf32>
    %c0_127 = arith.constant 0 : index
    %c0_128 = arith.constant 0 : index
    %107 = vector.load %arg10[%c0_127, %c0_128] : memref<1x128xf32, #tpu.memory_space<vmem>>, vector<1x128xf32>
    %108 = vector.broadcast %107 : vector<1x128xf32> to vector<72x128xf32>
    %109 = arith.mulf %106, %108 : vector<72x128xf32>
    %c0_129 = arith.constant 0 : index
    %c0_130 = arith.constant 0 : index
    %110 = vector.load %arg11[%c0_129, %c0_130] : memref<1x128xf32, #tpu.memory_space<vmem>>, vector<1x128xf32>
    %111 = vector.broadcast %110 : vector<1x128xf32> to vector<72x128xf32>
    %112 = arith.addf %109, %111 : vector<72x128xf32>
    %c0_131 = arith.constant 0 : index
    %c0_132 = arith.constant 0 : index
    %113 = vector.load %arg2[%c0_131, %c0_132] : memref<72x1xf32, #tpu.memory_space<vmem>>, vector<72x1xf32>
    %cst_133 = arith.constant 5.000000e-01 : f32
    %114 = vector.broadcast %cst_133 : f32 to vector<72x1xf32>
    %115 = arith.cmpf ogt, %113, %114 : vector<72x1xf32>
    %cst_134 = arith.constant 0.000000e+00 : f32
    %116 = vector.broadcast %cst_134 : f32 to vector<72x128xf32>
    %117 = arith.maximumf %112, %116 : vector<72x128xf32>
    %cst_135 = arith.constant 0.000000e+00 : f32
    %118 = vector.shape_cast %115 : vector<72x1xi1> to vector<72x1xi1>
    %119 = vector.broadcast %118 : vector<72x1xi1> to vector<72x128xi1>
    %120 = vector.broadcast %cst_135 : f32 to vector<72x128xf32>
    %121 = arith.select %119, %117, %120 : vector<72x128xi1>, vector<72x128xf32>
    %c10_136 = arith.constant 10 : index
    %c0_137 = arith.constant 0 : index
    %122 = vector.load %arg19[%c10_136, %c0_137] : memref<92x128xf32, #tpu.memory_space<vmem>>, vector<72x128xf32>
    tpu.vector_store %arg19[%c10_136, %c0_137], %121 {strides = array<i32>} : memref<92x128xf32, #tpu.memory_space<vmem>>, vector<72x128xf32>,
    %cst_138 = arith.constant 0.000000e+00 : f32
    %123 = vector.broadcast %cst_138 : f32 to vector<1x128xf32>
    %c20_139 = arith.constant 20 : index
    %c0_140 = arith.constant 0 : index
    %124 = vector.load %arg19[%c20_139, %c0_140] : memref<92x128xf32, #tpu.memory_space<vmem>>, vector<1x128xf32>
    %c0_141 = arith.constant 0 : index
    %c0_142 = arith.constant 0 : index
    %125 = vector.load %arg12[%c0_141, %c0_142] : memref<5376x128xf32, #tpu.memory_space<vmem>>, vector<128x128xf32>
    %cst_143 = arith.constant dense<0.000000e+00> : vector<1x128xf32>
    %126 = tpu.matmul %124, %125, %cst_143 {dimension_numbers = #tpu.dot_dimension_numbers<[1], [0], [0], [1], [0, 0, 1, 1], [], []>} : vector<1x128xf32>, vector<128x128xf32>, vector<1x128xf32> -> vector<1x128xf32>
    %127 = arith.addf %123, %126 : vector<1x128xf32>
    %c21 = arith.constant 21 : index
    %c0_144 = arith.constant 0 : index
    %128 = vector.load %arg19[%c21, %c0_144] : memref<92x128xf32, #tpu.memory_space<vmem>>, vector<1x128xf32>
    %c128_145 = arith.constant 128 : index
    %c0_146 = arith.constant 0 : index
    %129 = vector.load %arg12[%c128_145, %c0_146] : memref<5376x128xf32, #tpu.memory_space<vmem>>, vector<128x128xf32>
    %cst_147 = arith.constant dense<0.000000e+00> : vector<1x128xf32>
    %130 = tpu.matmul %128, %129, %cst_147 {dimension_numbers = #tpu.dot_dimension_numbers<[1], [0], [0], [1], [0, 0, 1, 1], [], []>} : vector<1x128xf32>, vector<128x128xf32>, vector<1x128xf32> -> vector<1x128xf32>
    %131 = arith.addf %127, %130 : vector<1x128xf32>
    %c22 = arith.constant 22 : index
    %c0_148 = arith.constant 0 : index
    %132 = vector.load %arg19[%c22, %c0_148] : memref<92x128xf32, #tpu.memory_space<vmem>>, vector<1x128xf32>
    %c256_149 = arith.constant 256 : index
    %c0_150 = arith.constant 0 : index
    %133 = vector.load %arg12[%c256_149, %c0_150] : memref<5376x128xf32, #tpu.memory_space<vmem>>, vector<128x128xf32>
    %cst_151 = arith.constant dense<0.000000e+00> : vector<1x128xf32>
    %134 = tpu.matmul %132, %133, %cst_151 {dimension_numbers = #tpu.dot_dimension_numbers<[1], [0], [0], [1], [0, 0, 1, 1], [], []>} : vector<1x128xf32>, vector<128x128xf32>, vector<1x128xf32> -> vector<1x128xf32>
    %135 = arith.addf %131, %134 : vector<1x128xf32>
    %c23 = arith.constant 23 : index
    %c0_152 = arith.constant 0 : index
    %136 = vector.load %arg19[%c23, %c0_152] : memref<92x128xf32, #tpu.memory_space<vmem>>, vector<1x128xf32>
    %c384_153 = arith.constant 384 : index
    %c0_154 = arith.constant 0 : index
    %137 = vector.load %arg12[%c384_153, %c0_154] : memref<5376x128xf32, #tpu.memory_space<vmem>>, vector<128x128xf32>
    %cst_155 = arith.constant dense<0.000000e+00> : vector<1x128xf32>
    %138 = tpu.matmul %136, %137, %cst_155 {dimension_numbers = #tpu.dot_dimension_numbers<[1], [0], [0], [1], [0, 0, 1, 1], [], []>} : vector<1x128xf32>, vector<128x128xf32>, vector<1x128xf32> -> vector<1x128xf32>
    %139 = arith.addf %135, %138 : vector<1x128xf32>
    %c24_156 = arith.constant 24 : index
    %c0_157 = arith.constant 0 : index
    %140 = vector.load %arg19[%c24_156, %c0_157] : memref<92x128xf32, #tpu.memory_space<vmem>>, vector<1x128xf32>
    %c512_158 = arith.constant 512 : index
    %c0_159 = arith.constant 0 : index
    %141 = vector.load %arg12[%c512_158, %c0_159] : memref<5376x128xf32, #tpu.memory_space<vmem>>, vector<128x128xf32>
    %cst_160 = arith.constant dense<0.000000e+00> : vector<1x128xf32>
    %142 = tpu.matmul %140, %141, %cst_160 {dimension_numbers = #tpu.dot_dimension_numbers<[1], [0], [0], [1], [0, 0, 1, 1], [], []>} : vector<1x128xf32>, vector<128x128xf32>, vector<1x128xf32> -> vector<1x128xf32>
    %143 = arith.addf %139, %142 : vector<1x128xf32>
    %c25 = arith.constant 25 : index
    %c0_161 = arith.constant 0 : index
    %144 = vector.load %arg19[%c25, %c0_161] : memref<92x128xf32, #tpu.memory_space<vmem>>, vector<1x128xf32>
    %c640 = arith.constant 640 : index
    %c0_162 = arith.constant 0 : index
    %145 = vector.load %arg12[%c640, %c0_162] : memref<5376x128xf32, #tpu.memory_space<vmem>>, vector<128x128xf32>
    %cst_163 = arith.constant dense<0.000000e+00> : vector<1x128xf32>
    %146 = tpu.matmul %144, %145, %cst_163 {dimension_numbers = #tpu.dot_dimension_numbers<[1], [0], [0], [1], [0, 0, 1, 1], [], []>} : vector<1x128xf32>, vector<128x128xf32>, vector<1x128xf32> -> vector<1x128xf32>
    %147 = arith.addf %143, %146 : vector<1x128xf32>
    %c26 = arith.constant 26 : index
    %c0_164 = arith.constant 0 : index
    %148 = vector.load %arg19[%c26, %c0_164] : memref<92x128xf32, #tpu.memory_space<vmem>>, vector<1x128xf32>
    %c768 = arith.constant 768 : index
    %c0_165 = arith.constant 0 : index
    %149 = vector.load %arg12[%c768, %c0_165] : memref<5376x128xf32, #tpu.memory_space<vmem>>, vector<128x128xf32>
    %cst_166 = arith.constant dense<0.000000e+00> : vector<1x128xf32>
    %150 = tpu.matmul %148, %149, %cst_166 {dimension_numbers = #tpu.dot_dimension_numbers<[1], [0], [0], [1], [0, 0, 1, 1], [], []>} : vector<1x128xf32>, vector<128x128xf32>, vector<1x128xf32> -> vector<1x128xf32>
    %151 = arith.addf %147, %150 : vector<1x128xf32>
    %c29 = arith.constant 29 : index
    %c0_167 = arith.constant 0 : index
    %152 = vector.load %arg19[%c29, %c0_167] : memref<92x128xf32, #tpu.memory_space<vmem>>, vector<1x128xf32>
    %c896 = arith.constant 896 : index
    %c0_168 = arith.constant 0 : index
    %153 = vector.load %arg12[%c896, %c0_168] : memref<5376x128xf32, #tpu.memory_space<vmem>>, vector<128x128xf32>
    %cst_169 = arith.constant dense<0.000000e+00> : vector<1x128xf32>
    %154 = tpu.matmul %152, %153, %cst_169 {dimension_numbers = #tpu.dot_dimension_numbers<[1], [0], [0], [1], [0, 0, 1, 1], [], []>} : vector<1x128xf32>, vector<128x128xf32>, vector<1x128xf32> -> vector<1x128xf32>
    %155 = arith.addf %151, %154 : vector<1x128xf32>
    %c30 = arith.constant 30 : index
    %c0_170 = arith.constant 0 : index
    %156 = vector.load %arg19[%c30, %c0_170] : memref<92x128xf32, #tpu.memory_space<vmem>>, vector<1x128xf32>
    %c1024 = arith.constant 1024 : index
    %c0_171 = arith.constant 0 : index
    %157 = vector.load %arg12[%c1024, %c0_171] : memref<5376x128xf32, #tpu.memory_space<vmem>>, vector<128x128xf32>
    %cst_172 = arith.constant dense<0.000000e+00> : vector<1x128xf32>
    %158 = tpu.matmul %156, %157, %cst_172 {dimension_numbers = #tpu.dot_dimension_numbers<[1], [0], [0], [1], [0, 0, 1, 1], [], []>} : vector<1x128xf32>, vector<128x128xf32>, vector<1x128xf32> -> vector<1x128xf32>
    %159 = arith.addf %155, %158 : vector<1x128xf32>
    %c31 = arith.constant 31 : index
    %c0_173 = arith.constant 0 : index
    %160 = vector.load %arg19[%c31, %c0_173] : memref<92x128xf32, #tpu.memory_space<vmem>>, vector<1x128xf32>
    %c1152 = arith.constant 1152 : index
    %c0_174 = arith.constant 0 : index
    %161 = vector.load %arg12[%c1152, %c0_174] : memref<5376x128xf32, #tpu.memory_space<vmem>>, vector<128x128xf32>
    %cst_175 = arith.constant dense<0.000000e+00> : vector<1x128xf32>
    %162 = tpu.matmul %160, %161, %cst_175 {dimension_numbers = #tpu.dot_dimension_numbers<[1], [0], [0], [1], [0, 0, 1, 1], [], []>} : vector<1x128xf32>, vector<128x128xf32>, vector<1x128xf32> -> vector<1x128xf32>
    %163 = arith.addf %159, %162 : vector<1x128xf32>
    %c32_176 = arith.constant 32 : index
    %c0_177 = arith.constant 0 : index
    %164 = vector.load %arg19[%c32_176, %c0_177] : memref<92x128xf32, #tpu.memory_space<vmem>>, vector<1x128xf32>
    %c1280 = arith.constant 1280 : index
    %c0_178 = arith.constant 0 : index
    %165 = vector.load %arg12[%c1280, %c0_178] : memref<5376x128xf32, #tpu.memory_space<vmem>>, vector<128x128xf32>
    %cst_179 = arith.constant dense<0.000000e+00> : vector<1x128xf32>
    %166 = tpu.matmul %164, %165, %cst_179 {dimension_numbers = #tpu.dot_dimension_numbers<[1], [0], [0], [1], [0, 0, 1, 1], [], []>} : vector<1x128xf32>, vector<128x128xf32>, vector<1x128xf32> -> vector<1x128xf32>
    %167 = arith.addf %163, %166 : vector<1x128xf32>
    %c33 = arith.constant 33 : index
    %c0_180 = arith.constant 0 : index
    %168 = vector.load %arg19[%c33, %c0_180] : memref<92x128xf32, #tpu.memory_space<vmem>>, vector<1x128xf32>
    %c1408 = arith.constant 1408 : index
    %c0_181 = arith.constant 0 : index
    %169 = vector.load %arg12[%c1408, %c0_181] : memref<5376x128xf32, #tpu.memory_space<vmem>>, vector<128x128xf32>
    %cst_182 = arith.constant dense<0.000000e+00> : vector<1x128xf32>
    %170 = tpu.matmul %168, %169, %cst_182 {dimension_numbers = #tpu.dot_dimension_numbers<[1], [0], [0], [1], [0, 0, 1, 1], [], []>} : vector<1x128xf32>, vector<128x128xf32>, vector<1x128xf32> -> vector<1x128xf32>
    %171 = arith.addf %167, %170 : vector<1x128xf32>
    %c34 = arith.constant 34 : index
    %c0_183 = arith.constant 0 : index
    %172 = vector.load %arg19[%c34, %c0_183] : memref<92x128xf32, #tpu.memory_space<vmem>>, vector<1x128xf32>
    %c1536 = arith.constant 1536 : index
    %c0_184 = arith.constant 0 : index
    %173 = vector.load %arg12[%c1536, %c0_184] : memref<5376x128xf32, #tpu.memory_space<vmem>>, vector<128x128xf32>
    %cst_185 = arith.constant dense<0.000000e+00> : vector<1x128xf32>
    %174 = tpu.matmul %172, %173, %cst_185 {dimension_numbers = #tpu.dot_dimension_numbers<[1], [0], [0], [1], [0, 0, 1, 1], [], []>} : vector<1x128xf32>, vector<128x128xf32>, vector<1x128xf32> -> vector<1x128xf32>
    %175 = arith.addf %171, %174 : vector<1x128xf32>
    %c35 = arith.constant 35 : index
    %c0_186 = arith.constant 0 : index
    %176 = vector.load %arg19[%c35, %c0_186] : memref<92x128xf32, #tpu.memory_space<vmem>>, vector<1x128xf32>
    %c1664 = arith.constant 1664 : index
    %c0_187 = arith.constant 0 : index
    %177 = vector.load %arg12[%c1664, %c0_187] : memref<5376x128xf32, #tpu.memory_space<vmem>>, vector<128x128xf32>
    %cst_188 = arith.constant dense<0.000000e+00> : vector<1x128xf32>
    %178 = tpu.matmul %176, %177, %cst_188 {dimension_numbers = #tpu.dot_dimension_numbers<[1], [0], [0], [1], [0, 0, 1, 1], [], []>} : vector<1x128xf32>, vector<128x128xf32>, vector<1x128xf32> -> vector<1x128xf32>
    %179 = arith.addf %175, %178 : vector<1x128xf32>
    %c38 = arith.constant 38 : index
    %c0_189 = arith.constant 0 : index
    %180 = vector.load %arg19[%c38, %c0_189] : memref<92x128xf32, #tpu.memory_space<vmem>>, vector<1x128xf32>
    %c1792 = arith.constant 1792 : index
    %c0_190 = arith.constant 0 : index
    %181 = vector.load %arg12[%c1792, %c0_190] : memref<5376x128xf32, #tpu.memory_space<vmem>>, vector<128x128xf32>
    %cst_191 = arith.constant dense<0.000000e+00> : vector<1x128xf32>
    %182 = tpu.matmul %180, %181, %cst_191 {dimension_numbers = #tpu.dot_dimension_numbers<[1], [0], [0], [1], [0, 0, 1, 1], [], []>} : vector<1x128xf32>, vector<128x128xf32>, vector<1x128xf32> -> vector<1x128xf32>
    %183 = arith.addf %179, %182 : vector<1x128xf32>
    %c39 = arith.constant 39 : index
    %c0_192 = arith.constant 0 : index
    %184 = vector.load %arg19[%c39, %c0_192] : memref<92x128xf32, #tpu.memory_space<vmem>>, vector<1x128xf32>
    %c1920 = arith.constant 1920 : index
    %c0_193 = arith.constant 0 : index
    %185 = vector.load %arg12[%c1920, %c0_193] : memref<5376x128xf32, #tpu.memory_space<vmem>>, vector<128x128xf32>
    %cst_194 = arith.constant dense<0.000000e+00> : vector<1x128xf32>
    %186 = tpu.matmul %184, %185, %cst_194 {dimension_numbers = #tpu.dot_dimension_numbers<[1], [0], [0], [1], [0, 0, 1, 1], [], []>} : vector<1x128xf32>, vector<128x128xf32>, vector<1x128xf32> -> vector<1x128xf32>
    %187 = arith.addf %183, %186 : vector<1x128xf32>
    %c40_195 = arith.constant 40 : index
    %c0_196 = arith.constant 0 : index
    %188 = vector.load %arg19[%c40_195, %c0_196] : memref<92x128xf32, #tpu.memory_space<vmem>>, vector<1x128xf32>
    %c2048 = arith.constant 2048 : index
    %c0_197 = arith.constant 0 : index
    %189 = vector.load %arg12[%c2048, %c0_197] : memref<5376x128xf32, #tpu.memory_space<vmem>>, vector<128x128xf32>
    %cst_198 = arith.constant dense<0.000000e+00> : vector<1x128xf32>
    %190 = tpu.matmul %188, %189, %cst_198 {dimension_numbers = #tpu.dot_dimension_numbers<[1], [0], [0], [1], [0, 0, 1, 1], [], []>} : vector<1x128xf32>, vector<128x128xf32>, vector<1x128xf32> -> vector<1x128xf32>
    %191 = arith.addf %187, %190 : vector<1x128xf32>
    %c41 = arith.constant 41 : index
    %c0_199 = arith.constant 0 : index
    %192 = vector.load %arg19[%c41, %c0_199] : memref<92x128xf32, #tpu.memory_space<vmem>>, vector<1x128xf32>
    %c2176 = arith.constant 2176 : index
    %c0_200 = arith.constant 0 : index
    %193 = vector.load %arg12[%c2176, %c0_200] : memref<5376x128xf32, #tpu.memory_space<vmem>>, vector<128x128xf32>
    %cst_201 = arith.constant dense<0.000000e+00> : vector<1x128xf32>
    %194 = tpu.matmul %192, %193, %cst_201 {dimension_numbers = #tpu.dot_dimension_numbers<[1], [0], [0], [1], [0, 0, 1, 1], [], []>} : vector<1x128xf32>, vector<128x128xf32>, vector<1x128xf32> -> vector<1x128xf32>
    %195 = arith.addf %191, %194 : vector<1x128xf32>
    %c42 = arith.constant 42 : index
    %c0_202 = arith.constant 0 : index
    %196 = vector.load %arg19[%c42, %c0_202] : memref<92x128xf32, #tpu.memory_space<vmem>>, vector<1x128xf32>
    %c2304 = arith.constant 2304 : index
    %c0_203 = arith.constant 0 : index
    %197 = vector.load %arg12[%c2304, %c0_203] : memref<5376x128xf32, #tpu.memory_space<vmem>>, vector<128x128xf32>
    %cst_204 = arith.constant dense<0.000000e+00> : vector<1x128xf32>
    %198 = tpu.matmul %196, %197, %cst_204 {dimension_numbers = #tpu.dot_dimension_numbers<[1], [0], [0], [1], [0, 0, 1, 1], [], []>} : vector<1x128xf32>, vector<128x128xf32>, vector<1x128xf32> -> vector<1x128xf32>
    %199 = arith.addf %195, %198 : vector<1x128xf32>
    %c43 = arith.constant 43 : index
    %c0_205 = arith.constant 0 : index
    %200 = vector.load %arg19[%c43, %c0_205] : memref<92x128xf32, #tpu.memory_space<vmem>>, vector<1x128xf32>
    %c2432 = arith.constant 2432 : index
    %c0_206 = arith.constant 0 : index
    %201 = vector.load %arg12[%c2432, %c0_206] : memref<5376x128xf32, #tpu.memory_space<vmem>>, vector<128x128xf32>
    %cst_207 = arith.constant dense<0.000000e+00> : vector<1x128xf32>
    %202 = tpu.matmul %200, %201, %cst_207 {dimension_numbers = #tpu.dot_dimension_numbers<[1], [0], [0], [1], [0, 0, 1, 1], [], []>} : vector<1x128xf32>, vector<128x128xf32>, vector<1x128xf32> -> vector<1x128xf32>
    %203 = arith.addf %199, %202 : vector<1x128xf32>
    %c44 = arith.constant 44 : index
    %c0_208 = arith.constant 0 : index
    %204 = vector.load %arg19[%c44, %c0_208] : memref<92x128xf32, #tpu.memory_space<vmem>>, vector<1x128xf32>
    %c2560 = arith.constant 2560 : index
    %c0_209 = arith.constant 0 : index
    %205 = vector.load %arg12[%c2560, %c0_209] : memref<5376x128xf32, #tpu.memory_space<vmem>>, vector<128x128xf32>
    %cst_210 = arith.constant dense<0.000000e+00> : vector<1x128xf32>
    %206 = tpu.matmul %204, %205, %cst_210 {dimension_numbers = #tpu.dot_dimension_numbers<[1], [0], [0], [1], [0, 0, 1, 1], [], []>} : vector<1x128xf32>, vector<128x128xf32>, vector<1x128xf32> -> vector<1x128xf32>
    %207 = arith.addf %203, %206 : vector<1x128xf32>
    %c47 = arith.constant 47 : index
    %c0_211 = arith.constant 0 : index
    %208 = vector.load %arg19[%c47, %c0_211] : memref<92x128xf32, #tpu.memory_space<vmem>>, vector<1x128xf32>
    %c2688 = arith.constant 2688 : index
    %c0_212 = arith.constant 0 : index
    %209 = vector.load %arg12[%c2688, %c0_212] : memref<5376x128xf32, #tpu.memory_space<vmem>>, vector<128x128xf32>
    %cst_213 = arith.constant dense<0.000000e+00> : vector<1x128xf32>
    %210 = tpu.matmul %208, %209, %cst_213 {dimension_numbers = #tpu.dot_dimension_numbers<[1], [0], [0], [1], [0, 0, 1, 1], [], []>} : vector<1x128xf32>, vector<128x128xf32>, vector<1x128xf32> -> vector<1x128xf32>
    %211 = arith.addf %207, %210 : vector<1x128xf32>
    %c48_214 = arith.constant 48 : index
    %c0_215 = arith.constant 0 : index
    %212 = vector.load %arg19[%c48_214, %c0_215] : memref<92x128xf32, #tpu.memory_space<vmem>>, vector<1x128xf32>
    %c2816 = arith.constant 2816 : index
    %c0_216 = arith.constant 0 : index
    %213 = vector.load %arg12[%c2816, %c0_216] : memref<5376x128xf32, #tpu.memory_space<vmem>>, vector<128x128xf32>
    %cst_217 = arith.constant dense<0.000000e+00> : vector<1x128xf32>
    %214 = tpu.matmul %212, %213, %cst_217 {dimension_numbers = #tpu.dot_dimension_numbers<[1], [0], [0], [1], [0, 0, 1, 1], [], []>} : vector<1x128xf32>, vector<128x128xf32>, vector<1x128xf32> -> vector<1x128xf32>
    %215 = arith.addf %211, %214 : vector<1x128xf32>
    %c49 = arith.constant 49 : index
    %c0_218 = arith.constant 0 : index
    %216 = vector.load %arg19[%c49, %c0_218] : memref<92x128xf32, #tpu.memory_space<vmem>>, vector<1x128xf32>
    %c2944 = arith.constant 2944 : index
    %c0_219 = arith.constant 0 : index
    %217 = vector.load %arg12[%c2944, %c0_219] : memref<5376x128xf32, #tpu.memory_space<vmem>>, vector<128x128xf32>
    %cst_220 = arith.constant dense<0.000000e+00> : vector<1x128xf32>
    %218 = tpu.matmul %216, %217, %cst_220 {dimension_numbers = #tpu.dot_dimension_numbers<[1], [0], [0], [1], [0, 0, 1, 1], [], []>} : vector<1x128xf32>, vector<128x128xf32>, vector<1x128xf32> -> vector<1x128xf32>
    %219 = arith.addf %215, %218 : vector<1x128xf32>
    %c50 = arith.constant 50 : index
    %c0_221 = arith.constant 0 : index
    %220 = vector.load %arg19[%c50, %c0_221] : memref<92x128xf32, #tpu.memory_space<vmem>>, vector<1x128xf32>
    %c3072 = arith.constant 3072 : index
    %c0_222 = arith.constant 0 : index
    %221 = vector.load %arg12[%c3072, %c0_222] : memref<5376x128xf32, #tpu.memory_space<vmem>>, vector<128x128xf32>
    %cst_223 = arith.constant dense<0.000000e+00> : vector<1x128xf32>
    %222 = tpu.matmul %220, %221, %cst_223 {dimension_numbers = #tpu.dot_dimension_numbers<[1], [0], [0], [1], [0, 0, 1, 1], [], []>} : vector<1x128xf32>, vector<128x128xf32>, vector<1x128xf32> -> vector<1x128xf32>
    %223 = arith.addf %219, %222 : vector<1x128xf32>
    %c51 = arith.constant 51 : index
    %c0_224 = arith.constant 0 : index
    %224 = vector.load %arg19[%c51, %c0_224] : memref<92x128xf32, #tpu.memory_space<vmem>>, vector<1x128xf32>
    %c3200 = arith.constant 3200 : index
    %c0_225 = arith.constant 0 : index
    %225 = vector.load %arg12[%c3200, %c0_225] : memref<5376x128xf32, #tpu.memory_space<vmem>>, vector<128x128xf32>
    %cst_226 = arith.constant dense<0.000000e+00> : vector<1x128xf32>
    %226 = tpu.matmul %224, %225, %cst_226 {dimension_numbers = #tpu.dot_dimension_numbers<[1], [0], [0], [1], [0, 0, 1, 1], [], []>} : vector<1x128xf32>, vector<128x128xf32>, vector<1x128xf32> -> vector<1x128xf32>
    %227 = arith.addf %223, %226 : vector<1x128xf32>
    %c52 = arith.constant 52 : index
    %c0_227 = arith.constant 0 : index
    %228 = vector.load %arg19[%c52, %c0_227] : memref<92x128xf32, #tpu.memory_space<vmem>>, vector<1x128xf32>
    %c3328 = arith.constant 3328 : index
    %c0_228 = arith.constant 0 : index
    %229 = vector.load %arg12[%c3328, %c0_228] : memref<5376x128xf32, #tpu.memory_space<vmem>>, vector<128x128xf32>
    %cst_229 = arith.constant dense<0.000000e+00> : vector<1x128xf32>
    %230 = tpu.matmul %228, %229, %cst_229 {dimension_numbers = #tpu.dot_dimension_numbers<[1], [0], [0], [1], [0, 0, 1, 1], [], []>} : vector<1x128xf32>, vector<128x128xf32>, vector<1x128xf32> -> vector<1x128xf32>
    %231 = arith.addf %227, %230 : vector<1x128xf32>
    %c53 = arith.constant 53 : index
    %c0_230 = arith.constant 0 : index
    %232 = vector.load %arg19[%c53, %c0_230] : memref<92x128xf32, #tpu.memory_space<vmem>>, vector<1x128xf32>
    %c3456 = arith.constant 3456 : index
    %c0_231 = arith.constant 0 : index
    %233 = vector.load %arg12[%c3456, %c0_231] : memref<5376x128xf32, #tpu.memory_space<vmem>>, vector<128x128xf32>
    %cst_232 = arith.constant dense<0.000000e+00> : vector<1x128xf32>
    %234 = tpu.matmul %232, %233, %cst_232 {dimension_numbers = #tpu.dot_dimension_numbers<[1], [0], [0], [1], [0, 0, 1, 1], [], []>} : vector<1x128xf32>, vector<128x128xf32>, vector<1x128xf32> -> vector<1x128xf32>
    %235 = arith.addf %231, %234 : vector<1x128xf32>
    %c56_233 = arith.constant 56 : index
    %c0_234 = arith.constant 0 : index
    %236 = vector.load %arg19[%c56_233, %c0_234] : memref<92x128xf32, #tpu.memory_space<vmem>>, vector<1x128xf32>
    %c3584 = arith.constant 3584 : index
    %c0_235 = arith.constant 0 : index
    %237 = vector.load %arg12[%c3584, %c0_235] : memref<5376x128xf32, #tpu.memory_space<vmem>>, vector<128x128xf32>
    %cst_236 = arith.constant dense<0.000000e+00> : vector<1x128xf32>
    %238 = tpu.matmul %236, %237, %cst_236 {dimension_numbers = #tpu.dot_dimension_numbers<[1], [0], [0], [1], [0, 0, 1, 1], [], []>} : vector<1x128xf32>, vector<128x128xf32>, vector<1x128xf32> -> vector<1x128xf32>
    %239 = arith.addf %235, %238 : vector<1x128xf32>
    %c57 = arith.constant 57 : index
    %c0_237 = arith.constant 0 : index
    %240 = vector.load %arg19[%c57, %c0_237] : memref<92x128xf32, #tpu.memory_space<vmem>>, vector<1x128xf32>
    %c3712 = arith.constant 3712 : index
    %c0_238 = arith.constant 0 : index
    %241 = vector.load %arg12[%c3712, %c0_238] : memref<5376x128xf32, #tpu.memory_space<vmem>>, vector<128x128xf32>
    %cst_239 = arith.constant dense<0.000000e+00> : vector<1x128xf32>
    %242 = tpu.matmul %240, %241, %cst_239 {dimension_numbers = #tpu.dot_dimension_numbers<[1], [0], [0], [1], [0, 0, 1, 1], [], []>} : vector<1x128xf32>, vector<128x128xf32>, vector<1x128xf32> -> vector<1x128xf32>
    %243 = arith.addf %239, %242 : vector<1x128xf32>
    %c58 = arith.constant 58 : index
    %c0_240 = arith.constant 0 : index
    %244 = vector.load %arg19[%c58, %c0_240] : memref<92x128xf32, #tpu.memory_space<vmem>>, vector<1x128xf32>
    %c3840 = arith.constant 3840 : index
    %c0_241 = arith.constant 0 : index
    %245 = vector.load %arg12[%c3840, %c0_241] : memref<5376x128xf32, #tpu.memory_space<vmem>>, vector<128x128xf32>
    %cst_242 = arith.constant dense<0.000000e+00> : vector<1x128xf32>
    %246 = tpu.matmul %244, %245, %cst_242 {dimension_numbers = #tpu.dot_dimension_numbers<[1], [0], [0], [1], [0, 0, 1, 1], [], []>} : vector<1x128xf32>, vector<128x128xf32>, vector<1x128xf32> -> vector<1x128xf32>
    %247 = arith.addf %243, %246 : vector<1x128xf32>
    %c59 = arith.constant 59 : index
    %c0_243 = arith.constant 0 : index
    %248 = vector.load %arg19[%c59, %c0_243] : memref<92x128xf32, #tpu.memory_space<vmem>>, vector<1x128xf32>
    %c3968 = arith.constant 3968 : index
    %c0_244 = arith.constant 0 : index
    %249 = vector.load %arg12[%c3968, %c0_244] : memref<5376x128xf32, #tpu.memory_space<vmem>>, vector<128x128xf32>
    %cst_245 = arith.constant dense<0.000000e+00> : vector<1x128xf32>
    %250 = tpu.matmul %248, %249, %cst_245 {dimension_numbers = #tpu.dot_dimension_numbers<[1], [0], [0], [1], [0, 0, 1, 1], [], []>} : vector<1x128xf32>, vector<128x128xf32>, vector<1x128xf32> -> vector<1x128xf32>
    %251 = arith.addf %247, %250 : vector<1x128xf32>
    %c60 = arith.constant 60 : index
    %c0_246 = arith.constant 0 : index
    %252 = vector.load %arg19[%c60, %c0_246] : memref<92x128xf32, #tpu.memory_space<vmem>>, vector<1x128xf32>
    %c4096 = arith.constant 4096 : index
    %c0_247 = arith.constant 0 : index
    %253 = vector.load %arg12[%c4096, %c0_247] : memref<5376x128xf32, #tpu.memory_space<vmem>>, vector<128x128xf32>
    %cst_248 = arith.constant dense<0.000000e+00> : vector<1x128xf32>
    %254 = tpu.matmul %252, %253, %cst_248 {dimension_numbers = #tpu.dot_dimension_numbers<[1], [0], [0], [1], [0, 0, 1, 1], [], []>} : vector<1x128xf32>, vector<128x128xf32>, vector<1x128xf32> -> vector<1x128xf32>
    %255 = arith.addf %251, %254 : vector<1x128xf32>
    %c61 = arith.constant 61 : index
    %c0_249 = arith.constant 0 : index
    %256 = vector.load %arg19[%c61, %c0_249] : memref<92x128xf32, #tpu.memory_space<vmem>>, vector<1x128xf32>
    %c4224 = arith.constant 4224 : index
    %c0_250 = arith.constant 0 : index
    %257 = vector.load %arg12[%c4224, %c0_250] : memref<5376x128xf32, #tpu.memory_space<vmem>>, vector<128x128xf32>
    %cst_251 = arith.constant dense<0.000000e+00> : vector<1x128xf32>
    %258 = tpu.matmul %256, %257, %cst_251 {dimension_numbers = #tpu.dot_dimension_numbers<[1], [0], [0], [1], [0, 0, 1, 1], [], []>} : vector<1x128xf32>, vector<128x128xf32>, vector<1x128xf32> -> vector<1x128xf32>
    %259 = arith.addf %255, %258 : vector<1x128xf32>
    %c62 = arith.constant 62 : index
    %c0_252 = arith.constant 0 : index
    %260 = vector.load %arg19[%c62, %c0_252] : memref<92x128xf32, #tpu.memory_space<vmem>>, vector<1x128xf32>
    %c4352 = arith.constant 4352 : index
    %c0_253 = arith.constant 0 : index
    %261 = vector.load %arg12[%c4352, %c0_253] : memref<5376x128xf32, #tpu.memory_space<vmem>>, vector<128x128xf32>
    %cst_254 = arith.constant dense<0.000000e+00> : vector<1x128xf32>
    %262 = tpu.matmul %260, %261, %cst_254 {dimension_numbers = #tpu.dot_dimension_numbers<[1], [0], [0], [1], [0, 0, 1, 1], [], []>} : vector<1x128xf32>, vector<128x128xf32>, vector<1x128xf32> -> vector<1x128xf32>
    %263 = arith.addf %259, %262 : vector<1x128xf32>
    %c65 = arith.constant 65 : index
    %c0_255 = arith.constant 0 : index
    %264 = vector.load %arg19[%c65, %c0_255] : memref<92x128xf32, #tpu.memory_space<vmem>>, vector<1x128xf32>
    %c4480 = arith.constant 4480 : index
    %c0_256 = arith.constant 0 : index
    %265 = vector.load %arg12[%c4480, %c0_256] : memref<5376x128xf32, #tpu.memory_space<vmem>>, vector<128x128xf32>
    %cst_257 = arith.constant dense<0.000000e+00> : vector<1x128xf32>
    %266 = tpu.matmul %264, %265, %cst_257 {dimension_numbers = #tpu.dot_dimension_numbers<[1], [0], [0], [1], [0, 0, 1, 1], [], []>} : vector<1x128xf32>, vector<128x128xf32>, vector<1x128xf32> -> vector<1x128xf32>
    %267 = arith.addf %263, %266 : vector<1x128xf32>
    %c66 = arith.constant 66 : index
    %c0_258 = arith.constant 0 : index
    %268 = vector.load %arg19[%c66, %c0_258] : memref<92x128xf32, #tpu.memory_space<vmem>>, vector<1x128xf32>
    %c4608 = arith.constant 4608 : index
    %c0_259 = arith.constant 0 : index
    %269 = vector.load %arg12[%c4608, %c0_259] : memref<5376x128xf32, #tpu.memory_space<vmem>>, vector<128x128xf32>
    %cst_260 = arith.constant dense<0.000000e+00> : vector<1x128xf32>
    %270 = tpu.matmul %268, %269, %cst_260 {dimension_numbers = #tpu.dot_dimension_numbers<[1], [0], [0], [1], [0, 0, 1, 1], [], []>} : vector<1x128xf32>, vector<128x128xf32>, vector<1x128xf32> -> vector<1x128xf32>
    %271 = arith.addf %267, %270 : vector<1x128xf32>
    %c67 = arith.constant 67 : index
    %c0_261 = arith.constant 0 : index
    %272 = vector.load %arg19[%c67, %c0_261] : memref<92x128xf32, #tpu.memory_space<vmem>>, vector<1x128xf32>
    %c4736 = arith.constant 4736 : index
    %c0_262 = arith.constant 0 : index
    %273 = vector.load %arg12[%c4736, %c0_262] : memref<5376x128xf32, #tpu.memory_space<vmem>>, vector<128x128xf32>
    %cst_263 = arith.constant dense<0.000000e+00> : vector<1x128xf32>
    %274 = tpu.matmul %272, %273, %cst_263 {dimension_numbers = #tpu.dot_dimension_numbers<[1], [0], [0], [1], [0, 0, 1, 1], [], []>} : vector<1x128xf32>, vector<128x128xf32>, vector<1x128xf32> -> vector<1x128xf32>
    %275 = arith.addf %271, %274 : vector<1x128xf32>
    %c68 = arith.constant 68 : index
    %c0_264 = arith.constant 0 : index
    %276 = vector.load %arg19[%c68, %c0_264] : memref<92x128xf32, #tpu.memory_space<vmem>>, vector<1x128xf32>
    %c4864 = arith.constant 4864 : index
    %c0_265 = arith.constant 0 : index
    %277 = vector.load %arg12[%c4864, %c0_265] : memref<5376x128xf32, #tpu.memory_space<vmem>>, vector<128x128xf32>
    %cst_266 = arith.constant dense<0.000000e+00> : vector<1x128xf32>
    %278 = tpu.matmul %276, %277, %cst_266 {dimension_numbers = #tpu.dot_dimension_numbers<[1], [0], [0], [1], [0, 0, 1, 1], [], []>} : vector<1x128xf32>, vector<128x128xf32>, vector<1x128xf32> -> vector<1x128xf32>
    %279 = arith.addf %275, %278 : vector<1x128xf32>
    %c69 = arith.constant 69 : index
    %c0_267 = arith.constant 0 : index
    %280 = vector.load %arg19[%c69, %c0_267] : memref<92x128xf32, #tpu.memory_space<vmem>>, vector<1x128xf32>
    %c4992 = arith.constant 4992 : index
    %c0_268 = arith.constant 0 : index
    %281 = vector.load %arg12[%c4992, %c0_268] : memref<5376x128xf32, #tpu.memory_space<vmem>>, vector<128x128xf32>
    %cst_269 = arith.constant dense<0.000000e+00> : vector<1x128xf32>
    %282 = tpu.matmul %280, %281, %cst_269 {dimension_numbers = #tpu.dot_dimension_numbers<[1], [0], [0], [1], [0, 0, 1, 1], [], []>} : vector<1x128xf32>, vector<128x128xf32>, vector<1x128xf32> -> vector<1x128xf32>
    %283 = arith.addf %279, %282 : vector<1x128xf32>
    %c70 = arith.constant 70 : index
    %c0_270 = arith.constant 0 : index
    %284 = vector.load %arg19[%c70, %c0_270] : memref<92x128xf32, #tpu.memory_space<vmem>>, vector<1x128xf32>
    %c5120 = arith.constant 5120 : index
    %c0_271 = arith.constant 0 : index
    %285 = vector.load %arg12[%c5120, %c0_271] : memref<5376x128xf32, #tpu.memory_space<vmem>>, vector<128x128xf32>
    %cst_272 = arith.constant dense<0.000000e+00> : vector<1x128xf32>
    %286 = tpu.matmul %284, %285, %cst_272 {dimension_numbers = #tpu.dot_dimension_numbers<[1], [0], [0], [1], [0, 0, 1, 1], [], []>} : vector<1x128xf32>, vector<128x128xf32>, vector<1x128xf32> -> vector<1x128xf32>
    %287 = arith.addf %283, %286 : vector<1x128xf32>
    %c71 = arith.constant 71 : index
    %c0_273 = arith.constant 0 : index
    %288 = vector.load %arg19[%c71, %c0_273] : memref<92x128xf32, #tpu.memory_space<vmem>>, vector<1x128xf32>
    %c5248 = arith.constant 5248 : index
    %c0_274 = arith.constant 0 : index
    %289 = vector.load %arg12[%c5248, %c0_274] : memref<5376x128xf32, #tpu.memory_space<vmem>>, vector<128x128xf32>
    %cst_275 = arith.constant dense<0.000000e+00> : vector<1x128xf32>
    %290 = tpu.matmul %288, %289, %cst_275 {dimension_numbers = #tpu.dot_dimension_numbers<[1], [0], [0], [1], [0, 0, 1, 1], [], []>} : vector<1x128xf32>, vector<128x128xf32>, vector<1x128xf32> -> vector<1x128xf32>
    %291 = arith.addf %287, %290 : vector<1x128xf32>
    %c0_276 = arith.constant 0 : index
    %c0_277 = arith.constant 0 : index
    %292 = vector.load %arg13[%c0_276, %c0_277] : memref<1x128xf32, #tpu.memory_space<vmem>>, vector<1x128xf32>
    %293 = arith.addf %291, %292 : vector<1x128xf32>
    %cst_278 = arith.constant 0.000000e+00 : f32
    %294 = vector.broadcast %cst_278 : f32 to vector<1x128xf32>
    %295 = arith.maximumf %293, %294 : vector<1x128xf32>
    %c0_279 = arith.constant 0 : index
    %c0_280 = arith.constant 0 : index
    %296 = vector.load %arg14[%c0_279, %c0_280] : memref<128x128xf32, #tpu.memory_space<vmem>>, vector<128x128xf32>
    %cst_281 = arith.constant dense<0.000000e+00> : vector<1x128xf32>
    %297 = tpu.matmul %295, %296, %cst_281 {dimension_numbers = #tpu.dot_dimension_numbers<[1], [0], [0], [1], [0, 0, 1, 1], [], []>} : vector<1x128xf32>, vector<128x128xf32>, vector<1x128xf32> -> vector<1x128xf32>
    %c0_282 = arith.constant 0 : index
    %c0_283 = arith.constant 0 : index
    %298 = vector.load %arg15[%c0_282, %c0_283] : memref<1x128xf32, #tpu.memory_space<vmem>>, vector<1x128xf32>
    %299 = arith.addf %297, %298 : vector<1x128xf32>
    %c0_284 = arith.constant 0 : index
    %c0_285 = arith.constant 0 : index
    %c0_286 = arith.constant 0 : index
    %300 = vector.load %arg16[%c0_284, %c0_285, %c0_286] : memref<1x1x128xf32, #tpu.memory_space<vmem>>, vector<1x1x128xf32>
    %301 = vector.shape_cast %300 : vector<1x1x128xf32> to vector<1x128xf32>
    %302 = vector.shape_cast %299 : vector<1x128xf32> to vector<1x1x128xf32>
    tpu.vector_store %arg16[%c0_284, %c0_285, %c0_286], %302 {strides = array<i32>} : memref<1x1x128xf32, #tpu.memory_space<vmem>>, vector<1x1x128xf32>,
    return
  }
  func.func @transform_0(%arg0: i32) -> (i32, i32, i32) {
    %c0_i32 = arith.constant 0 : i32
    %c0_i32_0 = arith.constant 0 : i32
    %c0_i32_1 = arith.constant 0 : i32
    return %arg0, %c0_i32, %c0_i32_0 : i32, i32, i32
  }
  func.func @transform_1(%arg0: i32) -> (i32, i32) {
    %c0_i32 = arith.constant 0 : i32
    %c0_i32_0 = arith.constant 0 : i32
    %c0_i32_1 = arith.constant 0 : i32
    return %c0_i32, %c0_i32_0 : i32, i32
  }
  func.func @transform_2(%arg0: i32) -> (i32, i32) {
    %c0_i32 = arith.constant 0 : i32
    %c0_i32_0 = arith.constant 0 : i32
    %c0_i32_1 = arith.constant 0 : i32
    return %c0_i32, %c0_i32_0 : i32, i32
  }
  func.func @transform_3(%arg0: i32) -> (i32, i32) {
    %c0_i32 = arith.constant 0 : i32
    %c0_i32_0 = arith.constant 0 : i32
    %c0_i32_1 = arith.constant 0 : i32
    return %c0_i32, %c0_i32_0 : i32, i32
  }
  func.func @transform_4(%arg0: i32) -> (i32, i32) {
    %c0_i32 = arith.constant 0 : i32
    %c0_i32_0 = arith.constant 0 : i32
    %c0_i32_1 = arith.constant 0 : i32
    return %c0_i32, %c0_i32_0 : i32, i32
  }
  func.func @transform_5(%arg0: i32) -> (i32, i32) {
    %c0_i32 = arith.constant 0 : i32
    %c0_i32_0 = arith.constant 0 : i32
    %c0_i32_1 = arith.constant 0 : i32
    return %c0_i32, %c0_i32_0 : i32, i32
  }
  func.func @transform_6(%arg0: i32) -> (i32, i32) {
    %c0_i32 = arith.constant 0 : i32
    %c0_i32_0 = arith.constant 0 : i32
    %c0_i32_1 = arith.constant 0 : i32
    return %c0_i32, %c0_i32_0 : i32, i32
  }
  func.func @transform_7(%arg0: i32) -> (i32, i32) {
    %c0_i32 = arith.constant 0 : i32
    %c0_i32_0 = arith.constant 0 : i32
    %c0_i32_1 = arith.constant 0 : i32
    return %c0_i32, %c0_i32_0 : i32, i32
  }
  func.func @transform_8(%arg0: i32) -> (i32, i32) {
    %c0_i32 = arith.constant 0 : i32
    %c0_i32_0 = arith.constant 0 : i32
    %c0_i32_1 = arith.constant 0 : i32
    return %c0_i32, %c0_i32_0 : i32, i32
  }
  func.func @transform_9(%arg0: i32) -> (i32, i32) {
    %c0_i32 = arith.constant 0 : i32
    %c0_i32_0 = arith.constant 0 : i32
    %c0_i32_1 = arith.constant 0 : i32
    return %c0_i32, %c0_i32_0 : i32, i32
  }
  func.func @transform_10(%arg0: i32) -> (i32, i32) {
    %c0_i32 = arith.constant 0 : i32
    %c0_i32_0 = arith.constant 0 : i32
    %c0_i32_1 = arith.constant 0 : i32
    return %c0_i32, %c0_i32_0 : i32, i32
  }
  func.func @transform_11(%arg0: i32) -> (i32, i32) {
    %c0_i32 = arith.constant 0 : i32
    %c0_i32_0 = arith.constant 0 : i32
    %c0_i32_1 = arith.constant 0 : i32
    return %c0_i32, %c0_i32_0 : i32, i32
  }
  func.func @transform_12(%arg0: i32) -> (i32, i32) {
    %c0_i32 = arith.constant 0 : i32
    %c0_i32_0 = arith.constant 0 : i32
    %c0_i32_1 = arith.constant 0 : i32
    return %c0_i32, %c0_i32_0 : i32, i32
  }
  func.func @transform_13(%arg0: i32) -> (i32, i32) {
    %c0_i32 = arith.constant 0 : i32
    %c0_i32_0 = arith.constant 0 : i32
    %c0_i32_1 = arith.constant 0 : i32
    return %c0_i32, %c0_i32_0 : i32, i32
  }
  func.func @transform_14(%arg0: i32) -> (i32, i32) {
    %c0_i32 = arith.constant 0 : i32
    %c0_i32_0 = arith.constant 0 : i32
    %c0_i32_1 = arith.constant 0 : i32
    return %c0_i32, %c0_i32_0 : i32, i32
  }
  func.func @transform_15(%arg0: i32) -> (i32, i32, i32) {
    %c0_i32 = arith.constant 0 : i32
    %c0_i32_0 = arith.constant 0 : i32
    %c0_i32_1 = arith.constant 0 : i32
    return %arg0, %c0_i32, %c0_i32_0 : i32, i32, i32
  }
}

</mosaic_0001>

<bundles_post_ra>
// kernel: connect4_cnn_forward.1
= control target key start
LH: loop header
LB: loop body
LE: loop exit
PB: predicated region body
PF: predicated region fallthrough
CT: control target
= control target key end

     0   :  { %s13462_s0 = inlined_call_operand.vmem [shape: f32[2,92,8], index: 0, kind: input, shape index: {}]   ;;  %s13463_s1 = inlined_call_operand.hbm [shape: f32[72,1], index: 1, kind: input, shape index: {}]   ;;  %s13464_s2 = inlined_call_operand.vmem [shape: f32[72,32], index: 2, kind: input, shape index: {}]   ;;  %s13465_s3 = inlined_call_operand.hbm [shape: f32[1,32], index: 3, kind: input, shape index: {}]   ;;  %s13466_s4 = inlined_call_operand.hbm [shape: f32[1,32], index: 4, kind: input, shape index: {}]   ;;  %s13467_s5 = inlined_call_operand.vmem [shape: f32[288,64], index: 5, kind: input, shape index: {}]   ;;  %s13468_s6 = inlined_call_operand.hbm [shape: f32[1,64], index: 6, kind: input, shape index: {}]   ;;  %s13469_s7 = inlined_call_operand.hbm [shape: f32[1,64], index: 7, kind: input, shape index: {}]   ;;  %s13470_s8 = inlined_call_operand.hbm [shape: f32[576,128], index: 8, kind: input, shape index: {}]   ;;  %s13471_s9 = inlined_call_operand.hbm [shape: f32[1,128], index: 9, kind: input, shape index: {}]   ;;  %s13472_s10 = inlined_call_operand.hbm [shape: f32[1,128], index: 10, kind: input, shape index: {}]   ;;  %s13473_s11 = inlined_call_operand.hbm [shape: f32[5376,128], index: 11, kind: input, shape index: {}]   ;;  %s13474_s12 = inlined_call_operand.hbm [shape: f32[1,128], index: 12, kind: input, shape index: {}]   ;;  %s13475_s13 = inlined_call_operand.hbm [shape: f32[128,128], index: 13, kind: input, shape index: {}]   ;;  %s13476_s14 = inlined_call_operand.hbm [shape: f32[1,128], index: 14, kind: input, shape index: {}]   ;;  %s13477_s15 = inlined_call_operand.hbm [shape: f32[2,1,128], index: 15, kind: output, shape index: {}]  }
   0x1   :  { %13492 = sst [smem:[#allocation44_spill]] %s13462_s0 }
   0x2   :  { %13493 = sst [smem:[#allocation45_spill]] %s13464_s2 }
   0x3   :  { %13494 = sst [smem:[#allocation46_spill]] %s13465_s3 }
   0x4   :  { %13495 = sst [smem:[#allocation47_spill]] %s13467_s5 }
   0x5   :  { %13496 = sst [smem:[#allocation48_spill]] %s13468_s6 }
   0x6   :  { %13497 = sst [smem:[#allocation49_spill]] %s13477_s15 }
   0x7   :  { %20 = vsyncpa [#allocation9], 0 }
   0x8   :  { %21 = vsyncpa [#allocation12], 0 }
   0x9   :  { %22 = vsyncpa [#allocation15], 0 }
   0xa   :  { %23 = vsyncpa [#allocation18], 0 }
   0xb   :  { %24 = vsyncpa [#allocation21], 0 }
   0xc   :  { %25 = vsyncpa [#allocation24], 0 }
   0xd   :  { %26 = vsyncpa [#allocation27], 0 }
   0xe   :  { %27 = vsyncpa [#allocation10], 0 }
   0xf   :  { %29 = vsyncpa [#allocation10 + $0x1], 0  ;;  %s11636_s18 = smov 0   ;;  %s11638_s19 = smov 0  }
  0x10   :  { %s11640_s20 = smov 0   ;;  %s11642_s21 = smov 0  }
  0x11 LB: > { %13498 = sst [smem:[#allocation37_spill]] %s11513_s18  ;;  %s11657_s22 = sadd.s32 4294967295, %s11525_s21   ;;  %s11525_s21 = sphi %s11642_s21, %s13538_s21   ;;  %s11521_s20 = sphi %s11640_s20, %s13540_s20   ;;  %s11517_s19 = sphi %s11638_s19, %s13542_s19   ;;  %s11513_s18 = sphi %s11636_s18, %s13541_s18  }
  0x12   : > { %13499 = sst [smem:[#allocation38_spill]] %s11521_s20  ;;  %s7096_s23 = sadd.s32 4294967294, %s11525_s21  }
  0x13   : > { %13500 = sst [smem:[#allocation39_spill]] %s11525_s21  ;;  %s11661_s24 = sadd.s32 1, %s11525_s21  }
  0x14   : > { %13501 = sst [smem:[#allocation40_spill]] %s11661_s24  ;;  %s362_s25 = sadd.s32 1, %s11521_s20 }
  0x15   : > { %s359_s26 = ssub.s32 %s11525_s21, %s11661_s24  ;;  %p372_p0 = scmp.ne.s32.totalorder %s11521_s20, %s11517_s19 }
  0x16   : > { %p360_p1 = scmp.eq.s32.totalorder %s359_s26, 0  ;;  %p373_p2 = scmp.eq.s32.totalorder %s11657_s22, 1 }
  0x17   : > { %p378_p3 = scmp.ne.s32.totalorder %s11517_s19, %s11513_s18  ;;  %p379_p4 = scmp.eq.s32.totalorder %s7096_s23, 1 }
  0x18   : > { %s11672_s27 = scalar_select %p360_p1, %s11521_s20, %s362_s25  }
  0x19   : > { %p11674_p5 = por %p373_p2, %p372_p0  ;;  %p11678_p6 = por %p379_p4, %p378_p3 }
  0x1a   : > { %13502 = sst [smem:[#allocation41_spill]] %s11672_s27  ;;  %p7097_p7 = scmp.ge.s32.totalorder %s11525_s21, 1 }
  0x1b   : > { %s13503_s28 = scalar_select %p11674_p5, 1, 0 }
  0x1c   : > { %s13505_s29 = scalar_select %p11678_p6, 1, 0 }
  0x1d   : > { %13504 = sst [smem:[#allocation42_spill]] %s13503_s28  ;;  %p386_p8 = scmp.lt.s32.totalorder %s11525_s21, 3 }
  0x1e   : > { %13506 = sst [smem:[#allocation43_spill]] %s13505_s29  ;;  %p13485_p10 = scmp.eq.s32.totalorder %s11657_s22, 0 }
  0x1f   : > { %p11686_p11 = pnand %p7097_p7, %p386_p8  ;;  %s11527_s16 = smov [#allocation11]  }
  0x20   : > { %s415_s17 = sshll.u32 %s11527_s16, 4  ;;  %s11528_s23 = smov [#allocation14]   ;;  %s416_s17 = int_to_ptr.vmem [resolvable:$true] %s415_s17 }
  0x21   : > { %s13507_s30 = scalar_select %p11686_p11, 1, 0 }
  0x22   : > { %p10971_p12 = pneg %p11686_p11  ;;  %s440_s25 = sshll.u32 %s11528_s23, 4  ;;  %s11698_s25 = int_to_ptr.vmem [resolvable:$true] %s440_s25 }
  0x23   : > { %s11529_s27 = smov [#allocation17]   ;;  %s13509_s3 = sld [smem:[#allocation46_spill]] }
  0x24   : > { %p11694_p13 = pnand %p13485_p10, %p10971_p12  ;;  %s11700_s20 = sshll.u32 %s11529_s27, 4  ;;  %s462_s20 = int_to_ptr.vmem [resolvable:$true] %s11700_s20 }
  0x26   : > { %p11710_p1 = pneg %p11694_p13 }
  0x29   : > { %s11099_s16 = scalar_lea.hbm %s13509_s3, 16 }
  0x2a   : > { %p11100_p0 = scmp.ne.s32.totalorder %s13509_s3, %s11099_s16  ;;  %p11106_p4 = scmp.lt.u32.totalorder %s11099_s16, %s13509_s3 }
  0x2c   : > { %p11102_p2 = pnand %p11710_p1, %p11100_p0 }
  0x2e   : > { %p11103_p3 = pneg %p11102_p2 }
  0x30   : > { %p11108_p7 = pnand %p11106_p4, %p11103_p3 }
  0x32   : > { %11111 = shalt.err (!%p11108_p7)
}
  0x33   : > { %s11112_s24 = scalar_lea.vmem %s416_s17, 16  ;;  %s11119_s18 = scalar_lea.vmem %s416_s17, 32 }
  0x34   : > { %p11113_p8 = scmp.ne.s32.totalorder %s416_s17, %s11112_s24  ;;  %p11120_p10 = scmp.lt.s32.totalorder %s416_s17, %s416_s17 }
  0x35   : > { %p11121_p6 = scmp.lt.s32.totalorder %s11119_s18, %s11112_s24 }
  0x36   : > { %p11115_p12 = pnand %p11113_p8, %p11710_p1 }
  0x37   : > { %p11122_p5 = por %p11121_p6, %p11120_p10 }
  0x38   : > { %p11116_p9 = pneg %p11115_p12 }
  0x3a   : > { %p11123_p11 = pnand %p11122_p5, %p11116_p9 }
  0x3c   : > { %11126 = shalt.err (!%p11123_p11)
}
  0x3d   : > { %10977 = dma.hbm_to_vmem [thread:$0]  (!%p11694_p13), %s13509_s3, 16, %s416_s17, [#allocation12]  }
  0x3e   : > { %s13511_s6 = sld [smem:[#allocation48_spill]] }
  0x44   : > { %s11127_s27 = scalar_lea.hbm %s13511_s6, 16 }
  0x45   : > { %p11128_p0 = scmp.ne.s32.totalorder %s13511_s6, %s11127_s27  ;;  %p11134_p5 = scmp.lt.u32.totalorder %s11127_s27, %s13511_s6 }
  0x47   : > { %p11130_p2 = pnand %p11128_p0, %p11710_p1 }
  0x49   : > { %p11131_p6 = pneg %p11130_p2 }
  0x4b   : > { %p11136_p9 = pnand %p11134_p5, %p11131_p6 }
  0x4d   : > { %11139 = shalt.err (!%p11136_p9)
}
  0x4e   : > { %s11140_s17 = scalar_lea.vmem %s11698_s25, 16  ;;  %s11147_s5 = scalar_lea.vmem %s11698_s25, 32 }
  0x4f   : > { %p11141_p10 = scmp.ne.s32.totalorder %s11698_s25, %s11140_s17  ;;  %p11148_p4 = scmp.lt.s32.totalorder %s11698_s25, %s11698_s25 }
  0x50   : > { %p11149_p7 = scmp.lt.s32.totalorder %s11147_s5, %s11140_s17 }
  0x51   : > { %p11143_p11 = pnand %p11141_p10, %p11710_p1 }
  0x52   : > { %p11150_p8 = por %p11149_p7, %p11148_p4 }
  0x53   : > { %p11144_p3 = pneg %p11143_p11 }
  0x55   : > { %p11151_p12 = pnand %p11150_p8, %p11144_p3 }
  0x57   : > { %11154 = shalt.err (!%p11151_p12)
}
  0x58   : > { %10983 = dma.hbm_to_vmem [thread:$0]  (!%p11694_p13), %s13511_s6, 16, %s11698_s25, [#allocation15]  }
  0x59   : > { %s11155_s16 = scalar_lea.hbm %s13470_s8, 9216 }
  0x5a   : > { %p11156_p0 = scmp.ne.s32.totalorder %s13470_s8, %s11155_s16  ;;  %p11162_p5 = scmp.lt.u32.totalorder %s11155_s16, %s13470_s8 }
  0x5c   : > { %p11158_p2 = pnand %p11156_p0, %p11710_p1 }
  0x5e   : > { %p11159_p6 = pneg %p11158_p2 }
  0x60   : > { %p11164_p9 = pnand %p11162_p5, %p11159_p6 }
  0x62   : > { %11167 = shalt.err (!%p11164_p9)
}
  0x63   : > { %s11168_s5 = scalar_lea.vmem %s462_s20, 9216  ;;  %p11176_p4 = scmp.lt.s32.totalorder %s462_s20, %s462_s20 }
  0x64   : > { %p11169_p10 = scmp.ne.s32.totalorder %s462_s20, %s11168_s5  ;;  %p11177_p7 = scmp.lt.s32.totalorder %s11168_s5, %s11168_s5 }
  0x66   : > { %p11171_p11 = pnand %p11169_p10, %p11710_p1  ;;  %p11178_p8 = por %p11177_p7, %p11176_p4 }
  0x68   : > { %p11172_p3 = pneg %p11171_p11 }
  0x6a   : > { %p11179_p12 = pnand %p11178_p8, %p11172_p3 }
  0x6c   : > { %11182 = shalt.err (!%p11179_p12)
}
  0x6d   : > { %s11530_s25 = smov 128   ;;  %s11531_s28 = smov 8  }
  0x6e   : > { %10989 = dma.hbm_to_vmem [thread:$0]  (!%p11694_p13), %s13470_s8, 9216, %s462_s20, [#allocation18], %s11530_s25, %s11530_s25, %s11531_s28  }
  0x6f   : > { %s11532_s15 = smov [#allocation20]   ;;  %s11533_s27 = smov [#allocation23]  }
  0x70   : > { %s486_s16 = sshll.u32 %s11532_s15, 4  ;;  %s510_s24 = sshll.u32 %s11533_s27, 4  ;;  %s487_s16 = int_to_ptr.vmem [resolvable:$true] %s486_s16  ;;  %s511_s24 = int_to_ptr.vmem [resolvable:$true] %s510_s24 }
  0x71   : > { %s11183_s5 = scalar_lea.hbm %s13472_s10, 16 }
  0x72   : > { %p11184_p0 = scmp.ne.s32.totalorder %s13472_s10, %s11183_s5  ;;  %p11190_p5 = scmp.lt.u32.totalorder %s11183_s5, %s13472_s10 }
  0x74   : > { %p11186_p2 = pnand %p11184_p0, %p11710_p1 }
  0x76   : > { %p11187_p6 = pneg %p11186_p2 }
  0x78   : > { %p11192_p9 = pnand %p11190_p5, %p11187_p6 }
  0x7a   : > { %11195 = shalt.err (!%p11192_p9)
}
  0x7b   : > { %s11196_s20 = scalar_lea.vmem %s487_s16, 16  ;;  %s11203_s21 = scalar_lea.vmem %s487_s16, 32 }
  0x7c   : > { %p11197_p10 = scmp.ne.s32.totalorder %s487_s16, %s11196_s20  ;;  %p11204_p4 = scmp.lt.s32.totalorder %s487_s16, %s487_s16 }
  0x7d   : > { %p11205_p7 = scmp.lt.s32.totalorder %s11203_s21, %s11196_s20 }
  0x7e   : > { %p11199_p11 = pnand %p11197_p10, %p11710_p1 }
  0x7f   : > { %p11206_p8 = por %p11205_p7, %p11204_p4 }
  0x80   : > { %p11200_p3 = pneg %p11199_p11 }
  0x82   : > { %p11207_p12 = pnand %p11206_p8, %p11200_p3 }
  0x84   : > { %11210 = shalt.err (!%p11207_p12)
}
  0x85   : > { %10995 = dma.hbm_to_vmem [thread:$0]  (!%p11694_p13), %s13472_s10, 16, %s487_s16, [#allocation21]  }
  0x86   : > { %s11211_s29 = scalar_lea.hbm %s13474_s12, 16 }
  0x87   : > { %p11212_p0 = scmp.ne.s32.totalorder %s13474_s12, %s11211_s29  ;;  %p11218_p5 = scmp.lt.u32.totalorder %s11211_s29, %s13474_s12 }
  0x89   : > { %p11214_p2 = pnand %p11212_p0, %p11710_p1 }
  0x8b   : > { %p11215_p6 = pneg %p11214_p2 }
  0x8d   : > { %p11220_p9 = pnand %p11218_p5, %p11215_p6 }
  0x8f   : > { %11223 = shalt.err (!%p11220_p9)
}
  0x90   : > { %s11224_s5 = scalar_lea.vmem %s511_s24, 16  ;;  %s11231_s16 = scalar_lea.vmem %s511_s24, 32 }
  0x91   : > { %p11225_p10 = scmp.ne.s32.totalorder %s511_s24, %s11224_s5  ;;  %p11232_p4 = scmp.lt.s32.totalorder %s511_s24, %s511_s24 }
  0x92   : > { %p11233_p7 = scmp.lt.s32.totalorder %s11231_s16, %s11224_s5 }
  0x93   : > { %p11227_p11 = pnand %p11225_p10, %p11710_p1 }
  0x94   : > { %p11234_p8 = por %p11233_p7, %p11232_p4 }
  0x95   : > { %p11228_p3 = pneg %p11227_p11 }
  0x97   : > { %p11235_p12 = pnand %p11234_p8, %p11228_p3 }
  0x99   : > { %11238 = shalt.err (!%p11235_p12)
}
  0x9a   : > { %11001 = dma.hbm_to_vmem [thread:$0]  (!%p11694_p13), %s13474_s12, 16, %s511_s24, [#allocation24]  }
  0x9b   : > { %s11534_s3 = smov [#allocation8]   ;;  %s11535_s0 = smov [#allocation13]  }
  0x9c   : > { %s398_s6 = sshll.u32 %s11534_s3, 4  ;;  %s426_s2 = sshll.u32 %s11535_s0, 4  ;;  %s399_s6 = int_to_ptr.vmem [resolvable:$true] %s398_s6  ;;  %s427_s2 = int_to_ptr.vmem [resolvable:$true] %s426_s2 }
  0x9d   : > { %s11239_s27 = scalar_lea.hbm %s13463_s1, 1152 }
  0x9e   : > { %p11240_p0 = scmp.ne.s32.totalorder %s13463_s1, %s11239_s27  ;;  %p11246_p5 = scmp.lt.u32.totalorder %s11239_s27, %s13463_s1 }
  0xa0   : > { %p11242_p2 = pnand %p11240_p0, %p11710_p1 }
  0xa2   : > { %p11243_p6 = pneg %p11242_p2 }
  0xa4   : > { %p11248_p9 = pnand %p11246_p5, %p11243_p6 }
  0xa6   : > { %11251 = shalt.err (!%p11248_p9)
}
  0xa7   : > { %s11252_s24 = scalar_lea.vmem %s399_s6, 1152  ;;  %p11260_p4 = scmp.lt.s32.totalorder %s399_s6, %s399_s6 }
  0xa8   : > { %p11253_p10 = scmp.ne.s32.totalorder %s399_s6, %s11252_s24  ;;  %p11261_p7 = scmp.lt.s32.totalorder %s11252_s24, %s11252_s24 }
  0xaa   : > { %p11255_p11 = pnand %p11253_p10, %p11710_p1  ;;  %p11262_p8 = por %p11261_p7, %p11260_p4 }
  0xac   : > { %p11256_p3 = pneg %p11255_p11 }
  0xae   : > { %p11263_p12 = pnand %p11262_p8, %p11256_p3 }
  0xb0   : > { %11266 = shalt.err (!%p11263_p12)
}
  0xb1   : > { %10974 = dma.hbm_to_vmem [thread:$0]  (!%p11694_p13), %s13463_s1, 1152, %s399_s6, [#allocation9], %s11530_s25, %s11530_s25, %s11531_s28  }
  0xb2   : > { %s11267_s29 = scalar_lea.hbm %s13466_s4, 16 }
  0xb3   : > { %p11268_p0 = scmp.ne.s32.totalorder %s13466_s4, %s11267_s29  ;;  %p11274_p5 = scmp.lt.u32.totalorder %s11267_s29, %s13466_s4 }
  0xb5   : > { %p11270_p2 = pnand %p11268_p0, %p11710_p1 }
  0xb7   : > { %p11271_p6 = pneg %p11270_p2 }
  0xb9   : > { %p11276_p9 = pnand %p11274_p5, %p11271_p6 }
  0xbb   : > { %11279 = shalt.err (!%p11276_p9)
}
  0xbc   : > { %s11280_s5 = scalar_lea.vmem %s427_s2, 16  ;;  %s11287_s6 = scalar_lea.vmem %s427_s2, 32 }
  0xbd   : > { %p11281_p10 = scmp.ne.s32.totalorder %s427_s2, %s11280_s5  ;;  %p11288_p4 = scmp.lt.s32.totalorder %s427_s2, %s427_s2 }
  0xbe   : > { %p11289_p7 = scmp.lt.s32.totalorder %s11287_s6, %s11280_s5 }
  0xbf   : > { %p11283_p11 = pnand %p11281_p10, %p11710_p1 }
  0xc0   : > { %p11290_p8 = por %p11289_p7, %p11288_p4 }
  0xc1   : > { %p11284_p3 = pneg %p11283_p11 }
  0xc3   : > { %p11291_p12 = pnand %p11290_p8, %p11284_p3 }
  0xc5   : > { %11294 = shalt.err (!%p11291_p12)
}
  0xc6   : > { %10980 = dma.hbm_to_vmem [thread:$0]  (!%p11694_p13), %s13466_s4, 16, %s427_s2, [#allocation12]  }
  0xc7   : > { %s11536_s20 = smov [#allocation16]   ;;  %s11537_s3 = smov [#allocation19]  }
  0xc8   : > { %s451_s21 = sshll.u32 %s11536_s20, 4  ;;  %s475_s0 = sshll.u32 %s11537_s3, 4  ;;  %s452_s21 = int_to_ptr.vmem [resolvable:$true] %s451_s21  ;;  %s476_s0 = int_to_ptr.vmem [resolvable:$true] %s475_s0 }
  0xc9   : > { %s11295_s27 = scalar_lea.hbm %s13469_s7, 16 }
  0xca   : > { %p11296_p0 = scmp.ne.s32.totalorder %s13469_s7, %s11295_s27  ;;  %p11302_p5 = scmp.lt.u32.totalorder %s11295_s27, %s13469_s7 }
  0xcc   : > { %p11298_p2 = pnand %p11296_p0, %p11710_p1 }
  0xce   : > { %p11299_p6 = pneg %p11298_p2 }
  0xd0   : > { %p11304_p9 = pnand %p11302_p5, %p11299_p6 }
  0xd2   : > { %11307 = shalt.err (!%p11304_p9)
}
  0xd3   : > { %s11308_s2 = scalar_lea.vmem %s452_s21, 16  ;;  %s11315_s16 = scalar_lea.vmem %s452_s21, 32 }
  0xd4   : > { %p11309_p10 = scmp.ne.s32.totalorder %s452_s21, %s11308_s2  ;;  %p11316_p4 = scmp.lt.s32.totalorder %s452_s21, %s452_s21 }
  0xd5   : > { %p11317_p7 = scmp.lt.s32.totalorder %s11315_s16, %s11308_s2 }
  0xd6   : > { %p11311_p11 = pnand %p11309_p10, %p11710_p1 }
  0xd7   : > { %p11318_p8 = por %p11317_p7, %p11316_p4 }
  0xd8   : > { %p11312_p3 = pneg %p11311_p11 }
  0xda   : > { %p11319_p12 = pnand %p11318_p8, %p11312_p3 }
  0xdc   : > { %11322 = shalt.err (!%p11319_p12)
}
  0xdd   : > { %10986 = dma.hbm_to_vmem [thread:$0]  (!%p11694_p13), %s13469_s7, 16, %s452_s21, [#allocation15]  }
  0xde   : > { %s11323_s15 = scalar_lea.hbm %s13471_s9, 16 }
  0xdf   : > { %p11324_p0 = scmp.ne.s32.totalorder %s13471_s9, %s11323_s15  ;;  %p11330_p5 = scmp.lt.u32.totalorder %s11323_s15, %s13471_s9 }
  0xe1   : > { %p11326_p2 = pnand %p11324_p0, %p11710_p1 }
  0xe3   : > { %p11327_p6 = pneg %p11326_p2 }
  0xe5   : > { %p11332_p9 = pnand %p11330_p5, %p11327_p6 }
  0xe7   : > { %11335 = shalt.err (!%p11332_p9)
}
  0xe8   : > { %s11336_s6 = scalar_lea.vmem %s476_s0, 16  ;;  %s11343_s21 = scalar_lea.vmem %s476_s0, 32 }
  0xe9   : > { %p11337_p10 = scmp.ne.s32.totalorder %s476_s0, %s11336_s6  ;;  %p11344_p4 = scmp.lt.s32.totalorder %s476_s0, %s476_s0 }
  0xea   : > { %p11345_p7 = scmp.lt.s32.totalorder %s11343_s21, %s11336_s6 }
  0xeb   : > { %p11339_p11 = pnand %p11337_p10, %p11710_p1 }
  0xec   : > { %p11346_p8 = por %p11345_p7, %p11344_p4 }
  0xed   : > { %p11340_p3 = pneg %p11339_p11 }
  0xef   : > { %p11347_p12 = pnand %p11346_p8, %p11340_p3 }
  0xf1   : > { %11350 = shalt.err (!%p11347_p12)
}
  0xf2   : > { %10992 = dma.hbm_to_vmem [thread:$0]  (!%p11694_p13), %s13471_s9, 16, %s476_s0, [#allocation18]  }
  0xf3   : > { %s11538_s24 = smov [#allocation22]   ;;  %s11539_s3 = smov [#allocation25]  }
  0xf4   : > { %s496_s20 = sshll.u32 %s11538_s24, 4  ;;  %s520_s29 = sshll.u32 %s11539_s3, 4  ;;  %s497_s20 = int_to_ptr.vmem [resolvable:$true] %s496_s20  ;;  %s521_s29 = int_to_ptr.vmem [resolvable:$true] %s520_s29 }
  0xf5   : > { %s11351_s18 = scalar_lea.hbm %s13473_s11, 86016 }
  0xf6   : > { %p11352_p0 = scmp.ne.s32.totalorder %s13473_s11, %s11351_s18  ;;  %p11358_p5 = scmp.lt.u32.totalorder %s11351_s18, %s13473_s11 }
  0xf8   : > { %p11354_p2 = pnand %p11352_p0, %p11710_p1 }
  0xfa   : > { %p11355_p6 = pneg %p11354_p2 }
  0xfc   : > { %p11360_p9 = pnand %p11358_p5, %p11355_p6 }
  0xfe   : > { %11363 = shalt.err (!%p11360_p9)
}
  0xff   : > { %s11364_s0 = scalar_lea.vmem %s497_s20, 86016  ;;  %p11372_p4 = scmp.lt.s32.totalorder %s497_s20, %s497_s20 }
 0x100   : > { %p11365_p10 = scmp.ne.s32.totalorder %s497_s20, %s11364_s0  ;;  %p11373_p7 = scmp.lt.s32.totalorder %s11364_s0, %s11364_s0 }
 0x102   : > { %p11367_p11 = pnand %p11365_p10, %p11710_p1  ;;  %p11374_p8 = por %p11373_p7, %p11372_p4 }
 0x104   : > { %p11368_p3 = pneg %p11367_p11 }
 0x106   : > { %p11375_p12 = pnand %p11374_p8, %p11368_p3 }
 0x108   : > { %11378 = shalt.err (!%p11375_p12)
}
 0x109   : > { %10998 = dma.hbm_to_vmem [thread:$0]  (!%p11694_p13), %s13473_s11, 86016, %s497_s20, [#allocation21], %s11530_s25, %s11530_s25, %s11531_s28  }
 0x10a   : > { %s11379_s15 = scalar_lea.hbm %s13475_s13, 2048 }
 0x10b   : > { %p11380_p0 = scmp.ne.s32.totalorder %s13475_s13, %s11379_s15  ;;  %p11386_p5 = scmp.lt.u32.totalorder %s11379_s15, %s13475_s13 }
 0x10d   : > { %p11382_p2 = pnand %p11380_p0, %p11710_p1 }
 0x10f   : > { %p11383_p6 = pneg %p11382_p2 }
 0x111   : > { %p11388_p9 = pnand %p11386_p5, %p11383_p6 }
 0x113   : > { %11391 = shalt.err (!%p11388_p9)
}
 0x114   : > { %s11392_s6 = scalar_lea.vmem %s521_s29, 2048  ;;  %p11400_p4 = scmp.lt.s32.totalorder %s521_s29, %s521_s29 }
 0x115   : > { %p11393_p10 = scmp.ne.s32.totalorder %s521_s29, %s11392_s6  ;;  %p11401_p7 = scmp.lt.s32.totalorder %s11392_s6, %s11392_s6 }
 0x117   : > { %p11395_p11 = pnand %p11393_p10, %p11710_p1  ;;  %p11402_p8 = por %p11401_p7, %p11400_p4 }
 0x119   : > { %p11396_p3 = pneg %p11395_p11 }
 0x11b   : > { %p11403_p12 = pnand %p11402_p8, %p11396_p3 }
 0x11d   : > { %11406 = shalt.err (!%p11403_p12)
}
 0x11e   : > { %11004 = dma.hbm_to_vmem [thread:$0]  (!%p11694_p13), %s13475_s13, 2048, %s521_s29, [#allocation24], %s11530_s25, %s11530_s25, %s11531_s28  }
 0x11f   : > { %s11540_s0 = smov [#allocation26]   ;;  %s11407_s3 = scalar_lea.hbm %s13476_s14, 16 }
 0x120   : > { %s534_s2 = sshll.u32 %s11540_s0, 4  ;;  %p11408_p0 = scmp.ne.s32.totalorder %s13476_s14, %s11407_s3  ;;  %s535_s2 = int_to_ptr.vmem [resolvable:$true] %s534_s2 }
 0x121   : > { %p11414_p5 = scmp.lt.u32.totalorder %s11407_s3, %s13476_s14 }
 0x122   : > { %p11410_p2 = pnand %p11408_p0, %p11710_p1 }
 0x124   : > { %p11411_p6 = pneg %p11410_p2 }
 0x126   : > { %p11416_p9 = pnand %p11414_p5, %p11411_p6 }
 0x128   : > { %11419 = shalt.err (!%p11416_p9)
}
 0x129   : > { %s11420_s25 = scalar_lea.vmem %s535_s2, 16  ;;  %s11427_s28 = scalar_lea.vmem %s535_s2, 32 }
 0x12a   : > { %p11421_p10 = scmp.ne.s32.totalorder %s535_s2, %s11420_s25  ;;  %p11428_p4 = scmp.lt.s32.totalorder %s535_s2, %s535_s2 }
 0x12b   : > { %p11429_p7 = scmp.lt.s32.totalorder %s11427_s28, %s11420_s25 }
 0x12c   : > { %p11423_p11 = pnand %p11421_p10, %p11710_p1 }
 0x12d   : > { %p11430_p8 = por %p11429_p7, %p11428_p4 }
 0x12e   : > { %p11424_p3 = pneg %p11423_p11 }
 0x130   : > { %p11431_p12 = pnand %p11430_p8, %p11424_p3 }
 0x132   : > { %11434 = shalt.err (!%p11431_p12)
}
 0x133   : > { %11007 = dma.hbm_to_vmem [thread:$0]  (!%p11694_p13), %s13476_s14, 16, %s535_s2, [#allocation27]  }
 0x134   : > { %p13512_p0 = scmp.ne.s32.totalorder %s13507_s30, 0 }
 0x135   : > { %p13513_p2 = scmp.eq.s32.totalorder (!%p13512_p0), %s11657_s22, 0 }
 0x136   : > { %555 = sbr.rel (%p13512_p0) target bundleno = 2686 (0xa7e), region = 80 }
 0x13d   : > { %11480 = dma.done.wait (%p13513_p2), [#allocation9], 1152   ;;  %p13514_p1 = pmov %p13513_p2 }
 0x13f   : > { %11482 = vsyncadd (%p13514_p1), [#allocation9], 4294966144  ;;  %p13515_p6 = pmov %p13514_p1 }
 0x140   : > { %p13516_p5 = pmov %p13514_p1 }
 0x141   : > { %11484 = dma.done.wait (%p13515_p6), [#allocation12], 32  }
 0x142   : > { %11486 = vsyncadd (%p13516_p5), [#allocation12], 4294967264  ;;  %p13517_p9 = pmov %p13514_p1 }
 0x143   : > { %p13518_p13 = pmov %p13514_p1 }
 0x144   : > { %11488 = dma.done.wait (%p13517_p9), [#allocation15], 32  }
 0x145   : > { %11490 = vsyncadd (%p13518_p13), [#allocation15], 4294967264  ;;  %p13519_p10 = pmov %p13514_p1 }
 0x146   : > { %p13520_p11 = pmov %p13514_p1 }
 0x147   : > { %11492 = dma.done.wait (%p13519_p10), [#allocation18], 9232  }
 0x148   : > { %11494 = vsyncadd (%p13520_p11), [#allocation18], 4294958064  ;;  %p13521_p3 = pmov %p13514_p1 }
 0x149   : > { %p13522_p4 = pmov %p13514_p1 }
 0x14a   : > { %11496 = dma.done.wait (%p13521_p3), [#allocation21], 86032  }
 0x14b   : > { %11498 = vsyncadd (%p13522_p4), [#allocation21], 4294881264  ;;  %p13523_p7 = pmov %p13514_p1 }
 0x14c   : > { %p13524_p8 = pmov %p13514_p1 }
 0x14d   : > { %11500 = dma.done.wait (%p13523_p7), [#allocation24], 2064  }
 0x14e   : > { %11502 = vsyncadd (%p13524_p8), [#allocation24], 4294965232  ;;  %p13525_p12 = pmov %p13514_p1 }
 0x14f   : > { %p13526_p0 = pmov %p13514_p1 }
 0x150   : > { %11504 = dma.done.wait (%p13525_p12), [#allocation27], 16  }
 0x151   : > { %11506 = vsyncadd (%p13526_p0), [#allocation27], 4294967280  ;;  %s644_s30 = sand.u32 1, %s11517_s19   ;;  %p646_p2 = scmp.lt.s32.totalorder %s11657_s22, 1 }
 0x152   : > { %s13527_s21 = sld [smem:[#allocation44_spill]]  ;;  %s11983_s2 = scalar_lea.vmem [#allocation28], %s644_s30 }
 0x153   : > { %s647_s26 = scalar_select %p646_p2, %s11657_s22, 1 }
 0x154   : > { %p13528_p1 = scmp.ne.s32.totalorder %s11657_s22, 0 }
 0x155   : > { %s10920_s23 = smul.u32 96, %s647_s26  ;;  %vm655_vm0 = vcmask (!%p13528_p1), 261120   ;;  %vm657_vm1 = vcmask (!%p13528_p1), 254976   ;;  %vm661_vm2 = vcmask (!%p13528_p1), 523264   ;;  %v11541_v0 = vmov (!%p13528_p1), 0.0  }
 0x156   : > { %654 = sbr.rel (%p13528_p1) target bundleno = 349 (0x15d), region = 132  ;;  %656 = vst.msk [vmem:[#allocation2] sm:$0xff] (!%p13528_p1), %vm655_vm0, %v11541_v0  ;;  %659 = vst.msk [vmem:[#allocation2 + $0x52] sm:$0xff] (!%p13528_p1), %vm655_vm0, %v11541_v0  ;;  %vm663_vm3 = vcmask (!%p13528_p1), 517120  }
 0x157   : > { %658 = vst.msk [vmem:[#allocation2 + $0x8] sm:$0x3] (!%p13528_p1), %vm657_vm1, %v11541_v0  ;;  %660 = vst.msk [vmem:[#allocation2 + $0x5a] sm:$0x3] (!%p13528_p1), %vm657_vm1, %v11541_v0 }
 0x158   : > { %s11979_s0 = scalar_lea.vmem %s13527_s21, %s10920_s23  ;;  %662 = vst.msk [vmem:[#allocation3] sm:$0xff] (!%p13528_p1), %vm661_vm2, %v11541_v0  ;;  %665 = vst.msk [vmem:[#allocation3 + $0x52] sm:$0xff] (!%p13528_p1), %vm661_vm2, %v11541_v0 }
 0x159   : > { %664 = vst.msk [vmem:[#allocation3 + $0x8] sm:$0x3] (!%p13528_p1), %vm663_vm3, %v11541_v0  ;;  %666 = vst.msk [vmem:[#allocation3 + $0x5a] sm:$0x3] (!%p13528_p1), %vm663_vm3, %v11541_v0 }
 0x15d PF: > { %v800_v1 = vld [vmem:[%s11979_s0 + $0x9] sm:$0xff]  ;;  %v690_v2 = vld [vmem:[%s11979_s0 + $0x1] sm:$0xff]  ;;  %s11542_s16 = smov 24   ;;  %s11543_s24 = smov 8   ;;  %v11546_v6 = vmov 0.0|0.0   ;;  %vm680_vm4 = vcmask 64512  }
 0x15e   : > { %818 = vrot.lane.b32.xlu1 %v800_v1, %s11542_s16  ;;  %708 = vrot.lane.b32.xlu0 %v690_v2, %s11543_s24  ;;  %v855_v3 = vld [vmem:[%s11979_s0 + $0xa] sm:$0xff]  ;;  %v745_v4 = vld [vmem:[%s11979_s0 + $0x2] sm:$0xff]  ;;  %s11544_s3 = smov 32   ;;  %s11545_s15 = smov 16   ;;  %vm11549_vm5 = vmmov 0   ;;  %v11550_v16 = vmov 0.0  }
 0x15f   : > { %v910_v5 = vld [vmem:[%s11979_s0 + $0xb] sm:$0xff]  ;;  %9746 = vmatprep.subr.bf16.mxu0 %v11546_v6  ;;  %s11547_s27 = smov 40   ;;  %v671_v8 = vld [vmem:[%s11979_s0] sm:$0xff]  ;;  %s11548_s18 = smov 48   ;;  %v1020_v12 = vld [vmem:[%s11979_s0 + $0x13] sm:$0xff]  ;;  %8136 = vmatprep.mubr.msk.f32.mxu0 %vm11549_vm5, %v11550_v16  ;;  %v11553_v53 = vmov 0  }
 0x160   : > { %v965_v7 = vld [vmem:[%s11979_s0 + $0x12] sm:$0xff]  ;;  %681 = vst.msk [vmem:[#allocation5] sm:$0xff] %vm680_vm4, %v671_v8  ;;  %v672_v9 = vld [vmem:[%s11979_s0 + $0x8] sm:$0xff]  ;;  %s13529_s28 = sld [smem:[#allocation45_spill]]  ;;  %s11551_s25 = smov 56   ;;  %v966_v27 = vld [vmem:[%s11979_s0 + $0x1a] sm:$0xff]  ;;  %11097 = vset.pattern.permute.xlu0 %v11553_v53  ;;  %11098 = vset.pattern.permute.xlu1 %v11553_v53 }
 0x161   : > { %682 = vst.msk [vmem:[#allocation5 + $0x8] sm:$0xff] %vm680_vm4, %v672_v9  ;;  %v801_v13 = vld [vmem:[%s11979_s0 + $0x11] sm:$0xff]  ;;  %s11552_s26 = smov 64   ;;  %v1021_v30 = vld [vmem:[%s11979_s0 + $0x1b] sm:$0xff]  ;;  %v1022_v35 = vld [vmem:[%s11979_s0 + $0x23] sm:$0xff]  ;;  %vm735_vm6 = vcmask 130112  }
 0x162   : > { %873 = vrot.lane.b32.xlu1 %v855_v3, %s11544_s3  ;;  %763 = vrot.lane.b32.xlu0 %v745_v4, %s11545_s15  ;;  %v673_v21 = vld [vmem:[%s11979_s0 + $0x10] sm:$0xff]  ;;  %v674_v28 = vld [vmem:[%s11979_s0 + $0x18] sm:$0xff]  ;;  %vm790_vm7 = vcmask 195712   ;;  %vm845_vm8 = vcmask 261312   ;;  %vm900_vm9 = vcmask 326912   ;;  %vm955_vm10 = vcmask 392512  }
 0x163   : > { %v1075_v22 = vld [vmem:[%s11979_s0 + $0x14] sm:$0xff]  ;;  %683 = vst.msk [vmem:[#allocation5 + $0x10] sm:$0xff] %vm680_vm4, %v673_v21  ;;  %684 = vst.msk [vmem:[#allocation5 + $0x18] sm:$0xff] %vm680_vm4, %v674_v28  ;;  %v1076_v32 = vld [vmem:[%s11979_s0 + $0x1c] sm:$0xff]  ;;  %vm1010_vm11 = vcmask 458112   ;;  %vm1065_vm12 = vcmask 523712  }
 0x164   : > { %v802_v31 = vld [vmem:[%s11979_s0 + $0x19] sm:$0xff]  ;;  %v967_v33 = vld [vmem:[%s11979_s0 + $0x22] sm:$0xff]  ;;  %v968_v38 = vld [vmem:[%s11979_s0 + $0x2a] sm:$0xff]  ;;  %vm1120_vm13 = vcmask 589312   ;;  %vm1148_vm0 = vcmask 588800   ;;  %s11554_s23 = smov 96  }
 0x165   : > { %v675_v34 = vld [vmem:[%s11979_s0 + $0x20] sm:$0xff]  ;;  %v676_v39 = vld [vmem:[%s11979_s0 + $0x28] sm:$0xff]  ;;  %v969_v43 = vld [vmem:[%s11979_s0 + $0x32] sm:$0xff] }
 0x166   : > { %928 = vrot.lane.b32.xlu1 %v910_v5, %s11547_s27  ;;  %710 = vrot.lane.b32.xlu0 %v800_v1, %s11543_s24  ;;  %v1139_v10 = vld [vmem:[%s13529_s28] sm:$0xff]  ;;  %v1140_v11 = vld [vmem:[%s13529_s28 + $0x8] sm:$0xff]  ;;  %685 = vst.msk [vmem:[#allocation5 + $0x20] sm:$0xff] %vm680_vm4, %v675_v34  ;;  %686 = vst.msk [vmem:[#allocation5 + $0x28] sm:$0xff] %vm680_vm4, %v676_v39 }
 0x167   : > { %v9747_v14 = vpack.c.bf16 %v1140_v11, %v1139_v10  ;;  %v1141_v15 = vld [vmem:[%s13529_s28 + $0x10] sm:$0xff]  ;;  %v1142_v17 = vld [vmem:[%s13529_s28 + $0x18] sm:$0xff]  ;;  %v1143_v19 = vld [vmem:[%s13529_s28 + $0x20] sm:$0xff] }
 0x168   : > { %v9750_v18 = vpack.c.bf16 %v1142_v17, %v1141_v15  ;;  %v1144_v20 = vld [vmem:[%s13529_s28 + $0x28] sm:$0xff]  ;;  %v1145_v24 = vld [vmem:[%s13529_s28 + $0x30] sm:$0xff]  ;;  %v1146_v25 = vld [vmem:[%s13529_s28 + $0x38] sm:$0xff] }
 0x169   : > { %9748 = vmatpush3.bf16.msra.mxu0 %v9747_v14  ;;  %v9753_v23 = vpack.c.bf16 %v1144_v20, %v1143_v19  ;;  %v9756_v26 = vpack.c.bf16 %v1146_v25, %v1145_v24  ;;  %v1147_v29 = vld [vmem:[%s13529_s28 + $0x40] sm:$0xff]  ;;  %v1023_v40 = vld [vmem:[%s11979_s0 + $0x2b] sm:$0xff]  ;;  %v1024_v45 = vld [vmem:[%s11979_s0 + $0x33] sm:$0xff] }
 0x16a   : > { %983 = vrot.lane.b32.xlu1 %v965_v7, %s11548_s18  ;;  %765 = vrot.lane.b32.xlu0 %v855_v3, %s11545_s15  ;;  %v803_v36 = vld [vmem:[%s11979_s0 + $0x21] sm:$0xff]  ;;  %v804_v41 = vld [vmem:[%s11979_s0 + $0x29] sm:$0xff]  ;;  %v1320_v21 = vld [vmem:[#allocation8 + $0x10] sm:$0xff] }
 0x16b   : > { %9749 = vmatprep.subr.bf16.mxu0 %v11546_v6  ;;  %v1077_v37 = vld [vmem:[%s11979_s0 + $0x24] sm:$0xff]  ;;  %v1078_v42 = vld [vmem:[%s11979_s0 + $0x2c] sm:$0xff]  ;;  %v1079_v47 = vld [vmem:[%s11979_s0 + $0x34] sm:$0xff]  ;;  %vm1329_vm2 = vcmp.gt.f32.partialorder %v1320_v21, 0.5 }
 0x16c   : > { %v677_v44 = vld [vmem:[%s11979_s0 + $0x30] sm:$0xff]  ;;  %v970_v48 = vld [vmem:[%s11979_s0 + $0x3a] sm:$0xff]  ;;  %v971_v54 = vld [vmem:[%s11979_s0 + $0x42] sm:$0xff] }
 0x16d   : > { %9751 = vmatpush3.bf16.msra.mxu0 %v9750_v18  ;;  %687 = vst.msk [vmem:[#allocation5 + $0x30] sm:$0xff] %vm680_vm4, %v677_v44  ;;  %v805_v46 = vld [vmem:[%s11979_s0 + $0x31] sm:$0xff]  ;;  %v1025_v50 = vld [vmem:[%s11979_s0 + $0x3b] sm:$0xff]  ;;  %v1026_v56 = vld [vmem:[%s11979_s0 + $0x43] sm:$0xff] }
 0x16e   : > { %1038 = vrot.lane.b32.xlu1 %v1020_v12, %s11551_s25  ;;  %820 = vrot.lane.b32.xlu0 %v801_v13, %s11542_s16  ;;  %v678_v49 = vld [vmem:[%s11979_s0 + $0x38] sm:$0xff]  ;;  %v679_v55 = vld [vmem:[%s11979_s0 + $0x40] sm:$0xff]  ;;  %v1319_v14 = vld [vmem:[#allocation8 + $0x8] sm:$0xff] }
 0x16f   : > { %9752 = vmatprep.subr.bf16.mxu0 %v11546_v6  ;;  %688 = vst.msk [vmem:[#allocation5 + $0x38] sm:$0xff] %vm680_vm4, %v678_v49  ;;  %v806_v51 = vld [vmem:[%s11979_s0 + $0x39] sm:$0xff]  ;;  %689 = vst.msk [vmem:[#allocation5 + $0x40] sm:$0xff] %vm680_vm4, %v679_v55  ;;  %v807_v57 = vld [vmem:[%s11979_s0 + $0x41] sm:$0xff]  ;;  %vm1328_vm15 = vcmp.gt.f32.partialorder %v1319_v14, 0.5 }
 0x170   : > { %v1080_v52 = vld [vmem:[%s11979_s0 + $0x3c] sm:$0xff]  ;;  %v1081_v58 = vld [vmem:[%s11979_s0 + $0x44] sm:$0xff]  ;;  %v973_v10 = vld [vmem:[%s11979_s0 + $0x52] sm:$0xff] }
 0x171   : > { %9754 = vmatpush3.bf16.msra.mxu0 %v9753_v23  ;;  %v972_v63 = vld [vmem:[%s11979_s0 + $0x4a] sm:$0xff]  ;;  %v1028_v15 = vld [vmem:[%s11979_s0 + $0x53] sm:$0xff]  ;;  %v1321_v20 = vld [vmem:[#allocation8 + $0x18] sm:$0xff] }
 0x172   : > { %1093 = vrot.lane.b32.xlu1 %v1075_v22, %s11552_s26  ;;  %875 = vrot.lane.b32.xlu0 %v965_v7, %s11544_s3  ;;  %v1027_v2 = vld [vmem:[%s11979_s0 + $0x4b] sm:$0xff]  ;;  %v1083_v17 = vld [vmem:[%s11979_s0 + $0x54] sm:$0xff]  ;;  %vm1330_vm1 = vcmp.gt.f32.partialorder %v1321_v20, 0.5 }
 0x173   : > { %9755 = vmatprep.subr.bf16.mxu0 %v11546_v6  ;;  %v808_v3 = vld [vmem:[%s11979_s0 + $0x49] sm:$0xff]  ;;  %v1324_v34 = vld [vmem:[#allocation8 + $0x30] sm:$0xff] }
 0x174   : > { %v1322_v28 = vld [vmem:[#allocation8 + $0x20] sm:$0xff] }
 0x175   : > { %9757 = vmatpush3.bf16.msra.mxu0 %v9756_v26  ;;  %v12172_v26 = vsel %vm1328_vm15, 1, %v11553_v53  ;;  %vm1331_vm4 = vcmp.gt.f32.partialorder %v1322_v28, 0.5  ;;  %vm1333_vm15 = vcmp.gt.f32.partialorder %v1324_v34, 0.5  ;;  %v1326_v39 = vld [vmem:[#allocation8 + $0x40] sm:$0xff] }
 0x176   : > { %930 = vrot.lane.b32.xlu1 %v1020_v12, %s11547_s27  ;;  %712 = vrot.lane.b32.xlu0 %v801_v13, %s11543_s24  ;;  %v1318_v13 = vld [vmem:[#allocation8] sm:$0xff] }
 0x177   : > { %8134 = vmatprep.subr.mxu0 %v11550_v16  ;;  %vm1327_vm14 = vcmp.gt.f32.partialorder %v1318_v13, 0.5  ;;  %v1482_v34 = vld [vmem:[#allocation2 + $0x2] sm:$0xff] }
 0x178   : > { %v12169_v22 = vsel %vm1327_vm14, 1, %v11553_v53 }
 0x179   : > { %8135 = vmatpush3.msra.mxu0 %v1147_v29  ;;  %v12182_v29 = vsel %vm1330_vm1, 1, %v11553_v53  ;;  %vm1335_vm1 = vcmp.gt.f32.partialorder %v1326_v39, 0.5 }
 0x17a   : > { %985 = vrot.lane.b32.xlu1 %v966_v27, %s11548_s18  ;;  %767 = vrot.lane.b32.xlu0 %v965_v7, %s11545_s15  ;;  %v1082_v7 = vld [vmem:[%s11979_s0 + $0x4c] sm:$0xff] }
 0x17b   : > { %9790 = vmatprep.subr.bf16.mxu0 %v11546_v6 }
 0x17e   : > { %1040 = vrot.lane.b32.xlu1 %v1021_v30, %s11551_s25  ;;  %822 = vrot.lane.b32.xlu0 %v802_v31, %s11542_s16 }
 0x182   : > { %1095 = vrot.lane.b32.xlu1 %v1076_v32, %s11552_s26  ;;  %877 = vrot.lane.b32.xlu0 %v966_v27, %s11544_s3  ;;  %v12185_v32 = vsel %vm1329_vm2, 1, %v11553_v53 }
 0x186   : > { %932 = vrot.lane.b32.xlu1 %v1021_v30, %s11547_s27  ;;  %714 = vrot.lane.b32.xlu0 %v802_v31, %s11543_s24 }
 0x18a   : > { %987 = vrot.lane.b32.xlu1 %v967_v33, %s11548_s18  ;;  %769 = vrot.lane.b32.xlu0 %v966_v27, %s11545_s15  ;;  %v1323_v27 = vld [vmem:[#allocation8 + $0x28] sm:$0xff] }
 0x18b   : > { %vm1332_vm3 = vcmp.gt.f32.partialorder %v1323_v27, 0.5 }
 0x18e   : > { %1042 = vrot.lane.b32.xlu1 %v1022_v35, %s11551_s25  ;;  %824 = vrot.lane.b32.xlu0 %v803_v36, %s11542_s16 }
 0x192   : > { %1097 = vrot.lane.b32.xlu1 %v1077_v37, %s11552_s26  ;;  %879 = vrot.lane.b32.xlu0 %v967_v33, %s11544_s3 }
 0x196   : > { %934 = vrot.lane.b32.xlu1 %v1022_v35, %s11547_s27  ;;  %716 = vrot.lane.b32.xlu0 %v803_v36, %s11543_s24  ;;  %v12192_v35 = vsel %vm1332_vm3, 1, %v11553_v53 }
 0x19a   : > { %989 = vrot.lane.b32.xlu1 %v968_v38, %s11548_s18  ;;  %771 = vrot.lane.b32.xlu0 %v967_v33, %s11545_s15  ;;  %v1325_v33 = vld [vmem:[#allocation8 + $0x38] sm:$0xff] }
 0x19b   : > { %vm1334_vm14 = vcmp.gt.f32.partialorder %v1325_v33, 0.5 }
 0x19e   : > { %1044 = vrot.lane.b32.xlu1 %v1023_v40, %s11551_s25  ;;  %826 = vrot.lane.b32.xlu0 %v804_v41, %s11542_s16 }
 0x1a2   : > { %1099 = vrot.lane.b32.xlu1 %v1078_v42, %s11552_s26  ;;  %881 = vrot.lane.b32.xlu0 %v968_v38, %s11544_s3 }
 0x1a6   : > { %936 = vrot.lane.b32.xlu1 %v1023_v40, %s11547_s27  ;;  %718 = vrot.lane.b32.xlu0 %v804_v41, %s11543_s24  ;;  %v12202_v40 = vsel %vm1334_vm14, 1, %v11553_v53  ;;  %vm1582_vm14 = vcmask 1048320  }
 0x1aa   : > { %991 = vrot.lane.b32.xlu1 %v969_v43, %s11548_s18  ;;  %773 = vrot.lane.b32.xlu0 %v968_v38, %s11545_s15  ;;  %v12195_v38 = vsel %vm1331_vm4, 1, %v11553_v53 }
 0x1ae   : > { %1046 = vrot.lane.b32.xlu1 %v1024_v45, %s11551_s25  ;;  %828 = vrot.lane.b32.xlu0 %v805_v46, %s11542_s16 }
 0x1b2   : > { %1101 = vrot.lane.b32.xlu1 %v1079_v47, %s11552_s26  ;;  %883 = vrot.lane.b32.xlu0 %v969_v43, %s11544_s3  ;;  %v12212_v47 = vsel %vm1335_vm1, 1, %v11553_v53  ;;  %vm2286_vm1 = vcmask 1048064  }
 0x1b6   : > { %938 = vrot.lane.b32.xlu1 %v1024_v45, %s11547_s27  ;;  %720 = vrot.lane.b32.xlu0 %v805_v46, %s11543_s24 }
 0x1ba   : > { %993 = vrot.lane.b32.xlu1 %v970_v48, %s11548_s18  ;;  %775 = vrot.lane.b32.xlu0 %v969_v43, %s11545_s15  ;;  %v12205_v43 = vsel %vm1333_vm15, 1, %v11553_v53  ;;  %vm2213_vm15 = vcmask 523264  }
 0x1be   : > { %1048 = vrot.lane.b32.xlu1 %v1025_v50, %s11551_s25  ;;  %830 = vrot.lane.b32.xlu0 %v806_v51, %s11542_s16 }
 0x1c2   : > { %1103 = vrot.lane.b32.xlu1 %v1080_v52, %s11552_s26  ;;  %885 = vrot.lane.b32.xlu0 %v970_v48, %s11544_s3 }
 0x1c6   : > { %940 = vrot.lane.b32.xlu1 %v1025_v50, %s11547_s27  ;;  %722 = vrot.lane.b32.xlu0 %v806_v51, %s11543_s24 }
 0x1ca   : > { %995 = vrot.lane.b32.xlu1 %v971_v54, %s11548_s18  ;;  %777 = vrot.lane.b32.xlu0 %v970_v48, %s11545_s15 }
 0x1ce   : > { %1050 = vrot.lane.b32.xlu1 %v1026_v56, %s11551_s25  ;;  %832 = vrot.lane.b32.xlu0 %v807_v57, %s11542_s16 }
 0x1d0   : > { %v819_v59 = vpop.permute.xlu1 %818  ;;  %v709_v60 = vpop.permute.xlu0 %708 }
 0x1d1   : > { %736 = vst.msk [vmem:[#allocation5] sm:$0xff] %vm735_vm6, %v709_v60 }
 0x1d2   : > { %1105 = vrot.lane.b32.xlu1 %v1081_v58, %s11552_s26  ;;  %887 = vrot.lane.b32.xlu0 %v971_v54, %s11544_s3 }
 0x1d4   : > { %v874_v61 = vpop.permute.xlu1 %873  ;;  %v764_v62 = vpop.permute.xlu0 %763 }
 0x1d5   : > { %791 = vst.msk [vmem:[#allocation5] sm:$0xff] %vm790_vm7, %v764_v62 }
 0x1d6   : > { %846 = vst.msk [vmem:[#allocation5] sm:$0xff] %vm845_vm8, %v819_v59  ;;  %942 = vrot.lane.b32.xlu1 %v1026_v56, %s11547_s27  ;;  %724 = vrot.lane.b32.xlu0 %v807_v57, %s11543_s24  ;;  %s13530_s24 = sld [smem:[#allocation47_spill]] }
 0x1d7   : > { %901 = vst.msk [vmem:[#allocation5] sm:$0xff] %vm900_vm9, %v874_v61 }
 0x1d8   : > { %v929_v0 = vpop.permute.xlu1 %928  ;;  %v711_v1 = vpop.permute.xlu0 %710 }
 0x1d9   : > { %956 = vst.msk [vmem:[#allocation5] sm:$0xff] %vm955_vm10, %v929_v0 }
 0x1da   : > { %737 = vst.msk [vmem:[#allocation5 + $0x8] sm:$0xff] %vm735_vm6, %v711_v1  ;;  %997 = vrot.lane.b32.xlu1 %v972_v63, %s11548_s18  ;;  %779 = vrot.lane.b32.xlu0 %v971_v54, %s11545_s15 }
 0x1dc   : > { %v984_v4 = vpop.permute.xlu1 %983  ;;  %v766_v5 = vpop.permute.xlu0 %765 }
 0x1dd   : > { %1011 = vst.msk [vmem:[#allocation5] sm:$0xff] %vm1010_vm11, %v984_v4 }
 0x1de   : > { %792 = vst.msk [vmem:[#allocation5 + $0x8] sm:$0xff] %vm790_vm7, %v766_v5  ;;  %1052 = vrot.lane.b32.xlu1 %v1027_v2, %s11551_s25  ;;  %834 = vrot.lane.b32.xlu0 %v808_v3, %s11542_s16  ;;  %s13532_s16 = sld [smem:[#allocation49_spill]] }
 0x1e0   : > { %v1039_v8 = vpop.permute.xlu1 %1038  ;;  %v821_v9 = vpop.permute.xlu0 %820 }
 0x1e1   : > { %1066 = vst.msk [vmem:[#allocation5] sm:$0xff] %vm1065_vm12, %v1039_v8 }
 0x1e2   : > { %847 = vst.msk [vmem:[#allocation5 + $0x8] sm:$0xff] %vm845_vm8, %v821_v9  ;;  %1107 = vrot.lane.b32.xlu1 %v1082_v7, %s11552_s26  ;;  %889 = vrot.lane.b32.xlu0 %v972_v63, %s11544_s3 }
 0x1e4   : > { %v1094_v11 = vpop.permute.xlu1 %1093  ;;  %v876_v12 = vpop.permute.xlu0 %875 }
 0x1e5   : > { %1121 = vst.msk [vmem:[#allocation5] sm:$0xff] %vm1120_vm13, %v1094_v11 }
 0x1e6   : > { %902 = vst.msk [vmem:[#allocation5 + $0x8] sm:$0xff] %vm900_vm9, %v876_v12  ;;  %944 = vrot.lane.b32.xlu0 %v1027_v2, %s11547_s27  ;;  %999 = vrot.lane.b32.xlu1 %v973_v10, %s11548_s18  ;;  %s6912_s27 = scalar_lea.sflag [#allocation10], %s644_s30 }
 0x1e8   : > { %v931_v18 = vpop.permute.xlu1 %930  ;;  %v713_v19 = vpop.permute.xlu0 %712 }
 0x1e9   : > { %957 = vst.msk [vmem:[#allocation5 + $0x8] sm:$0xff] %vm955_vm10, %v931_v18 }
 0x1ea   : > { %738 = vst.msk [vmem:[#allocation5 + $0x10] sm:$0xff] %vm735_vm6, %v713_v19  ;;  %1054 = vrot.lane.b32.xlu0 %v1028_v15, %s11551_s25  ;;  %1109 = vrot.lane.b32.xlu1 %v1083_v17, %s11552_s26 }
 0x1ec   : > { %v986_v23 = vpop.permute.xlu1 %985  ;;  %v768_v24 = vpop.permute.xlu0 %767  ;;  %v1130_v25 = vld [vmem:[#allocation5] sm:$0xff] }
 0x1ed   : > { %1012 = vst.msk [vmem:[#allocation5 + $0x8] sm:$0xff] %vm1010_vm11, %v986_v23  ;;  %8137 = vmatmul.mubr.msk.f32.vlgmr.msra.gmra.mrb[0].mxu0 %vm1148_vm0, %v1130_v25 }
 0x1ee   : > { %793 = vst.msk [vmem:[#allocation5 + $0x10] sm:$0xff] %vm790_vm7, %v768_v24  ;;  %8139 = vmatprep.mubr.msk.f32.mxu0 %vm11549_vm5, %v11550_v16  ;;  %1355 = vperm.xlu0 %11097, %v12169_v22  }
 0x1ef   : > { %1358 = vperm.xlu1 %11098, %v12172_v26  }
 0x1f0   : > { %v1041_v30 = vpop.permute.xlu1 %1040  ;;  %v823_v31 = vpop.permute.xlu0 %822 }
 0x1f1   : > { %1067 = vst.msk [vmem:[#allocation5 + $0x8] sm:$0xff] %vm1065_vm12, %v1041_v30  ;;  %v1427_v30 = vld [vmem:[#allocation2 + $0x1] sm:$0xff] }
 0x1f2   : > { %848 = vst.msk [vmem:[#allocation5 + $0x10] sm:$0xff] %vm845_vm8, %v823_v31  ;;  %1364 = vperm.xlu0 %11097, %v12182_v29  }
 0x1f3   : > { %1361 = vperm.xlu1 %11098, %v12185_v32  }
 0x1f4   : > { %v1096_v36 = vpop.permute.xlu1 %1095  ;;  %v878_v37 = vpop.permute.xlu0 %877 }
 0x1f5   : > { %1122 = vst.msk [vmem:[#allocation5 + $0x8] sm:$0xff] %vm1120_vm13, %v1096_v36 }
 0x1f6   : > { %903 = vst.msk [vmem:[#allocation5 + $0x10] sm:$0xff] %vm900_vm9, %v878_v37  ;;  %1370 = vperm.xlu0 %11097, %v12192_v35  }
 0x1f7   : > { %1367 = vperm.xlu1 %11098, %v12195_v38  }
 0x1f8   : > { %v933_v41 = vpop.permute.xlu1 %932  ;;  %v715_v42 = vpop.permute.xlu0 %714 }
 0x1f9   : > { %958 = vst.msk [vmem:[#allocation5 + $0x10] sm:$0xff] %vm955_vm10, %v933_v41 }
 0x1fa   : > { %739 = vst.msk [vmem:[#allocation5 + $0x18] sm:$0xff] %vm735_vm6, %v715_v42  ;;  %1376 = vperm.xlu0 %11097, %v12202_v40  }
 0x1fb   : > { %1373 = vperm.xlu1 %11098, %v12205_v43  }
 0x1fc   : > { %v988_v44 = vpop.permute.xlu1 %987  ;;  %v770_v45 = vpop.permute.xlu0 %769  ;;  %v1131_v46 = vld [vmem:[#allocation5 + $0x8] sm:$0xff] }
 0x1fd   : > { %1013 = vst.msk [vmem:[#allocation5 + $0x10] sm:$0xff] %vm1010_vm11, %v988_v44  ;;  %8140 = vmatmul.mubr.msk.f32.gmra.mrb[2].mxu0 %vm1148_vm0, %v1131_v46 }
 0x1fe   : > { %794 = vst.msk [vmem:[#allocation5 + $0x18] sm:$0xff] %vm790_vm7, %v770_v45  ;;  %8142 = vmatprep.mubr.msk.f32.mxu0 %vm11549_vm5, %v11550_v16 }
 0x1ff   : > { %1379 = vperm.xlu1 %11098, %v12212_v47  }
 0x200   : > { %v1043_v48 = vpop.permute.xlu1 %1042  ;;  %v825_v49 = vpop.permute.xlu0 %824 }
 0x201   : > { %1068 = vst.msk [vmem:[#allocation5 + $0x10] sm:$0xff] %vm1065_vm12, %v1043_v48 }
 0x202   : > { %849 = vst.msk [vmem:[#allocation5 + $0x18] sm:$0xff] %vm845_vm8, %v825_v49  ;;  %v1672_v49 = vld [vmem:[#allocation2 + $0x52] sm:$0xff] }
 0x203   : > { %1445 = vrot.lane.b32.xlu1 %v1427_v30, %s11544_s3  ;;  %1698 = vrot.lane.b32.xlu0 %v1672_v49, %s11552_s26 }
 0x204   : > { %v1098_v50 = vpop.permute.xlu1 %1097  ;;  %v880_v51 = vpop.permute.xlu0 %879 }
 0x205   : > { %1123 = vst.msk [vmem:[#allocation5 + $0x10] sm:$0xff] %vm1120_vm13, %v1098_v50 }
 0x206   : > { %904 = vst.msk [vmem:[#allocation5 + $0x18] sm:$0xff] %vm900_vm9, %v880_v51 }
 0x207   : > { %1500 = vrot.lane.b32.xlu1 %v1482_v34, %s11552_s26  ;;  %v1820_v34 = vld [vmem:[%s13530_s24 + $0x18] sm:$0xff] }
 0x208   : > { %v935_v52 = vpop.permute.xlu1 %934  ;;  %v717_v54 = vpop.permute.xlu0 %716 }
 0x209   : > { %959 = vst.msk [vmem:[#allocation5 + $0x18] sm:$0xff] %vm955_vm10, %v935_v52 }
 0x20a   : > { %740 = vst.msk [vmem:[#allocation5 + $0x20] sm:$0xff] %vm735_vm6, %v717_v54 }
 0x20c   : > { %v990_v55 = vpop.permute.xlu1 %989  ;;  %v772_v56 = vpop.permute.xlu0 %771  ;;  %v1132_v57 = vld [vmem:[#allocation5 + $0x10] sm:$0xff] }
 0x20d   : > { %1014 = vst.msk [vmem:[#allocation5 + $0x18] sm:$0xff] %vm1010_vm11, %v990_v55  ;;  %8143 = vmatmul.mubr.msk.f32.gmra.mrb[4].mxu0 %vm1148_vm0, %v1132_v57  ;;  %v1849_v55 = vld [vmem:[%s13530_s24 + $0x100] sm:$0xff] }
 0x20e   : > { %795 = vst.msk [vmem:[#allocation5 + $0x20] sm:$0xff] %vm790_vm7, %v772_v56  ;;  %8145 = vmatprep.mubr.msk.f32.mxu0 %vm11549_vm5, %v11550_v16  ;;  %v1850_v56 = vld [vmem:[%s13530_s24 + $0x108] sm:$0xff] }
 0x20f   : > { %v9791_v57 = vpack.c.bf16 %v1850_v56, %v1849_v55  ;;  %v1823_v56 = vld [vmem:[%s13530_s24 + $0x30] sm:$0xff] }
 0x210   : > { %v1045_v58 = vpop.permute.xlu1 %1044  ;;  %v827_v59 = vpop.permute.xlu0 %826 }
 0x211   : > { %1069 = vst.msk [vmem:[#allocation5 + $0x18] sm:$0xff] %vm1065_vm12, %v1045_v58  ;;  %9792 = vmatpush3.bf16.msra.mxu0 %v9791_v57  ;;  %v1851_v58 = vld [vmem:[%s13530_s24 + $0x110] sm:$0xff]  ;;  %v1824_v57 = vld [vmem:[%s13530_s24 + $0x38] sm:$0xff] }
 0x212   : > { %850 = vst.msk [vmem:[#allocation5 + $0x20] sm:$0xff] %vm845_vm8, %v827_v59  ;;  %9793 = vmatprep.subr.bf16.mxu0 %v11546_v6  ;;  %v1852_v59 = vld [vmem:[%s13530_s24 + $0x118] sm:$0xff] }
 0x214   : > { %v1100_v60 = vpop.permute.xlu1 %1099  ;;  %v882_v61 = vpop.permute.xlu0 %881 }
 0x215   : > { %1124 = vst.msk [vmem:[#allocation5 + $0x18] sm:$0xff] %vm1120_vm13, %v1100_v60  ;;  %v9794_v60 = vpack.c.bf16 %v1852_v59, %v1851_v58  ;;  %v9772_v58 = vpack.c.bf16 %v1824_v57, %v1823_v56  ;;  %v1841_v59 = vld [vmem:[%s13530_s24 + $0xc0] sm:$0xff] }
 0x216   : > { %905 = vst.msk [vmem:[#allocation5 + $0x20] sm:$0xff] %vm900_vm9, %v882_v61 }
 0x217   : > { %9795 = vmatpush3.bf16.msra.mxu0 %v9794_v60  ;;  %v1842_v60 = vld [vmem:[%s13530_s24 + $0xc8] sm:$0xff] }
 0x218   : > { %v937_v62 = vpop.permute.xlu1 %936  ;;  %v719_v63 = vpop.permute.xlu0 %718 }
 0x219   : > { %960 = vst.msk [vmem:[#allocation5 + $0x20] sm:$0xff] %vm955_vm10, %v937_v62 }
 0x21a   : > { %741 = vst.msk [vmem:[#allocation5 + $0x28] sm:$0xff] %vm735_vm6, %v719_v63 }
 0x21c   : > { %v992_v0 = vpop.permute.xlu1 %991  ;;  %v774_v1 = vpop.permute.xlu0 %773  ;;  %v1133_v2 = vld [vmem:[#allocation5 + $0x18] sm:$0xff] }
 0x21d   : > { %1015 = vst.msk [vmem:[#allocation5 + $0x20] sm:$0xff] %vm1010_vm11, %v992_v0  ;;  %8146 = vmatmul.mubr.msk.f32.gmra.mrb[6].mxu0 %vm1148_vm0, %v1133_v2 }
 0x21e   : > { %796 = vst.msk [vmem:[#allocation5 + $0x28] sm:$0xff] %vm790_vm7, %v774_v1  ;;  %8148 = vmatprep.mubr.msk.f32.mxu0 %vm11549_vm5, %v11550_v16 }
 0x220   : > { %v1047_v3 = vpop.permute.xlu1 %1046  ;;  %v829_v4 = vpop.permute.xlu0 %828 }
 0x221   : > { %1070 = vst.msk [vmem:[#allocation5 + $0x20] sm:$0xff] %vm1065_vm12, %v1047_v3  ;;  %v12315_v3 = vld [vmem:[#allocation11] ss:$0 sm:$0xff] }
 0x222   : > { %851 = vst.msk [vmem:[#allocation5 + $0x28] sm:$0xff] %vm845_vm8, %v829_v4 }
 0x224   : > { %v1102_v5 = vpop.permute.xlu1 %1101  ;;  %v884_v7 = vpop.permute.xlu0 %883 }
 0x225   : > { %1125 = vst.msk [vmem:[#allocation5 + $0x20] sm:$0xff] %vm1120_vm13, %v1102_v5  ;;  %v12317_v5 = vld [vmem:[#allocation13] ss:$0 sm:$0xff] }
 0x226   : > { %906 = vst.msk [vmem:[#allocation5 + $0x28] sm:$0xff] %vm900_vm9, %v884_v7  ;;  %v1409_v7 = vld [vmem:[#allocation2] sm:$0xff] }
 0x228   : > { %v939_v8 = vpop.permute.xlu1 %938  ;;  %v721_v9 = vpop.permute.xlu0 %720 }
 0x229   : > { %961 = vst.msk [vmem:[#allocation5 + $0x28] sm:$0xff] %vm955_vm10, %v939_v8 }
 0x22a   : > { %742 = vst.msk [vmem:[#allocation5 + $0x30] sm:$0xff] %vm735_vm6, %v721_v9 }
 0x22c   : > { %v994_v10 = vpop.permute.xlu1 %993  ;;  %v776_v11 = vpop.permute.xlu0 %775  ;;  %v1134_v12 = vld [vmem:[#allocation5 + $0x20] sm:$0xff] }
 0x22d   : > { %1016 = vst.msk [vmem:[#allocation5 + $0x28] sm:$0xff] %vm1010_vm11, %v994_v10  ;;  %8149 = vmatmul.mubr.msk.f32.gmra.mrb[8].mxu0 %vm1148_vm0, %v1134_v12 }
 0x22e   : > { %797 = vst.msk [vmem:[#allocation5 + $0x30] sm:$0xff] %vm790_vm7, %v776_v11  ;;  %8151 = vmatprep.mubr.msk.f32.mxu0 %vm11549_vm5, %v11550_v16 }
 0x230   : > { %v1049_v13 = vpop.permute.xlu1 %1048  ;;  %v831_v14 = vpop.permute.xlu0 %830 }
 0x231   : > { %1071 = vst.msk [vmem:[#allocation5 + $0x28] sm:$0xff] %vm1065_vm12, %v1049_v13 }
 0x232   : > { %852 = vst.msk [vmem:[#allocation5 + $0x30] sm:$0xff] %vm845_vm8, %v831_v14 }
 0x234   : > { %v1104_v15 = vpop.permute.xlu1 %1103  ;;  %v886_v17 = vpop.permute.xlu0 %885 }
 0x235   : > { %1126 = vst.msk [vmem:[#allocation5 + $0x28] sm:$0xff] %vm1120_vm13, %v1104_v15  ;;  %v1833_v15 = vld [vmem:[%s13530_s24 + $0x80] sm:$0xff] }
 0x236   : > { %907 = vst.msk [vmem:[#allocation5 + $0x30] sm:$0xff] %vm900_vm9, %v886_v17  ;;  %v1834_v17 = vld [vmem:[%s13530_s24 + $0x88] sm:$0xff] }
 0x238   : > { %v941_v18 = vpop.permute.xlu1 %940  ;;  %v723_v19 = vpop.permute.xlu0 %722 }
 0x239   : > { %962 = vst.msk [vmem:[#allocation5 + $0x30] sm:$0xff] %vm955_vm10, %v941_v18  ;;  %v9758_v18 = vpack.c.bf16 %v1834_v17, %v1833_v15  ;;  %v1827_v17 = vld [vmem:[%s13530_s24 + $0x50] sm:$0xff] }
 0x23a   : > { %743 = vst.msk [vmem:[#allocation5 + $0x38] sm:$0xff] %vm735_vm6, %v723_v19  ;;  %v1817_v19 = vld [vmem:[%s13530_s24] sm:$0xff] }
 0x23b   : > { %9759 = vmatprep.subr.bf16.mxu1 %v9758_v18  ;;  %v1828_v18 = vld [vmem:[%s13530_s24 + $0x58] sm:$0xff] }
 0x23c   : > { %v996_v20 = vpop.permute.xlu1 %995  ;;  %v778_v21 = vpop.permute.xlu0 %777  ;;  %v1135_v23 = vld [vmem:[#allocation5 + $0x28] sm:$0xff] }
 0x23d   : > { %1017 = vst.msk [vmem:[#allocation5 + $0x30] sm:$0xff] %vm1010_vm11, %v996_v20  ;;  %8152 = vmatmul.mubr.msk.f32.gmra.mrb[10].mxu0 %vm1148_vm0, %v1135_v23  ;;  %v1818_v20 = vld [vmem:[%s13530_s24 + $0x8] sm:$0xff]  ;;  %v1835_v23 = vld [vmem:[%s13530_s24 + $0x90] sm:$0xff] }
 0x23e   : > { %798 = vst.msk [vmem:[#allocation5 + $0x38] sm:$0xff] %vm790_vm7, %v778_v21  ;;  %8154 = vmatprep.mubr.msk.f32.mxu0 %vm11549_vm5, %v11550_v16  ;;  %v9760_v21 = vpack.c.bf16 %v1818_v20, %v1817_v19 }
 0x240   : > { %v1051_v24 = vpop.permute.xlu1 %1050  ;;  %v833_v25 = vpop.permute.xlu0 %832  ;;  %9761 = vmatpush3.bf16.msra.mxu1 %v9760_v21  ;;  %v9780_v21 = vpack.c.bf16 %v1828_v18, %v1827_v17 }
 0x241   : > { %1072 = vst.msk [vmem:[#allocation5 + $0x30] sm:$0xff] %vm1065_vm12, %v1051_v24  ;;  %v1836_v24 = vld [vmem:[%s13530_s24 + $0x98] sm:$0xff] }
 0x242   : > { %853 = vst.msk [vmem:[#allocation5 + $0x38] sm:$0xff] %vm845_vm8, %v833_v25  ;;  %v9762_v25 = vpack.c.bf16 %v1836_v24, %v1835_v23  ;;  %v1845_v23 = vld [vmem:[%s13530_s24 + $0xe0] sm:$0xff]  ;;  %v1846_v24 = vld [vmem:[%s13530_s24 + $0xe8] sm:$0xff] }
 0x244   : > { %v1106_v27 = vpop.permute.xlu1 %1105  ;;  %v888_v28 = vpop.permute.xlu0 %887  ;;  %9763 = vmatprep.subr.bf16.mxu1 %v9762_v25 }
 0x245   : > { %1127 = vst.msk [vmem:[#allocation5 + $0x30] sm:$0xff] %vm1120_vm13, %v1106_v27 }
 0x246   : > { %908 = vst.msk [vmem:[#allocation5 + $0x38] sm:$0xff] %vm900_vm9, %v888_v28 }
 0x248   : > { %v943_v31 = vpop.permute.xlu1 %942  ;;  %v725_v33 = vpop.permute.xlu0 %724 }
 0x249   : > { %963 = vst.msk [vmem:[#allocation5 + $0x38] sm:$0xff] %vm955_vm10, %v943_v31 }
 0x24a   : > { %744 = vst.msk [vmem:[#allocation5 + $0x40] sm:$0xff] %vm735_vm6, %v725_v33  ;;  %vm1399_vm6 = vcmask 261120   ;;  %v1819_v33 = vld [vmem:[%s13530_s24 + $0x10] sm:$0xff] }
 0x24b   : > { %1418 = vst.msk [vmem:[#allocation6] sm:$0xff] %vm1399_vm6, %v1409_v7 }
 0x24c   : > { %v998_v36 = vpop.permute.xlu1 %997  ;;  %v780_v37 = vpop.permute.xlu0 %779  ;;  %v1136_v39 = vld [vmem:[#allocation5 + $0x30] sm:$0xff] }
 0x24d   : > { %1018 = vst.msk [vmem:[#allocation5 + $0x38] sm:$0xff] %vm1010_vm11, %v998_v36  ;;  %8155 = vmatmul.mubr.msk.f32.gmra.mrb[12].mxu0 %vm1148_vm0, %v1136_v39  ;;  %v9764_v39 = vpack.c.bf16 %v1820_v34, %v1819_v33  ;;  %v1847_v34 = vld [vmem:[%s13530_s24 + $0xf0] sm:$0xff] }
 0x24e   : > { %799 = vst.msk [vmem:[#allocation5 + $0x40] sm:$0xff] %vm790_vm7, %v780_v37  ;;  %8157 = vmatprep.mubr.msk.f32.mxu0 %vm11549_vm5, %v11550_v16  ;;  %vm1472_vm7 = vcmask 523520  }
 0x24f   : > { %9765 = vmatpush3.bf16.msra.mxu1 %v9764_v39 }
 0x250   : > { %v1053_v41 = vpop.permute.xlu1 %1052  ;;  %v835_v42 = vpop.permute.xlu0 %834 }
 0x251   : > { %1073 = vst.msk [vmem:[#allocation5 + $0x38] sm:$0xff] %vm1065_vm12, %v1053_v41  ;;  %v1837_v41 = vld [vmem:[%s13530_s24 + $0xa0] sm:$0xff] }
 0x252   : > { %854 = vst.msk [vmem:[#allocation5 + $0x40] sm:$0xff] %vm845_vm8, %v835_v42  ;;  %vm1527_vm8 = vcmask 785920   ;;  %v1838_v42 = vld [vmem:[%s13530_s24 + $0xa8] sm:$0xff] }
 0x254   : > { %v1108_v44 = vpop.permute.xlu1 %1107  ;;  %v890_v45 = vpop.permute.xlu0 %889 }
 0x255   : > { %1128 = vst.msk [vmem:[#allocation5 + $0x38] sm:$0xff] %vm1120_vm13, %v1108_v44 }
 0x256   : > { %909 = vst.msk [vmem:[#allocation5 + $0x40] sm:$0xff] %vm900_vm9, %v890_v45  ;;  %v9766_v45 = vpack.c.bf16 %v1838_v42, %v1837_v41  ;;  %v1831_v41 = vld [vmem:[%s13530_s24 + $0x70] sm:$0xff] }
 0x258   : > { %v945_v46 = vpop.permute.xlu0 %944  ;;  %v1000_v48 = vpop.permute.xlu1 %999  ;;  %9767 = vmatprep.subr.bf16.mxu1 %v9766_v45 }
 0x259   : > { %964 = vst.msk [vmem:[#allocation5 + $0x40] sm:$0xff] %vm955_vm10, %v945_v46  ;;  %v1821_v46 = vld [vmem:[%s13530_s24 + $0x20] sm:$0xff] }
 0x25a   : > { %1019 = vst.msk [vmem:[#allocation5 + $0x40] sm:$0xff] %vm1010_vm11, %v1000_v48  ;;  %v1822_v48 = vld [vmem:[%s13530_s24 + $0x28] sm:$0xff] }
 0x25b   : > { %v9768_v49 = vpack.c.bf16 %v1822_v48, %v1821_v46 }
 0x25c   : > { %v1055_v50 = vpop.permute.xlu0 %1054  ;;  %v1110_v51 = vpop.permute.xlu1 %1109  ;;  %v1137_v52 = vld [vmem:[#allocation5 + $0x38] sm:$0xff] }
 0x25d   : > { %1074 = vst.msk [vmem:[#allocation5 + $0x40] sm:$0xff] %vm1065_vm12, %v1055_v50  ;;  %8158 = vmatmul.mubr.msk.f32.gmra.mrb[14].mxu0 %vm1148_vm0, %v1137_v52  ;;  %v1840_v52 = vld [vmem:[%s13530_s24 + $0xb8] sm:$0xff]  ;;  %9769 = vmatpush3.bf16.msra.mxu1 %v9768_v49 }
 0x25e   : > { %1129 = vst.msk [vmem:[#allocation5 + $0x40] sm:$0xff] %vm1120_vm13, %v1110_v51  ;;  %8160 = vmatprep.mubr.msk.f32.mxu0 %vm11549_vm5, %v11550_v16  ;;  %v1839_v51 = vld [vmem:[%s13530_s24 + $0xb0] sm:$0xff] }
 0x25f   : > { %v9770_v55 = vpack.c.bf16 %v1840_v52, %v1839_v51 }
 0x261   : > { %9771 = vmatprep.subr.bf16.mxu1 %v9770_v55 }
 0x262   : > { %9773 = vmatpush3.bf16.msra.mxu1 %v9772_v58 }
 0x265   : > { %v1138_v54 = vld [vmem:[#allocation5 + $0x40] sm:$0xff] }
 0x266   : > { %8161 = vmatmul.mubr.msk.f32.gmra.mrb[16].mxu0 %vm1148_vm0, %v1138_v54 }
 0x267   : > { %8171 = vmatprep.mubr.msk.f32.mxu0 %vm11549_vm5, %v11550_v16 }
 0x26d   : > { %v1356_v10 = vpop.permute.xlu0 %1355 }
 0x26e   : > { %v12305_v61 = vpop.permute.xlu1 %1358  ;;  %vm1381_vm9 = vcmp.eq.s32.totalorder %v1356_v10, 1 }
 0x26f   : > { %vm1382_vm10 = vcmp.eq.s32.totalorder %v12305_v61, 1  ;;  %v9774_v61 = vpack.c.bf16 %v1842_v60, %v1841_v59 }
 0x271   : > { %9775 = vmatprep.subr.bf16.mxu1 %v9774_v61  ;;  %v1365_v55 = vpop.permute.xlu0 %1364 }
 0x272   : > { %v12307_v62 = vpop.permute.xlu1 %1361  ;;  %vm1384_vm12 = vcmp.eq.s32.totalorder %v1365_v55, 1 }
 0x273   : > { %vm1383_vm11 = vcmp.eq.s32.totalorder %v12307_v62, 1  ;;  %v1832_v62 = vld [vmem:[%s13530_s24 + $0x78] sm:$0xff] }
 0x274   : > { %v9788_v42 = vpack.c.bf16 %v1832_v62, %v1831_v41 }
 0x276   : > { %v12309_v63 = vpop.permute.xlu1 %1367 }
 0x277   : > { %vm1385_vm13 = vcmp.eq.s32.totalorder %v12309_v63, 1 }
 0x27a   : > { %v12311_v0 = vpop.permute.xlu1 %1373 }
 0x27b   : > { %vm1387_vm2 = vcmp.eq.s32.totalorder %v12311_v0, 1 }
 0x27e   : > { %v12313_v1 = vpop.permute.xlu1 %1379 }
 0x27f   : > { %vm1389_vm4 = vcmp.eq.s32.totalorder %v12313_v1, 1 }
 0x282   : > { %v1446_v2 = vpop.permute.xlu1 %1445 }
 0x283   : > { %1473 = vst.msk [vmem:[#allocation6] sm:$0xff] %vm1472_vm7, %v1446_v2  ;;  %v1825_v2 = vld [vmem:[%s13530_s24 + $0x40] sm:$0xff] }
 0x286   : > { %v1501_v11 = vpop.permute.xlu1 %1500 }
 0x287   : > { %1528 = vst.msk [vmem:[#allocation6] sm:$0xff] %vm1527_vm8, %v1501_v11 }
 0x2c0   : > { %v1242_v4 = vpop.f32.mrb[0].mxu0 }
 0x2c1   : > { %v1293_v8 = vmul.f32 %v12315_v3, %v1242_v4  ;;  %v8138_v9 = vpop.f32.mrb[1].mxu0  ;;  %v1826_v4 = vld [vmem:[%s13530_s24 + $0x48] sm:$0xff] }
 0x2c2   : > { %v9776_v7 = vpack.c.bf16 %v1826_v4, %v1825_v2  ;;  %v1844_v9 = vld [vmem:[%s13530_s24 + $0xd8] sm:$0xff] }
 0x2c3   : > { %v1309_v12 = vadd.f32 %v12317_v5, %v1293_v8  ;;  %v1843_v8 = vld [vmem:[%s13530_s24 + $0xd0] sm:$0xff] }
 0x2c4   : > { %v9778_v10 = vpack.c.bf16 %v1844_v9, %v1843_v8  ;;  %9777 = vmatpush3.bf16.msra.mxu1 %v9776_v7 }
 0x2c5   : > { %v1336_v13 = vmax.f32 %v1309_v12, 0.0 }
 0x2c6   : > { %9779 = vmatprep.subr.bf16.mxu1 %v9778_v10 }
 0x2c7   : > { %v1390_v14 = vsel %vm1381_vm9, %v1336_v13, 0.0 }
 0x2c8   : > { %1400 = vst.msk [vmem:[#allocation2 + $0xa] sm:$0xff] %vm1399_vm6, %v1390_v14  ;;  %9781 = vmatpush3.bf16.msra.mxu1 %v9780_v21 }
 0x2cf   : > { %v1537_v27 = vld [vmem:[#allocation2 + $0x9] sm:$0xff] }
 0x2d0   : > { %v1483_v28 = vld [vmem:[#allocation2 + $0xa] sm:$0xff]  ;;  %1555 = vrot.lane.b32.xlu1 %v1537_v27, %s11554_s23  ;;  %v1247_v31 = vpop.f32.mrb[2].mxu0 }
 0x2d1   : > { %v1410_v30 = vld [vmem:[#allocation2 + $0x8] sm:$0xff]  ;;  %1601 = vst.msk [vmem:[#allocation6 + $0x8] sm:$0xff] %vm1399_vm6, %v1483_v28  ;;  %v1294_v36 = vmul.f32 %v12315_v3, %v1247_v31  ;;  %v8141_v37 = vpop.f32.mrb[3].mxu0 }
 0x2d2   : > { %1419 = vst.msk [vmem:[#allocation6 + $0x18] sm:$0xff] %vm1399_vm6, %v1410_v30  ;;  %v1830_v30 = vld [vmem:[%s13530_s24 + $0x68] sm:$0xff] }
 0x2d3   : > { %v1310_v44 = vadd.f32 %v12317_v5, %v1294_v36  ;;  %v1848_v36 = vld [vmem:[%s13530_s24 + $0xf8] sm:$0xff] }
 0x2d4   : > { %1447 = vrot.lane.b32.xlu1 %v1537_v27, %s11544_s3  ;;  %v9782_v27 = vpack.c.bf16 %v1846_v24, %v1845_v23  ;;  %v9786_v39 = vpack.c.bf16 %v1848_v36, %v1847_v34  ;;  %v1371_v24 = vpop.permute.xlu0 %1370 }
 0x2d5   : > { %v1337_v50 = vmax.f32 %v1310_v44, 0.0  ;;  %vm1386_vm0 = vcmp.eq.s32.totalorder %v1371_v24, 1 }
 0x2d6   : > { %9783 = vmatprep.subr.bf16.mxu1 %v9782_v27 }
 0x2d7   : > { %v1391_v54 = vsel %vm1382_vm10, %v1337_v50, 0.0 }
 0x2d8   : > { %1401 = vst.msk [vmem:[#allocation2 + $0x12] sm:$0xff] %vm1399_vm6, %v1391_v54  ;;  %1502 = vrot.lane.b32.xlu1 %v1483_v28, %s11552_s26  ;;  %v1829_v28 = vld [vmem:[%s13530_s24 + $0x60] sm:$0xff]  ;;  %v1377_v55 = vpop.permute.xlu0 %1376 }
 0x2d9   : > { %v9784_v31 = vpack.c.bf16 %v1830_v30, %v1829_v28  ;;  %vm1388_vm3 = vcmp.eq.s32.totalorder %v1377_v55, 1 }
 0x2db   : > { %9785 = vmatpush3.bf16.msra.mxu1 %v9784_v31 }
 0x2dc   : > { %9787 = vmatprep.subr.bf16.mxu1 %v9786_v39 }
 0x2df   : > { %v1610_v11 = vld [vmem:[#allocation2 + $0xb] sm:$0xff]  ;;  %9789 = vmatpush3.bf16.msra.mxu1 %v9788_v42 }
 0x2e0   : > { %v1538_v12 = vld [vmem:[#allocation2 + $0x11] sm:$0xff]  ;;  %1628 = vrot.lane.b32.xlu0 %v1610_v11, %s11544_s3  ;;  %v1252_v14 = vpop.f32.mrb[4].mxu0 }
 0x2e1   : > { %v1664_v13 = vld [vmem:[#allocation2 + $0x12] sm:$0xff]  ;;  %1557 = vrot.lane.b32.xlu1 %v1538_v12, %s11554_s23  ;;  %v1295_v19 = vmul.f32 %v12315_v3, %v1252_v14  ;;  %v8144_v20 = vpop.f32.mrb[5].mxu0 }
 0x2e2   : > { %v1411_v15 = vld [vmem:[#allocation2 + $0x10] sm:$0xff]  ;;  %1602 = vst.msk [vmem:[#allocation6 + $0x20] sm:$0xff] %vm1399_vm6, %v1664_v13 }
 0x2e3   : > { %1420 = vst.msk [vmem:[#allocation6 + $0x30] sm:$0xff] %vm1399_vm6, %v1411_v15  ;;  %v1311_v25 = vadd.f32 %v12317_v5, %v1295_v19 }
 0x2e4   : > { %1682 = vrot.lane.b32.xlu0 %v1664_v13, %s11552_s26 }
 0x2e5   : > { %1449 = vrot.lane.b32.xlu1 %v1538_v12, %s11544_s3  ;;  %v1338_v33 = vmax.f32 %v1311_v25, 0.0 }
 0x2e7   : > { %v1392_v37 = vsel %vm1383_vm11, %v1338_v33, 0.0 }
 0x2e8   : > { %1402 = vst.msk [vmem:[#allocation2 + $0x1a] sm:$0xff] %vm1399_vm6, %v1392_v37 }
 0x2e9   : > { %1504 = vrot.lane.b32.xlu1 %v1664_v13, %s11552_s26 }
 0x2ef   : > { %v1772_v44 = vld [vmem:[#allocation2 + $0x14] sm:$0xff] }
 0x2f0   : > { %v1718_v45 = vld [vmem:[#allocation2 + $0x13] sm:$0xff]  ;;  %1781 = vst.msk [vmem:[#allocation6 + $0x10] sm:$0xff] %vm1399_vm6, %v1772_v44  ;;  %v1257_v48 = vpop.f32.mrb[6].mxu0 }
 0x2f1   : > { %v1539_v46 = vld [vmem:[#allocation2 + $0x19] sm:$0xff]  ;;  %1736 = vrot.lane.b32.xlu0 %v1718_v45, %s11554_s23  ;;  %v1296_v51 = vmul.f32 %v12315_v3, %v1257_v48  ;;  %v8147_v52 = vpop.f32.mrb[7].mxu0 }
 0x2f2   : > { %1559 = vrot.lane.b32.xlu1 %v1539_v46, %s11554_s23  ;;  %v1665_v49 = vld [vmem:[#allocation2 + $0x1a] sm:$0xff] }
 0x2f3   : > { %v1412_v50 = vld [vmem:[#allocation2 + $0x18] sm:$0xff]  ;;  %1603 = vst.msk [vmem:[#allocation6 + $0x38] sm:$0xff] %vm1399_vm6, %v1665_v49  ;;  %v1312_v54 = vadd.f32 %v12317_v5, %v1296_v51 }
 0x2f4   : > { %1421 = vst.msk [vmem:[#allocation6 + $0x48] sm:$0xff] %vm1399_vm6, %v1412_v50 }
 0x2f5   : > { %1630 = vrot.lane.b32.xlu0 %v1718_v45, %s11544_s3  ;;  %v1339_v56 = vmax.f32 %v1312_v54, 0.0 }
 0x2f6   : > { %1451 = vrot.lane.b32.xlu1 %v1539_v46, %s11544_s3 }
 0x2f7   : > { %v1393_v57 = vsel %vm1384_vm12, %v1339_v56, 0.0  ;;  %v1792_v58 = vld [vmem:[#allocation6 + $0x10] sm:$0xff] }
 0x2f8   : > { %1403 = vst.msk [vmem:[#allocation2 + $0x22] sm:$0xff] %vm1399_vm6, %v1393_v57  ;;  %8172 = vmatmul.mubr.msk.f32.vlgmr.msra.gmra.mrb[18].mxu0 %vm1399_vm6, %v1792_v58 }
 0x2f9   : > { %1684 = vrot.lane.b32.xlu0 %v1665_v49, %s11552_s26  ;;  %8174 = vmatprep.mubr.msk.f32.mxu0 %vm11549_vm5, %v11550_v16 }
 0x2fa   : > { %1506 = vrot.lane.b32.xlu1 %v1665_v49, %s11552_s26 }
 0x2ff   : > { %v1719_v59 = vld [vmem:[#allocation2 + $0x1b] sm:$0xff] }
 0x300   : > { %v1540_v60 = vld [vmem:[#allocation2 + $0x21] sm:$0xff]  ;;  %1738 = vrot.lane.b32.xlu0 %v1719_v59, %s11554_s23  ;;  %v1262_v2 = vpop.f32.mrb[8].mxu0 }
 0x301   : > { %v1773_v61 = vld [vmem:[#allocation2 + $0x1c] sm:$0xff]  ;;  %1561 = vrot.lane.b32.xlu1 %v1540_v60, %s11554_s23  ;;  %v1297_v8 = vmul.f32 %v12315_v3, %v1262_v2  ;;  %v8150_v9 = vpop.f32.mrb[9].mxu0 }
 0x302   : > { %1782 = vst.msk [vmem:[#allocation6 + $0x28] sm:$0xff] %vm1399_vm6, %v1773_v61  ;;  %v1666_v4 = vld [vmem:[#allocation2 + $0x22] sm:$0xff] }
 0x303   : > { %v1413_v7 = vld [vmem:[#allocation2 + $0x20] sm:$0xff]  ;;  %1604 = vst.msk [vmem:[#allocation6 + $0x50] sm:$0xff] %vm1399_vm6, %v1666_v4  ;;  %v1313_v10 = vadd.f32 %v12317_v5, %v1297_v8 }
 0x304   : > { %1422 = vst.msk [vmem:[#allocation6 + $0x60] sm:$0xff] %vm1399_vm6, %v1413_v7  ;;  %1632 = vrot.lane.b32.xlu0 %v1719_v59, %s11544_s3 }
 0x305   : > { %1453 = vrot.lane.b32.xlu1 %v1540_v60, %s11544_s3  ;;  %v1340_v11 = vmax.f32 %v1313_v10, 0.0 }
 0x307   : > { %v1394_v12 = vsel %vm1385_vm13, %v1340_v11, 0.0 }
 0x308   : > { %1404 = vst.msk [vmem:[#allocation2 + $0x2a] sm:$0xff] %vm1399_vm6, %v1394_v12  ;;  %1686 = vrot.lane.b32.xlu0 %v1666_v4, %s11552_s26 }
 0x309   : > { %v1795_v13 = vld [vmem:[#allocation6 + $0x28] sm:$0xff]  ;;  %1508 = vrot.lane.b32.xlu1 %v1666_v4, %s11552_s26 }
 0x30a   : > { %8175 = vmatmul.mubr.msk.f32.gmra.mrb[20].mxu0 %vm1399_vm6, %v1795_v13 }
 0x30b   : > { %8177 = vmatprep.mubr.msk.f32.mxu0 %vm11549_vm5, %v11550_v16 }
 0x30f   : > { %v1720_v14 = vld [vmem:[#allocation2 + $0x23] sm:$0xff] }
 0x310   : > { %v1541_v15 = vld [vmem:[#allocation2 + $0x29] sm:$0xff]  ;;  %1740 = vrot.lane.b32.xlu0 %v1720_v14, %s11554_s23  ;;  %v1267_v63 = vpop.f32.mrb[10].mxu0 }
 0x311   : > { %v1774_v17 = vld [vmem:[#allocation2 + $0x24] sm:$0xff]  ;;  %1563 = vrot.lane.b32.xlu1 %v1541_v15, %s11554_s23  ;;  %v1298_v20 = vmul.f32 %v12315_v3, %v1267_v63  ;;  %v8153_v21 = vpop.f32.mrb[11].mxu0 }
 0x312   : > { %1783 = vst.msk [vmem:[#allocation6 + $0x40] sm:$0xff] %vm1399_vm6, %v1774_v17  ;;  %v1667_v18 = vld [vmem:[#allocation2 + $0x2a] sm:$0xff] }
 0x313   : > { %v1414_v19 = vld [vmem:[#allocation2 + $0x28] sm:$0xff]  ;;  %1605 = vst.msk [vmem:[#allocation6 + $0x68] sm:$0xff] %vm1399_vm6, %v1667_v18  ;;  %v1314_v23 = vadd.f32 %v12317_v5, %v1298_v20  ;;  %v12541_v20 = vpop.permute.xlu0 %1698 }
 0x314   : > { %1423 = vst.msk [vmem:[#allocation6 + $0x78] sm:$0xff] %vm1399_vm6, %v1414_v19  ;;  %1634 = vrot.lane.b32.xlu0 %v1720_v14, %s11544_s3 }
 0x315   : > { %1455 = vrot.lane.b32.xlu1 %v1541_v15, %s11544_s3  ;;  %v1341_v25 = vmax.f32 %v1314_v23, 0.0 }
 0x317   : > { %v1395_v27 = vsel %vm1386_vm0, %v1341_v25, 0.0 }
 0x318   : > { %1405 = vst.msk [vmem:[#allocation2 + $0x32] sm:$0xff] %vm1399_vm6, %v1395_v27  ;;  %1688 = vrot.lane.b32.xlu0 %v1667_v18, %s11552_s26 }
 0x319   : > { %v1798_v28 = vld [vmem:[#allocation6 + $0x40] sm:$0xff]  ;;  %1510 = vrot.lane.b32.xlu1 %v1667_v18, %s11552_s26 }
 0x31a   : > { %8178 = vmatmul.mubr.msk.f32.gmra.mrb[22].mxu0 %vm1399_vm6, %v1798_v28  ;;  %v1780_v28 = vld [vmem:[#allocation2 + $0x54] sm:$0xff] }
 0x31b   : > { %8180 = vmatprep.mubr.msk.f32.mxu0 %vm11549_vm5, %v11550_v16  ;;  %1789 = vst.msk [vmem:[#allocation6 + $0xd0] sm:$0xff] %vm1399_vm6, %v1780_v28 }
 0x31f   : > { %v1721_v30 = vld [vmem:[#allocation2 + $0x2b] sm:$0xff] }
 0x320   : > { %v1542_v31 = vld [vmem:[#allocation2 + $0x31] sm:$0xff]  ;;  %1742 = vrot.lane.b32.xlu0 %v1721_v30, %s11554_s23  ;;  %v1272_v34 = vpop.f32.mrb[12].mxu0 }
 0x321   : > { %v1775_v33 = vld [vmem:[#allocation2 + $0x2c] sm:$0xff]  ;;  %1565 = vrot.lane.b32.xlu1 %v1542_v31, %s11554_s23  ;;  %v1299_v39 = vmul.f32 %v12315_v3, %v1272_v34  ;;  %v8156_v41 = vpop.f32.mrb[13].mxu0 }
 0x322   : > { %1784 = vst.msk [vmem:[#allocation6 + $0x58] sm:$0xff] %vm1399_vm6, %v1775_v33  ;;  %v1668_v36 = vld [vmem:[#allocation2 + $0x32] sm:$0xff] }
 0x323   : > { %v1415_v37 = vld [vmem:[#allocation2 + $0x30] sm:$0xff]  ;;  %1606 = vst.msk [vmem:[#allocation6 + $0x80] sm:$0xff] %vm1399_vm6, %v1668_v36  ;;  %v1315_v62 = vadd.f32 %v12317_v5, %v1299_v39  ;;  %v1816_v33 = vld [vmem:[#allocation6 + $0xd0] sm:$0xff] }
 0x324   : > { %1424 = vst.msk [vmem:[#allocation6 + $0x90] sm:$0xff] %vm1399_vm6, %v1415_v37  ;;  %1636 = vrot.lane.b32.xlu0 %v1721_v30, %s11544_s3 }
 0x325   : > { %1457 = vrot.lane.b32.xlu1 %v1542_v31, %s11544_s3  ;;  %v1342_v42 = vmax.f32 %v1315_v62, 0.0  ;;  %v1726_v31 = vld [vmem:[#allocation2 + $0x53] sm:$0xff] }
 0x327   : > { %v1396_v44 = vsel %vm1387_vm2, %v1342_v42, 0.0 }
 0x328   : > { %1406 = vst.msk [vmem:[#allocation2 + $0x3a] sm:$0xff] %vm1399_vm6, %v1396_v44  ;;  %1690 = vrot.lane.b32.xlu0 %v1668_v36, %s11552_s26 }
 0x329   : > { %v1801_v45 = vld [vmem:[#allocation6 + $0x58] sm:$0xff]  ;;  %1512 = vrot.lane.b32.xlu1 %v1668_v36, %s11552_s26 }
 0x32a   : > { %8181 = vmatmul.mubr.msk.f32.gmra.mrb[24].mxu0 %vm1399_vm6, %v1801_v45 }
 0x32b   : > { %8183 = vmatprep.mubr.msk.f32.mxu0 %vm11549_vm5, %v11550_v16 }
 0x32f   : > { %v1722_v46 = vld [vmem:[#allocation2 + $0x33] sm:$0xff] }
 0x330   : > { %v1543_v48 = vld [vmem:[#allocation2 + $0x39] sm:$0xff]  ;;  %1744 = vrot.lane.b32.xlu0 %v1722_v46, %s11554_s23  ;;  %v1277_v0 = vpop.f32.mrb[14].mxu0 }
 0x331   : > { %v1776_v49 = vld [vmem:[#allocation2 + $0x34] sm:$0xff]  ;;  %1567 = vrot.lane.b32.xlu1 %v1543_v48, %s11554_s23  ;;  %v1300_v52 = vmul.f32 %v12315_v3, %v1277_v0  ;;  %v8159_v54 = vpop.f32.mrb[15].mxu0 }
 0x332   : > { %1785 = vst.msk [vmem:[#allocation6 + $0x70] sm:$0xff] %vm1399_vm6, %v1776_v49  ;;  %v1669_v50 = vld [vmem:[#allocation2 + $0x3a] sm:$0xff] }
 0x333   : > { %v1416_v51 = vld [vmem:[#allocation2 + $0x38] sm:$0xff]  ;;  %1607 = vst.msk [vmem:[#allocation6 + $0x98] sm:$0xff] %vm1399_vm6, %v1669_v50  ;;  %v1316_v56 = vadd.f32 %v12317_v5, %v1300_v52 }
 0x334   : > { %1425 = vst.msk [vmem:[#allocation6 + $0xa8] sm:$0xff] %vm1399_vm6, %v1416_v51  ;;  %1638 = vrot.lane.b32.xlu0 %v1722_v46, %s11544_s3 }
 0x335   : > { %1459 = vrot.lane.b32.xlu1 %v1543_v48, %s11544_s3  ;;  %v1343_v57 = vmax.f32 %v1316_v56, 0.0 }
 0x337   : > { %v1397_v58 = vsel %vm1388_vm3, %v1343_v57, 0.0 }
 0x338   : > { %1407 = vst.msk [vmem:[#allocation2 + $0x42] sm:$0xff] %vm1399_vm6, %v1397_v58  ;;  %1692 = vrot.lane.b32.xlu0 %v1669_v50, %s11552_s26 }
 0x339   : > { %v1804_v59 = vld [vmem:[#allocation6 + $0x70] sm:$0xff]  ;;  %1514 = vrot.lane.b32.xlu1 %v1669_v50, %s11552_s26  ;;  %v1282_v60 = vpop.f32.mrb[16].mxu0 }
 0x33a   : > { %8184 = vmatmul.mubr.msk.f32.gmra.mrb[26].mxu0 %vm1399_vm6, %v1804_v59  ;;  %v1301_v61 = vmul.f32 %v12315_v3, %v1282_v60  ;;  %v8162_v2 = vpop.f32.mrb[17].mxu0 }
 0x33b   : > { %8186 = vmatprep.mubr.msk.f32.mxu0 %vm11549_vm5, %v11550_v16 }
 0x33c   : > { %v1317_v4 = vadd.f32 %v12317_v5, %v1301_v61 }
 0x33e   : > { %v1344_v7 = vmax.f32 %v1317_v4, 0.0 }
 0x33f   : > { %v1723_v8 = vld [vmem:[#allocation2 + $0x3b] sm:$0xff] }
 0x340   : > { %v1544_v9 = vld [vmem:[#allocation2 + $0x41] sm:$0xff]  ;;  %v1398_v11 = vsel %vm1389_vm4, %v1344_v7, 0.0  ;;  %1746 = vrot.lane.b32.xlu0 %v1723_v8, %s11554_s23 }
 0x341   : > { %v1777_v10 = vld [vmem:[#allocation2 + $0x3c] sm:$0xff]  ;;  %1569 = vrot.lane.b32.xlu1 %v1544_v9, %s11554_s23  ;;  %1408 = vst.msk [vmem:[#allocation2 + $0x4a] sm:$0xff] %vm1399_vm6, %v1398_v11 }
 0x342   : > { %1786 = vst.msk [vmem:[#allocation6 + $0x88] sm:$0xff] %vm1399_vm6, %v1777_v10  ;;  %v1670_v12 = vld [vmem:[#allocation2 + $0x42] sm:$0xff]  ;;  %v1556_v1 = vpop.permute.xlu1 %1555 }
 0x343   : > { %v1417_v13 = vld [vmem:[#allocation2 + $0x40] sm:$0xff]  ;;  %1608 = vst.msk [vmem:[#allocation6 + $0xb0] sm:$0xff] %vm1399_vm6, %v1670_v12 }
 0x344   : > { %1426 = vst.msk [vmem:[#allocation6 + $0xc0] sm:$0xff] %vm1399_vm6, %v1417_v13  ;;  %1640 = vrot.lane.b32.xlu0 %v1723_v8, %s11544_s3 }
 0x345   : > { %1583 = vst.msk [vmem:[#allocation6] sm:$0xff] %vm1582_vm14, %v1556_v1  ;;  %1461 = vrot.lane.b32.xlu1 %v1544_v9, %s11544_s3 }
 0x346   : > { %v1448_v3 = vpop.permute.xlu1 %1447 }
 0x347   : > { %1474 = vst.msk [vmem:[#allocation6 + $0x18] sm:$0xff] %vm1472_vm7, %v1448_v3 }
 0x348   : > { %1694 = vrot.lane.b32.xlu0 %v1670_v12, %s11552_s26  ;;  %v1778_v14 = vld [vmem:[#allocation2 + $0x44] sm:$0xff]  ;;  %v1779_v17 = vld [vmem:[#allocation2 + $0x4c] sm:$0xff] }
 0x349   : > { %v1807_v5 = vld [vmem:[#allocation6 + $0x88] sm:$0xff]  ;;  %1516 = vrot.lane.b32.xlu1 %v1670_v12, %s11552_s26  ;;  %1787 = vst.msk [vmem:[#allocation6 + $0xa0] sm:$0xff] %vm1399_vm6, %v1778_v14  ;;  %1788 = vst.msk [vmem:[#allocation6 + $0xb8] sm:$0xff] %vm1399_vm6, %v1779_v17  ;;  %v1724_v18 = vld [vmem:[#allocation2 + $0x43] sm:$0xff] }
 0x34a   : > { %8187 = vmatmul.mubr.msk.f32.gmra.mrb[28].mxu0 %vm1399_vm6, %v1807_v5  ;;  %v1671_v15 = vld [vmem:[#allocation2 + $0x4a] sm:$0xff]  ;;  %v1503_v63 = vpop.permute.xlu1 %1502 }
 0x34b   : > { %8189 = vmatprep.mubr.msk.f32.mxu0 %vm11549_vm5, %v11550_v16  ;;  %1609 = vst.msk [vmem:[#allocation6 + $0xc8] sm:$0xff] %vm1399_vm6, %v1671_v15  ;;  %v1545_v19 = vld [vmem:[#allocation2 + $0x49] sm:$0xff] }
 0x34c   : > { %1529 = vst.msk [vmem:[#allocation6 + $0x18] sm:$0xff] %vm1527_vm8, %v1503_v63  ;;  %1748 = vrot.lane.b32.xlu0 %v1724_v18, %s11554_s23  ;;  %v1725_v30 = vld [vmem:[#allocation2 + $0x4b] sm:$0xff] }
 0x34d   : > { %1571 = vrot.lane.b32.xlu1 %v1545_v19, %s11554_s23  ;;  %v1790_v62 = vld [vmem:[#allocation6] sm:$0xff] }
 0x350   : > { %1642 = vrot.lane.b32.xlu0 %v1724_v18, %s11544_s3  ;;  %v1810_v21 = vld [vmem:[#allocation6 + $0xa0] sm:$0xff]  ;;  %v1813_v25 = vld [vmem:[#allocation6 + $0xb8] sm:$0xff] }
 0x351   : > { %2172 = vperm.xlu1 %11098, %v12172_v26   ;;  %8190 = vmatmul.mubr.msk.f32.gmra.mrb[30].mxu0 %vm1399_vm6, %v1810_v21 }
 0x352   : > { %v1629_v23 = vpop.permute.xlu0 %1628  ;;  %8192 = vmatprep.mubr.msk.f32.mxu0 %vm11549_vm5, %v11550_v16 }
 0x353   : > { %v1558_v24 = vpop.permute.xlu1 %1557  ;;  %1655 = vst.msk [vmem:[#allocation6 + $0x8] sm:$0xff] %vm1472_vm7, %v1629_v23 }
 0x354   : > { %1584 = vst.msk [vmem:[#allocation6 + $0x18] sm:$0xff] %vm1582_vm14, %v1558_v24  ;;  %1696 = vrot.lane.b32.xlu0 %v1671_v15, %s11552_s26 }
 0x355   : > { %2178 = vperm.xlu1 %11098, %v12182_v29   ;;  %8193 = vmatmul.mubr.msk.f32.gmra.mrb[32].mxu0 %vm1399_vm6, %v1813_v25 }
 0x356   : > { %v1683_v27 = vpop.permute.xlu0 %1682  ;;  %8195 = vmatprep.mubr.msk.f32.mxu0 %vm11549_vm5, %v11550_v16 }
 0x357   : > { %v1450_v26 = vpop.permute.xlu1 %1449  ;;  %1709 = vst.msk [vmem:[#allocation6 + $0x8] sm:$0xff] %vm1527_vm8, %v1683_v27 }
 0x358   : > { %1475 = vst.msk [vmem:[#allocation6 + $0x30] sm:$0xff] %vm1472_vm7, %v1450_v26  ;;  %1750 = vrot.lane.b32.xlu0 %v1725_v30, %s11554_s23 }
 0x359   : > { %2184 = vperm.xlu1 %11098, %v12192_v35   ;;  %8196 = vmatmul.mubr.msk.f32.gmra.mrb[34].mxu0 %vm1399_vm6, %v1816_v33 }
 0x35b   : > { %v1505_v29 = vpop.permute.xlu1 %1504 }
 0x35c   : > { %1530 = vst.msk [vmem:[#allocation6 + $0x30] sm:$0xff] %vm1527_vm8, %v1505_v29  ;;  %1644 = vrot.lane.b32.xlu0 %v1725_v30, %s11544_s3  ;;  %s13531_s3 = sld [smem:[#allocation42_spill]] }
 0x35d   : > { %2190 = vperm.xlu1 %11098, %v12202_v40  }
 0x360   : > { %1752 = vrot.lane.b32.xlu0 %v1726_v31, %s11554_s23  ;;  %v2241_v31 = vld [vmem:[#allocation3 + $0x1] sm:$0xff]  ;;  %s6924_s23 = sshll.u32 %s11983_s2, 4  ;;  %s13419_s23 = int_to_ptr.vmem [resolvable:$true] %s6924_s23 }
 0x361   : > { %s11435_s18 = scalar_lea.vmem %s13419_s23, 16 }
 0x362   : > { %p11436_p6 = scmp.ne.s32.totalorder %s13419_s23, %s11435_s18  ;;  %p13533_p5 = scmp.ne.s32.totalorder %s13531_s3, 0 }
 0x363   : > { %v1737_v34 = vpop.permute.xlu0 %1736 }
 0x364   : > { %v1560_v36 = vpop.permute.xlu1 %1559  ;;  %1763 = vst.msk [vmem:[#allocation6 + $0x8] sm:$0xff] %vm1582_vm14, %v1737_v34  ;;  %2169 = vperm.xlu0 %11097, %v12169_v22   ;;  %p11437_p9 = pnand %p11436_p6, %p13533_p5 }
 0x365   : > { %1585 = vst.msk [vmem:[#allocation6 + $0x30] sm:$0xff] %vm1582_vm14, %v1560_v36 }
 0x366   : > { %p11438_p13 = pneg %p11437_p9 }
 0x367   : > { %v1631_v35 = vpop.permute.xlu0 %1630 }
 0x368   : > { %v1452_v37 = vpop.permute.xlu1 %1451  ;;  %1656 = vst.msk [vmem:[#allocation6 + $0x20] sm:$0xff] %vm1472_vm7, %v1631_v35  ;;  %2175 = vperm.xlu0 %11097, %v12185_v32  }
 0x369   : > { %1476 = vst.msk [vmem:[#allocation6 + $0x48] sm:$0xff] %vm1472_vm7, %v1452_v37 }
 0x36b   : > { %v1685_v40 = vpop.permute.xlu0 %1684  ;;  %v1791_v39 = vld [vmem:[#allocation6 + $0x8] sm:$0xff] }
 0x36c   : > { %1710 = vst.msk [vmem:[#allocation6 + $0x20] sm:$0xff] %vm1527_vm8, %v1685_v40  ;;  %v1507_v41 = vpop.permute.xlu1 %1506  ;;  %1944 = vmatprep.mubr.f32.mxu1 %v1791_v39  ;;  %2181 = vperm.xlu0 %11097, %v12195_v38   ;;  %v1796_v54 = vld [vmem:[#allocation6 + $0x30] sm:$0xff] }
 0x36d   : > { %1531 = vst.msk [vmem:[#allocation6 + $0x48] sm:$0xff] %vm1527_vm8, %v1507_v41  ;;  %1945 = vmatmul.mubr.f32.vlgmr.msra.gmra.mrb[0].mxu1 %v1790_v62 }
 0x370   : > { %2187 = vperm.xlu0 %11097, %v12205_v43   ;;  %v1793_v43 = vld [vmem:[#allocation6 + $0x18] sm:$0xff] }
 0x372   : > { %v1739_v22 = vpop.permute.xlu0 %1738 }
 0x373   : > { %v1562_v42 = vpop.permute.xlu1 %1561  ;;  %1764 = vst.msk [vmem:[#allocation6 + $0x20] sm:$0xff] %vm1582_vm14, %v1739_v22 }
 0x374   : > { %1586 = vst.msk [vmem:[#allocation6 + $0x48] sm:$0xff] %vm1582_vm14, %v1562_v42  ;;  %2193 = vperm.xlu0 %11097, %v12212_v47  }
 0x376   : > { %v1633_v32 = vpop.permute.xlu0 %1632 }
 0x377   : > { %v1454_v44 = vpop.permute.xlu1 %1453  ;;  %1657 = vst.msk [vmem:[#allocation6 + $0x38] sm:$0xff] %vm1472_vm7, %v1633_v32 }
 0x378   : > { %1477 = vst.msk [vmem:[#allocation6 + $0x60] sm:$0xff] %vm1472_vm7, %v1454_v44  ;;  %2259 = vrot.lane.b32.xlu0 %v2241_v31, %s11552_s26 }
 0x37a   : > { %v1687_v45 = vpop.permute.xlu0 %1686  ;;  %v1794_v46 = vld [vmem:[#allocation6 + $0x20] sm:$0xff] }
 0x37b   : > { %1711 = vst.msk [vmem:[#allocation6 + $0x38] sm:$0xff] %vm1527_vm8, %v1687_v45  ;;  %v1509_v38 = vpop.permute.xlu1 %1508  ;;  %1949 = vmatprep.mubr.f32.mxu1 %v1794_v46  ;;  %v1799_v2 = vld [vmem:[#allocation6 + $0x48] sm:$0xff] }
 0x37c   : > { %1532 = vst.msk [vmem:[#allocation6 + $0x60] sm:$0xff] %vm1527_vm8, %v1509_v38  ;;  %1950 = vmatmul.mubr.f32.gmra.mrb[2].mxu1 %v1793_v43 }
 0x382   : > { %v1741_v48 = vpop.permute.xlu0 %1740 }
 0x383   : > { %v1564_v49 = vpop.permute.xlu1 %1563  ;;  %1765 = vst.msk [vmem:[#allocation6 + $0x38] sm:$0xff] %vm1582_vm14, %v1741_v48 }
 0x384   : > { %1587 = vst.msk [vmem:[#allocation6 + $0x60] sm:$0xff] %vm1582_vm14, %v1564_v49 }
 0x386   : > { %v1635_v47 = vpop.permute.xlu0 %1634 }
 0x387   : > { %v1456_v0 = vpop.permute.xlu1 %1455  ;;  %1658 = vst.msk [vmem:[#allocation6 + $0x50] sm:$0xff] %vm1472_vm7, %v1635_v47 }
 0x388   : > { %1478 = vst.msk [vmem:[#allocation6 + $0x78] sm:$0xff] %vm1472_vm7, %v1456_v0 }
 0x38a   : > { %v1689_v50 = vpop.permute.xlu0 %1688  ;;  %v1797_v51 = vld [vmem:[#allocation6 + $0x38] sm:$0xff] }
 0x38b   : > { %1712 = vst.msk [vmem:[#allocation6 + $0x50] sm:$0xff] %vm1527_vm8, %v1689_v50  ;;  %v1511_v52 = vpop.permute.xlu1 %1510  ;;  %1954 = vmatprep.mubr.f32.mxu1 %v1797_v51  ;;  %v1802_v13 = vld [vmem:[#allocation6 + $0x60] sm:$0xff] }
 0x38c   : > { %1533 = vst.msk [vmem:[#allocation6 + $0x78] sm:$0xff] %vm1527_vm8, %v1511_v52  ;;  %1955 = vmatmul.mubr.f32.gmra.mrb[4].mxu1 %v1796_v54  ;;  %v2591_v54 = vld [vmem:[#allocation17 + $0x80] sm:$0xff] }
 0x392   : > { %v1743_v55 = vpop.permute.xlu0 %1742 }
 0x393   : > { %v1566_v56 = vpop.permute.xlu1 %1565  ;;  %1766 = vst.msk [vmem:[#allocation6 + $0x50] sm:$0xff] %vm1582_vm14, %v1743_v55  ;;  %v2592_v55 = vld [vmem:[#allocation17 + $0x88] sm:$0xff] }
 0x394   : > { %1588 = vst.msk [vmem:[#allocation6 + $0x78] sm:$0xff] %vm1582_vm14, %v1566_v56  ;;  %v9796_v56 = vpack.c.bf16 %v2592_v55, %v2591_v54  ;;  %v2586_v54 = vld [vmem:[#allocation17 + $0x58] sm:$0xff] }
 0x396   : > { %v1637_v57 = vpop.permute.xlu0 %1636  ;;  %9797 = vmatprep.subr.bf16.mxu1 %v9796_v56 }
 0x397   : > { %v1458_v58 = vpop.permute.xlu1 %1457  ;;  %1659 = vst.msk [vmem:[#allocation6 + $0x68] sm:$0xff] %vm1472_vm7, %v1637_v57  ;;  %v2575_v57 = vld [vmem:[#allocation17] sm:$0xff] }
 0x398   : > { %1479 = vst.msk [vmem:[#allocation6 + $0x90] sm:$0xff] %vm1472_vm7, %v1458_v58  ;;  %v2576_v58 = vld [vmem:[#allocation17 + $0x8] sm:$0xff] }
 0x39a   : > { %v1691_v59 = vpop.permute.xlu0 %1690  ;;  %v1800_v60 = vld [vmem:[#allocation6 + $0x50] sm:$0xff] }
 0x39b   : > { %1713 = vst.msk [vmem:[#allocation6 + $0x68] sm:$0xff] %vm1527_vm8, %v1691_v59  ;;  %v1513_v61 = vpop.permute.xlu1 %1512  ;;  %1959 = vmatprep.mubr.f32.mxu1 %v1800_v60  ;;  %v1805_v18 = vld [vmem:[#allocation6 + $0x78] sm:$0xff]  ;;  %v9798_v59 = vpack.c.bf16 %v2576_v58, %v2575_v57  ;;  %v2593_v60 = vld [vmem:[#allocation17 + $0x90] sm:$0xff]  ;;  %v2603_v57 = vld [vmem:[#allocation17 + $0xe0] sm:$0xff] }
 0x39c   : > { %1534 = vst.msk [vmem:[#allocation6 + $0x90] sm:$0xff] %vm1527_vm8, %v1513_v61  ;;  %1960 = vmatmul.mubr.f32.gmra.mrb[6].mxu1 %v1799_v2  ;;  %v2594_v61 = vld [vmem:[#allocation17 + $0x98] sm:$0xff]  ;;  %v2577_v2 = vld [vmem:[#allocation17 + $0x10] sm:$0xff]  ;;  %v2604_v58 = vld [vmem:[#allocation17 + $0xe8] sm:$0xff] }
 0x39d   : > { %9799 = vmatpush3.bf16.msra.mxu1 %v9798_v59  ;;  %v9820_v59 = vpack.c.bf16 %v2604_v58, %v2603_v57 }
 0x3a2   : > { %v1745_v4 = vpop.permute.xlu0 %1744 }
 0x3a3   : > { %v1568_v7 = vpop.permute.xlu1 %1567  ;;  %1767 = vst.msk [vmem:[#allocation6 + $0x68] sm:$0xff] %vm1582_vm14, %v1745_v4  ;;  %v9800_v4 = vpack.c.bf16 %v2594_v61, %v2593_v60 }
 0x3a4   : > { %1589 = vst.msk [vmem:[#allocation6 + $0x90] sm:$0xff] %vm1582_vm14, %v1568_v7  ;;  %v2578_v7 = vld [vmem:[#allocation17 + $0x18] sm:$0xff] }
 0x3a5   : > { %9801 = vmatprep.subr.bf16.mxu1 %v9800_v4  ;;  %v2587_v4 = vld [vmem:[#allocation17 + $0x60] sm:$0xff] }
 0x3a6   : > { %v1639_v8 = vpop.permute.xlu0 %1638 }
 0x3a7   : > { %v1460_v9 = vpop.permute.xlu1 %1459  ;;  %1660 = vst.msk [vmem:[#allocation6 + $0x80] sm:$0xff] %vm1472_vm7, %v1639_v8  ;;  %v2223_v8 = vld [vmem:[#allocation3] sm:$0xff] }
 0x3a8   : > { %1480 = vst.msk [vmem:[#allocation6 + $0xa8] sm:$0xff] %vm1472_vm7, %v1460_v9  ;;  %v2595_v9 = vld [vmem:[#allocation17 + $0xa0] sm:$0xff] }
 0x3a9   : > { %2232 = vst.msk [vmem:[#allocation7] sm:$0xff] %vm2213_vm15, %v2223_v8 }
 0x3aa   : > { %v1693_v10 = vpop.permute.xlu0 %1692  ;;  %v1803_v11 = vld [vmem:[#allocation6 + $0x68] sm:$0xff] }
 0x3ab   : > { %1714 = vst.msk [vmem:[#allocation6 + $0x80] sm:$0xff] %vm1527_vm8, %v1693_v10  ;;  %v1515_v12 = vpop.permute.xlu1 %1514  ;;  %1964 = vmatprep.mubr.f32.mxu1 %v1803_v11  ;;  %v1808_v27 = vld [vmem:[#allocation6 + $0x90] sm:$0xff]  ;;  %v9802_v10 = vpack.c.bf16 %v2578_v7, %v2577_v2  ;;  %v2596_v11 = vld [vmem:[#allocation17 + $0xa8] sm:$0xff] }
 0x3ac   : > { %1535 = vst.msk [vmem:[#allocation6 + $0xa8] sm:$0xff] %vm1527_vm8, %v1515_v12  ;;  %1965 = vmatmul.mubr.f32.gmra.mrb[8].mxu1 %v1802_v13  ;;  %v2588_v7 = vld [vmem:[#allocation17 + $0x68] sm:$0xff] }
 0x3ad   : > { %9803 = vmatpush3.bf16.msra.mxu1 %v9802_v10  ;;  %v9822_v10 = vpack.c.bf16 %v2588_v7, %v2587_v4 }
 0x3b2   : > { %v1747_v1 = vpop.permute.xlu0 %1746 }
 0x3b3   : > { %v1570_v3 = vpop.permute.xlu1 %1569  ;;  %1768 = vst.msk [vmem:[#allocation6 + $0x80] sm:$0xff] %vm1582_vm14, %v1747_v1  ;;  %v9804_v1 = vpack.c.bf16 %v2596_v11, %v2595_v9  ;;  %v2606_v11 = vld [vmem:[#allocation17 + $0xf8] sm:$0xff] }
 0x3b4   : > { %1590 = vst.msk [vmem:[#allocation6 + $0xa8] sm:$0xff] %vm1582_vm14, %v1570_v3 }
 0x3b5   : > { %9805 = vmatprep.subr.bf16.mxu1 %v9804_v1 }
 0x3b6   : > { %v1641_v5 = vpop.permute.xlu0 %1640 }
 0x3b7   : > { %v1462_v14 = vpop.permute.xlu1 %1461  ;;  %1661 = vst.msk [vmem:[#allocation6 + $0x98] sm:$0xff] %vm1472_vm7, %v1641_v5 }
 0x3b8   : > { %1481 = vst.msk [vmem:[#allocation6 + $0xc0] sm:$0xff] %vm1472_vm7, %v1462_v14  ;;  %v12646_v14 = vld [vmem:[#allocation14] ss:$0 sm:$0xff] }
 0x3ba   : > { %v1695_v15 = vpop.permute.xlu0 %1694  ;;  %v1806_v17 = vld [vmem:[#allocation6 + $0x80] sm:$0xff] }
 0x3bb   : > { %1715 = vst.msk [vmem:[#allocation6 + $0x98] sm:$0xff] %vm1527_vm8, %v1695_v15  ;;  %v1517_v63 = vpop.permute.xlu1 %1516  ;;  %1969 = vmatprep.mubr.f32.mxu1 %v1806_v17  ;;  %v1811_v36 = vld [vmem:[#allocation6 + $0xa8] sm:$0xff] }
 0x3bc   : > { %1536 = vst.msk [vmem:[#allocation6 + $0xc0] sm:$0xff] %vm1527_vm8, %v1517_v63  ;;  %1970 = vmatmul.mubr.f32.gmra.mrb[10].mxu1 %v1805_v18  ;;  %v2579_v63 = vld [vmem:[#allocation17 + $0x20] sm:$0xff]  ;;  %v2580_v18 = vld [vmem:[#allocation17 + $0x28] sm:$0xff] }
 0x3be   : > { %v1749_v19 = vpop.permute.xlu0 %1748 }
 0x3bf   : > { %1769 = vst.msk [vmem:[#allocation6 + $0x98] sm:$0xff] %vm1582_vm14, %v1749_v19  ;;  %v1572_v21 = vpop.permute.xlu1 %1571  ;;  %v12649_v19 = vld [vmem:[#allocation16] ss:$0 sm:$0xff] }
 0x3c0   : > { %1591 = vst.msk [vmem:[#allocation6 + $0xc0] sm:$0xff] %vm1582_vm14, %v1572_v21  ;;  %v9806_v21 = vpack.c.bf16 %v2580_v18, %v2579_v63 }
 0x3c2   : > { %v1643_v23 = vpop.permute.xlu0 %1642  ;;  %9807 = vmatpush3.bf16.msra.mxu1 %v9806_v21 }
 0x3c3   : > { %1662 = vst.msk [vmem:[#allocation6 + $0xb0] sm:$0xff] %vm1472_vm7, %v1643_v23  ;;  %v2296_v23 = vld [vmem:[#allocation3 + $0x2] sm:$0xff] }
 0x3c4   : > { %2305 = vst.msk [vmem:[#allocation7 + $0x8] sm:$0xff] %vm2213_vm15, %v2296_v23 }
 0x3c6   : > { %v1697_v24 = vpop.permute.xlu0 %1696  ;;  %v1809_v25 = vld [vmem:[#allocation6 + $0x98] sm:$0xff] }
 0x3c7   : > { %1716 = vst.msk [vmem:[#allocation6 + $0xb0] sm:$0xff] %vm1527_vm8, %v1697_v24  ;;  %1974 = vmatprep.mubr.f32.mxu1 %v1809_v25  ;;  %v1814_v40 = vld [vmem:[#allocation6 + $0xc0] sm:$0xff] }
 0x3c8   : > { %1975 = vmatmul.mubr.f32.gmra.mrb[12].mxu1 %v1808_v27  ;;  %v2597_v25 = vld [vmem:[#allocation17 + $0xb0] sm:$0xff]  ;;  %v2598_v27 = vld [vmem:[#allocation17 + $0xb8] sm:$0xff] }
 0x3ca   : > { %v1751_v26 = vpop.permute.xlu0 %1750 }
 0x3cb   : > { %1770 = vst.msk [vmem:[#allocation6 + $0xb0] sm:$0xff] %vm1582_vm14, %v1751_v26  ;;  %v12612_v28 = vpop.f32.mrb[18].mxu0 }
 0x3cc   : > { %v8173_v30 = vpop.f32.mrb[19].mxu0 }
 0x3cd   : > { %v2581_v30 = vld [vmem:[#allocation17 + $0x30] sm:$0xff] }
 0x3ce   : > { %v1645_v29 = vpop.permute.xlu0 %1644 }
 0x3cf   : > { %1663 = vst.msk [vmem:[#allocation6 + $0xc8] sm:$0xff] %vm1472_vm7, %v1645_v29  ;;  %v2582_v29 = vld [vmem:[#allocation17 + $0x38] sm:$0xff] }
 0x3d0   : > { %1717 = vst.msk [vmem:[#allocation6 + $0xc8] sm:$0xff] %vm1527_vm8, %v12541_v20  ;;  %v9810_v31 = vpack.c.bf16 %v2582_v29, %v2581_v30 }
 0x3d2   : > { %v1753_v33 = vpop.permute.xlu0 %1752  ;;  %v1812_v34 = vld [vmem:[#allocation6 + $0xb0] sm:$0xff] }
 0x3d3   : > { %1771 = vst.msk [vmem:[#allocation6 + $0xc8] sm:$0xff] %vm1582_vm14, %v1753_v33  ;;  %1979 = vmatprep.mubr.f32.mxu1 %v1812_v34  ;;  %v2599_v33 = vld [vmem:[#allocation17 + $0xc0] sm:$0xff]  ;;  %v2600_v34 = vld [vmem:[#allocation17 + $0xc8] sm:$0xff] }
 0x3d4   : > { %1980 = vmatmul.mubr.f32.gmra.mrb[14].mxu1 %v1811_v36 }
 0x3da   : > { %v1815_v35 = vld [vmem:[#allocation6 + $0xc8] sm:$0xff] }
 0x3db   : > { %1984 = vmatprep.mubr.f32.mxu1 %v1815_v35  ;;  %v9812_v35 = vpack.c.bf16 %v2600_v34, %v2599_v33 }
 0x3dc   : > { %1985 = vmatmul.mubr.f32.gmra.mrb[16].mxu1 %v1814_v40 }
 0x3dd   : > { %v12619_v37 = vpop.f32.mrb[20].mxu0 }
 0x3de   : > { %v8176_v39 = vpop.f32.mrb[21].mxu0 }
 0x3df   : > { %v2583_v39 = vld [vmem:[#allocation17 + $0x40] sm:$0xff] }
 0x3e3   : > { %v12631_v43 = vpop.permute.xlu0 %2169 }
 0x3e4   : > { %vm2195_vm6 = vcmp.eq.s32.totalorder %v12631_v43, 1 }
 0x3e7   : > { %v12635_v47 = vpop.permute.xlu0 %2175 }
 0x3e8   : > { %vm2197_vm8 = vcmp.eq.s32.totalorder %v12635_v47, 1 }
 0x3eb   : > { %v12639_v50 = vpop.permute.xlu0 %2181 }
 0x3ec   : > { %vm2199_vm10 = vcmp.eq.s32.totalorder %v12639_v50, 1 }
 0x3ed   : > { %v12621_v41 = vpop.f32.mrb[22].mxu0 }
 0x3ee   : > { %v8179_v20 = vpop.f32.mrb[23].mxu0 }
 0x3ef   : > { %v12641_v52 = vpop.permute.xlu0 %2187  ;;  %v2584_v20 = vld [vmem:[#allocation17 + $0x48] sm:$0xff] }
 0x3f0   : > { %vm2201_vm12 = vcmp.eq.s32.totalorder %v12641_v52, 1 }
 0x3f3   : > { %v12644_v12 = vpop.permute.xlu0 %2193 }
 0x3f4   : > { %vm2203_vm0 = vcmp.eq.s32.totalorder %v12644_v12, 1 }
 0x3f7   : > { %v2260_v17 = vpop.permute.xlu0 %2259 }
 0x3f8   : > { %2287 = vst.msk [vmem:[#allocation7] sm:$0xff] %vm2286_vm1, %v2260_v17 }
 0x3fd   : > { %v12623_v62 = vpop.f32.mrb[24].mxu0 }
 0x3fe   : > { %v8182_v22 = vpop.f32.mrb[25].mxu0 }
 0x3ff   : > { %v9814_v22 = vpack.c.bf16 %v2584_v20, %v2583_v39 }
 0x40d   : > { %v12625_v42 = vpop.f32.mrb[26].mxu0 }
 0x40e   : > { %v8185_v32 = vpop.f32.mrb[27].mxu0 }
 0x40f   : > { %v2601_v32 = vld [vmem:[#allocation17 + $0xd0] sm:$0xff] }
 0x41d   : > { %v12627_v44 = vpop.f32.mrb[28].mxu0 }
 0x41e   : > { %v8188_v45 = vpop.f32.mrb[29].mxu0 }
 0x41f   : > { %v2602_v45 = vld [vmem:[#allocation17 + $0xd8] sm:$0xff] }
 0x424   : > { %v12629_v46 = vpop.f32.mrb[30].mxu0 }
 0x425   : > { %v8191_v38 = vpop.f32.mrb[31].mxu0 }
 0x428   : > { %v12633_v48 = vpop.f32.mrb[32].mxu0 }
 0x429   : > { %v8194_v49 = vpop.f32.mrb[33].mxu0 }
 0x42a   : > { %v9816_v49 = vpack.c.bf16 %v2602_v45, %v2601_v32 }
 0x42c   : > { %v12637_v0 = vpop.f32.mrb[34].mxu0 }
 0x42d   : > { %v8197_v51 = vpop.f32.mrb[35].mxu0 }
 0x42e   : > { %v2585_v51 = vld [vmem:[#allocation17 + $0x50] sm:$0xff] }
 0x42f   : > { %v9818_v56 = vpack.c.bf16 %v2586_v54, %v2585_v51 }
 0x440   : > { %v7212_v13 = vpop.f32.mrb[0].mxu1 }
 0x441   : > { %v7213_v3 = vpop.f32.mrb[1].mxu1 }
 0x442   : > { %v7214_v5 = vadd.f32 %v7213_v3, %v7212_v13  ;;  %v2173_v13 = vpop.permute.xlu1 %2172 }
 0x443   : > { %vm2196_vm7 = vcmp.eq.s32.totalorder %v2173_v13, 1 }
 0x444   : > { %v2057_v15 = vadd.f32 %v7214_v5, %v12612_v28  ;;  %v9808_v28 = vpack.c.bf16 %v2598_v27, %v2597_v25  ;;  %v2589_v5 = vld [vmem:[#allocation17 + $0x70] sm:$0xff] }
 0x446   : > { %v2107_v24 = vmul.f32 %v12646_v14, %v2057_v15  ;;  %9809 = vmatprep.subr.bf16.mxu1 %v9808_v28  ;;  %v2590_v15 = vld [vmem:[#allocation17 + $0x78] sm:$0xff] }
 0x447   : > { %9811 = vmatpush3.bf16.msra.mxu1 %v9810_v31  ;;  %v9826_v17 = vpack.c.bf16 %v2590_v15, %v2589_v5 }
 0x448   : > { %v2123_v26 = vadd.f32 %v12649_v19, %v2107_v24  ;;  %9813 = vmatprep.subr.bf16.mxu1 %v9812_v35 }
 0x44a   : > { %v2150_v36 = vmax.f32 %v2123_v26, 0.0 }
 0x44b   : > { %9815 = vmatpush3.bf16.msra.mxu1 %v9814_v22 }
 0x44c   : > { %v2204_v40 = vsel %vm2195_vm6, %v2150_v36, 0.0  ;;  %9817 = vmatprep.subr.bf16.mxu1 %v9816_v49 }
 0x44d   : > { %2214 = vst.msk [vmem:[#allocation3 + $0xa] sm:$0xff] %vm2213_vm15, %v2204_v40 }
 0x44f   : > { %v7215_v38 = vpop.f32.mrb[2].mxu1  ;;  %9819 = vmatpush3.bf16.msra.mxu1 %v9818_v56 }
 0x450   : > { %v7216_v55 = vpop.f32.mrb[3].mxu1  ;;  %9821 = vmatprep.subr.bf16.mxu1 %v9820_v59 }
 0x451   : > { %v7217_v43 = vadd.f32 %v7216_v55, %v7215_v38 }
 0x453   : > { %v2062_v60 = vadd.f32 %v7217_v43, %v12619_v37  ;;  %v2605_v37 = vld [vmem:[#allocation17 + $0xf0] sm:$0xff]  ;;  %9823 = vmatpush3.bf16.msra.mxu1 %v9822_v10 }
 0x454   : > { %v2314_v61 = vld [vmem:[#allocation3 + $0x9] sm:$0xff]  ;;  %v9824_v3 = vpack.c.bf16 %v2606_v11, %v2605_v37 }
 0x455   : > { %v2224_v2 = vld [vmem:[#allocation3 + $0x8] sm:$0xff]  ;;  %2332 = vrot.lane.b32.xlu1 %v2314_v61, %s11552_s26  ;;  %2261 = vrot.lane.b32.xlu0 %v2314_v61, %s11552_s26  ;;  %v2108_v9 = vmul.f32 %v12646_v14, %v2062_v60 }
 0x456   : > { %2233 = vst.msk [vmem:[#allocation7 + $0x28] sm:$0xff] %vm2213_vm15, %v2224_v2  ;;  %v2297_v8 = vld [vmem:[#allocation3 + $0xa] sm:$0xff]  ;;  %9825 = vmatprep.subr.bf16.mxu1 %v9824_v3 }
 0x457   : > { %2306 = vst.msk [vmem:[#allocation7 + $0x30] sm:$0xff] %vm2213_vm15, %v2297_v8  ;;  %2377 = vst.msk [vmem:[#allocation7 + $0x10] sm:$0xff] %vm2213_vm15, %v2297_v8  ;;  %v2124_v1 = vadd.f32 %v12649_v19, %v2108_v9  ;;  %9827 = vmatpush3.bf16.msra.mxu1 %v9826_v17 }
 0x459   : > { %v2151_v63 = vmax.f32 %v2124_v1, 0.0 }
 0x45b   : > { %v2205_v18 = vsel %vm2196_vm7, %v2151_v63, 0.0 }
 0x45c   : > { %2215 = vst.msk [vmem:[#allocation3 + $0x12] sm:$0xff] %vm2213_vm15, %v2205_v18  ;;  %v2623_v18 = vld [vmem:[#allocation17 + $0x180] sm:$0xff] }
 0x45f   : > { %v7218_v21 = vpop.f32.mrb[4].mxu1 }
 0x460   : > { %v7219_v23 = vpop.f32.mrb[5].mxu1 }
 0x461   : > { %v7220_v24 = vadd.f32 %v7219_v23, %v7218_v21  ;;  %v2624_v21 = vld [vmem:[#allocation17 + $0x188] sm:$0xff] }
 0x462   : > { %v9828_v23 = vpack.c.bf16 %v2624_v21, %v2623_v18 }
 0x463   : > { %v2067_v25 = vadd.f32 %v7220_v24, %v12621_v41  ;;  %v2315_v27 = vld [vmem:[#allocation3 + $0x11] sm:$0xff] }
 0x464   : > { %v2225_v26 = vld [vmem:[#allocation3 + $0x10] sm:$0xff]  ;;  %2334 = vrot.lane.b32.xlu1 %v2315_v27, %s11552_s26  ;;  %2263 = vrot.lane.b32.xlu0 %v2315_v27, %s11552_s26  ;;  %v2607_v24 = vld [vmem:[#allocation17 + $0x100] sm:$0xff] }
 0x465   : > { %2234 = vst.msk [vmem:[#allocation7 + $0x50] sm:$0xff] %vm2213_vm15, %v2225_v26  ;;  %v2298_v28 = vld [vmem:[#allocation3 + $0x12] sm:$0xff]  ;;  %v2109_v30 = vmul.f32 %v12646_v14, %v2067_v25  ;;  %v2608_v25 = vld [vmem:[#allocation17 + $0x108] sm:$0xff]  ;;  %10904 = vmatprep.subr.bf16.mxu1 %v9828_v23  ;;  %9829 = vmatprep.subr.bf16.mxu0 %v9828_v23  ;;  %v2617_v23 = vld [vmem:[#allocation17 + $0x150] sm:$0xff] }
 0x466   : > { %2307 = vst.msk [vmem:[#allocation7 + $0x58] sm:$0xff] %vm2213_vm15, %v2298_v28  ;;  %2378 = vst.msk [vmem:[#allocation7 + $0x38] sm:$0xff] %vm2213_vm15, %v2298_v28  ;;  %v12713_v26 = vpack.c.bf16 %v2608_v25, %v2607_v24  ;;  %v2618_v24 = vld [vmem:[#allocation17 + $0x158] sm:$0xff] }
 0x467   : > { %2449 = vst.msk [vmem:[#allocation7 + $0x18] sm:$0xff] %vm2213_vm15, %v2298_v28  ;;  %v2125_v29 = vadd.f32 %v12649_v19, %v2109_v30  ;;  %v12767_v25 = vpack.c.bf16 %v2618_v24, %v2617_v23  ;;  %v3043_v23 = vld [vmem:[#allocation8 + $0x38] sm:$0xff] }
 0x468   : > { %9831 = vmatpush3.bf16.msra.mxu0 %v12713_v26 }
 0x469   : > { %v2152_v41 = vmax.f32 %v2125_v29, 0.0 }
 0x46b   : > { %v2206_v31 = vsel %vm2197_vm8, %v2152_v41, 0.0  ;;  %v2625_v41 = vld [vmem:[#allocation17 + $0x190] sm:$0xff] }
 0x46c   : > { %2216 = vst.msk [vmem:[#allocation3 + $0x1a] sm:$0xff] %vm2213_vm15, %v2206_v31  ;;  %v2626_v31 = vld [vmem:[#allocation17 + $0x198] sm:$0xff] }
 0x46f   : > { %v7221_v33 = vpop.f32.mrb[6].mxu1 }
 0x470   : > { %v7222_v34 = vpop.f32.mrb[7].mxu1 }
 0x471   : > { %v7223_v36 = vadd.f32 %v7222_v34, %v7221_v33  ;;  %v12721_v34 = vpack.c.bf16 %v2626_v31, %v2625_v41  ;;  %v2620_v41 = vld [vmem:[#allocation17 + $0x168] sm:$0xff] }
 0x473   : > { %v2072_v35 = vadd.f32 %v7223_v36, %v12623_v62  ;;  %v2316_v40 = vld [vmem:[#allocation3 + $0x19] sm:$0xff]  ;;  %v2179_v62 = vpop.permute.xlu1 %2178  ;;  %v2609_v36 = vld [vmem:[#allocation17 + $0x110] sm:$0xff]  ;;  %9833 = vmatprep.subr.bf16.mxu0 %v12721_v34 }
 0x474   : > { %v2226_v39 = vld [vmem:[#allocation3 + $0x18] sm:$0xff]  ;;  %2336 = vrot.lane.b32.xlu1 %v2316_v40, %s11552_s26  ;;  %2265 = vrot.lane.b32.xlu0 %v2316_v40, %s11552_s26  ;;  %vm2198_vm9 = vcmp.eq.s32.totalorder %v2179_v62, 1 }
 0x475   : > { %2235 = vst.msk [vmem:[#allocation7 + $0x78] sm:$0xff] %vm2213_vm15, %v2226_v39  ;;  %v2299_v20 = vld [vmem:[#allocation3 + $0x1a] sm:$0xff]  ;;  %v2110_v47 = vmul.f32 %v12646_v14, %v2072_v35  ;;  %v2610_v35 = vld [vmem:[#allocation17 + $0x118] sm:$0xff] }
 0x476   : > { %v2512_v22 = vld [vmem:[#allocation3 + $0x14] sm:$0xff]  ;;  %2308 = vst.msk [vmem:[#allocation7 + $0x80] sm:$0xff] %vm2213_vm15, %v2299_v20  ;;  %2379 = vst.msk [vmem:[#allocation7 + $0x60] sm:$0xff] %vm2213_vm15, %v2299_v20  ;;  %v12726_v39 = vpack.c.bf16 %v2610_v35, %v2609_v36 }
 0x477   : > { %2450 = vst.msk [vmem:[#allocation7 + $0x40] sm:$0xff] %vm2213_vm15, %v2299_v20  ;;  %2521 = vst.msk [vmem:[#allocation7 + $0x20] sm:$0xff] %vm2213_vm15, %v2512_v22  ;;  %v2126_v32 = vadd.f32 %v12649_v19, %v2110_v47  ;;  %v2627_v40 = vld [vmem:[#allocation17 + $0x1a0] sm:$0xff]  ;;  %v2628_v20 = vld [vmem:[#allocation17 + $0x1a8] sm:$0xff] }
 0x478   : > { %v12728_v62 = vpack.c.bf16 %v2628_v20, %v2627_v40  ;;  %9835 = vmatpush3.bf16.msra.mxu0 %v12726_v39  ;;  %v2637_v40 = vld [vmem:[#allocation17 + $0x1f0] sm:$0xff]  ;;  %v2638_v20 = vld [vmem:[#allocation17 + $0x1f8] sm:$0xff] }
 0x479   : > { %v2153_v45 = vmax.f32 %v2126_v32, 0.0  ;;  %v2611_v32 = vld [vmem:[#allocation17 + $0x120] sm:$0xff] }
 0x47a   : > { %9837 = vmatprep.subr.bf16.mxu0 %v12728_v62 }
 0x47b   : > { %v2207_v38 = vsel %vm2198_vm9, %v2153_v45, 0.0  ;;  %v2612_v45 = vld [vmem:[#allocation17 + $0x128] sm:$0xff]  ;;  %vm3052_vm9 = vcmp.gt.f32.partialorder %v3043_v23, 0.5 }
 0x47c   : > { %2217 = vst.msk [vmem:[#allocation3 + $0x22] sm:$0xff] %vm2213_vm15, %v2207_v38 }
 0x47f   : > { %v7224_v49 = vpop.f32.mrb[8].mxu1 }
 0x480   : > { %v7225_v51 = vpop.f32.mrb[9].mxu1 }
 0x481   : > { %v7226_v54 = vadd.f32 %v7225_v51, %v7224_v49  ;;  %v12735_v51 = vpack.c.bf16 %v2612_v45, %v2611_v32  ;;  %v2622_v32 = vld [vmem:[#allocation17 + $0x178] sm:$0xff] }
 0x483   : > { %v2077_v55 = vadd.f32 %v7226_v54, %v12625_v42  ;;  %v2317_v56 = vld [vmem:[#allocation3 + $0x21] sm:$0xff]  ;;  %9839 = vmatpush3.bf16.msra.mxu0 %v12735_v51 }
 0x484   : > { %v2227_v57 = vld [vmem:[#allocation3 + $0x20] sm:$0xff]  ;;  %2338 = vrot.lane.b32.xlu1 %v2317_v56, %s11552_s26  ;;  %2267 = vrot.lane.b32.xlu0 %v2317_v56, %s11552_s26  ;;  %v2630_v56 = vld [vmem:[#allocation17 + $0x1b8] sm:$0xff] }
 0x485   : > { %2236 = vst.msk [vmem:[#allocation7 + $0xa0] sm:$0xff] %vm2213_vm15, %v2227_v57  ;;  %v2300_v58 = vld [vmem:[#allocation3 + $0x22] sm:$0xff]  ;;  %v2111_v59 = vmul.f32 %v12646_v14, %v2077_v55 }
 0x486   : > { %v2513_v43 = vld [vmem:[#allocation3 + $0x1c] sm:$0xff]  ;;  %2309 = vst.msk [vmem:[#allocation7 + $0xa8] sm:$0xff] %vm2213_vm15, %v2300_v58  ;;  %2380 = vst.msk [vmem:[#allocation7 + $0x88] sm:$0xff] %vm2213_vm15, %v2300_v58  ;;  %v2629_v55 = vld [vmem:[#allocation17 + $0x1b0] sm:$0xff] }
 0x487   : > { %2451 = vst.msk [vmem:[#allocation7 + $0x68] sm:$0xff] %vm2213_vm15, %v2300_v58  ;;  %2522 = vst.msk [vmem:[#allocation7 + $0x48] sm:$0xff] %vm2213_vm15, %v2513_v43  ;;  %v2127_v42 = vadd.f32 %v12649_v19, %v2111_v59  ;;  %v2613_v57 = vld [vmem:[#allocation17 + $0x130] sm:$0xff]  ;;  %v12740_v43 = vpack.c.bf16 %v2630_v56, %v2629_v55  ;;  %v2614_v59 = vld [vmem:[#allocation17 + $0x138] sm:$0xff] }
 0x488   : > { %v2466_v55 = vld [vmem:[#allocation3 + $0x53] sm:$0xff] }
 0x489   : > { %v2154_v60 = vmax.f32 %v2127_v42, 0.0  ;;  %9841 = vmatprep.subr.bf16.mxu0 %v12740_v43 }
 0x48b   : > { %v2208_v61 = vsel %vm2199_vm10, %v2154_v60, 0.0 }
 0x48c   : > { %2218 = vst.msk [vmem:[#allocation3 + $0x2a] sm:$0xff] %vm2213_vm15, %v2208_v61 }
 0x48f   : > { %v7227_v2 = vpop.f32.mrb[10].mxu1 }
 0x490   : > { %v7228_v4 = vpop.f32.mrb[11].mxu1 }
 0x491   : > { %v7229_v7 = vadd.f32 %v7228_v4, %v7227_v2 }
 0x493   : > { %v2082_v8 = vadd.f32 %v7229_v7, %v12627_v44  ;;  %v2318_v9 = vld [vmem:[#allocation3 + $0x29] sm:$0xff]  ;;  %v2185_v44 = vpop.permute.xlu1 %2184  ;;  %v12743_v7 = vpack.c.bf16 %v2614_v59, %v2613_v57 }
 0x494   : > { %v2228_v10 = vld [vmem:[#allocation3 + $0x28] sm:$0xff]  ;;  %2340 = vrot.lane.b32.xlu1 %v2318_v9, %s11552_s26  ;;  %2269 = vrot.lane.b32.xlu0 %v2318_v9, %s11552_s26  ;;  %vm2200_vm11 = vcmp.eq.s32.totalorder %v2185_v44, 1  ;;  %v2631_v9 = vld [vmem:[#allocation17 + $0x1c0] sm:$0xff] }
 0x495   : > { %2237 = vst.msk [vmem:[#allocation7 + $0xc8] sm:$0xff] %vm2213_vm15, %v2228_v10  ;;  %v2301_v37 = vld [vmem:[#allocation3 + $0x2a] sm:$0xff]  ;;  %v2112_v50 = vmul.f32 %v12646_v14, %v2082_v8  ;;  %v2632_v10 = vld [vmem:[#allocation17 + $0x1c8] sm:$0xff]  ;;  %v2615_v44 = vld [vmem:[#allocation17 + $0x140] sm:$0xff]  ;;  %9843 = vmatpush3.bf16.msra.mxu0 %v12743_v7 }
 0x496   : > { %v2514_v11 = vld [vmem:[#allocation3 + $0x24] sm:$0xff]  ;;  %2310 = vst.msk [vmem:[#allocation7 + $0xd0] sm:$0xff] %vm2213_vm15, %v2301_v37  ;;  %2381 = vst.msk [vmem:[#allocation7 + $0xb0] sm:$0xff] %vm2213_vm15, %v2301_v37 }
 0x497   : > { %2452 = vst.msk [vmem:[#allocation7 + $0x90] sm:$0xff] %vm2213_vm15, %v2301_v37  ;;  %2523 = vst.msk [vmem:[#allocation7 + $0x70] sm:$0xff] %vm2213_vm15, %v2514_v11  ;;  %v2128_v13 = vadd.f32 %v12649_v19, %v2112_v50  ;;  %v2191_v42 = vpop.permute.xlu1 %2190  ;;  %v12750_v50 = vpack.c.bf16 %v2632_v10, %v2631_v9  ;;  %v2386_v59 = vld [vmem:[#allocation3 + $0xb] sm:$0xff] }
 0x498   : > { %vm2202_vm13 = vcmp.eq.s32.totalorder %v2191_v42, 1  ;;  %v2387_v42 = vld [vmem:[#allocation3 + $0x13] sm:$0xff] }
 0x499   : > { %v2155_v1 = vmax.f32 %v2128_v13, 0.0  ;;  %v2616_v13 = vld [vmem:[#allocation17 + $0x148] sm:$0xff]  ;;  %9845 = vmatprep.subr.bf16.mxu0 %v12750_v50  ;;  %v3037_v10 = vld [vmem:[#allocation8 + $0x8] sm:$0xff] }
 0x49a   : > { %vm3046_vm2 = vcmp.gt.f32.partialorder %v3037_v10, 0.5  ;;  %v2641_v10 = vld [vmem:[#allocation17 + $0x210] sm:$0xff] }
 0x49b   : > { %v2209_v3 = vsel %vm2200_vm11, %v2155_v1, 0.0  ;;  %v7230_v5 = vpop.f32.mrb[12].mxu1  ;;  %v2633_v1 = vld [vmem:[#allocation17 + $0x1d0] sm:$0xff] }
 0x49c   : > { %2219 = vst.msk [vmem:[#allocation3 + $0x32] sm:$0xff] %vm2213_vm15, %v2209_v3  ;;  %v7231_v15 = vpop.f32.mrb[13].mxu1  ;;  %v2634_v3 = vld [vmem:[#allocation17 + $0x1d8] sm:$0xff] }
 0x49d   : > { %v7232_v17 = vadd.f32 %v7231_v15, %v7230_v5  ;;  %v12761_v18 = vpack.c.bf16 %v2634_v3, %v2633_v1  ;;  %v3039_v1 = vld [vmem:[#allocation8 + $0x18] sm:$0xff] }
 0x49e   : > { %vm3048_vm6 = vcmp.gt.f32.partialorder %v3039_v1, 0.5 }
 0x49f   : > { %v2087_v63 = vadd.f32 %v7232_v17, %v12629_v46 }
 0x4a1   : > { %v2113_v27 = vmul.f32 %v12646_v14, %v2087_v63  ;;  %v12756_v63 = vpack.c.bf16 %v2616_v13, %v2615_v44  ;;  %v3042_v13 = vld [vmem:[#allocation8 + $0x30] sm:$0xff] }
 0x4a2   : > { %vm3051_vm14 = vcmp.gt.f32.partialorder %v3042_v13, 0.5 }
 0x4a3   : > { %v2129_v28 = vadd.f32 %v12649_v19, %v2113_v27  ;;  %v2319_v30 = vld [vmem:[#allocation3 + $0x31] sm:$0xff]  ;;  %9847 = vmatpush3.bf16.msra.mxu0 %v12756_v63 }
 0x4a4   : > { %v2229_v29 = vld [vmem:[#allocation3 + $0x30] sm:$0xff]  ;;  %2342 = vrot.lane.b32.xlu1 %v2319_v30, %s11552_s26  ;;  %2271 = vrot.lane.b32.xlu0 %v2319_v30, %s11552_s26  ;;  %v2635_v27 = vld [vmem:[#allocation17 + $0x1e0] sm:$0xff] }
 0x4a5   : > { %2238 = vst.msk [vmem:[#allocation7 + $0xf0] sm:$0xff] %vm2213_vm15, %v2229_v29  ;;  %v2302_v46 = vld [vmem:[#allocation3 + $0x32] sm:$0xff]  ;;  %v2156_v33 = vmax.f32 %v2129_v28, 0.0  ;;  %9849 = vmatprep.subr.bf16.mxu0 %v12761_v18  ;;  %v2636_v28 = vld [vmem:[#allocation17 + $0x1e8] sm:$0xff] }
 0x4a6   : > { %2311 = vst.msk [vmem:[#allocation7 + $0xf8] sm:$0xff] %vm2213_vm15, %v2302_v46  ;;  %2382 = vst.msk [vmem:[#allocation7 + $0xd8] sm:$0xff] %vm2213_vm15, %v2302_v46  ;;  %v2515_v38 = vld [vmem:[#allocation3 + $0x2c] sm:$0xff]  ;;  %v12769_v29 = vpack.c.bf16 %v2636_v28, %v2635_v27 }
 0x4a7   : > { %2453 = vst.msk [vmem:[#allocation7 + $0xb8] sm:$0xff] %vm2213_vm15, %v2302_v46  ;;  %v2210_v22 = vsel %vm2201_vm12, %v2156_v33, 0.0  ;;  %v7233_v47 = vpop.f32.mrb[14].mxu1  ;;  %2524 = vst.msk [vmem:[#allocation7 + $0x98] sm:$0xff] %vm2213_vm15, %v2515_v38  ;;  %9851 = vmatpush3.bf16.msra.mxu0 %v12767_v25  ;;  %v2619_v46 = vld [vmem:[#allocation17 + $0x160] sm:$0xff]  ;;  %v2390_v9 = vld [vmem:[#allocation3 + $0x2b] sm:$0xff] }
 0x4a8   : > { %2220 = vst.msk [vmem:[#allocation3 + $0x3a] sm:$0xff] %vm2213_vm15, %v2210_v22  ;;  %v7234_v49 = vpop.f32.mrb[15].mxu1  ;;  %9853 = vmatprep.subr.bf16.mxu0 %v12769_v29  ;;  %v12786_v22 = vpack.c.bf16 %v2638_v20, %v2637_v40  ;;  %v3044_v27 = vld [vmem:[#allocation8 + $0x40] sm:$0xff] }
 0x4a9   : > { %v7235_v52 = vadd.f32 %v7234_v49, %v7233_v47  ;;  %v2621_v47 = vld [vmem:[#allocation17 + $0x170] sm:$0xff]  ;;  %vm3053_vm10 = vcmp.gt.f32.partialorder %v3044_v27, 0.5 }
 0x4aa   : > { %v12788_v45 = vpack.c.bf16 %v2622_v32, %v2621_v47 }
 0x4ab   : > { %v2092_v54 = vadd.f32 %v7235_v52, %v12633_v48 }
 0x4ad   : > { %v2114_v58 = vmul.f32 %v12646_v14, %v2092_v54 }
 0x4af   : > { %v2130_v60 = vadd.f32 %v12649_v19, %v2114_v58  ;;  %v7236_v61 = vpop.f32.mrb[16].mxu1  ;;  %v2320_v2 = vld [vmem:[#allocation3 + $0x39] sm:$0xff] }
 0x4b0   : > { %v2230_v4 = vld [vmem:[#allocation3 + $0x38] sm:$0xff]  ;;  %v7237_v48 = vpop.f32.mrb[17].mxu1  ;;  %2344 = vrot.lane.b32.xlu1 %v2320_v2, %s11552_s26  ;;  %2273 = vrot.lane.b32.xlu0 %v2320_v2, %s11552_s26 }
 0x4b1   : > { %2239 = vst.msk [vmem:[#allocation7 + $0x118] sm:$0xff] %vm2213_vm15, %v2230_v4  ;;  %v2303_v8 = vld [vmem:[#allocation3 + $0x3a] sm:$0xff]  ;;  %v2157_v37 = vmax.f32 %v2130_v60, 0.0  ;;  %v7238_v11 = vadd.f32 %v7237_v48, %v7236_v61  ;;  %v2389_v4 = vld [vmem:[#allocation3 + $0x23] sm:$0xff] }
 0x4b2   : > { %2312 = vst.msk [vmem:[#allocation7 + $0x120] sm:$0xff] %vm2213_vm15, %v2303_v8  ;;  %2454 = vst.msk [vmem:[#allocation7 + $0xe0] sm:$0xff] %vm2213_vm15, %v2303_v8  ;;  %v2516_v5 = vld [vmem:[#allocation3 + $0x34] sm:$0xff]  ;;  %v2530_v61 = vld [vmem:[#allocation7] sm:$0xff] }
 0x4b3   : > { %2383 = vst.msk [vmem:[#allocation7 + $0x100] sm:$0xff] %vm2213_vm15, %v2303_v8  ;;  %v2211_v15 = vsel %vm2202_vm13, %v2157_v37, 0.0  ;;  %v2097_v17 = vadd.f32 %v7238_v11, %v12637_v0  ;;  %2525 = vst.msk [vmem:[#allocation7 + $0xc0] sm:$0xff] %vm2213_vm15, %v2516_v5  ;;  %v2388_v2 = vld [vmem:[#allocation3 + $0x1b] sm:$0xff]  ;;  %v3036_v5 = vld [vmem:[#allocation8] sm:$0xff] }
 0x4b4   : > { %2221 = vst.msk [vmem:[#allocation3 + $0x42] sm:$0xff] %vm2213_vm15, %v2211_v15  ;;  %v3038_v37 = vld [vmem:[#allocation8 + $0x10] sm:$0xff]  ;;  %v3041_v15 = vld [vmem:[#allocation8 + $0x28] sm:$0xff]  ;;  %vm3045_vm7 = vcmp.gt.f32.partialorder %v3036_v5, 0.5 }
 0x4b5   : > { %v2115_v21 = vmul.f32 %v12646_v14, %v2097_v17  ;;  %v2448_v14 = vld [vmem:[#allocation3 + $0x52] sm:$0xff]  ;;  %vm3047_vm3 = vcmp.gt.f32.partialorder %v3038_v37, 0.5  ;;  %v3069_v17 = vsel %vm3051_vm14, 1, %v11553_v53  ;;  %vm3050_vm8 = vcmp.gt.f32.partialorder %v3041_v15, 0.5 }
 0x4b6   : > { %2457 = vst.msk [vmem:[#allocation7 + $0x158] sm:$0xff] %vm2213_vm15, %v2448_v14  ;;  %v3065_v11 = vsel %vm3047_vm3, 1, %v11553_v53  ;;  %v3063_v24 = vsel %vm3045_vm7, 1, %v11553_v53  ;;  %v3071_v14 = vsel %vm3053_vm10, 1, %v11553_v53  ;;  %v2646_v5 = vld [vmem:[#allocation17 + $0x238] sm:$0xff] }
 0x4b7   : > { %v2131_v0 = vadd.f32 %v12649_v19, %v2115_v21  ;;  %v12774_v19 = vpack.c.bf16 %v2620_v41, %v2619_v46 }
 0x4b9   : > { %v2158_v30 = vmax.f32 %v2131_v0, 0.0  ;;  %9855 = vmatpush3.bf16.msra.mxu0 %v12774_v19  ;;  %v2520_v0 = vld [vmem:[#allocation3 + $0x54] sm:$0xff] }
 0x4ba   : > { %9857 = vmatprep.subr.bf16.mxu0 %v12786_v22  ;;  %2529 = vst.msk [vmem:[#allocation7 + $0x160] sm:$0xff] %vm2213_vm15, %v2520_v0 }
 0x4bb   : > { %v2212_v31 = vsel %vm2203_vm0, %v2158_v30, 0.0  ;;  %v2321_v33 = vld [vmem:[#allocation3 + $0x41] sm:$0xff] }
 0x4bc   : > { %v2231_v36 = vld [vmem:[#allocation3 + $0x40] sm:$0xff]  ;;  %2222 = vst.msk [vmem:[#allocation3 + $0x4a] sm:$0xff] %vm2213_vm15, %v2212_v31  ;;  %2346 = vrot.lane.b32.xlu1 %v2321_v33, %s11552_s26  ;;  %2275 = vrot.lane.b32.xlu0 %v2321_v33, %s11552_s26 }
 0x4bd   : > { %2240 = vst.msk [vmem:[#allocation7 + $0x140] sm:$0xff] %vm2213_vm15, %v2231_v36  ;;  %v2304_v12 = vld [vmem:[#allocation3 + $0x42] sm:$0xff]  ;;  %9859 = vmatpush3.bf16.msra.mxu0 %v12788_v45 }
 0x4be   : > { %v2517_v35 = vld [vmem:[#allocation3 + $0x3c] sm:$0xff]  ;;  %2313 = vst.msk [vmem:[#allocation7 + $0x148] sm:$0xff] %vm2213_vm15, %v2304_v12  ;;  %2455 = vst.msk [vmem:[#allocation7 + $0x108] sm:$0xff] %vm2213_vm15, %v2304_v12  ;;  %9872 = vmatprep.subr.bf16.mxu0 %v11546_v6 }
 0x4bf   : > { %2384 = vst.msk [vmem:[#allocation7 + $0x128] sm:$0xff] %vm2213_vm15, %v2304_v12  ;;  %2526 = vst.msk [vmem:[#allocation7 + $0xe8] sm:$0xff] %vm2213_vm15, %v2517_v35 }
 0x4c3   : > { %v12793_v38 = vld [vmem:[#allocation3 + $0x4b] sm:$0xff] }
 0x4c4   : > { %v2322_v49 = vld [vmem:[#allocation3 + $0x49] sm:$0xff]  ;;  %2420 = vrot.lane.b32.xlu0 %v12793_v38, %s11552_s26 }
 0x4c5   : > { %2348 = vrot.lane.b32.xlu1 %v2322_v49, %s11552_s26  ;;  %v2376_v52 = vld [vmem:[#allocation3 + $0x4a] sm:$0xff] }
 0x4c6   : > { %v2518_v54 = vld [vmem:[#allocation3 + $0x44] sm:$0xff]  ;;  %2385 = vst.msk [vmem:[#allocation7 + $0x150] sm:$0xff] %vm2213_vm15, %v2376_v52  ;;  %2456 = vst.msk [vmem:[#allocation7 + $0x130] sm:$0xff] %vm2213_vm15, %v2376_v52  ;;  %v2519_v56 = vld [vmem:[#allocation3 + $0x4c] sm:$0xff] }
 0x4c7   : > { %2527 = vst.msk [vmem:[#allocation7 + $0x110] sm:$0xff] %vm2213_vm15, %v2518_v54  ;;  %v2333_v57 = vpop.permute.xlu1 %2332  ;;  %v2262_v58 = vpop.permute.xlu0 %2261  ;;  %2528 = vst.msk [vmem:[#allocation7 + $0x138] sm:$0xff] %vm2213_vm15, %v2519_v56 }
 0x4c8   : > { %2359 = vst.msk [vmem:[#allocation7 + $0x8] sm:$0xff] %vm2286_vm1, %v2333_v57  ;;  %2288 = vst.msk [vmem:[#allocation7 + $0x28] sm:$0xff] %vm2286_vm1, %v2262_v58  ;;  %2404 = vrot.lane.b32.xlu0 %v2386_v59, %s11552_s26 }
 0x4c9   : > { %2492 = vrot.lane.b32.xlu1 %v2466_v55, %s11552_s26 }
 0x4cc   : > { %2406 = vrot.lane.b32.xlu0 %v2387_v42, %s11552_s26 }
 0x4cd   : > { %2476 = vrot.lane.b32.xlu1 %v2387_v42, %s11552_s26 }
 0x4cf   : > { %v2531_v60 = vld [vmem:[#allocation7 + $0x8] sm:$0xff] }
 0x4d0   : > { %2738 = vmatprep.mubr.f32.mxu1 %v2531_v60  ;;  %2408 = vrot.lane.b32.xlu0 %v2388_v2, %s11552_s26  ;;  %v2639_v60 = vld [vmem:[#allocation17 + $0x200] sm:$0xff] }
 0x4d1   : > { %2478 = vrot.lane.b32.xlu1 %v2388_v2, %s11552_s26  ;;  %2739 = vmatmul.mubr.f32.vlgmr.msra.gmra.mrb[18].mxu1 %v2530_v61  ;;  %v2640_v61 = vld [vmem:[#allocation17 + $0x208] sm:$0xff] }
 0x4d2   : > { %10912 = vmatpush3.bf16.msra.mxu1 %v12713_v26  ;;  %v2391_v26 = vld [vmem:[#allocation3 + $0x33] sm:$0xff] }
 0x4d3   : > { %10905 = vmatprep.subr.bf16.mxu1 %v12721_v34  ;;  %v3064_v34 = vsel %vm3046_vm2, 1, %v11553_v53 }
 0x4d4   : > { %2410 = vrot.lane.b32.xlu0 %v2389_v4, %s11552_s26 }
 0x4d5   : > { %2480 = vrot.lane.b32.xlu1 %v2389_v4, %s11552_s26  ;;  %v9861_v4 = vpack.c.bf16 %v2640_v61, %v2639_v60  ;;  %v3146_v61 = vld [vmem:[#allocation22 + $0x90] sm:$0xff] }
 0x4d6   : > { %v2335_v48 = vpop.permute.xlu1 %2334  ;;  %v2264_v8 = vpop.permute.xlu0 %2263  ;;  %10913 = vmatpush3.bf16.msra.mxu1 %v12726_v39 }
 0x4d7   : > { %2360 = vst.msk [vmem:[#allocation7 + $0x30] sm:$0xff] %vm2286_vm1, %v2335_v48  ;;  %2289 = vst.msk [vmem:[#allocation7 + $0x50] sm:$0xff] %vm2286_vm1, %v2264_v8  ;;  %10906 = vmatprep.subr.bf16.mxu1 %v12728_v62  ;;  %v2535_v62 = vld [vmem:[#allocation7 + $0x28] sm:$0xff] }
 0x4d8   : > { %2412 = vrot.lane.b32.xlu0 %v2390_v9, %s11552_s26 }
 0x4d9   : > { %2482 = vrot.lane.b32.xlu1 %v2390_v9, %s11552_s26 }
 0x4da   : > { %10914 = vmatpush3.bf16.msra.mxu1 %v12735_v51  ;;  %v2463_v51 = vld [vmem:[#allocation3 + $0x3b] sm:$0xff] }
 0x4db   : > { %10907 = vmatprep.subr.bf16.mxu1 %v12740_v43  ;;  %v3040_v43 = vld [vmem:[#allocation8 + $0x20] sm:$0xff] }
 0x4dc   : > { %2414 = vrot.lane.b32.xlu0 %v2391_v26, %s11552_s26  ;;  %vm3049_vm4 = vcmp.gt.f32.partialorder %v3040_v43, 0.5  ;;  %v2643_v43 = vld [vmem:[#allocation17 + $0x220] sm:$0xff] }
 0x4dd   : > { %2484 = vrot.lane.b32.xlu1 %v2391_v26, %s11552_s26  ;;  %v3067_v3 = vsel %vm3049_vm4, 1, %v11553_v53  ;;  %v2642_v26 = vld [vmem:[#allocation17 + $0x218] sm:$0xff] }
 0x4de   : > { %v2536_v39 = vld [vmem:[#allocation7 + $0x30] sm:$0xff]  ;;  %10915 = vmatpush3.bf16.msra.mxu1 %v12743_v7  ;;  %v2464_v7 = vld [vmem:[#allocation3 + $0x43] sm:$0xff] }
 0x4df   : > { %2743 = vmatprep.mubr.f32.mxu1 %v2536_v39  ;;  %10908 = vmatprep.subr.bf16.mxu1 %v12750_v50  ;;  %v2540_v21 = vld [vmem:[#allocation7 + $0x50] sm:$0xff]  ;;  %v9864_v39 = vpack.c.bf16 %v2642_v26, %v2641_v10 }
 0x4e0   : > { %2744 = vmatmul.mubr.f32.gmra.mrb[20].mxu1 %v2535_v62  ;;  %3076 = vperm.xlu0 %11097, %v3064_v34  }
 0x4e1   : > { %2486 = vrot.lane.b32.xlu1 %v2463_v51, %s11552_s26 }
 0x4e2   : > { %10916 = vmatpush3.bf16.msra.mxu1 %v12756_v63 }
 0x4e3   : > { %10909 = vmatprep.subr.bf16.mxu1 %v12761_v18  ;;  %v3066_v18 = vsel %vm3048_vm6, 1, %v11553_v53 }
 0x4e4   : > { %2490 = vrot.lane.b32.xlu0 %v12793_v38, %s11552_s26 }
 0x4e5   : > { %2488 = vrot.lane.b32.xlu1 %v2464_v7, %s11552_s26 }
 0x4e6   : > { %v2337_v50 = vpop.permute.xlu1 %2336  ;;  %v2266_v44 = vpop.permute.xlu0 %2265  ;;  %10917 = vmatpush3.bf16.msra.mxu1 %v12767_v25  ;;  %v3068_v25 = vsel %vm3050_vm8, 1, %v11553_v53 }
 0x4e7   : > { %2361 = vst.msk [vmem:[#allocation7 + $0x58] sm:$0xff] %vm2286_vm1, %v2337_v50  ;;  %2290 = vst.msk [vmem:[#allocation7 + $0x78] sm:$0xff] %vm2286_vm1, %v2266_v44  ;;  %10910 = vmatprep.subr.bf16.mxu1 %v12769_v29  ;;  %v3070_v29 = vsel %vm3052_vm9, 1, %v11553_v53 }
 0x4e8   : > { %3079 = vperm.xlu0 %11097, %v3065_v11  }
 0x4e9   : > { %2416 = vrot.lane.b32.xlu1 %v2463_v51, %s11552_s26 }
 0x4ea   : > { %10918 = vmatpush3.bf16.msra.mxu1 %v12774_v19 }
 0x4eb   : > { %10911 = vmatprep.subr.bf16.mxu1 %v12786_v22 }
 0x4ec   : > { %3085 = vperm.xlu0 %11097, %v3067_v3   ;;  %v2645_v3 = vld [vmem:[#allocation17 + $0x230] sm:$0xff] }
 0x4ed   : > { %2418 = vrot.lane.b32.xlu1 %v2464_v7, %s11552_s26  ;;  %v2644_v7 = vld [vmem:[#allocation17 + $0x228] sm:$0xff]  ;;  %s7159_s26 = sshll.u32 %s11657_s22, 4  ;;  %s11555_s22 = smov [#allocation28]  }
 0x4ee   : > { %v2541_v63 = vld [vmem:[#allocation7 + $0x58] sm:$0xff]  ;;  %10919 = vmatpush3.bf16.msra.mxu1 %v12788_v45  ;;  %v9867_v50 = vpack.c.bf16 %v2644_v7, %v2643_v43  ;;  %v3133_v43 = vld [vmem:[#allocation22 + $0x30] sm:$0xff]  ;;  %s13417_s15 = scalar_lea.hbm %s13532_s16, %s7159_s26  ;;  %s11439_s25 = sshll.u32 %s11555_s22, 4  ;;  %s11440_s25 = int_to_ptr.vmem [resolvable:$false] %s11439_s25 }
 0x4ef   : > { %2748 = vmatprep.mubr.f32.mxu1 %v2541_v63  ;;  %9860 = vmatprep.subr.bf16.mxu1 %v11546_v6  ;;  %v2545_v41 = vld [vmem:[#allocation7 + $0x78] sm:$0xff]  ;;  %s11441_s5 = scalar_lea.vmem %s11440_s25, 32  ;;  %p11442_p10 = scmp.lt.s32.totalorder %s13419_s23, %s11440_s25 }
 0x4f0   : > { %2749 = vmatmul.mubr.f32.gmra.mrb[22].mxu1 %v2540_v21  ;;  %3091 = vperm.xlu0 %11097, %v3069_v17   ;;  %v9870_v17 = vpack.c.bf16 %v2646_v5, %v2645_v3  ;;  %v3136_v5 = vld [vmem:[#allocation22 + $0x48] sm:$0xff]  ;;  %p11443_p11 = scmp.lt.s32.totalorder %s11441_s5, %s11435_s18 }
 0x4f1   : > { %3082 = vperm.xlu1 %11098, %v3066_v18  }
 0x4f2   : > { %p11444_p3 = por %p11443_p11, %p11442_p10 }
 0x4f4   : > { %3073 = vperm.xlu0 %11097, %v3063_v24   ;;  %p11445_p4 = pnand %p11444_p3, %p11438_p13 }
 0x4f5   : > { %3088 = vperm.xlu1 %11098, %v3068_v25   ;;  %v2534_v25 = vld [vmem:[#allocation7 + $0x20] sm:$0xff] }
 0x4f6   : > { %v2339_v28 = vpop.permute.xlu1 %2338  ;;  %v2268_v30 = vpop.permute.xlu0 %2267 }
 0x4f7   : > { %2362 = vst.msk [vmem:[#allocation7 + $0x80] sm:$0xff] %vm2286_vm1, %v2339_v28  ;;  %2291 = vst.msk [vmem:[#allocation7 + $0xa0] sm:$0xff] %vm2286_vm1, %v2268_v30 }
 0x4f9   : > { %3094 = vperm.xlu1 %11098, %v3070_v29   ;;  %v2539_v29 = vld [vmem:[#allocation7 + $0x48] sm:$0xff] }
 0x4fd   : > { %3097 = vperm.xlu1 %11098, %v3071_v14  }
 0x4fe   : > { %v2546_v46 = vld [vmem:[#allocation7 + $0x80] sm:$0xff] }
 0x4ff   : > { %2753 = vmatprep.mubr.f32.mxu1 %v2546_v46  ;;  %v2550_v19 = vld [vmem:[#allocation7 + $0xa0] sm:$0xff] }
 0x500   : > { %2754 = vmatmul.mubr.f32.gmra.mrb[24].mxu1 %v2545_v41 }
 0x506   : > { %v2341_v31 = vpop.permute.xlu1 %2340  ;;  %v2270_v33 = vpop.permute.xlu0 %2269 }
 0x507   : > { %2363 = vst.msk [vmem:[#allocation7 + $0xa8] sm:$0xff] %vm2286_vm1, %v2341_v31  ;;  %2292 = vst.msk [vmem:[#allocation7 + $0xc8] sm:$0xff] %vm2286_vm1, %v2270_v33  ;;  %v2544_v31 = vld [vmem:[#allocation7 + $0x70] sm:$0xff] }
 0x50e   : > { %v2551_v36 = vld [vmem:[#allocation7 + $0xa8] sm:$0xff] }
 0x50f   : > { %2758 = vmatprep.mubr.f32.mxu1 %v2551_v36  ;;  %v2555_v40 = vld [vmem:[#allocation7 + $0xc8] sm:$0xff] }
 0x510   : > { %2759 = vmatmul.mubr.f32.gmra.mrb[26].mxu1 %v2550_v19 }
 0x516   : > { %v2343_v12 = vpop.permute.xlu1 %2342  ;;  %v2272_v35 = vpop.permute.xlu0 %2271 }
 0x517   : > { %2364 = vst.msk [vmem:[#allocation7 + $0xd0] sm:$0xff] %vm2286_vm1, %v2343_v12  ;;  %2293 = vst.msk [vmem:[#allocation7 + $0xf0] sm:$0xff] %vm2286_vm1, %v2272_v35  ;;  %v2549_v35 = vld [vmem:[#allocation7 + $0x98] sm:$0xff] }
 0x51e   : > { %v2556_v53 = vld [vmem:[#allocation7 + $0xd0] sm:$0xff] }
 0x51f   : > { %2763 = vmatprep.mubr.f32.mxu1 %v2556_v53  ;;  %v2560_v32 = vld [vmem:[#allocation7 + $0xf0] sm:$0xff] }
 0x520   : > { %2764 = vmatmul.mubr.f32.gmra.mrb[28].mxu1 %v2555_v40 }
 0x522   : > { %v2345_v20 = vpop.permute.xlu1 %2344  ;;  %v2274_v22 = vpop.permute.xlu0 %2273 }
 0x523   : > { %2365 = vst.msk [vmem:[#allocation7 + $0xf8] sm:$0xff] %vm2286_vm1, %v2345_v20  ;;  %2294 = vst.msk [vmem:[#allocation7 + $0x118] sm:$0xff] %vm2286_vm1, %v2274_v22  ;;  %v2554_v20 = vld [vmem:[#allocation7 + $0xc0] sm:$0xff]  ;;  %v2559_v22 = vld [vmem:[#allocation7 + $0xe8] sm:$0xff] }
 0x52a   : > { %v2561_v47 = vld [vmem:[#allocation7 + $0xf8] sm:$0xff] }
 0x52b   : > { %2768 = vmatprep.mubr.f32.mxu1 %v2561_v47  ;;  %v2565_v55 = vld [vmem:[#allocation7 + $0x118] sm:$0xff]  ;;  %v2564_v47 = vld [vmem:[#allocation7 + $0x110] sm:$0xff] }
 0x52c   : > { %2769 = vmatmul.mubr.f32.gmra.mrb[30].mxu1 %v2560_v32 }
 0x52e   : > { %v2347_v45 = vpop.permute.xlu1 %2346  ;;  %v2276_v38 = vpop.permute.xlu0 %2275 }
 0x52f   : > { %2366 = vst.msk [vmem:[#allocation7 + $0x120] sm:$0xff] %vm2286_vm1, %v2347_v45  ;;  %2295 = vst.msk [vmem:[#allocation7 + $0x140] sm:$0xff] %vm2286_vm1, %v2276_v38  ;;  %v2569_v38 = vld [vmem:[#allocation7 + $0x138] sm:$0xff] }
 0x536   : > { %v2421_v49 = vpop.permute.xlu0 %2420  ;;  %v2566_v54 = vld [vmem:[#allocation7 + $0x120] sm:$0xff] }
 0x537   : > { %v2349_v52 = vpop.permute.xlu1 %2348  ;;  %2439 = vst.msk [vmem:[#allocation7 + $0x150] sm:$0xff] %vm2286_vm1, %v2421_v49  ;;  %2773 = vmatprep.mubr.f32.mxu1 %v2566_v54  ;;  %v2570_v2 = vld [vmem:[#allocation7 + $0x140] sm:$0xff] }
 0x538   : > { %2367 = vst.msk [vmem:[#allocation7 + $0x148] sm:$0xff] %vm2286_vm1, %v2349_v52  ;;  %2774 = vmatmul.mubr.f32.gmra.mrb[32].mxu1 %v2565_v55  ;;  %v2574_v49 = vld [vmem:[#allocation7 + $0x160] sm:$0xff] }
 0x539   : > { %v3127_v52 = vld [vmem:[#allocation22] sm:$0xff]  ;;  %v3128_v54 = vld [vmem:[#allocation22 + $0x8] sm:$0xff] }
 0x53a   : > { %v2405_v56 = vpop.permute.xlu0 %2404  ;;  %v9897_v55 = vpack.c.bf16 %v3128_v54, %v3127_v52 }
 0x53b   : > { %v2493_v57 = vpop.permute.xlu1 %2492  ;;  %2431 = vst.msk [vmem:[#allocation7 + $0x10] sm:$0xff] %vm2286_vm1, %v2405_v56  ;;  %v3144_v56 = vld [vmem:[#allocation22 + $0x80] sm:$0xff] }
 0x53c   : > { %2511 = vst.msk [vmem:[#allocation7 + $0x158] sm:$0xff] %vm2286_vm1, %v2493_v57  ;;  %v3145_v57 = vld [vmem:[#allocation22 + $0x88] sm:$0xff] }
 0x53e   : > { %v2407_v58 = vpop.permute.xlu0 %2406  ;;  %v2572_v34 = vld [vmem:[#allocation7 + $0x150] sm:$0xff] }
 0x53f   : > { %v2477_v59 = vpop.permute.xlu1 %2476  ;;  %v2571_v42 = vld [vmem:[#allocation7 + $0x148] sm:$0xff]  ;;  %2432 = vst.msk [vmem:[#allocation7 + $0x38] sm:$0xff] %vm2286_vm1, %v2407_v58  ;;  %v9873_v58 = vpack.c.bf16 %v3145_v57, %v3144_v56 }
 0x540   : > { %2503 = vst.msk [vmem:[#allocation7 + $0x18] sm:$0xff] %vm2286_vm1, %v2477_v59  ;;  %2778 = vmatprep.mubr.f32.mxu1 %v2571_v42  ;;  %v3129_v59 = vld [vmem:[#allocation22 + $0x10] sm:$0xff]  ;;  %v3130_v42 = vld [vmem:[#allocation22 + $0x18] sm:$0xff] }
 0x541   : > { %2779 = vmatmul.mubr.f32.gmra.mrb[34].mxu1 %v2570_v2  ;;  %v9900_v60 = vpack.c.bf16 %v3130_v42, %v3129_v59  ;;  %v3147_v2 = vld [vmem:[#allocation22 + $0x98] sm:$0xff] }
 0x542   : > { %v2409_v48 = vpop.permute.xlu0 %2408  ;;  %v2532_v11 = vld [vmem:[#allocation7 + $0x10] sm:$0xff] }
 0x543   : > { %v2479_v8 = vpop.permute.xlu1 %2478  ;;  %v2573_v9 = vld [vmem:[#allocation7 + $0x158] sm:$0xff]  ;;  %2433 = vst.msk [vmem:[#allocation7 + $0x60] sm:$0xff] %vm2286_vm1, %v2409_v48 }
 0x544   : > { %2504 = vst.msk [vmem:[#allocation7 + $0x40] sm:$0xff] %vm2286_vm1, %v2479_v8  ;;  %2888 = vmatprep.mubr.f32.mxu1 %v2573_v9  ;;  %v3131_v48 = vld [vmem:[#allocation22 + $0x20] sm:$0xff]  ;;  %v3132_v8 = vld [vmem:[#allocation22 + $0x28] sm:$0xff] }
 0x545   : > { %2889 = vmatmul.mubr.f32.vlgmr.msra.gmra.mrb[36].mxu1 %v2572_v34  ;;  %v9903_v10 = vpack.c.bf16 %v3132_v8, %v3131_v48  ;;  %v3148_v34 = vld [vmem:[#allocation22 + $0xa0] sm:$0xff] }
 0x546   : > { %9862 = vmatpush3.bf16.msra.mxu1 %v9861_v4  ;;  %8214 = vmatprep.mubr.msk.f32.mxu1 %vm11549_vm5, %v11550_v16  ;;  %v2411_v62 = vpop.permute.xlu0 %2410  ;;  %v2537_v15 = vld [vmem:[#allocation7 + $0x38] sm:$0xff]  ;;  %v9876_v4 = vpack.c.bf16 %v3147_v2, %v3146_v61 }
 0x547   : > { %v2481_v37 = vpop.permute.xlu1 %2480  ;;  %v2533_v51 = vld [vmem:[#allocation7 + $0x18] sm:$0xff]  ;;  %9863 = vmatprep.subr.bf16.mxu1 %v11546_v6  ;;  %2434 = vst.msk [vmem:[#allocation7 + $0x88] sm:$0xff] %vm2286_vm1, %v2411_v62 }
 0x548   : > { %2505 = vst.msk [vmem:[#allocation7 + $0x68] sm:$0xff] %vm2286_vm1, %v2481_v37  ;;  %2848 = vmatprep.mubr.f32.mxu0 %v2533_v51  ;;  %v3150_v37 = vld [vmem:[#allocation22 + $0xb0] sm:$0xff]  ;;  %v3151_v51 = vld [vmem:[#allocation22 + $0xb8] sm:$0xff] }
 0x549   : > { %2849 = vmatmul.mubr.f32.vlgmr.msra.gmra.mrb[36].mxu0 %v2532_v11  ;;  %v9882_v7 = vpack.c.bf16 %v3151_v51, %v3150_v37  ;;  %v3134_v11 = vld [vmem:[#allocation22 + $0x38] sm:$0xff] }
 0x54a   : > { %9865 = vmatpush3.bf16.msra.mxu1 %v9864_v39  ;;  %v2413_v44 = vpop.permute.xlu0 %2412  ;;  %v2542_v23 = vld [vmem:[#allocation7 + $0x60] sm:$0xff]  ;;  %9874 = vmatpush3.bf16.msra.mxu0 %v9873_v58 }
 0x54b   : > { %v2483_v13 = vpop.permute.xlu1 %2482  ;;  %v2538_v1 = vld [vmem:[#allocation7 + $0x40] sm:$0xff]  ;;  %9866 = vmatprep.subr.bf16.mxu1 %v11546_v6  ;;  %2435 = vst.msk [vmem:[#allocation7 + $0xb0] sm:$0xff] %vm2286_vm1, %v2413_v44  ;;  %9875 = vmatprep.subr.bf16.mxu0 %v11546_v6 }
 0x54c   : > { %2506 = vst.msk [vmem:[#allocation7 + $0x90] sm:$0xff] %vm2286_vm1, %v2483_v13  ;;  %2853 = vmatprep.mubr.f32.mxu0 %v2538_v1  ;;  %v3149_v39 = vld [vmem:[#allocation22 + $0xa8] sm:$0xff]  ;;  %v3152_v44 = vld [vmem:[#allocation22 + $0xc0] sm:$0xff] }
 0x54d   : > { %2854 = vmatmul.mubr.f32.gmra.mrb[38].mxu0 %v2537_v15  ;;  %v9879_v62 = vpack.c.bf16 %v3149_v39, %v3148_v34  ;;  %v3153_v13 = vld [vmem:[#allocation22 + $0xc8] sm:$0xff]  ;;  %v3135_v1 = vld [vmem:[#allocation22 + $0x40] sm:$0xff] }
 0x54e   : > { %9868 = vmatpush3.bf16.msra.mxu1 %v9867_v50  ;;  %v2415_v63 = vpop.permute.xlu0 %2414  ;;  %v2547_v27 = vld [vmem:[#allocation7 + $0x88] sm:$0xff]  ;;  %9877 = vmatpush3.bf16.msra.mxu0 %v9876_v4  ;;  %v9906_v50 = vpack.c.bf16 %v3134_v11, %v3133_v43  ;;  %v9885_v3 = vpack.c.bf16 %v3153_v13, %v3152_v44  ;;  %v9909_v15 = vpack.c.bf16 %v3136_v5, %v3135_v1  ;;  %v12942_v13 = vld [vmem:[#allocation19] ss:$0 sm:$0xff] }
 0x54f   : > { %v2485_v18 = vpop.permute.xlu1 %2484  ;;  %v2543_v21 = vld [vmem:[#allocation7 + $0x68] sm:$0xff]  ;;  %9869 = vmatprep.subr.bf16.mxu1 %v11546_v6  ;;  %2436 = vst.msk [vmem:[#allocation7 + $0xd8] sm:$0xff] %vm2286_vm1, %v2415_v63  ;;  %9878 = vmatprep.subr.bf16.mxu0 %v11546_v6 }
 0x550   : > { %2507 = vst.msk [vmem:[#allocation7 + $0xb8] sm:$0xff] %vm2286_vm1, %v2485_v18  ;;  %2858 = vmatprep.mubr.f32.mxu0 %v2543_v21  ;;  %v3154_v18 = vld [vmem:[#allocation22 + $0xd0] sm:$0xff]  ;;  %v3155_v21 = vld [vmem:[#allocation22 + $0xd8] sm:$0xff] }
 0x551   : > { %2859 = vmatmul.mubr.f32.gmra.mrb[40].mxu0 %v2542_v23  ;;  %v3137_v23 = vld [vmem:[#allocation22 + $0x50] sm:$0xff] }
 0x552   : > { %9871 = vmatpush3.bf16.msra.mxu1 %v9870_v17  ;;  %v2552_v14 = vld [vmem:[#allocation7 + $0xb0] sm:$0xff]  ;;  %9880 = vmatpush3.bf16.msra.mxu0 %v9879_v62 }
 0x553   : > { %v2548_v24 = vld [vmem:[#allocation7 + $0x90] sm:$0xff]  ;;  %9896 = vmatprep.subr.bf16.mxu1 %v11546_v6  ;;  %v2487_v0 = vpop.permute.xlu1 %2486  ;;  %9881 = vmatprep.subr.bf16.mxu0 %v11546_v6 }
 0x554   : > { %2863 = vmatprep.mubr.f32.mxu0 %v2548_v24  ;;  %2508 = vst.msk [vmem:[#allocation7 + $0xe0] sm:$0xff] %vm2286_vm1, %v2487_v0  ;;  %v9888_v0 = vpack.c.bf16 %v3155_v21, %v3154_v18 }
 0x555   : > { %8215 = vmatmul.mubr.msk.f32.vlgmr.msra.gmra.mrb[38].mxu1 %vm2213_vm15, %v2534_v25  ;;  %2864 = vmatmul.mubr.f32.gmra.mrb[42].mxu0 %v2547_v27  ;;  %v3138_v25 = vld [vmem:[#allocation22 + $0x58] sm:$0xff] }
 0x556   : > { %8217 = vmatprep.mubr.msk.f32.mxu1 %vm11549_vm5, %v11550_v16  ;;  %v2557_v33 = vld [vmem:[#allocation7 + $0xd8] sm:$0xff]  ;;  %9898 = vmatpush3.bf16.msra.mxu1 %v9897_v55  ;;  %v9912_v27 = vpack.c.bf16 %v3138_v25, %v3137_v23 }
 0x557   : > { %v2553_v28 = vld [vmem:[#allocation7 + $0xb8] sm:$0xff]  ;;  %v2489_v30 = vpop.permute.xlu1 %2488  ;;  %9899 = vmatprep.subr.bf16.mxu1 %v11546_v6  ;;  %9883 = vmatpush3.bf16.msra.mxu0 %v9882_v7 }
 0x558   : > { %2868 = vmatprep.mubr.f32.mxu0 %v2553_v28  ;;  %2509 = vst.msk [vmem:[#allocation7 + $0x108] sm:$0xff] %vm2286_vm1, %v2489_v30  ;;  %9884 = vmatprep.subr.bf16.mxu0 %v11546_v6  ;;  %v3156_v28 = vld [vmem:[#allocation22 + $0xe0] sm:$0xff]  ;;  %v3157_v30 = vld [vmem:[#allocation22 + $0xe8] sm:$0xff] }
 0x559   : > { %8218 = vmatmul.mubr.msk.f32.gmra.mrb[40].mxu1 %vm2213_vm15, %v2539_v29  ;;  %2869 = vmatmul.mubr.f32.gmra.mrb[44].mxu0 %v2552_v14  ;;  %v3139_v29 = vld [vmem:[#allocation22 + $0x60] sm:$0xff]  ;;  %v9891_v14 = vpack.c.bf16 %v3157_v30, %v3156_v28 }
 0x55a   : > { %8220 = vmatprep.mubr.msk.f32.mxu1 %vm11549_vm5, %v11550_v16  ;;  %9901 = vmatpush3.bf16.msra.mxu1 %v9900_v60 }
 0x55b   : > { %v2417_v46 = vpop.permute.xlu1 %2416  ;;  %v2558_v41 = vld [vmem:[#allocation7 + $0xe0] sm:$0xff]  ;;  %9902 = vmatprep.subr.bf16.mxu1 %v11546_v6  ;;  %9886 = vmatpush3.bf16.msra.mxu0 %v9885_v3 }
 0x55c   : > { %2437 = vst.msk [vmem:[#allocation7 + $0x100] sm:$0xff] %vm2286_vm1, %v2417_v46  ;;  %2873 = vmatprep.mubr.f32.mxu0 %v2558_v41  ;;  %9887 = vmatprep.subr.bf16.mxu0 %v11546_v6  ;;  %v3140_v46 = vld [vmem:[#allocation22 + $0x68] sm:$0xff] }
 0x55d   : > { %8221 = vmatmul.mubr.msk.f32.gmra.mrb[42].mxu1 %vm2213_vm15, %v2544_v31  ;;  %2874 = vmatmul.mubr.f32.gmra.mrb[46].mxu0 %v2557_v33  ;;  %v9915_v41 = vpack.c.bf16 %v3140_v46, %v3139_v29  ;;  %v3158_v31 = vld [vmem:[#allocation22 + $0xf0] sm:$0xff]  ;;  %v3159_v33 = vld [vmem:[#allocation22 + $0xf8] sm:$0xff] }
 0x55e   : > { %8223 = vmatprep.mubr.msk.f32.mxu1 %vm11549_vm5, %v11550_v16  ;;  %9904 = vmatpush3.bf16.msra.mxu1 %v9903_v10 }
 0x55f   : > { %v2419_v36 = vpop.permute.xlu1 %2418  ;;  %v12894_v19 = vpop.permute.xlu0 %3076  ;;  %v2563_v12 = vld [vmem:[#allocation7 + $0x108] sm:$0xff]  ;;  %9905 = vmatprep.subr.bf16.mxu1 %v11546_v6  ;;  %9889 = vmatpush3.bf16.msra.mxu0 %v9888_v0 }
 0x560   : > { %2438 = vst.msk [vmem:[#allocation7 + $0x128] sm:$0xff] %vm2286_vm1, %v2419_v36  ;;  %2878 = vmatprep.mubr.f32.mxu0 %v2563_v12  ;;  %9890 = vmatprep.subr.bf16.mxu0 %v11546_v6  ;;  %v3141_v36 = vld [vmem:[#allocation22 + $0x70] sm:$0xff]  ;;  %v9894_v12 = vpack.c.bf16 %v3159_v33, %v3158_v31 }
 0x561   : > { %8224 = vmatmul.mubr.msk.f32.gmra.mrb[44].mxu1 %vm2213_vm15, %v2549_v35  ;;  %v3142_v35 = vld [vmem:[#allocation22 + $0x78] sm:$0xff] }
 0x562   : > { %8226 = vmatprep.mubr.msk.f32.mxu1 %vm11549_vm5, %v11550_v16  ;;  %9907 = vmatpush3.bf16.msra.mxu1 %v9906_v50 }
 0x563   : > { %v2491_v53 = vpop.permute.xlu0 %2490  ;;  %v2562_v40 = vld [vmem:[#allocation7 + $0x100] sm:$0xff]  ;;  %9908 = vmatprep.subr.bf16.mxu1 %v11546_v6  ;;  %9892 = vmatpush3.bf16.msra.mxu0 %v9891_v14 }
 0x564   : > { %2510 = vst.msk [vmem:[#allocation7 + $0x130] sm:$0xff] %vm2286_vm1, %v2491_v53  ;;  %2879 = vmatmul.mubr.f32.gmra.mrb[48].mxu0 %v2562_v40  ;;  %9893 = vmatprep.subr.bf16.mxu0 %v11546_v6  ;;  %v9918_v53 = vpack.c.bf16 %v3142_v35, %v3141_v36 }
 0x565   : > { %8227 = vmatmul.mubr.msk.f32.gmra.mrb[46].mxu1 %vm2213_vm15, %v2554_v20 }
 0x566   : > { %8229 = vmatprep.mubr.msk.f32.mxu1 %vm11549_vm5, %v11550_v16  ;;  %9910 = vmatpush3.bf16.msra.mxu1 %v9909_v15 }
 0x567   : > { %v2567_v45 = vld [vmem:[#allocation7 + $0x128] sm:$0xff]  ;;  %9911 = vmatprep.subr.bf16.mxu1 %v11546_v6  ;;  %9895 = vmatpush3.bf16.msra.mxu0 %v9894_v12  ;;  %v3080_v8 = vpop.permute.xlu0 %3079 }
 0x568   : > { %9920 = vmatprep.subr.bf16.mxu0 %v11546_v6  ;;  %vm3101_vm1 = vcmp.eq.s32.totalorder %v3080_v8, 1 }
 0x569   : > { %8230 = vmatmul.mubr.msk.f32.gmra.mrb[48].mxu1 %vm2213_vm15, %v2559_v22 }
 0x56a   : > { %8232 = vmatprep.mubr.msk.f32.mxu1 %vm11549_vm5, %v11550_v16  ;;  %9913 = vmatpush3.bf16.msra.mxu1 %v9912_v27 }
 0x56b   : > { %v2568_v32 = vld [vmem:[#allocation7 + $0x130] sm:$0xff]  ;;  %9914 = vmatprep.subr.bf16.mxu1 %v11546_v6  ;;  %v12938_v34 = vpop.permute.xlu0 %3085 }
 0x56c   : > { %2883 = vmatprep.mubr.f32.mxu0 %v2568_v32  ;;  %vm3103_vm12 = vcmp.eq.s32.totalorder %v12938_v34, 1 }
 0x56d   : > { %8233 = vmatmul.mubr.msk.f32.gmra.mrb[50].mxu1 %vm2213_vm15, %v2564_v47  ;;  %2884 = vmatmul.mubr.f32.gmra.mrb[50].mxu0 %v2567_v45 }
 0x56e   : > { %8235 = vmatprep.mubr.msk.f32.mxu1 %vm11549_vm5, %v11550_v16  ;;  %8273 = vmatprep.mubr.msk.f32.mxu0 %vm11549_vm5, %v11550_v16 }
 0x56f   : > { %9916 = vmatpush3.bf16.msra.mxu1 %v9915_v41  ;;  %v12940_v7 = vpop.permute.xlu0 %3091 }
 0x570   : > { %9917 = vmatprep.subr.bf16.mxu1 %v11546_v6  ;;  %vm3105_vm0 = vcmp.eq.s32.totalorder %v12940_v7, 1  ;;  %v3312_v7 = vld [vmem:[#allocation22 + $0x158] sm:$0xff] }
 0x571   : > { %8236 = vmatmul.mubr.msk.f32.gmra.mrb[52].mxu1 %vm2213_vm15, %v2569_v38 }
 0x572   : > { %8238 = vmatprep.mubr.msk.f32.mxu1 %vm11549_vm5, %v11550_v16 }
 0x573   : > { %9919 = vmatpush3.bf16.msra.mxu1 %v9918_v53  ;;  %v3074_v18 = vpop.permute.xlu0 %3073 }
 0x574   : > { %9944 = vmatprep.subr.bf16.mxu1 %v11546_v6 }
 0x575   : > { %8239 = vmatmul.mubr.msk.f32.gmra.mrb[54].mxu1 %vm2213_vm15, %v2574_v49  ;;  %vm3100_vm15 = vcmp.eq.s32.totalorder %v12894_v19, 1 }
 0x576   : > { %8308 = vmatprep.mubr.msk.f32.mxu1 %vm11549_vm5, %v11550_v16 }
 0x5a4   : > { %v7284_v9 = vpop.f32.mrb[18].mxu1 }
 0x5a5   : > { %v7285_v26 = vpop.f32.mrb[19].mxu1 }
 0x5b3   : > { %v7287_v17 = vpop.f32.mrb[20].mxu1 }
 0x5b4   : > { %v7288_v63 = vpop.f32.mrb[21].mxu1 }
 0x5b5   : > { %v7289_v24 = vadd.f32 %v7288_v63, %v7287_v17  ;;  %v12944_v17 = vld [vmem:[#allocation20] ss:$0 sm:$0xff] }
 0x5c3   : > { %v7290_v40 = vpop.f32.mrb[22].mxu1 }
 0x5c4   : > { %v7291_v20 = vpop.f32.mrb[23].mxu1 }
 0x5c5   : > { %v7292_v22 = vadd.f32 %v7291_v20, %v7290_v40 }
 0x5d3   : > { %v7293_v47 = vpop.f32.mrb[24].mxu1 }
 0x5d4   : > { %v7294_v32 = vpop.f32.mrb[25].mxu1 }
 0x5d5   : > { %v7295_v45 = vadd.f32 %v7294_v32, %v7293_v47 }
 0x5e3   : > { %v7296_v38 = vpop.f32.mrb[26].mxu1 }
 0x5e4   : > { %v7297_v49 = vpop.f32.mrb[27].mxu1 }
 0x5e5   : > { %v7298_v52 = vadd.f32 %v7297_v49, %v7296_v38  ;;  %v3083_v38 = vpop.permute.xlu1 %3082 }
 0x5e6   : > { %vm3102_vm11 = vcmp.eq.s32.totalorder %v3083_v38, 1 }
 0x5f3   : > { %v7299_v54 = vpop.f32.mrb[28].mxu1 }
 0x5f4   : > { %v7300_v55 = vpop.f32.mrb[29].mxu1 }
 0x5f5   : > { %v7301_v56 = vadd.f32 %v7300_v55, %v7299_v54  ;;  %v3301_v54 = vld [vmem:[#allocation22 + $0x100] sm:$0xff] }
 0x5ff   : > { %v7302_v57 = vpop.f32.mrb[30].mxu1 }
 0x600   : > { %v7303_v58 = vpop.f32.mrb[31].mxu1 }
 0x601   : > { %v12934_v59 = vadd.f32 %v7303_v58, %v7302_v57  ;;  %v3302_v58 = vld [vmem:[#allocation22 + $0x108] sm:$0xff] }
 0x60b   : > { %v7305_v42 = vpop.f32.mrb[32].mxu1 }
 0x60c   : > { %v7306_v60 = vpop.f32.mrb[33].mxu1 }
 0x60d   : > { %v12936_v61 = vadd.f32 %v7306_v60, %v7305_v42  ;;  %v3389_v42 = vld [vmem:[#allocation22 + $0x180] sm:$0xff]  ;;  %v3390_v60 = vld [vmem:[#allocation22 + $0x188] sm:$0xff] }
 0x614   : > { %v7308_v2 = vpop.f32.mrb[34].mxu1 }
 0x615   : > { %v7309_v4 = vpop.f32.mrb[35].mxu1 }
 0x618   : > { %v7367_v48 = vpop.f32.mrb[36].mxu1 }
 0x619   : > { %v7368_v9 = vpop.f32.mrb[37].mxu1 }
 0x61c   : > { %v7343_v10 = vpop.f32.mrb[36].mxu0 }
 0x61d   : > { %v7344_v26 = vpop.f32.mrb[37].mxu0 }
 0x620   : > { %v7346_v39 = vpop.f32.mrb[38].mxu0 }
 0x621   : > { %v7347_v62 = vpop.f32.mrb[39].mxu0 }
 0x622   : > { %v7348_v37 = vadd.f32 %v7347_v62, %v7346_v39  ;;  %v9921_v39 = vpack.c.bf16 %v3302_v58, %v3301_v54  ;;  %v9945_v62 = vpack.c.bf16 %v3390_v60, %v3389_v42  ;;  %v3309_v60 = vld [vmem:[#allocation22 + $0x140] sm:$0xff] }
 0x624   : > { %v7349_v51 = vpop.f32.mrb[40].mxu0  ;;  %v2856_v43 = vadd.f32 %v7348_v37, %v7289_v24  ;;  %v3303_v37 = vld [vmem:[#allocation22 + $0x110] sm:$0xff] }
 0x625   : > { %v7350_v11 = vpop.f32.mrb[41].mxu0 }
 0x626   : > { %v7351_v50 = vadd.f32 %v7350_v11, %v7349_v51  ;;  %v3391_v11 = vld [vmem:[#allocation22 + $0x190] sm:$0xff] }
 0x628   : > { %v2960_v44 = vpop.f32.mrb[38].mxu1  ;;  %v7352_v1 = vpop.f32.mrb[42].mxu0  ;;  %v2861_v3 = vadd.f32 %v7351_v50, %v7292_v22  ;;  %v3392_v50 = vld [vmem:[#allocation22 + $0x198] sm:$0xff] }
 0x629   : > { %v8216_v5 = vpop.f32.mrb[39].mxu1  ;;  %v7353_v15 = vpop.f32.mrb[43].mxu0 }
 0x62a   : > { %v7354_v63 = vadd.f32 %v7353_v15, %v7352_v1 }
 0x62c   : > { %v2965_v21 = vpop.f32.mrb[40].mxu1  ;;  %v7355_v23 = vpop.f32.mrb[44].mxu0  ;;  %v2866_v0 = vadd.f32 %v7354_v63, %v7295_v45 }
 0x62d   : > { %v2966_v25 = vadd.f32 %v2965_v21, %v2856_v43  ;;  %v8219_v24 = vpop.f32.mrb[41].mxu1  ;;  %v7356_v27 = vpop.f32.mrb[45].mxu0  ;;  %v3304_v43 = vld [vmem:[#allocation22 + $0x118] sm:$0xff] }
 0x62e   : > { %v7357_v28 = vadd.f32 %v7356_v27, %v7355_v23  ;;  %v9924_v23 = vpack.c.bf16 %v3304_v43, %v3303_v37  ;;  %v3089_v24 = vpop.permute.xlu1 %3088  ;;  %v3399_v37 = vld [vmem:[#allocation22 + $0x1d0] sm:$0xff] }
 0x62f   : > { %v3012_v30 = vmul.f32 %v12942_v13, %v2966_v25  ;;  %v3306_v25 = vld [vmem:[#allocation22 + $0x128] sm:$0xff]  ;;  %vm3104_vm13 = vcmp.eq.s32.totalorder %v3089_v24, 1 }
 0x630   : > { %v2970_v29 = vpop.f32.mrb[42].mxu1  ;;  %v2871_v14 = vadd.f32 %v7357_v28, %v7298_v52  ;;  %v7358_v31 = vpop.f32.mrb[46].mxu0  ;;  %v3393_v28 = vld [vmem:[#allocation22 + $0x1a0] sm:$0xff]  ;;  %v3478_v24 = vld [vmem:[#allocation22 + $0x208] sm:$0xff] }
 0x631   : > { %v3028_v46 = vadd.f32 %v12944_v17, %v3012_v30  ;;  %v2971_v41 = vadd.f32 %v2970_v29, %v2861_v3  ;;  %v8222_v33 = vpop.f32.mrb[43].mxu1  ;;  %v7359_v36 = vpop.f32.mrb[47].mxu0  ;;  %v3394_v30 = vld [vmem:[#allocation22 + $0x1a8] sm:$0xff] }
 0x632   : > { %v7360_v53 = vadd.f32 %v7359_v36, %v7358_v31  ;;  %v3095_v54 = vpop.permute.xlu1 %3094 }
 0x633   : > { %v3055_v12 = vmax.f32 %v3028_v46, 0.0  ;;  %v3013_v35 = vmul.f32 %v12942_v13, %v2971_v41  ;;  %vm3106_vm2 = vcmp.eq.s32.totalorder %v3095_v54, 1 }
 0x634   : > { %v2975_v40 = vpop.f32.mrb[44].mxu1  ;;  %v2876_v45 = vadd.f32 %v7360_v53, %v7301_v56  ;;  %v9951_v53 = vpack.c.bf16 %v3394_v30, %v3393_v28  ;;  %v3566_v28 = vld [vmem:[#allocation22 + $0x288] sm:$0xff] }
 0x635   : > { %v3109_v20 = vsel %vm3100_vm15, %v3055_v12, 0.0  ;;  %v3029_v22 = vadd.f32 %v12944_v17, %v3013_v35  ;;  %v2976_v47 = vadd.f32 %v2975_v40, %v2866_v0  ;;  %v8225_v32 = vpop.f32.mrb[45].mxu1  ;;  %v3305_v0 = vld [vmem:[#allocation22 + $0x120] sm:$0xff]  ;;  %v3307_v40 = vld [vmem:[#allocation22 + $0x130] sm:$0xff] }
 0x636   : > { %3118 = vst [vmem:[#allocation4 + $0x12] sm:$0xff] %v3109_v20  ;;  %v9927_v33 = vpack.c.bf16 %v3306_v25, %v3305_v0  ;;  %v3396_v32 = vld [vmem:[#allocation22 + $0x1b8] sm:$0xff]  ;;  %v3477_v25 = vld [vmem:[#allocation22 + $0x200] sm:$0xff] }
 0x637   : > { %v3056_v49 = vmax.f32 %v3029_v22, 0.0  ;;  %v3014_v52 = vmul.f32 %v12942_v13, %v2976_v47  ;;  %v7361_v55 = vpop.f32.mrb[48].mxu0  ;;  %v3308_v22 = vld [vmem:[#allocation22 + $0x138] sm:$0xff]  ;;  %v3395_v47 = vld [vmem:[#allocation22 + $0x1b0] sm:$0xff]  ;;  %v9969_v30 = vpack.c.bf16 %v3478_v24, %v3477_v25 }
 0x638   : > { %v2980_v57 = vpop.f32.mrb[46].mxu1  ;;  %v7362_v48 = vpop.f32.mrb[49].mxu0  ;;  %v9930_v58 = vpack.c.bf16 %v3308_v22, %v3307_v40  ;;  %v9954_v42 = vpack.c.bf16 %v3396_v32, %v3395_v47  ;;  %v3569_v40 = vld [vmem:[#allocation22 + $0x2a0] sm:$0xff]  ;;  %v3483_v32 = vld [vmem:[#allocation22 + $0x230] sm:$0xff] }
 0x639   : > { %v3110_v19 = vsel %vm3101_vm1, %v3056_v49, 0.0  ;;  %v3030_v2 = vadd.f32 %v12944_v17, %v3014_v52  ;;  %v2981_v4 = vadd.f32 %v2980_v57, %v2871_v14  ;;  %v8228_v9 = vpop.f32.mrb[47].mxu1  ;;  %v7363_v56 = vadd.f32 %v7362_v48, %v7361_v55 }
 0x63a   : > { %3119 = vst [vmem:[#allocation4 + $0x1a] sm:$0xff] %v3110_v19  ;;  %v3310_v19 = vld [vmem:[#allocation22 + $0x148] sm:$0xff] }
 0x63b   : > { %v3057_v10 = vmax.f32 %v3030_v2, 0.0  ;;  %v3015_v26 = vmul.f32 %v12942_v13, %v2981_v4  ;;  %v2881_v51 = vadd.f32 %v7363_v56, %v12934_v59  ;;  %v9948_v59 = vpack.c.bf16 %v3392_v50, %v3391_v11  ;;  %v3397_v4 = vld [vmem:[#allocation22 + $0x1c0] sm:$0xff] }
 0x63c   : > { %v2985_v8 = vpop.f32.mrb[48].mxu1 }
 0x63d   : > { %v3111_v44 = vsel %vm3102_vm11, %v3057_v10, 0.0  ;;  %v3031_v1 = vadd.f32 %v12944_v17, %v3015_v26  ;;  %v2986_v3 = vadd.f32 %v2985_v8, %v2876_v45  ;;  %v8231_v5 = vpop.f32.mrb[49].mxu1  ;;  %v3143_v15 = vld [vmem:[#allocation4 + $0x15] sm:$0x1]  ;;  %v3126_v63 = vld [vmem:[#allocation4 + $0x14] sm:$0x1]  ;;  %v9933_v10 = vpack.c.bf16 %v3310_v19, %v3309_v60 }
 0x63e   : > { %3120 = vst [vmem:[#allocation4 + $0x22] sm:$0xff] %v3111_v44  ;;  %8274 = vmatmul.mubr.f32.vlgmr.msra.gmra.mrb[52].mxu0 %v3143_v15  ;;  %8309 = vmatmul.mubr.f32.vlgmr.msra.gmra.mrb[56].mxu1 %v3126_v63  ;;  %v3400_v8 = vld [vmem:[#allocation22 + $0x1d8] sm:$0xff]  ;;  %v3314_v44 = vld [vmem:[#allocation22 + $0x168] sm:$0xff]  ;;  %v3315_v63 = vld [vmem:[#allocation22 + $0x170] sm:$0xff] }
 0x63f   : > { %v3058_v18 = vmax.f32 %v3031_v1, 0.0  ;;  %v3016_v21 = vmul.f32 %v12942_v13, %v2986_v3  ;;  %9922 = vmatpush3.bf16.msra.mxu0 %v9921_v39  ;;  %9946 = vmatpush3.bf16.msra.mxu1 %v9945_v62  ;;  %v3311_v62 = vld [vmem:[#allocation22 + $0x150] sm:$0xff]  ;;  %v9960_v50 = vpack.c.bf16 %v3400_v8, %v3399_v37  ;;  %v3401_v1 = vld [vmem:[#allocation22 + $0x1e0] sm:$0xff]  ;;  %v3402_v3 = vld [vmem:[#allocation22 + $0x1e8] sm:$0xff] }
 0x640   : > { %v2990_v27 = vpop.f32.mrb[50].mxu1  ;;  %9923 = vmatprep.subr.bf16.mxu0 %v11546_v6  ;;  %9947 = vmatprep.subr.bf16.mxu1 %v11546_v6  ;;  %v7364_v31 = vpop.f32.mrb[50].mxu0  ;;  %v9936_v11 = vpack.c.bf16 %v3312_v7, %v3311_v62  ;;  %v9963_v15 = vpack.c.bf16 %v3402_v3, %v3401_v1  ;;  %v3578_v62 = vld [vmem:[#allocation22 + $0x2e8] sm:$0xff]  ;;  %v3491_v8 = vld [vmem:[#allocation22 + $0x270] sm:$0xff]  ;;  %v3741_v1 = vld [vmem:[#allocation22 + $0x380] sm:$0xff] }
 0x641   : > { %v3112_v29 = vsel %vm3103_vm12, %v3058_v18, 0.0  ;;  %v3032_v14 = vadd.f32 %v12944_v17, %v3016_v21  ;;  %v2991_v46 = vadd.f32 %v2990_v27, %v2881_v51  ;;  %v8234_v41 = vpop.f32.mrb[51].mxu1  ;;  %8343 = vmatprep.mubr.msk.f32.mxu0 %vm11549_vm5, %v11550_v16  ;;  %8378 = vmatprep.mubr.msk.f32.mxu1 %vm11549_vm5, %v11550_v16  ;;  %v7365_v34 = vpop.f32.mrb[51].mxu0  ;;  %v3316_v18 = vld [vmem:[#allocation22 + $0x178] sm:$0xff]  ;;  %v3403_v21 = vld [vmem:[#allocation22 + $0x1f0] sm:$0xff]  ;;  %v3565_v27 = vld [vmem:[#allocation22 + $0x280] sm:$0xff] }
 0x642   : > { %3121 = vst [vmem:[#allocation4 + $0x2a] sm:$0xff] %v3112_v29  ;;  %v7366_v35 = vadd.f32 %v7365_v34, %v7364_v31  ;;  %v3098_v51 = vpop.permute.xlu1 %3097  ;;  %v9993_v29 = vpack.c.bf16 %v3566_v28, %v3565_v27  ;;  %v3567_v41 = vld [vmem:[#allocation22 + $0x290] sm:$0xff]  ;;  %v3568_v31 = vld [vmem:[#allocation22 + $0x298] sm:$0xff]  ;;  %v3742_v3 = vld [vmem:[#allocation22 + $0x388] sm:$0xff] }
 0x643   : > { %v3059_v36 = vmax.f32 %v3032_v14, 0.0  ;;  %v3017_v12 = vmul.f32 %v12942_v13, %v2991_v46  ;;  %9925 = vmatpush3.bf16.msra.mxu0 %v9924_v23  ;;  %9949 = vmatpush3.bf16.msra.mxu1 %v9948_v59  ;;  %v3404_v23 = vld [vmem:[#allocation22 + $0x1f8] sm:$0xff]  ;;  %v9942_v59 = vpack.c.bf16 %v3316_v18, %v3315_v63  ;;  %v3479_v14 = vld [vmem:[#allocation22 + $0x210] sm:$0xff]  ;;  %v3657_v27 = vld [vmem:[#allocation22 + $0x320] sm:$0xff] }
 0x644   : > { %v2995_v20 = vpop.f32.mrb[52].mxu1  ;;  %9926 = vmatprep.subr.bf16.mxu0 %v11546_v6  ;;  %9950 = vmatprep.subr.bf16.mxu1 %v11546_v6  ;;  %v2886_v49 = vadd.f32 %v7366_v35, %v12936_v61  ;;  %v3398_v61 = vld [vmem:[#allocation22 + $0x1c8] sm:$0xff]  ;;  %v9966_v0 = vpack.c.bf16 %v3404_v23, %v3403_v21  ;;  %v3480_v46 = vld [vmem:[#allocation22 + $0x218] sm:$0xff]  ;;  %v3481_v35 = vld [vmem:[#allocation22 + $0x220] sm:$0xff] }
 0x645   : > { %v3113_v45 = vsel %vm3104_vm13, %v3059_v36, 0.0  ;;  %v3033_v38 = vadd.f32 %v12944_v17, %v3017_v12  ;;  %v8237_v52 = vpop.f32.mrb[53].mxu1  ;;  %v9957_v39 = vpack.c.bf16 %v3398_v61, %v3397_v4  ;;  %v3300_v34 = vld [vmem:[#allocation4 + $0x16] sm:$0x1]  ;;  %v9972_v36 = vpack.c.bf16 %v3480_v46, %v3479_v14  ;;  %v3575_v61 = vld [vmem:[#allocation22 + $0x2d0] sm:$0xff]  ;;  %v3658_v28 = vld [vmem:[#allocation22 + $0x328] sm:$0xff] }
 0x646   : > { %3122 = vst [vmem:[#allocation4 + $0x32] sm:$0xff] %v3113_v45  ;;  %v2996_v57 = vadd.f32 %v2995_v20, %v2886_v49  ;;  %v9996_v12 = vpack.c.bf16 %v3568_v31, %v3567_v41  ;;  %v3570_v20 = vld [vmem:[#allocation22 + $0x2a8] sm:$0xff]  ;;  %v3484_v45 = vld [vmem:[#allocation22 + $0x238] sm:$0xff]  ;;  %v3655_v63 = vld [vmem:[#allocation22 + $0x310] sm:$0xff]  ;;  %v10023_v14 = vpack.c.bf16 %v3658_v28, %v3657_v27 }
 0x647   : > { %v3060_v55 = vmax.f32 %v3033_v38, 0.0  ;;  %9928 = vmatpush3.bf16.msra.mxu0 %v9927_v33  ;;  %9952 = vmatpush3.bf16.msra.mxu1 %v9951_v53  ;;  %v3388_v33 = vld [vmem:[#allocation4 + $0x17] sm:$0x1]  ;;  %v3482_v53 = vld [vmem:[#allocation22 + $0x228] sm:$0xff]  ;;  %v9999_v47 = vpack.c.bf16 %v3570_v20, %v3569_v40  ;;  %v3571_v38 = vld [vmem:[#allocation22 + $0x2b0] sm:$0xff]  ;;  %v9978_v52 = vpack.c.bf16 %v3484_v45, %v3483_v32 }
 0x648   : > { %v3000_v2 = vpop.f32.mrb[54].mxu1  ;;  %9929 = vmatprep.subr.bf16.mxu0 %v11546_v6  ;;  %9953 = vmatprep.subr.bf16.mxu1 %v11546_v6  ;;  %v3018_v9 = vmul.f32 %v12942_v13, %v2996_v57  ;;  %v9975_v22 = vpack.c.bf16 %v3482_v53, %v3481_v35  ;;  %v3572_v49 = vld [vmem:[#allocation22 + $0x2b8] sm:$0xff]  ;;  %v3486_v57 = vld [vmem:[#allocation22 + $0x248] sm:$0xff]  ;;  %v3743_v21 = vld [vmem:[#allocation22 + $0x390] sm:$0xff] }
 0x649   : > { %v3114_v48 = vsel %vm3105_vm0, %v3060_v55, 0.0  ;;  %v8240_v56 = vpop.f32.mrb[55].mxu1  ;;  %v10002_v54 = vpack.c.bf16 %v3572_v49, %v3571_v38  ;;  %v3485_v55 = vld [vmem:[#allocation22 + $0x240] sm:$0xff]  ;;  %v3487_v2 = vld [vmem:[#allocation22 + $0x250] sm:$0xff]  ;;  %v3488_v4 = vld [vmem:[#allocation22 + $0x258] sm:$0xff] }
 0x64a   : > { %3123 = vst [vmem:[#allocation4 + $0x3a] sm:$0xff] %v3114_v48  ;;  %v3034_v26 = vadd.f32 %v12944_v17, %v3018_v9  ;;  %v3313_v17 = vld [vmem:[#allocation22 + $0x160] sm:$0xff]  ;;  %v9981_v60 = vpack.c.bf16 %v3486_v57, %v3485_v55  ;;  %v3576_v48 = vld [vmem:[#allocation22 + $0x2d8] sm:$0xff]  ;;  %v9984_v9 = vpack.c.bf16 %v3488_v4, %v3487_v2  ;;  %v3659_v41 = vld [vmem:[#allocation22 + $0x330] sm:$0xff] }
 0x64b   : > { %9931 = vmatpush3.bf16.msra.mxu0 %v9930_v58  ;;  %9955 = vmatpush3.bf16.msra.mxu1 %v9954_v42  ;;  %v9939_v5 = vpack.c.bf16 %v3314_v44, %v3313_v17  ;;  %v3573_v58 = vld [vmem:[#allocation22 + $0x2c0] sm:$0xff]  ;;  %v3574_v42 = vld [vmem:[#allocation22 + $0x2c8] sm:$0xff]  ;;  %v10008_v56 = vpack.c.bf16 %v3576_v48, %v3575_v61  ;;  %v3492_v51 = vld [vmem:[#allocation22 + $0x278] sm:$0xff] }
 0x64c   : > { %9932 = vmatprep.subr.bf16.mxu0 %v11546_v6  ;;  %9956 = vmatprep.subr.bf16.mxu1 %v11546_v6  ;;  %v3061_v43 = vmax.f32 %v3034_v26, 0.0  ;;  %v10005_v19 = vpack.c.bf16 %v3574_v42, %v3573_v58  ;;  %v3490_v26 = vld [vmem:[#allocation22 + $0x268] sm:$0xff]  ;;  %v3653_v17 = vld [vmem:[#allocation22 + $0x300] sm:$0xff]  ;;  %v3656_v18 = vld [vmem:[#allocation22 + $0x318] sm:$0xff] }
 0x64d   : > { %v3654_v44 = vld [vmem:[#allocation22 + $0x308] sm:$0xff]  ;;  %v3744_v23 = vld [vmem:[#allocation22 + $0x398] sm:$0xff]  ;;  %v10020_v25 = vpack.c.bf16 %v3656_v18, %v3655_v63  ;;  %v3661_v35 = vld [vmem:[#allocation22 + $0x340] sm:$0xff] }
 0x64e   : > { %v3115_v13 = vsel %vm3106_vm2, %v3061_v43, 0.0  ;;  %v3579_v43 = vld [vmem:[#allocation22 + $0x2f0] sm:$0xff]  ;;  %v10044_v24 = vpack.c.bf16 %v3744_v23, %v3743_v21  ;;  %v3660_v31 = vld [vmem:[#allocation22 + $0x338] sm:$0xff]  ;;  %v3662_v53 = vld [vmem:[#allocation22 + $0x348] sm:$0xff] }
 0x64f   : > { %9934 = vmatpush3.bf16.msra.mxu0 %v9933_v10  ;;  %9958 = vmatpush3.bf16.msra.mxu1 %v9957_v39  ;;  %3124 = vst [vmem:[#allocation4 + $0x42] sm:$0xff] %v3115_v13  ;;  %v3489_v10 = vld [vmem:[#allocation22 + $0x260] sm:$0xff]  ;;  %v3580_v13 = vld [vmem:[#allocation22 + $0x2f8] sm:$0xff]  ;;  %v3750_v20 = vld [vmem:[#allocation22 + $0x3c8] sm:$0xff] }
 0x650   : > { %9935 = vmatprep.subr.bf16.mxu0 %v11546_v6  ;;  %9959 = vmatprep.subr.bf16.mxu1 %v11546_v6  ;;  %v3577_v39 = vld [vmem:[#allocation22 + $0x2e0] sm:$0xff]  ;;  %v9987_v7 = vpack.c.bf16 %v3490_v26, %v3489_v10  ;;  %v3663_v32 = vld [vmem:[#allocation22 + $0x350] sm:$0xff]  ;;  %v3664_v45 = vld [vmem:[#allocation22 + $0x358] sm:$0xff] }
 0x651   : > { %v10011_v37 = vpack.c.bf16 %v3578_v62, %v3577_v39  ;;  %v3749_v40 = vld [vmem:[#allocation22 + $0x3c0] sm:$0xff]  ;;  %v3751_v38 = vld [vmem:[#allocation22 + $0x3d0] sm:$0xff]  ;;  %v3752_v49 = vld [vmem:[#allocation22 + $0x3d8] sm:$0xff] }
 0x652   : > { %v3665_v55 = vld [vmem:[#allocation22 + $0x360] sm:$0xff]  ;;  %v3666_v57 = vld [vmem:[#allocation22 + $0x368] sm:$0xff]  ;;  %v3667_v2 = vld [vmem:[#allocation22 + $0x370] sm:$0xff] }
 0x653   : > { %9937 = vmatpush3.bf16.msra.mxu0 %v9936_v11  ;;  %9961 = vmatpush3.bf16.msra.mxu1 %v9960_v50  ;;  %v9990_v11 = vpack.c.bf16 %v3492_v51, %v3491_v8  ;;  %v10014_v50 = vpack.c.bf16 %v3580_v13, %v3579_v43  ;;  %v3753_v58 = vld [vmem:[#allocation22 + $0x3e0] sm:$0xff]  ;;  %v3754_v42 = vld [vmem:[#allocation22 + $0x3e8] sm:$0xff]  ;;  %v3668_v4 = vld [vmem:[#allocation22 + $0x378] sm:$0xff] }
 0x654   : > { %9938 = vmatprep.subr.bf16.mxu0 %v11546_v6  ;;  %9962 = vmatprep.subr.bf16.mxu1 %v11546_v6  ;;  %v3755_v61 = vld [vmem:[#allocation22 + $0x3f0] sm:$0xff]  ;;  %v3756_v48 = vld [vmem:[#allocation22 + $0x3f8] sm:$0xff]  ;;  %v3829_v10 = vld [vmem:[#allocation22 + $0x400] sm:$0xff] }
 0x655   : > { %v3830_v26 = vld [vmem:[#allocation22 + $0x408] sm:$0xff]  ;;  %v3917_v39 = vld [vmem:[#allocation22 + $0x480] sm:$0xff]  ;;  %v3831_v8 = vld [vmem:[#allocation22 + $0x410] sm:$0xff] }
 0x656   : > { %v3918_v62 = vld [vmem:[#allocation22 + $0x488] sm:$0xff]  ;;  %v3832_v51 = vld [vmem:[#allocation22 + $0x418] sm:$0xff]  ;;  %v3919_v43 = vld [vmem:[#allocation22 + $0x490] sm:$0xff] }
 0x657   : > { %9940 = vmatpush3.bf16.msra.mxu0 %v9939_v5  ;;  %9964 = vmatpush3.bf16.msra.mxu1 %v9963_v15  ;;  %v10017_v5 = vpack.c.bf16 %v3654_v44, %v3653_v17  ;;  %v10041_v15 = vpack.c.bf16 %v3742_v3, %v3741_v1  ;;  %v3920_v13 = vld [vmem:[#allocation22 + $0x498] sm:$0xff]  ;;  %v10068_v17 = vpack.c.bf16 %v3832_v51, %v3831_v8  ;;  %v3833_v1 = vld [vmem:[#allocation22 + $0x420] sm:$0xff]  ;;  %v3834_v3 = vld [vmem:[#allocation22 + $0x428] sm:$0xff] }
 0x658   : > { %9941 = vmatprep.subr.bf16.mxu0 %v11546_v6  ;;  %9965 = vmatprep.subr.bf16.mxu1 %v11546_v6  ;;  %v10092_v44 = vpack.c.bf16 %v3920_v13, %v3919_v43  ;;  %v10071_v63 = vpack.c.bf16 %v3834_v3, %v3833_v1  ;;  %v3835_v21 = vld [vmem:[#allocation22 + $0x430] sm:$0xff]  ;;  %v3836_v23 = vld [vmem:[#allocation22 + $0x438] sm:$0xff]  ;;  %v3837_v27 = vld [vmem:[#allocation22 + $0x440] sm:$0xff] }
 0x659   : > { %v3838_v28 = vld [vmem:[#allocation22 + $0x448] sm:$0xff]  ;;  %v4011_v43 = vld [vmem:[#allocation22 + $0x530] sm:$0xff]  ;;  %v4012_v13 = vld [vmem:[#allocation22 + $0x538] sm:$0xff] }
 0x65a   : > { %v4013_v1 = vld [vmem:[#allocation22 + $0x540] sm:$0xff]  ;;  %v4014_v3 = vld [vmem:[#allocation22 + $0x548] sm:$0xff] }
 0x65b   : > { %9943 = vmatpush3.bf16.msra.mxu0 %v9942_v59  ;;  %9967 = vmatpush3.bf16.msra.mxu1 %v9966_v0  ;;  %v3476_v59 = vld [vmem:[#allocation4 + $0x18] sm:$0x1]  ;;  %v3564_v0 = vld [vmem:[#allocation4 + $0x19] sm:$0x1] }
 0x65c   : > { %9968 = vmatprep.subr.bf16.mxu0 %v11546_v6  ;;  %9992 = vmatprep.subr.bf16.mxu1 %v11546_v6 }
 0x65e   : > { %8344 = vmatmul.mubr.f32.vlgmr.msra.gmra.mrb[54].mxu0 %v3300_v34  ;;  %8379 = vmatmul.mubr.f32.vlgmr.msra.gmra.mrb[58].mxu1 %v3388_v33  ;;  %v3747_v34 = vld [vmem:[#allocation22 + $0x3b0] sm:$0xff]  ;;  %v3748_v33 = vld [vmem:[#allocation22 + $0x3b8] sm:$0xff] }
 0x65f   : > { %9970 = vmatpush3.bf16.msra.mxu0 %v9969_v30  ;;  %9994 = vmatpush3.bf16.msra.mxu1 %v9993_v29  ;;  %v3745_v30 = vld [vmem:[#allocation22 + $0x3a0] sm:$0xff]  ;;  %v3746_v29 = vld [vmem:[#allocation22 + $0x3a8] sm:$0xff] }
 0x660   : > { %9971 = vmatprep.subr.bf16.mxu0 %v11546_v6  ;;  %9995 = vmatprep.subr.bf16.mxu1 %v11546_v6  ;;  %v10047_v46 = vpack.c.bf16 %v3746_v29, %v3745_v30  ;;  %v3925_v30 = vld [vmem:[#allocation22 + $0x4c0] sm:$0xff]  ;;  %v3926_v29 = vld [vmem:[#allocation22 + $0x4c8] sm:$0xff] }
 0x661   : > { %8413 = vmatprep.mubr.msk.f32.mxu0 %vm11549_vm5, %v11550_v16  ;;  %8448 = vmatprep.mubr.msk.f32.mxu1 %vm11549_vm5, %v11550_v16 }
 0x663   : > { %9973 = vmatpush3.bf16.msra.mxu0 %v9972_v36  ;;  %9997 = vmatpush3.bf16.msra.mxu1 %v9996_v12  ;;  %v10026_v36 = vpack.c.bf16 %v3660_v31, %v3659_v41  ;;  %v10050_v12 = vpack.c.bf16 %v3748_v33, %v3747_v34  ;;  %v3839_v41 = vld [vmem:[#allocation22 + $0x450] sm:$0xff]  ;;  %v3840_v31 = vld [vmem:[#allocation22 + $0x458] sm:$0xff] }
 0x664   : > { %9974 = vmatprep.subr.bf16.mxu0 %v11546_v6  ;;  %9998 = vmatprep.subr.bf16.mxu1 %v11546_v6  ;;  %v3927_v34 = vld [vmem:[#allocation22 + $0x4d0] sm:$0xff]  ;;  %v3928_v33 = vld [vmem:[#allocation22 + $0x4d8] sm:$0xff] }
 0x667   : > { %9976 = vmatpush3.bf16.msra.mxu0 %v9975_v22  ;;  %10000 = vmatpush3.bf16.msra.mxu1 %v9999_v47  ;;  %v10029_v22 = vpack.c.bf16 %v3662_v53, %v3661_v35  ;;  %v10053_v47 = vpack.c.bf16 %v3750_v20, %v3749_v40  ;;  %v3841_v35 = vld [vmem:[#allocation22 + $0x460] sm:$0xff]  ;;  %v3842_v53 = vld [vmem:[#allocation22 + $0x468] sm:$0xff] }
 0x668   : > { %9977 = vmatprep.subr.bf16.mxu0 %v11546_v6  ;;  %10001 = vmatprep.subr.bf16.mxu1 %v11546_v6  ;;  %v3929_v40 = vld [vmem:[#allocation22 + $0x4e0] sm:$0xff]  ;;  %v3930_v20 = vld [vmem:[#allocation22 + $0x4e8] sm:$0xff] }
 0x66b   : > { %9979 = vmatpush3.bf16.msra.mxu0 %v9978_v52  ;;  %10003 = vmatpush3.bf16.msra.mxu1 %v10002_v54  ;;  %v10032_v52 = vpack.c.bf16 %v3664_v45, %v3663_v32  ;;  %v10056_v54 = vpack.c.bf16 %v3752_v49, %v3751_v38  ;;  %v3843_v32 = vld [vmem:[#allocation22 + $0x470] sm:$0xff]  ;;  %v3844_v45 = vld [vmem:[#allocation22 + $0x478] sm:$0xff] }
 0x66c   : > { %9980 = vmatprep.subr.bf16.mxu0 %v11546_v6  ;;  %10004 = vmatprep.subr.bf16.mxu1 %v11546_v6  ;;  %v3931_v38 = vld [vmem:[#allocation22 + $0x4f0] sm:$0xff]  ;;  %v3932_v49 = vld [vmem:[#allocation22 + $0x4f8] sm:$0xff] }
 0x66f   : > { %9982 = vmatpush3.bf16.msra.mxu0 %v9981_v60  ;;  %10006 = vmatpush3.bf16.msra.mxu1 %v10005_v19  ;;  %v10035_v60 = vpack.c.bf16 %v3666_v57, %v3665_v55  ;;  %v10059_v19 = vpack.c.bf16 %v3754_v42, %v3753_v58  ;;  %v4005_v55 = vld [vmem:[#allocation22 + $0x500] sm:$0xff]  ;;  %v4006_v57 = vld [vmem:[#allocation22 + $0x508] sm:$0xff] }
 0x670   : > { %9983 = vmatprep.subr.bf16.mxu0 %v11546_v6  ;;  %10007 = vmatprep.subr.bf16.mxu1 %v11546_v6  ;;  %v4093_v58 = vld [vmem:[#allocation22 + $0x580] sm:$0xff]  ;;  %v4094_v42 = vld [vmem:[#allocation22 + $0x588] sm:$0xff] }
 0x673   : > { %9985 = vmatpush3.bf16.msra.mxu0 %v9984_v9  ;;  %10009 = vmatpush3.bf16.msra.mxu1 %v10008_v56  ;;  %v10038_v9 = vpack.c.bf16 %v3668_v4, %v3667_v2  ;;  %v10062_v56 = vpack.c.bf16 %v3756_v48, %v3755_v61  ;;  %v4007_v2 = vld [vmem:[#allocation22 + $0x510] sm:$0xff]  ;;  %v4008_v4 = vld [vmem:[#allocation22 + $0x518] sm:$0xff] }
 0x674   : > { %9986 = vmatprep.subr.bf16.mxu0 %v11546_v6  ;;  %10010 = vmatprep.subr.bf16.mxu1 %v11546_v6  ;;  %v4095_v61 = vld [vmem:[#allocation22 + $0x590] sm:$0xff]  ;;  %v4096_v48 = vld [vmem:[#allocation22 + $0x598] sm:$0xff] }
 0x677   : > { %9988 = vmatpush3.bf16.msra.mxu0 %v9987_v7  ;;  %10012 = vmatpush3.bf16.msra.mxu1 %v10011_v37  ;;  %v10065_v7 = vpack.c.bf16 %v3830_v26, %v3829_v10  ;;  %v10089_v37 = vpack.c.bf16 %v3918_v62, %v3917_v39  ;;  %v10116_v10 = vpack.c.bf16 %v4008_v4, %v4007_v2  ;;  %v4009_v39 = vld [vmem:[#allocation22 + $0x520] sm:$0xff]  ;;  %v4010_v62 = vld [vmem:[#allocation22 + $0x528] sm:$0xff] }
 0x678   : > { %9989 = vmatprep.subr.bf16.mxu0 %v11546_v6  ;;  %10013 = vmatprep.subr.bf16.mxu1 %v11546_v6  ;;  %v10140_v26 = vpack.c.bf16 %v4096_v48, %v4095_v61  ;;  %v10119_v8 = vpack.c.bf16 %v4010_v62, %v4009_v39  ;;  %v4187_v61 = vld [vmem:[#allocation22 + $0x630] sm:$0xff]  ;;  %v4188_v48 = vld [vmem:[#allocation22 + $0x638] sm:$0xff]  ;;  %v4189_v39 = vld [vmem:[#allocation22 + $0x640] sm:$0xff] }
 0x679   : > { %v4190_v62 = vld [vmem:[#allocation22 + $0x648] sm:$0xff] }
 0x67b   : > { %9991 = vmatpush3.bf16.msra.mxu0 %v9990_v11  ;;  %10015 = vmatpush3.bf16.msra.mxu1 %v10014_v50  ;;  %v3652_v11 = vld [vmem:[#allocation4 + $0x1a] sm:$0x1]  ;;  %v3740_v50 = vld [vmem:[#allocation4 + $0x1d] sm:$0x1] }
 0x67c   : > { %10016 = vmatprep.subr.bf16.mxu0 %v11546_v6  ;;  %10040 = vmatprep.subr.bf16.mxu1 %v11546_v6 }
 0x67e   : > { %8414 = vmatmul.mubr.f32.vlgmr.msra.gmra.mrb[56].mxu0 %v3476_v59  ;;  %8449 = vmatmul.mubr.f32.vlgmr.msra.gmra.mrb[60].mxu1 %v3564_v0  ;;  %v3923_v59 = vld [vmem:[#allocation22 + $0x4b0] sm:$0xff]  ;;  %v3924_v0 = vld [vmem:[#allocation22 + $0x4b8] sm:$0xff] }
 0x67f   : > { %10018 = vmatpush3.bf16.msra.mxu0 %v10017_v5  ;;  %10042 = vmatpush3.bf16.msra.mxu1 %v10041_v15  ;;  %v3921_v5 = vld [vmem:[#allocation22 + $0x4a0] sm:$0xff]  ;;  %v3922_v15 = vld [vmem:[#allocation22 + $0x4a8] sm:$0xff] }
 0x680   : > { %10019 = vmatprep.subr.bf16.mxu0 %v11546_v6  ;;  %10043 = vmatprep.subr.bf16.mxu1 %v11546_v6  ;;  %v10095_v18 = vpack.c.bf16 %v3922_v15, %v3921_v5  ;;  %v4101_v5 = vld [vmem:[#allocation22 + $0x5c0] sm:$0xff]  ;;  %v4102_v15 = vld [vmem:[#allocation22 + $0x5c8] sm:$0xff] }
 0x681   : > { %8483 = vmatprep.mubr.msk.f32.mxu0 %vm11549_vm5, %v11550_v16  ;;  %8518 = vmatprep.mubr.msk.f32.mxu1 %vm11549_vm5, %v11550_v16 }
 0x683   : > { %10021 = vmatpush3.bf16.msra.mxu0 %v10020_v25  ;;  %10045 = vmatpush3.bf16.msra.mxu1 %v10044_v24  ;;  %v10074_v25 = vpack.c.bf16 %v3836_v23, %v3835_v21  ;;  %v10098_v24 = vpack.c.bf16 %v3924_v0, %v3923_v59  ;;  %v4015_v21 = vld [vmem:[#allocation22 + $0x550] sm:$0xff]  ;;  %v4016_v23 = vld [vmem:[#allocation22 + $0x558] sm:$0xff] }
 0x684   : > { %10022 = vmatprep.subr.bf16.mxu0 %v11546_v6  ;;  %10046 = vmatprep.subr.bf16.mxu1 %v11546_v6  ;;  %v4103_v59 = vld [vmem:[#allocation22 + $0x5d0] sm:$0xff]  ;;  %v4104_v0 = vld [vmem:[#allocation22 + $0x5d8] sm:$0xff] }
 0x687   : > { %10024 = vmatpush3.bf16.msra.mxu0 %v10023_v14  ;;  %10048 = vmatpush3.bf16.msra.mxu1 %v10047_v46  ;;  %v10077_v14 = vpack.c.bf16 %v3838_v28, %v3837_v27  ;;  %v10101_v46 = vpack.c.bf16 %v3926_v29, %v3925_v30  ;;  %v4017_v27 = vld [vmem:[#allocation22 + $0x560] sm:$0xff]  ;;  %v4018_v28 = vld [vmem:[#allocation22 + $0x568] sm:$0xff] }
 0x688   : > { %10025 = vmatprep.subr.bf16.mxu0 %v11546_v6  ;;  %10049 = vmatprep.subr.bf16.mxu1 %v11546_v6  ;;  %v4105_v30 = vld [vmem:[#allocation22 + $0x5e0] sm:$0xff]  ;;  %v4106_v29 = vld [vmem:[#allocation22 + $0x5e8] sm:$0xff] }
 0x68b   : > { %10027 = vmatpush3.bf16.msra.mxu0 %v10026_v36  ;;  %10051 = vmatpush3.bf16.msra.mxu1 %v10050_v12  ;;  %v10080_v36 = vpack.c.bf16 %v3840_v31, %v3839_v41  ;;  %v10104_v12 = vpack.c.bf16 %v3928_v33, %v3927_v34  ;;  %v4019_v41 = vld [vmem:[#allocation22 + $0x570] sm:$0xff]  ;;  %v4020_v31 = vld [vmem:[#allocation22 + $0x578] sm:$0xff] }
 0x68c   : > { %10028 = vmatprep.subr.bf16.mxu0 %v11546_v6  ;;  %10052 = vmatprep.subr.bf16.mxu1 %v11546_v6  ;;  %v4107_v34 = vld [vmem:[#allocation22 + $0x5f0] sm:$0xff]  ;;  %v4108_v33 = vld [vmem:[#allocation22 + $0x5f8] sm:$0xff] }
 0x68f   : > { %10030 = vmatpush3.bf16.msra.mxu0 %v10029_v22  ;;  %10054 = vmatpush3.bf16.msra.mxu1 %v10053_v47  ;;  %v10083_v22 = vpack.c.bf16 %v3842_v53, %v3841_v35  ;;  %v10107_v47 = vpack.c.bf16 %v3930_v20, %v3929_v40  ;;  %v4181_v35 = vld [vmem:[#allocation22 + $0x600] sm:$0xff]  ;;  %v4182_v53 = vld [vmem:[#allocation22 + $0x608] sm:$0xff] }
 0x690   : > { %10031 = vmatprep.subr.bf16.mxu0 %v11546_v6  ;;  %10055 = vmatprep.subr.bf16.mxu1 %v11546_v6  ;;  %v4269_v40 = vld [vmem:[#allocation22 + $0x680] sm:$0xff]  ;;  %v4270_v20 = vld [vmem:[#allocation22 + $0x688] sm:$0xff] }
 0x693   : > { %10033 = vmatpush3.bf16.msra.mxu0 %v10032_v52  ;;  %10057 = vmatpush3.bf16.msra.mxu1 %v10056_v54  ;;  %v10086_v52 = vpack.c.bf16 %v3844_v45, %v3843_v32  ;;  %v10110_v54 = vpack.c.bf16 %v3932_v49, %v3931_v38  ;;  %v4183_v32 = vld [vmem:[#allocation22 + $0x610] sm:$0xff]  ;;  %v4184_v45 = vld [vmem:[#allocation22 + $0x618] sm:$0xff] }
 0x694   : > { %10034 = vmatprep.subr.bf16.mxu0 %v11546_v6  ;;  %10058 = vmatprep.subr.bf16.mxu1 %v11546_v6  ;;  %v4271_v38 = vld [vmem:[#allocation22 + $0x690] sm:$0xff]  ;;  %v4272_v49 = vld [vmem:[#allocation22 + $0x698] sm:$0xff] }
 0x697   : > { %10036 = vmatpush3.bf16.msra.mxu0 %v10035_v60  ;;  %10060 = vmatpush3.bf16.msra.mxu1 %v10059_v19  ;;  %v10113_v60 = vpack.c.bf16 %v4006_v57, %v4005_v55  ;;  %v10137_v19 = vpack.c.bf16 %v4094_v42, %v4093_v58  ;;  %v10164_v55 = vpack.c.bf16 %v4184_v45, %v4183_v32  ;;  %v4185_v58 = vld [vmem:[#allocation22 + $0x620] sm:$0xff]  ;;  %v4186_v42 = vld [vmem:[#allocation22 + $0x628] sm:$0xff] }
 0x698   : > { %10037 = vmatprep.subr.bf16.mxu0 %v11546_v6  ;;  %10061 = vmatprep.subr.bf16.mxu1 %v11546_v6  ;;  %v10188_v57 = vpack.c.bf16 %v4272_v49, %v4271_v38  ;;  %v10167_v2 = vpack.c.bf16 %v4186_v42, %v4185_v58  ;;  %v4363_v38 = vld [vmem:[#allocation22 + $0x730] sm:$0xff]  ;;  %v4364_v49 = vld [vmem:[#allocation22 + $0x738] sm:$0xff]  ;;  %v4365_v58 = vld [vmem:[#allocation22 + $0x740] sm:$0xff] }
 0x699   : > { %v4366_v42 = vld [vmem:[#allocation22 + $0x748] sm:$0xff] }
 0x69b   : > { %10039 = vmatpush3.bf16.msra.mxu0 %v10038_v9  ;;  %10063 = vmatpush3.bf16.msra.mxu1 %v10062_v56  ;;  %v3828_v9 = vld [vmem:[#allocation4 + $0x1e] sm:$0x1]  ;;  %v3916_v56 = vld [vmem:[#allocation4 + $0x1f] sm:$0x1] }
 0x69c   : > { %10064 = vmatprep.subr.bf16.mxu0 %v11546_v6  ;;  %10088 = vmatprep.subr.bf16.mxu1 %v11546_v6 }
 0x69e   : > { %8484 = vmatmul.mubr.f32.vlgmr.msra.gmra.mrb[58].mxu0 %v3652_v11  ;;  %8519 = vmatmul.mubr.f32.vlgmr.msra.gmra.mrb[62].mxu1 %v3740_v50  ;;  %v4099_v11 = vld [vmem:[#allocation22 + $0x5b0] sm:$0xff]  ;;  %v4100_v50 = vld [vmem:[#allocation22 + $0x5b8] sm:$0xff] }
 0x69f   : > { %10066 = vmatpush3.bf16.msra.mxu0 %v10065_v7  ;;  %10090 = vmatpush3.bf16.msra.mxu1 %v10089_v37  ;;  %v4097_v7 = vld [vmem:[#allocation22 + $0x5a0] sm:$0xff]  ;;  %v4098_v37 = vld [vmem:[#allocation22 + $0x5a8] sm:$0xff] }
 0x6a0   : > { %10067 = vmatprep.subr.bf16.mxu0 %v11546_v6  ;;  %10091 = vmatprep.subr.bf16.mxu1 %v11546_v6  ;;  %v10143_v51 = vpack.c.bf16 %v4098_v37, %v4097_v7  ;;  %v4277_v7 = vld [vmem:[#allocation22 + $0x6c0] sm:$0xff]  ;;  %v4278_v37 = vld [vmem:[#allocation22 + $0x6c8] sm:$0xff] }
 0x6a1   : > { %8553 = vmatprep.mubr.msk.f32.mxu0 %vm11549_vm5, %v11550_v16  ;;  %8588 = vmatprep.mubr.msk.f32.mxu1 %vm11549_vm5, %v11550_v16 }
 0x6a3   : > { %10069 = vmatpush3.bf16.msra.mxu0 %v10068_v17  ;;  %10093 = vmatpush3.bf16.msra.mxu1 %v10092_v44  ;;  %v10122_v17 = vpack.c.bf16 %v4012_v13, %v4011_v43  ;;  %v10146_v44 = vpack.c.bf16 %v4100_v50, %v4099_v11  ;;  %v4191_v43 = vld [vmem:[#allocation22 + $0x650] sm:$0xff]  ;;  %v4192_v13 = vld [vmem:[#allocation22 + $0x658] sm:$0xff] }
 0x6a4   : > { %10070 = vmatprep.subr.bf16.mxu0 %v11546_v6  ;;  %10094 = vmatprep.subr.bf16.mxu1 %v11546_v6  ;;  %v4279_v11 = vld [vmem:[#allocation22 + $0x6d0] sm:$0xff]  ;;  %v4280_v50 = vld [vmem:[#allocation22 + $0x6d8] sm:$0xff] }
 0x6a7   : > { %10072 = vmatpush3.bf16.msra.mxu0 %v10071_v63  ;;  %10096 = vmatpush3.bf16.msra.mxu1 %v10095_v18  ;;  %v10125_v63 = vpack.c.bf16 %v4014_v3, %v4013_v1  ;;  %v10149_v18 = vpack.c.bf16 %v4102_v15, %v4101_v5  ;;  %v4193_v1 = vld [vmem:[#allocation22 + $0x660] sm:$0xff]  ;;  %v4194_v3 = vld [vmem:[#allocation22 + $0x668] sm:$0xff] }
 0x6a8   : > { %10073 = vmatprep.subr.bf16.mxu0 %v11546_v6  ;;  %10097 = vmatprep.subr.bf16.mxu1 %v11546_v6  ;;  %v4281_v5 = vld [vmem:[#allocation22 + $0x6e0] sm:$0xff]  ;;  %v4282_v15 = vld [vmem:[#allocation22 + $0x6e8] sm:$0xff] }
 0x6ab   : > { %10075 = vmatpush3.bf16.msra.mxu0 %v10074_v25  ;;  %10099 = vmatpush3.bf16.msra.mxu1 %v10098_v24  ;;  %v10128_v25 = vpack.c.bf16 %v4016_v23, %v4015_v21  ;;  %v10152_v24 = vpack.c.bf16 %v4104_v0, %v4103_v59  ;;  %v4195_v21 = vld [vmem:[#allocation22 + $0x670] sm:$0xff]  ;;  %v4196_v23 = vld [vmem:[#allocation22 + $0x678] sm:$0xff] }
 0x6ac   : > { %10076 = vmatprep.subr.bf16.mxu0 %v11546_v6  ;;  %10100 = vmatprep.subr.bf16.mxu1 %v11546_v6  ;;  %v4283_v59 = vld [vmem:[#allocation22 + $0x6f0] sm:$0xff]  ;;  %v4284_v0 = vld [vmem:[#allocation22 + $0x6f8] sm:$0xff] }
 0x6af   : > { %10078 = vmatpush3.bf16.msra.mxu0 %v10077_v14  ;;  %10102 = vmatpush3.bf16.msra.mxu1 %v10101_v46  ;;  %v10131_v14 = vpack.c.bf16 %v4018_v28, %v4017_v27  ;;  %v10155_v46 = vpack.c.bf16 %v4106_v29, %v4105_v30  ;;  %v4357_v27 = vld [vmem:[#allocation22 + $0x700] sm:$0xff]  ;;  %v4358_v28 = vld [vmem:[#allocation22 + $0x708] sm:$0xff] }
 0x6b0   : > { %10079 = vmatprep.subr.bf16.mxu0 %v11546_v6  ;;  %10103 = vmatprep.subr.bf16.mxu1 %v11546_v6  ;;  %v4445_v30 = vld [vmem:[#allocation22 + $0x780] sm:$0xff]  ;;  %v4446_v29 = vld [vmem:[#allocation22 + $0x788] sm:$0xff] }
 0x6b3   : > { %10081 = vmatpush3.bf16.msra.mxu0 %v10080_v36  ;;  %10105 = vmatpush3.bf16.msra.mxu1 %v10104_v12  ;;  %v10134_v36 = vpack.c.bf16 %v4020_v31, %v4019_v41  ;;  %v10158_v12 = vpack.c.bf16 %v4108_v33, %v4107_v34  ;;  %v4359_v41 = vld [vmem:[#allocation22 + $0x710] sm:$0xff]  ;;  %v4360_v31 = vld [vmem:[#allocation22 + $0x718] sm:$0xff] }
 0x6b4   : > { %10082 = vmatprep.subr.bf16.mxu0 %v11546_v6  ;;  %10106 = vmatprep.subr.bf16.mxu1 %v11546_v6  ;;  %v4447_v34 = vld [vmem:[#allocation22 + $0x790] sm:$0xff]  ;;  %v4448_v33 = vld [vmem:[#allocation22 + $0x798] sm:$0xff] }
 0x6b7   : > { %10084 = vmatpush3.bf16.msra.mxu0 %v10083_v22  ;;  %10108 = vmatpush3.bf16.msra.mxu1 %v10107_v47  ;;  %v10161_v22 = vpack.c.bf16 %v4182_v53, %v4181_v35  ;;  %v10185_v47 = vpack.c.bf16 %v4270_v20, %v4269_v40  ;;  %v10212_v35 = vpack.c.bf16 %v4360_v31, %v4359_v41  ;;  %v4361_v40 = vld [vmem:[#allocation22 + $0x720] sm:$0xff]  ;;  %v4362_v20 = vld [vmem:[#allocation22 + $0x728] sm:$0xff] }
 0x6b8   : > { %10085 = vmatprep.subr.bf16.mxu0 %v11546_v6  ;;  %10109 = vmatprep.subr.bf16.mxu1 %v11546_v6  ;;  %v10236_v53 = vpack.c.bf16 %v4448_v33, %v4447_v34  ;;  %v10215_v32 = vpack.c.bf16 %v4362_v20, %v4361_v40  ;;  %v4537_v31 = vld [vmem:[#allocation22 + $0x820] sm:$0xff]  ;;  %v4538_v34 = vld [vmem:[#allocation22 + $0x828] sm:$0xff]  ;;  %v4540_v40 = vld [vmem:[#allocation22 + $0x838] sm:$0xff] }
 0x6b9   : > { %v4625_v33 = vld [vmem:[#allocation22 + $0x8a0] sm:$0xff]  ;;  %v4627_v20 = vld [vmem:[#allocation22 + $0x8b0] sm:$0xff] }
 0x6bb   : > { %10087 = vmatpush3.bf16.msra.mxu0 %v10086_v52  ;;  %10111 = vmatpush3.bf16.msra.mxu1 %v10110_v54  ;;  %v4004_v52 = vld [vmem:[#allocation4 + $0x20] sm:$0x1]  ;;  %v4092_v54 = vld [vmem:[#allocation4 + $0x21] sm:$0x1] }
 0x6bc   : > { %10112 = vmatprep.subr.bf16.mxu0 %v11546_v6  ;;  %10136 = vmatprep.subr.bf16.mxu1 %v11546_v6 }
 0x6be   : > { %8554 = vmatmul.mubr.f32.vlgmr.msra.gmra.mrb[60].mxu0 %v3828_v9  ;;  %8589 = vmatmul.mubr.f32.vlgmr.msra.gmra.mrb[64].mxu1 %v3916_v56  ;;  %v4275_v9 = vld [vmem:[#allocation22 + $0x6b0] sm:$0xff]  ;;  %v4276_v56 = vld [vmem:[#allocation22 + $0x6b8] sm:$0xff] }
 0x6bf   : > { %10114 = vmatpush3.bf16.msra.mxu0 %v10113_v60  ;;  %10138 = vmatpush3.bf16.msra.mxu1 %v10137_v19  ;;  %v4273_v60 = vld [vmem:[#allocation22 + $0x6a0] sm:$0xff]  ;;  %v4274_v19 = vld [vmem:[#allocation22 + $0x6a8] sm:$0xff] }
 0x6c0   : > { %10115 = vmatprep.subr.bf16.mxu0 %v11546_v6  ;;  %10139 = vmatprep.subr.bf16.mxu1 %v11546_v6  ;;  %v10191_v4 = vpack.c.bf16 %v4274_v19, %v4273_v60  ;;  %v4453_v60 = vld [vmem:[#allocation22 + $0x7c0] sm:$0xff]  ;;  %v4454_v19 = vld [vmem:[#allocation22 + $0x7c8] sm:$0xff] }
 0x6c1   : > { %8623 = vmatprep.mubr.msk.f32.mxu0 %vm11549_vm5, %v11550_v16  ;;  %8658 = vmatprep.mubr.msk.f32.mxu1 %vm11549_vm5, %v11550_v16 }
 0x6c3   : > { %10117 = vmatpush3.bf16.msra.mxu0 %v10116_v10  ;;  %10141 = vmatpush3.bf16.msra.mxu1 %v10140_v26  ;;  %v10170_v10 = vpack.c.bf16 %v4188_v48, %v4187_v61  ;;  %v10194_v26 = vpack.c.bf16 %v4276_v56, %v4275_v9  ;;  %v4367_v61 = vld [vmem:[#allocation22 + $0x750] sm:$0xff]  ;;  %v4368_v48 = vld [vmem:[#allocation22 + $0x758] sm:$0xff] }
 0x6c4   : > { %10118 = vmatprep.subr.bf16.mxu0 %v11546_v6  ;;  %10142 = vmatprep.subr.bf16.mxu1 %v11546_v6  ;;  %v4455_v9 = vld [vmem:[#allocation22 + $0x7d0] sm:$0xff]  ;;  %v4456_v56 = vld [vmem:[#allocation22 + $0x7d8] sm:$0xff] }
 0x6c7   : > { %10120 = vmatpush3.bf16.msra.mxu0 %v10119_v8  ;;  %10144 = vmatpush3.bf16.msra.mxu1 %v10143_v51  ;;  %v10173_v8 = vpack.c.bf16 %v4190_v62, %v4189_v39  ;;  %v10197_v51 = vpack.c.bf16 %v4278_v37, %v4277_v7  ;;  %v4369_v39 = vld [vmem:[#allocation22 + $0x760] sm:$0xff]  ;;  %v4370_v62 = vld [vmem:[#allocation22 + $0x768] sm:$0xff] }
 0x6c8   : > { %10121 = vmatprep.subr.bf16.mxu0 %v11546_v6  ;;  %10145 = vmatprep.subr.bf16.mxu1 %v11546_v6  ;;  %v4457_v7 = vld [vmem:[#allocation22 + $0x7e0] sm:$0xff]  ;;  %v4458_v37 = vld [vmem:[#allocation22 + $0x7e8] sm:$0xff] }
 0x6cb   : > { %10123 = vmatpush3.bf16.msra.mxu0 %v10122_v17  ;;  %10147 = vmatpush3.bf16.msra.mxu1 %v10146_v44  ;;  %v10176_v17 = vpack.c.bf16 %v4192_v13, %v4191_v43  ;;  %v10200_v44 = vpack.c.bf16 %v4280_v50, %v4279_v11  ;;  %v10227_v50 = vpack.c.bf16 %v4370_v62, %v4369_v39 }
 0x6cc   : > { %10124 = vmatprep.subr.bf16.mxu0 %v11546_v6  ;;  %10148 = vmatprep.subr.bf16.mxu1 %v11546_v6 }
 0x6cf   : > { %10126 = vmatpush3.bf16.msra.mxu0 %v10125_v63  ;;  %10150 = vmatpush3.bf16.msra.mxu1 %v10149_v18  ;;  %v10179_v63 = vpack.c.bf16 %v4194_v3, %v4193_v1  ;;  %v10203_v18 = vpack.c.bf16 %v4282_v15, %v4281_v5  ;;  %v4372_v1 = vld [vmem:[#allocation22 + $0x778] sm:$0xff]  ;;  %v4459_v3 = vld [vmem:[#allocation22 + $0x7f0] sm:$0xff] }
 0x6d0   : > { %10127 = vmatprep.subr.bf16.mxu0 %v11546_v6  ;;  %10151 = vmatprep.subr.bf16.mxu1 %v11546_v6  ;;  %v4460_v5 = vld [vmem:[#allocation22 + $0x7f8] sm:$0xff] }
 0x6d3   : > { %10129 = vmatpush3.bf16.msra.mxu0 %v10128_v25  ;;  %10153 = vmatpush3.bf16.msra.mxu1 %v10152_v24  ;;  %v10182_v25 = vpack.c.bf16 %v4196_v23, %v4195_v21  ;;  %v10206_v24 = vpack.c.bf16 %v4284_v0, %v4283_v59  ;;  %v4534_v21 = vld [vmem:[#allocation22 + $0x808] sm:$0xff]  ;;  %v4621_v23 = vld [vmem:[#allocation22 + $0x880] sm:$0xff] }
 0x6d4   : > { %10130 = vmatprep.subr.bf16.mxu0 %v11546_v6  ;;  %10154 = vmatprep.subr.bf16.mxu1 %v11546_v6  ;;  %v4622_v59 = vld [vmem:[#allocation22 + $0x888] sm:$0xff] }
 0x6d7   : > { %10132 = vmatpush3.bf16.msra.mxu0 %v10131_v14  ;;  %10156 = vmatpush3.bf16.msra.mxu1 %v10155_v46  ;;  %v10209_v14 = vpack.c.bf16 %v4358_v28, %v4357_v27  ;;  %v10233_v46 = vpack.c.bf16 %v4446_v29, %v4445_v30  ;;  %v4536_v27 = vld [vmem:[#allocation22 + $0x818] sm:$0xff]  ;;  %v4623_v28 = vld [vmem:[#allocation22 + $0x890] sm:$0xff]  ;;  %v4356_v29 = vld [vmem:[#allocation4 + $0x26] sm:$0x1] }
 0x6d8   : > { %10133 = vmatprep.subr.bf16.mxu0 %v11546_v6  ;;  %10157 = vmatprep.subr.bf16.mxu1 %v11546_v6  ;;  %v4624_v30 = vld [vmem:[#allocation22 + $0x898] sm:$0xff] }
 0x6d9   : > { %v10284_v41 = vpack.c.bf16 %v4624_v30, %v4623_v28  ;;  %v4713_v28 = vld [vmem:[#allocation22 + $0x920] sm:$0xff]  ;;  %v4714_v30 = vld [vmem:[#allocation22 + $0x928] sm:$0xff] }
 0x6db   : > { %10135 = vmatpush3.bf16.msra.mxu0 %v10134_v36  ;;  %10159 = vmatpush3.bf16.msra.mxu1 %v10158_v12  ;;  %v4180_v36 = vld [vmem:[#allocation4 + $0x22] sm:$0x1]  ;;  %v4268_v12 = vld [vmem:[#allocation4 + $0x23] sm:$0x1] }
 0x6dc   : > { %10160 = vmatprep.subr.bf16.mxu0 %v11546_v6  ;;  %10184 = vmatprep.subr.bf16.mxu1 %v11546_v6 }
 0x6de   : > { %8624 = vmatmul.mubr.f32.vlgmr.msra.gmra.mrb[62].mxu0 %v4004_v52  ;;  %8659 = vmatmul.mubr.f32.vlgmr.msra.gmra.mrb[66].mxu1 %v4092_v54  ;;  %v4451_v52 = vld [vmem:[#allocation22 + $0x7b0] sm:$0xff]  ;;  %v4452_v54 = vld [vmem:[#allocation22 + $0x7b8] sm:$0xff] }
 0x6df   : > { %10162 = vmatpush3.bf16.msra.mxu0 %v10161_v22  ;;  %10186 = vmatpush3.bf16.msra.mxu1 %v10185_v47  ;;  %v4449_v22 = vld [vmem:[#allocation22 + $0x7a0] sm:$0xff]  ;;  %v4450_v47 = vld [vmem:[#allocation22 + $0x7a8] sm:$0xff] }
 0x6e0   : > { %10163 = vmatprep.subr.bf16.mxu0 %v11546_v6  ;;  %10187 = vmatprep.subr.bf16.mxu1 %v11546_v6  ;;  %v10239_v45 = vpack.c.bf16 %v4450_v47, %v4449_v22  ;;  %v4628_v22 = vld [vmem:[#allocation22 + $0x8b8] sm:$0xff] }
 0x6e1   : > { %8693 = vmatprep.mubr.msk.f32.mxu0 %vm11549_vm5, %v11550_v16  ;;  %8728 = vmatprep.mubr.msk.f32.mxu1 %vm11549_vm5, %v11550_v16 }
 0x6e3   : > { %10165 = vmatpush3.bf16.msra.mxu0 %v10164_v55  ;;  %10189 = vmatpush3.bf16.msra.mxu1 %v10188_v57  ;;  %v10218_v55 = vpack.c.bf16 %v4364_v49, %v4363_v38  ;;  %v10242_v57 = vpack.c.bf16 %v4452_v54, %v4451_v52  ;;  %v4542_v38 = vld [vmem:[#allocation22 + $0x848] sm:$0xff]  ;;  %v4629_v49 = vld [vmem:[#allocation22 + $0x8c0] sm:$0xff] }
 0x6e4   : > { %10166 = vmatprep.subr.bf16.mxu0 %v11546_v6  ;;  %10190 = vmatprep.subr.bf16.mxu1 %v11546_v6  ;;  %v4630_v52 = vld [vmem:[#allocation22 + $0x8c8] sm:$0xff] }
 0x6e7   : > { %10168 = vmatpush3.bf16.msra.mxu0 %v10167_v2  ;;  %10192 = vmatpush3.bf16.msra.mxu1 %v10191_v4  ;;  %v10221_v2 = vpack.c.bf16 %v4366_v42, %v4365_v58  ;;  %v10245_v4 = vpack.c.bf16 %v4454_v19, %v4453_v60  ;;  %v4544_v58 = vld [vmem:[#allocation22 + $0x858] sm:$0xff]  ;;  %v4631_v42 = vld [vmem:[#allocation22 + $0x8d0] sm:$0xff] }
 0x6e8   : > { %10169 = vmatprep.subr.bf16.mxu0 %v11546_v6  ;;  %10193 = vmatprep.subr.bf16.mxu1 %v11546_v6  ;;  %v4632_v60 = vld [vmem:[#allocation22 + $0x8d8] sm:$0xff] }
 0x6eb   : > { %10171 = vmatpush3.bf16.msra.mxu0 %v10170_v10  ;;  %10195 = vmatpush3.bf16.msra.mxu1 %v10194_v26  ;;  %v10224_v10 = vpack.c.bf16 %v4368_v48, %v4367_v61  ;;  %v10248_v26 = vpack.c.bf16 %v4456_v56, %v4455_v9  ;;  %v4546_v61 = vld [vmem:[#allocation22 + $0x868] sm:$0xff]  ;;  %v4633_v48 = vld [vmem:[#allocation22 + $0x8e0] sm:$0xff] }
 0x6ec   : > { %10172 = vmatprep.subr.bf16.mxu0 %v11546_v6  ;;  %10196 = vmatprep.subr.bf16.mxu1 %v11546_v6  ;;  %v4634_v9 = vld [vmem:[#allocation22 + $0x8e8] sm:$0xff] }
 0x6ef   : > { %10174 = vmatpush3.bf16.msra.mxu0 %v10173_v8  ;;  %10198 = vmatpush3.bf16.msra.mxu1 %v10197_v51 }
 0x6f0   : > { %10175 = vmatprep.subr.bf16.mxu0 %v11546_v6  ;;  %10199 = vmatprep.subr.bf16.mxu1 %v11546_v6 }
 0x6f3   : > { %10177 = vmatpush3.bf16.msra.mxu0 %v10176_v17  ;;  %10201 = vmatpush3.bf16.msra.mxu1 %v10200_v44  ;;  %v10251_v17 = vpack.c.bf16 %v4458_v37, %v4457_v7  ;;  %v4371_v44 = vld [vmem:[#allocation22 + $0x770] sm:$0xff]  ;;  %v10299_v37 = vpack.c.bf16 %v4634_v9, %v4633_v48 }
 0x6f4   : > { %10178 = vmatprep.subr.bf16.mxu0 %v11546_v6  ;;  %10202 = vmatprep.subr.bf16.mxu1 %v11546_v6  ;;  %v10230_v15 = vpack.c.bf16 %v4372_v1, %v4371_v44  ;;  %v4709_v44 = vld [vmem:[#allocation22 + $0x900] sm:$0xff]  ;;  %v4710_v1 = vld [vmem:[#allocation22 + $0x908] sm:$0xff] }
 0x6f7   : > { %10180 = vmatpush3.bf16.msra.mxu0 %v10179_v63  ;;  %10204 = vmatpush3.bf16.msra.mxu1 %v10203_v18  ;;  %v10254_v63 = vpack.c.bf16 %v4460_v5, %v4459_v3  ;;  %v4533_v18 = vld [vmem:[#allocation22 + $0x800] sm:$0xff]  ;;  %v4798_v5 = vld [vmem:[#allocation22 + $0x988] sm:$0xff] }
 0x6f8   : > { %10181 = vmatprep.subr.bf16.mxu0 %v11546_v6  ;;  %10205 = vmatprep.subr.bf16.mxu1 %v11546_v6  ;;  %v10257_v0 = vpack.c.bf16 %v4534_v21, %v4533_v18  ;;  %v4797_v3 = vld [vmem:[#allocation22 + $0x980] sm:$0xff]  ;;  %v4711_v18 = vld [vmem:[#allocation22 + $0x910] sm:$0xff]  ;;  %v4712_v21 = vld [vmem:[#allocation22 + $0x918] sm:$0xff] }
 0x6fb   : > { %10183 = vmatpush3.bf16.msra.mxu0 %v10182_v25  ;;  %10207 = vmatpush3.bf16.msra.mxu1 %v10206_v24  ;;  %v10281_v25 = vpack.c.bf16 %v4622_v59, %v4621_v23  ;;  %v4535_v24 = vld [vmem:[#allocation22 + $0x810] sm:$0xff]  ;;  %v4800_v59 = vld [vmem:[#allocation22 + $0x998] sm:$0xff] }
 0x6fc   : > { %10208 = vmatprep.subr.bf16.mxu0 %v11546_v6  ;;  %10232 = vmatprep.subr.bf16.mxu1 %v11546_v6  ;;  %v4799_v23 = vld [vmem:[#allocation22 + $0x990] sm:$0xff] }
 0x6fe   : > { %8694 = vmatmul.mubr.f32.vlgmr.msra.gmra.mrb[64].mxu0 %v4180_v36  ;;  %8729 = vmatmul.mubr.f32.vlgmr.msra.gmra.mrb[68].mxu1 %v4268_v12  ;;  %v4626_v36 = vld [vmem:[#allocation22 + $0x8a8] sm:$0xff]  ;;  %v10263_v12 = vpack.c.bf16 %v4538_v34, %v4537_v31  ;;  %v4715_v31 = vld [vmem:[#allocation22 + $0x930] sm:$0xff]  ;;  %v4716_v34 = vld [vmem:[#allocation22 + $0x938] sm:$0xff] }
 0x6ff   : > { %10210 = vmatpush3.bf16.msra.mxu0 %v10209_v14  ;;  %10234 = vmatpush3.bf16.msra.mxu1 %v10233_v46  ;;  %v4444_v14 = vld [vmem:[#allocation4 + $0x27] sm:$0x1]  ;;  %v10260_v46 = vpack.c.bf16 %v4536_v27, %v4535_v24  ;;  %v10308_v24 = vpack.c.bf16 %v4712_v21, %v4711_v18  ;;  %v10332_v27 = vpack.c.bf16 %v4800_v59, %v4799_v23  ;;  %v4889_v23 = vld [vmem:[#allocation22 + $0xa20] sm:$0xff] }
 0x700   : > { %10211 = vmatprep.subr.bf16.mxu0 %v11546_v6  ;;  %10235 = vmatprep.subr.bf16.mxu1 %v11546_v6  ;;  %v4890_v59 = vld [vmem:[#allocation22 + $0xa28] sm:$0xff] }
 0x701   : > { %8763 = vmatprep.mubr.msk.f32.mxu0 %vm11549_vm5, %v11550_v16  ;;  %8798 = vmatprep.mubr.msk.f32.mxu1 %vm11549_vm5, %v11550_v16 }
 0x703   : > { %10213 = vmatpush3.bf16.msra.mxu0 %v10212_v35  ;;  %10237 = vmatpush3.bf16.msra.mxu1 %v10236_v53  ;;  %v10287_v35 = vpack.c.bf16 %v4626_v36, %v4625_v33  ;;  %v4539_v53 = vld [vmem:[#allocation22 + $0x830] sm:$0xff]  ;;  %v4804_v36 = vld [vmem:[#allocation22 + $0x9b8] sm:$0xff] }
 0x704   : > { %10214 = vmatprep.subr.bf16.mxu0 %v11546_v6  ;;  %10238 = vmatprep.subr.bf16.mxu1 %v11546_v6  ;;  %v10266_v47 = vpack.c.bf16 %v4540_v40, %v4539_v53  ;;  %v4803_v33 = vld [vmem:[#allocation22 + $0x9b0] sm:$0xff]  ;;  %v4717_v53 = vld [vmem:[#allocation22 + $0x940] sm:$0xff]  ;;  %v4718_v40 = vld [vmem:[#allocation22 + $0x948] sm:$0xff] }
 0x707   : > { %10216 = vmatpush3.bf16.msra.mxu0 %v10215_v32  ;;  %10240 = vmatpush3.bf16.msra.mxu1 %v10239_v45  ;;  %v10290_v32 = vpack.c.bf16 %v4628_v22, %v4627_v20  ;;  %v4541_v45 = vld [vmem:[#allocation22 + $0x840] sm:$0xff]  ;;  %v4806_v22 = vld [vmem:[#allocation22 + $0x9c8] sm:$0xff] }
 0x708   : > { %10217 = vmatprep.subr.bf16.mxu0 %v11546_v6  ;;  %10241 = vmatprep.subr.bf16.mxu1 %v11546_v6  ;;  %v10269_v54 = vpack.c.bf16 %v4542_v38, %v4541_v45  ;;  %v4805_v20 = vld [vmem:[#allocation22 + $0x9c0] sm:$0xff]  ;;  %v4719_v45 = vld [vmem:[#allocation22 + $0x950] sm:$0xff]  ;;  %v4720_v38 = vld [vmem:[#allocation22 + $0x958] sm:$0xff] }
 0x70b   : > { %10219 = vmatpush3.bf16.msra.mxu0 %v10218_v55  ;;  %10243 = vmatpush3.bf16.msra.mxu1 %v10242_v57  ;;  %v10293_v55 = vpack.c.bf16 %v4630_v52, %v4629_v49  ;;  %v4543_v57 = vld [vmem:[#allocation22 + $0x850] sm:$0xff]  ;;  %v4808_v52 = vld [vmem:[#allocation22 + $0x9d8] sm:$0xff] }
 0x70c   : > { %10220 = vmatprep.subr.bf16.mxu0 %v11546_v6  ;;  %10244 = vmatprep.subr.bf16.mxu1 %v11546_v6  ;;  %v10272_v19 = vpack.c.bf16 %v4544_v58, %v4543_v57  ;;  %v4807_v49 = vld [vmem:[#allocation22 + $0x9d0] sm:$0xff]  ;;  %v4721_v57 = vld [vmem:[#allocation22 + $0x960] sm:$0xff]  ;;  %v4722_v58 = vld [vmem:[#allocation22 + $0x968] sm:$0xff] }
 0x70d   : > { %v10323_v9 = vpack.c.bf16 %v4722_v58, %v4721_v57 }
 0x70f   : > { %10222 = vmatpush3.bf16.msra.mxu0 %v10221_v2  ;;  %10246 = vmatpush3.bf16.msra.mxu1 %v10245_v4  ;;  %v10296_v2 = vpack.c.bf16 %v4632_v60, %v4631_v42  ;;  %v4545_v4 = vld [vmem:[#allocation22 + $0x860] sm:$0xff]  ;;  %v4810_v60 = vld [vmem:[#allocation22 + $0x9e8] sm:$0xff] }
 0x710   : > { %10223 = vmatprep.subr.bf16.mxu0 %v11546_v6  ;;  %10247 = vmatprep.subr.bf16.mxu1 %v11546_v6  ;;  %v10275_v7 = vpack.c.bf16 %v4546_v61, %v4545_v4  ;;  %v4809_v42 = vld [vmem:[#allocation22 + $0x9e0] sm:$0xff] }
 0x711   : > { %v3226_v8 = vpop.f32.mrb[52].mxu0  ;;  %v3296_v51 = vpop.f32.mrb[56].mxu1 }
 0x712   : > { %v13099_v43 = vadd.f32 %v3296_v51, %v3226_v8  ;;  %v8275_v13 = vpop.f32.mrb[53].mxu0  ;;  %v8310_v11 = vpop.f32.mrb[57].mxu1  ;;  %v4547_v8 = vld [vmem:[#allocation22 + $0x870] sm:$0xff] }
 0x713   : > { %10225 = vmatpush3.bf16.msra.mxu0 %v10224_v10  ;;  %10249 = vmatpush3.bf16.msra.mxu1 %v10248_v26  ;;  %v4548_v13 = vld [vmem:[#allocation22 + $0x878] sm:$0xff]  ;;  %v4635_v11 = vld [vmem:[#allocation22 + $0x8f0] sm:$0xff] }
 0x714   : > { %10226 = vmatprep.subr.bf16.mxu0 %v11546_v6  ;;  %10250 = vmatprep.subr.bf16.mxu1 %v11546_v6 }
 0x717   : > { %10228 = vmatpush3.bf16.msra.mxu0 %v10227_v50  ;;  %10252 = vmatpush3.bf16.msra.mxu1 %v10251_v17  ;;  %v4636_v50 = vld [vmem:[#allocation22 + $0x8f8] sm:$0xff]  ;;  %v10278_v17 = vpack.c.bf16 %v4548_v13, %v4547_v8  ;;  %v4886_v13 = vld [vmem:[#allocation22 + $0xa08] sm:$0xff] }
 0x718   : > { %10229 = vmatprep.subr.bf16.mxu0 %v11546_v6  ;;  %10253 = vmatprep.subr.bf16.mxu1 %v11546_v6 }
 0x71b   : > { %10231 = vmatpush3.bf16.msra.mxu0 %v10230_v15  ;;  %10255 = vmatpush3.bf16.msra.mxu1 %v10254_v63  ;;  %v10305_v15 = vpack.c.bf16 %v4710_v1, %v4709_v44  ;;  %v10329_v63 = vpack.c.bf16 %v4798_v5, %v4797_v3  ;;  %v4887_v44 = vld [vmem:[#allocation22 + $0xa10] sm:$0xff]  ;;  %v4888_v1 = vld [vmem:[#allocation22 + $0xa18] sm:$0xff] }
 0x71c   : > { %10256 = vmatprep.subr.bf16.mxu0 %v11546_v6  ;;  %10280 = vmatprep.subr.bf16.mxu1 %v11546_v6  ;;  %v4975_v3 = vld [vmem:[#allocation22 + $0xa90] sm:$0xff]  ;;  %v4976_v5 = vld [vmem:[#allocation22 + $0xa98] sm:$0xff]  ;;  %v10356_v18 = vpack.c.bf16 %v4888_v1, %v4887_v44 }
 0x71d   : > { %v10380_v21 = vpack.c.bf16 %v4976_v5, %v4975_v3  ;;  %v5065_v3 = vld [vmem:[#allocation22 + $0xb20] sm:$0xff]  ;;  %v5066_v5 = vld [vmem:[#allocation22 + $0xb28] sm:$0xff] }
 0x71e   : > { %8764 = vmatmul.mubr.f32.vlgmr.msra.gmra.mrb[66].mxu0 %v4356_v29  ;;  %8799 = vmatmul.mubr.f32.vlgmr.msra.gmra.mrb[70].mxu1 %v4444_v14  ;;  %v4801_v29 = vld [vmem:[#allocation22 + $0x9a0] sm:$0xff]  ;;  %v4802_v14 = vld [vmem:[#allocation22 + $0x9a8] sm:$0xff] }
 0x71f   : > { %10258 = vmatpush3.bf16.msra.mxu0 %v10257_v0  ;;  %10282 = vmatpush3.bf16.msra.mxu1 %v10281_v25  ;;  %v4532_v0 = vld [vmem:[#allocation4 + $0x28] sm:$0x1]  ;;  %v4620_v25 = vld [vmem:[#allocation4 + $0x29] sm:$0x1] }
 0x720   : > { %10259 = vmatprep.subr.bf16.mxu0 %v11546_v6  ;;  %10283 = vmatprep.subr.bf16.mxu1 %v11546_v6 }
 0x721   : > { %8833 = vmatprep.mubr.msk.f32.mxu0 %vm11549_vm5, %v11550_v16  ;;  %8868 = vmatprep.mubr.msk.f32.mxu1 %vm11549_vm5, %v11550_v16 }
 0x723   : > { %10261 = vmatpush3.bf16.msra.mxu0 %v10260_v46  ;;  %10285 = vmatpush3.bf16.msra.mxu1 %v10284_v41  ;;  %v10311_v46 = vpack.c.bf16 %v4714_v30, %v4713_v28  ;;  %v10335_v41 = vpack.c.bf16 %v4802_v14, %v4801_v29  ;;  %v4891_v28 = vld [vmem:[#allocation22 + $0xa30] sm:$0xff]  ;;  %v4892_v30 = vld [vmem:[#allocation22 + $0xa38] sm:$0xff] }
 0x724   : > { %10262 = vmatprep.subr.bf16.mxu0 %v11546_v6  ;;  %10286 = vmatprep.subr.bf16.mxu1 %v11546_v6  ;;  %v4979_v29 = vld [vmem:[#allocation22 + $0xab0] sm:$0xff]  ;;  %v4980_v14 = vld [vmem:[#allocation22 + $0xab8] sm:$0xff] }
 0x727   : > { %10264 = vmatpush3.bf16.msra.mxu0 %v10263_v12  ;;  %10288 = vmatpush3.bf16.msra.mxu1 %v10287_v35  ;;  %v10314_v12 = vpack.c.bf16 %v4716_v34, %v4715_v31  ;;  %v10338_v35 = vpack.c.bf16 %v4804_v36, %v4803_v33  ;;  %v4893_v31 = vld [vmem:[#allocation22 + $0xa40] sm:$0xff]  ;;  %v4894_v34 = vld [vmem:[#allocation22 + $0xa48] sm:$0xff] }
 0x728   : > { %10265 = vmatprep.subr.bf16.mxu0 %v11546_v6  ;;  %10289 = vmatprep.subr.bf16.mxu1 %v11546_v6  ;;  %v4981_v33 = vld [vmem:[#allocation22 + $0xac0] sm:$0xff]  ;;  %v4982_v36 = vld [vmem:[#allocation22 + $0xac8] sm:$0xff] }
 0x72b   : > { %10267 = vmatpush3.bf16.msra.mxu0 %v10266_v47  ;;  %10291 = vmatpush3.bf16.msra.mxu1 %v10290_v32  ;;  %v10317_v47 = vpack.c.bf16 %v4718_v40, %v4717_v53  ;;  %v10341_v32 = vpack.c.bf16 %v4806_v22, %v4805_v20  ;;  %v4895_v53 = vld [vmem:[#allocation22 + $0xa50] sm:$0xff]  ;;  %v4896_v40 = vld [vmem:[#allocation22 + $0xa58] sm:$0xff] }
 0x72c   : > { %10268 = vmatprep.subr.bf16.mxu0 %v11546_v6  ;;  %10292 = vmatprep.subr.bf16.mxu1 %v11546_v6  ;;  %v4983_v20 = vld [vmem:[#allocation22 + $0xad0] sm:$0xff]  ;;  %v4984_v22 = vld [vmem:[#allocation22 + $0xad8] sm:$0xff] }
 0x72f   : > { %10270 = vmatpush3.bf16.msra.mxu0 %v10269_v54  ;;  %10294 = vmatpush3.bf16.msra.mxu1 %v10293_v55  ;;  %v10320_v54 = vpack.c.bf16 %v4720_v38, %v4719_v45  ;;  %v10344_v55 = vpack.c.bf16 %v4808_v52, %v4807_v49  ;;  %v4897_v45 = vld [vmem:[#allocation22 + $0xa60] sm:$0xff]  ;;  %v4898_v38 = vld [vmem:[#allocation22 + $0xa68] sm:$0xff] }
 0x730   : > { %10271 = vmatprep.subr.bf16.mxu0 %v11546_v6  ;;  %10295 = vmatprep.subr.bf16.mxu1 %v11546_v6  ;;  %v4985_v49 = vld [vmem:[#allocation22 + $0xae0] sm:$0xff]  ;;  %v4986_v52 = vld [vmem:[#allocation22 + $0xae8] sm:$0xff] }
 0x731   : > { %v3383_v56 = vpop.f32.mrb[54].mxu0  ;;  %v3471_v10 = vpop.f32.mrb[58].mxu1 }
 0x732   : > { %v3387_v26 = vadd.f32 %v3383_v56, %v13099_v43  ;;  %v8345_v39 = vpop.f32.mrb[55].mxu0  ;;  %v8380_v62 = vpop.f32.mrb[59].mxu1  ;;  %v10302_v43 = vpack.c.bf16 %v4636_v50, %v4635_v11  ;;  %v10347_v56 = vpack.c.bf16 %v4810_v60, %v4809_v42  ;;  %v4973_v11 = vld [vmem:[#allocation22 + $0xa80] sm:$0xff]  ;;  %v4974_v50 = vld [vmem:[#allocation22 + $0xa88] sm:$0xff]  ;;  %v10371_v60 = vpack.c.bf16 %v4898_v38, %v4897_v45 }
 0x733   : > { %10273 = vmatpush3.bf16.msra.mxu0 %v10272_v19  ;;  %10297 = vmatpush3.bf16.msra.mxu1 %v10296_v2  ;;  %v4724_v39 = vld [vmem:[#allocation22 + $0x978] sm:$0xff]  ;;  %v4811_v62 = vld [vmem:[#allocation22 + $0x9f0] sm:$0xff] }
 0x734   : > { %v13122_v51 = vadd.f32 %v3471_v10, %v3387_v26  ;;  %10274 = vmatprep.subr.bf16.mxu0 %v11546_v6  ;;  %10298 = vmatprep.subr.bf16.mxu1 %v11546_v6  ;;  %v4723_v10 = vld [vmem:[#allocation22 + $0x970] sm:$0xff] }
 0x737   : > { %10276 = vmatpush3.bf16.msra.mxu0 %v10275_v7  ;;  %10300 = vmatpush3.bf16.msra.mxu1 %v10299_v37  ;;  %v4812_v7 = vld [vmem:[#allocation22 + $0x9f8] sm:$0xff]  ;;  %v10326_v37 = vpack.c.bf16 %v4724_v39, %v4723_v10  ;;  %v5062_v39 = vld [vmem:[#allocation22 + $0xb08] sm:$0xff] }
 0x738   : > { %10277 = vmatprep.subr.bf16.mxu0 %v11546_v6  ;;  %10301 = vmatprep.subr.bf16.mxu1 %v11546_v6  ;;  %v10350_v8 = vpack.c.bf16 %v4812_v7, %v4811_v62  ;;  %v5149_v62 = vld [vmem:[#allocation22 + $0xb80] sm:$0xff]  ;;  %v5150_v7 = vld [vmem:[#allocation22 + $0xb88] sm:$0xff] }
 0x73b   : > { %10279 = vmatpush3.bf16.msra.mxu0 %v10278_v17  ;;  %10303 = vmatpush3.bf16.msra.mxu1 %v10302_v43  ;;  %v10377_v43 = vpack.c.bf16 %v4974_v50, %v4973_v11  ;;  %v5151_v11 = vld [vmem:[#allocation22 + $0xb90] sm:$0xff]  ;;  %v5152_v50 = vld [vmem:[#allocation22 + $0xb98] sm:$0xff] }
 0x73c   : > { %10304 = vmatprep.subr.bf16.mxu0 %v11546_v6  ;;  %10328 = vmatprep.subr.bf16.mxu1 %v11546_v6  ;;  %v10428_v1 = vpack.c.bf16 %v5152_v50, %v5151_v11  ;;  %v5241_v11 = vld [vmem:[#allocation22 + $0xc20] sm:$0xff]  ;;  %v5242_v50 = vld [vmem:[#allocation22 + $0xc28] sm:$0xff] }
 0x73e   : > { %8834 = vmatmul.mubr.f32.vlgmr.msra.gmra.mrb[68].mxu0 %v4532_v0  ;;  %8869 = vmatmul.mubr.f32.vlgmr.msra.gmra.mrb[72].mxu1 %v4620_v25  ;;  %v4977_v0 = vld [vmem:[#allocation22 + $0xaa0] sm:$0xff]  ;;  %v4978_v25 = vld [vmem:[#allocation22 + $0xaa8] sm:$0xff] }
 0x73f   : > { %10306 = vmatpush3.bf16.msra.mxu0 %v10305_v15  ;;  %10330 = vmatpush3.bf16.msra.mxu1 %v10329_v63  ;;  %v4708_v15 = vld [vmem:[#allocation4 + $0x2a] sm:$0x1]  ;;  %v4796_v63 = vld [vmem:[#allocation4 + $0x2b] sm:$0x1] }
 0x740   : > { %10307 = vmatprep.subr.bf16.mxu0 %v11546_v6  ;;  %10331 = vmatprep.subr.bf16.mxu1 %v11546_v6 }
 0x741   : > { %8903 = vmatprep.mubr.msk.f32.mxu0 %vm11549_vm5, %v11550_v16  ;;  %8938 = vmatprep.mubr.msk.f32.mxu1 %vm11549_vm5, %v11550_v16 }
 0x743   : > { %10309 = vmatpush3.bf16.msra.mxu0 %v10308_v24  ;;  %10333 = vmatpush3.bf16.msra.mxu1 %v10332_v27  ;;  %v10359_v24 = vpack.c.bf16 %v4890_v59, %v4889_v23  ;;  %v10383_v27 = vpack.c.bf16 %v4978_v25, %v4977_v0  ;;  %v5067_v23 = vld [vmem:[#allocation22 + $0xb30] sm:$0xff]  ;;  %v5068_v59 = vld [vmem:[#allocation22 + $0xb38] sm:$0xff] }
 0x744   : > { %10310 = vmatprep.subr.bf16.mxu0 %v11546_v6  ;;  %10334 = vmatprep.subr.bf16.mxu1 %v11546_v6  ;;  %v5155_v0 = vld [vmem:[#allocation22 + $0xbb0] sm:$0xff]  ;;  %v5156_v25 = vld [vmem:[#allocation22 + $0xbb8] sm:$0xff] }
 0x747   : > { %10312 = vmatpush3.bf16.msra.mxu0 %v10311_v46  ;;  %10336 = vmatpush3.bf16.msra.mxu1 %v10335_v41  ;;  %v10362_v46 = vpack.c.bf16 %v4892_v30, %v4891_v28  ;;  %v10386_v41 = vpack.c.bf16 %v4980_v14, %v4979_v29  ;;  %v5069_v28 = vld [vmem:[#allocation22 + $0xb40] sm:$0xff]  ;;  %v5070_v30 = vld [vmem:[#allocation22 + $0xb48] sm:$0xff] }
 0x748   : > { %10313 = vmatprep.subr.bf16.mxu0 %v11546_v6  ;;  %10337 = vmatprep.subr.bf16.mxu1 %v11546_v6  ;;  %v5157_v29 = vld [vmem:[#allocation22 + $0xbc0] sm:$0xff]  ;;  %v5158_v14 = vld [vmem:[#allocation22 + $0xbc8] sm:$0xff] }
 0x74b   : > { %10315 = vmatpush3.bf16.msra.mxu0 %v10314_v12  ;;  %10339 = vmatpush3.bf16.msra.mxu1 %v10338_v35  ;;  %v10365_v12 = vpack.c.bf16 %v4894_v34, %v4893_v31  ;;  %v10389_v35 = vpack.c.bf16 %v4982_v36, %v4981_v33  ;;  %v5071_v31 = vld [vmem:[#allocation22 + $0xb50] sm:$0xff]  ;;  %v5072_v34 = vld [vmem:[#allocation22 + $0xb58] sm:$0xff] }
 0x74c   : > { %10316 = vmatprep.subr.bf16.mxu0 %v11546_v6  ;;  %10340 = vmatprep.subr.bf16.mxu1 %v11546_v6  ;;  %v5159_v33 = vld [vmem:[#allocation22 + $0xbd0] sm:$0xff]  ;;  %v5160_v36 = vld [vmem:[#allocation22 + $0xbd8] sm:$0xff] }
 0x74f   : > { %10318 = vmatpush3.bf16.msra.mxu0 %v10317_v47  ;;  %10342 = vmatpush3.bf16.msra.mxu1 %v10341_v32  ;;  %v10368_v47 = vpack.c.bf16 %v4896_v40, %v4895_v53  ;;  %v10392_v32 = vpack.c.bf16 %v4984_v22, %v4983_v20  ;;  %v5073_v53 = vld [vmem:[#allocation22 + $0xb60] sm:$0xff]  ;;  %v5074_v40 = vld [vmem:[#allocation22 + $0xb68] sm:$0xff] }
 0x750   : > { %10319 = vmatprep.subr.bf16.mxu0 %v11546_v6  ;;  %10343 = vmatprep.subr.bf16.mxu1 %v11546_v6  ;;  %v5161_v20 = vld [vmem:[#allocation22 + $0xbe0] sm:$0xff]  ;;  %v5162_v22 = vld [vmem:[#allocation22 + $0xbe8] sm:$0xff] }
 0x751   : > { %v3559_v19 = vpop.f32.mrb[56].mxu0  ;;  %v3647_v2 = vpop.f32.mrb[60].mxu1 }
 0x752   : > { %v3563_v4 = vadd.f32 %v3559_v19, %v13122_v51  ;;  %v8415_v61 = vpop.f32.mrb[57].mxu0  ;;  %v8450_v48 = vpop.f32.mrb[61].mxu1  ;;  %v4885_v51 = vld [vmem:[#allocation22 + $0xa00] sm:$0xff]  ;;  %v10395_v19 = vpack.c.bf16 %v4986_v52, %v4985_v49  ;;  %v10419_v52 = vpack.c.bf16 %v5074_v40, %v5073_v53 }
 0x753   : > { %10321 = vmatpush3.bf16.msra.mxu0 %v10320_v54  ;;  %10345 = vmatpush3.bf16.msra.mxu1 %v10344_v55  ;;  %v10353_v17 = vpack.c.bf16 %v4886_v13, %v4885_v51  ;;  %v4900_v61 = vld [vmem:[#allocation22 + $0xa78] sm:$0xff]  ;;  %v4987_v48 = vld [vmem:[#allocation22 + $0xaf0] sm:$0xff] }
 0x754   : > { %v13145_v26 = vadd.f32 %v3647_v2, %v3563_v4  ;;  %10322 = vmatprep.subr.bf16.mxu0 %v11546_v6  ;;  %10346 = vmatprep.subr.bf16.mxu1 %v11546_v6  ;;  %v4899_v2 = vld [vmem:[#allocation22 + $0xa70] sm:$0xff]  ;;  %v5064_v13 = vld [vmem:[#allocation22 + $0xb18] sm:$0xff] }
 0x755   : > { %v5063_v51 = vld [vmem:[#allocation22 + $0xb10] sm:$0xff] }
 0x756   : > { %v10404_v44 = vpack.c.bf16 %v5064_v13, %v5063_v51 }
 0x757   : > { %10324 = vmatpush3.bf16.msra.mxu0 %v10323_v9  ;;  %10348 = vmatpush3.bf16.msra.mxu1 %v10347_v56  ;;  %v4988_v9 = vld [vmem:[#allocation22 + $0xaf8] sm:$0xff]  ;;  %v10374_v56 = vpack.c.bf16 %v4900_v61, %v4899_v2  ;;  %v5238_v61 = vld [vmem:[#allocation22 + $0xc08] sm:$0xff] }
 0x758   : > { %10325 = vmatprep.subr.bf16.mxu0 %v11546_v6  ;;  %10349 = vmatprep.subr.bf16.mxu1 %v11546_v6  ;;  %v10398_v10 = vpack.c.bf16 %v4988_v9, %v4987_v48  ;;  %v5325_v48 = vld [vmem:[#allocation22 + $0xc80] sm:$0xff]  ;;  %v5326_v9 = vld [vmem:[#allocation22 + $0xc88] sm:$0xff] }
 0x75b   : > { %10327 = vmatpush3.bf16.msra.mxu0 %v10326_v37  ;;  %10351 = vmatpush3.bf16.msra.mxu1 %v10350_v8  ;;  %v10425_v8 = vpack.c.bf16 %v5150_v7, %v5149_v62  ;;  %v5327_v62 = vld [vmem:[#allocation22 + $0xc90] sm:$0xff]  ;;  %v5328_v7 = vld [vmem:[#allocation22 + $0xc98] sm:$0xff] }
 0x75c   : > { %10352 = vmatprep.subr.bf16.mxu0 %v11546_v6  ;;  %10376 = vmatprep.subr.bf16.mxu1 %v11546_v6  ;;  %v10476_v13 = vpack.c.bf16 %v5328_v7, %v5327_v62  ;;  %v5417_v62 = vld [vmem:[#allocation22 + $0xd20] sm:$0xff]  ;;  %v5418_v7 = vld [vmem:[#allocation22 + $0xd28] sm:$0xff] }
 0x75e   : > { %8904 = vmatmul.mubr.f32.vlgmr.msra.gmra.mrb[70].mxu0 %v4708_v15  ;;  %8939 = vmatmul.mubr.f32.vlgmr.msra.gmra.mrb[74].mxu1 %v4796_v63  ;;  %v5153_v15 = vld [vmem:[#allocation22 + $0xba0] sm:$0xff]  ;;  %v5154_v63 = vld [vmem:[#allocation22 + $0xba8] sm:$0xff] }
 0x75f   : > { %10354 = vmatpush3.bf16.msra.mxu0 %v10353_v17  ;;  %10378 = vmatpush3.bf16.msra.mxu1 %v10377_v43  ;;  %v4884_v17 = vld [vmem:[#allocation4 + $0x2c] sm:$0x1]  ;;  %v4972_v43 = vld [vmem:[#allocation4 + $0x2f] sm:$0x1] }
 0x760   : > { %10355 = vmatprep.subr.bf16.mxu0 %v11546_v6  ;;  %10379 = vmatprep.subr.bf16.mxu1 %v11546_v6 }
 0x761   : > { %8973 = vmatprep.mubr.msk.f32.mxu0 %vm11549_vm5, %v11550_v16  ;;  %9008 = vmatprep.mubr.msk.f32.mxu1 %vm11549_vm5, %v11550_v16 }
 0x763   : > { %10357 = vmatpush3.bf16.msra.mxu0 %v10356_v18  ;;  %10381 = vmatpush3.bf16.msra.mxu1 %v10380_v21  ;;  %v10407_v18 = vpack.c.bf16 %v5066_v5, %v5065_v3  ;;  %v10431_v21 = vpack.c.bf16 %v5154_v63, %v5153_v15  ;;  %v5243_v3 = vld [vmem:[#allocation22 + $0xc30] sm:$0xff]  ;;  %v5244_v5 = vld [vmem:[#allocation22 + $0xc38] sm:$0xff] }
 0x764   : > { %10358 = vmatprep.subr.bf16.mxu0 %v11546_v6  ;;  %10382 = vmatprep.subr.bf16.mxu1 %v11546_v6  ;;  %v5331_v15 = vld [vmem:[#allocation22 + $0xcb0] sm:$0xff]  ;;  %v5332_v63 = vld [vmem:[#allocation22 + $0xcb8] sm:$0xff] }
 0x767   : > { %10360 = vmatpush3.bf16.msra.mxu0 %v10359_v24  ;;  %10384 = vmatpush3.bf16.msra.mxu1 %v10383_v27  ;;  %v10410_v24 = vpack.c.bf16 %v5068_v59, %v5067_v23  ;;  %v10434_v27 = vpack.c.bf16 %v5156_v25, %v5155_v0  ;;  %v5245_v23 = vld [vmem:[#allocation22 + $0xc40] sm:$0xff]  ;;  %v5246_v59 = vld [vmem:[#allocation22 + $0xc48] sm:$0xff] }
 0x768   : > { %10361 = vmatprep.subr.bf16.mxu0 %v11546_v6  ;;  %10385 = vmatprep.subr.bf16.mxu1 %v11546_v6  ;;  %v5333_v0 = vld [vmem:[#allocation22 + $0xcc0] sm:$0xff]  ;;  %v5334_v25 = vld [vmem:[#allocation22 + $0xcc8] sm:$0xff] }
 0x76b   : > { %10363 = vmatpush3.bf16.msra.mxu0 %v10362_v46  ;;  %10387 = vmatpush3.bf16.msra.mxu1 %v10386_v41  ;;  %v10413_v46 = vpack.c.bf16 %v5070_v30, %v5069_v28  ;;  %v10437_v41 = vpack.c.bf16 %v5158_v14, %v5157_v29  ;;  %v5247_v28 = vld [vmem:[#allocation22 + $0xc50] sm:$0xff]  ;;  %v5248_v30 = vld [vmem:[#allocation22 + $0xc58] sm:$0xff] }
 0x76c   : > { %10364 = vmatprep.subr.bf16.mxu0 %v11546_v6  ;;  %10388 = vmatprep.subr.bf16.mxu1 %v11546_v6  ;;  %v5335_v29 = vld [vmem:[#allocation22 + $0xcd0] sm:$0xff]  ;;  %v5336_v14 = vld [vmem:[#allocation22 + $0xcd8] sm:$0xff] }
 0x76f   : > { %10366 = vmatpush3.bf16.msra.mxu0 %v10365_v12  ;;  %10390 = vmatpush3.bf16.msra.mxu1 %v10389_v35  ;;  %v10416_v12 = vpack.c.bf16 %v5072_v34, %v5071_v31  ;;  %v10440_v35 = vpack.c.bf16 %v5160_v36, %v5159_v33  ;;  %v5249_v31 = vld [vmem:[#allocation22 + $0xc60] sm:$0xff]  ;;  %v5250_v34 = vld [vmem:[#allocation22 + $0xc68] sm:$0xff] }
 0x770   : > { %10367 = vmatprep.subr.bf16.mxu0 %v11546_v6  ;;  %10391 = vmatprep.subr.bf16.mxu1 %v11546_v6  ;;  %v5337_v33 = vld [vmem:[#allocation22 + $0xce0] sm:$0xff]  ;;  %v5338_v36 = vld [vmem:[#allocation22 + $0xce8] sm:$0xff] }
 0x771   : > { %v3735_v54 = vpop.f32.mrb[58].mxu0  ;;  %v3823_v55 = vpop.f32.mrb[62].mxu1 }
 0x772   : > { %v3739_v57 = vadd.f32 %v3735_v54, %v13145_v26  ;;  %v8485_v58 = vpop.f32.mrb[59].mxu0  ;;  %v8520_v42 = vpop.f32.mrb[63].mxu1  ;;  %v5061_v26 = vld [vmem:[#allocation22 + $0xb00] sm:$0xff]  ;;  %v10443_v54 = vpack.c.bf16 %v5162_v22, %v5161_v20  ;;  %v10467_v22 = vpack.c.bf16 %v5250_v34, %v5249_v31 }
 0x773   : > { %10369 = vmatpush3.bf16.msra.mxu0 %v10368_v47  ;;  %10393 = vmatpush3.bf16.msra.mxu1 %v10392_v32  ;;  %v10401_v37 = vpack.c.bf16 %v5062_v39, %v5061_v26  ;;  %v5076_v58 = vld [vmem:[#allocation22 + $0xb78] sm:$0xff]  ;;  %v5163_v42 = vld [vmem:[#allocation22 + $0xbf0] sm:$0xff] }
 0x774   : > { %v13168_v4 = vadd.f32 %v3823_v55, %v3739_v57  ;;  %10370 = vmatprep.subr.bf16.mxu0 %v11546_v6  ;;  %10394 = vmatprep.subr.bf16.mxu1 %v11546_v6  ;;  %v5075_v55 = vld [vmem:[#allocation22 + $0xb70] sm:$0xff]  ;;  %v5240_v39 = vld [vmem:[#allocation22 + $0xc18] sm:$0xff] }
 0x775   : > { %v5239_v26 = vld [vmem:[#allocation22 + $0xc10] sm:$0xff] }
 0x776   : > { %v10452_v51 = vpack.c.bf16 %v5240_v39, %v5239_v26 }
 0x777   : > { %10372 = vmatpush3.bf16.msra.mxu0 %v10371_v60  ;;  %10396 = vmatpush3.bf16.msra.mxu1 %v10395_v19  ;;  %v5164_v60 = vld [vmem:[#allocation22 + $0xbf8] sm:$0xff]  ;;  %v10422_v19 = vpack.c.bf16 %v5076_v58, %v5075_v55  ;;  %v5414_v58 = vld [vmem:[#allocation22 + $0xd08] sm:$0xff] }
 0x778   : > { %10373 = vmatprep.subr.bf16.mxu0 %v11546_v6  ;;  %10397 = vmatprep.subr.bf16.mxu1 %v11546_v6  ;;  %v10446_v2 = vpack.c.bf16 %v5164_v60, %v5163_v42  ;;  %v5501_v42 = vld [vmem:[#allocation22 + $0xd80] sm:$0xff]  ;;  %v5502_v60 = vld [vmem:[#allocation22 + $0xd88] sm:$0xff] }
 0x77b   : > { %10375 = vmatpush3.bf16.msra.mxu0 %v10374_v56  ;;  %10399 = vmatpush3.bf16.msra.mxu1 %v10398_v10  ;;  %v10473_v10 = vpack.c.bf16 %v5326_v9, %v5325_v48  ;;  %v5503_v48 = vld [vmem:[#allocation22 + $0xd90] sm:$0xff]  ;;  %v5504_v9 = vld [vmem:[#allocation22 + $0xd98] sm:$0xff] }
 0x77c   : > { %10400 = vmatprep.subr.bf16.mxu0 %v11546_v6  ;;  %10424 = vmatprep.subr.bf16.mxu1 %v11546_v6  ;;  %v10524_v39 = vpack.c.bf16 %v5504_v9, %v5503_v48  ;;  %v5593_v48 = vld [vmem:[#allocation22 + $0xe20] sm:$0xff]  ;;  %v5594_v9 = vld [vmem:[#allocation22 + $0xe28] sm:$0xff] }
 0x77e   : > { %8974 = vmatmul.mubr.f32.vlgmr.msra.gmra.mrb[72].mxu0 %v4884_v17  ;;  %9009 = vmatmul.mubr.f32.vlgmr.msra.gmra.mrb[76].mxu1 %v4972_v43  ;;  %v5329_v17 = vld [vmem:[#allocation22 + $0xca0] sm:$0xff]  ;;  %v5330_v43 = vld [vmem:[#allocation22 + $0xca8] sm:$0xff] }
 0x77f   : > { %10402 = vmatpush3.bf16.msra.mxu0 %v10401_v37  ;;  %10426 = vmatpush3.bf16.msra.mxu1 %v10425_v8  ;;  %v5060_v37 = vld [vmem:[#allocation4 + $0x30] sm:$0x1]  ;;  %v5148_v8 = vld [vmem:[#allocation4 + $0x31] sm:$0x1] }
 0x780   : > { %10403 = vmatprep.subr.bf16.mxu0 %v11546_v6  ;;  %10427 = vmatprep.subr.bf16.mxu1 %v11546_v6 }
 0x781   : > { %9043 = vmatprep.mubr.msk.f32.mxu0 %vm11549_vm5, %v11550_v16  ;;  %9078 = vmatprep.mubr.msk.f32.mxu1 %vm11549_vm5, %v11550_v16 }
 0x783   : > { %10405 = vmatpush3.bf16.msra.mxu0 %v10404_v44  ;;  %10429 = vmatpush3.bf16.msra.mxu1 %v10428_v1  ;;  %v10455_v44 = vpack.c.bf16 %v5242_v50, %v5241_v11  ;;  %v10479_v1 = vpack.c.bf16 %v5330_v43, %v5329_v17  ;;  %v5419_v11 = vld [vmem:[#allocation22 + $0xd30] sm:$0xff]  ;;  %v5420_v50 = vld [vmem:[#allocation22 + $0xd38] sm:$0xff] }
 0x784   : > { %10406 = vmatprep.subr.bf16.mxu0 %v11546_v6  ;;  %10430 = vmatprep.subr.bf16.mxu1 %v11546_v6  ;;  %v5507_v17 = vld [vmem:[#allocation22 + $0xdb0] sm:$0xff]  ;;  %v5508_v43 = vld [vmem:[#allocation22 + $0xdb8] sm:$0xff] }
 0x787   : > { %10408 = vmatpush3.bf16.msra.mxu0 %v10407_v18  ;;  %10432 = vmatpush3.bf16.msra.mxu1 %v10431_v21  ;;  %v10458_v18 = vpack.c.bf16 %v5244_v5, %v5243_v3  ;;  %v10482_v21 = vpack.c.bf16 %v5332_v63, %v5331_v15  ;;  %v5421_v3 = vld [vmem:[#allocation22 + $0xd40] sm:$0xff]  ;;  %v5422_v5 = vld [vmem:[#allocation22 + $0xd48] sm:$0xff] }
 0x788   : > { %10409 = vmatprep.subr.bf16.mxu0 %v11546_v6  ;;  %10433 = vmatprep.subr.bf16.mxu1 %v11546_v6  ;;  %v5509_v15 = vld [vmem:[#allocation22 + $0xdc0] sm:$0xff]  ;;  %v5510_v63 = vld [vmem:[#allocation22 + $0xdc8] sm:$0xff] }
 0x78b   : > { %10411 = vmatpush3.bf16.msra.mxu0 %v10410_v24  ;;  %10435 = vmatpush3.bf16.msra.mxu1 %v10434_v27  ;;  %v10461_v24 = vpack.c.bf16 %v5246_v59, %v5245_v23  ;;  %v10485_v27 = vpack.c.bf16 %v5334_v25, %v5333_v0  ;;  %v5423_v23 = vld [vmem:[#allocation22 + $0xd50] sm:$0xff]  ;;  %v5424_v59 = vld [vmem:[#allocation22 + $0xd58] sm:$0xff] }
 0x78c   : > { %10412 = vmatprep.subr.bf16.mxu0 %v11546_v6  ;;  %10436 = vmatprep.subr.bf16.mxu1 %v11546_v6  ;;  %v5511_v0 = vld [vmem:[#allocation22 + $0xdd0] sm:$0xff]  ;;  %v5512_v25 = vld [vmem:[#allocation22 + $0xdd8] sm:$0xff] }
 0x78f   : > { %10414 = vmatpush3.bf16.msra.mxu0 %v10413_v46  ;;  %10438 = vmatpush3.bf16.msra.mxu1 %v10437_v41  ;;  %v10464_v46 = vpack.c.bf16 %v5248_v30, %v5247_v28  ;;  %v10488_v41 = vpack.c.bf16 %v5336_v14, %v5335_v29  ;;  %v5425_v28 = vld [vmem:[#allocation22 + $0xd60] sm:$0xff]  ;;  %v5426_v30 = vld [vmem:[#allocation22 + $0xd68] sm:$0xff] }
 0x790   : > { %10415 = vmatprep.subr.bf16.mxu0 %v11546_v6  ;;  %10439 = vmatprep.subr.bf16.mxu1 %v11546_v6  ;;  %v5513_v29 = vld [vmem:[#allocation22 + $0xde0] sm:$0xff]  ;;  %v5514_v14 = vld [vmem:[#allocation22 + $0xde8] sm:$0xff] }
 0x791   : > { %v3911_v47 = vpop.f32.mrb[60].mxu0  ;;  %v3999_v32 = vpop.f32.mrb[64].mxu1 }
 0x792   : > { %v3915_v45 = vadd.f32 %v3911_v47, %v13168_v4  ;;  %v8555_v38 = vpop.f32.mrb[61].mxu0  ;;  %v8590_v49 = vpop.f32.mrb[65].mxu1  ;;  %v5237_v4 = vld [vmem:[#allocation22 + $0xc00] sm:$0xff]  ;;  %v10491_v47 = vpack.c.bf16 %v5338_v36, %v5337_v33  ;;  %v10515_v36 = vpack.c.bf16 %v5426_v30, %v5425_v28 }
 0x793   : > { %10417 = vmatpush3.bf16.msra.mxu0 %v10416_v12  ;;  %10441 = vmatpush3.bf16.msra.mxu1 %v10440_v35  ;;  %v10449_v56 = vpack.c.bf16 %v5238_v61, %v5237_v4  ;;  %v5252_v38 = vld [vmem:[#allocation22 + $0xc78] sm:$0xff]  ;;  %v5339_v49 = vld [vmem:[#allocation22 + $0xcf0] sm:$0xff] }
 0x794   : > { %v13191_v57 = vadd.f32 %v3999_v32, %v3915_v45  ;;  %10418 = vmatprep.subr.bf16.mxu0 %v11546_v6  ;;  %10442 = vmatprep.subr.bf16.mxu1 %v11546_v6  ;;  %v5251_v32 = vld [vmem:[#allocation22 + $0xc70] sm:$0xff]  ;;  %v5416_v61 = vld [vmem:[#allocation22 + $0xd18] sm:$0xff] }
 0x795   : > { %v5415_v4 = vld [vmem:[#allocation22 + $0xd10] sm:$0xff] }
 0x796   : > { %v10500_v26 = vpack.c.bf16 %v5416_v61, %v5415_v4 }
 0x797   : > { %10420 = vmatpush3.bf16.msra.mxu0 %v10419_v52  ;;  %10444 = vmatpush3.bf16.msra.mxu1 %v10443_v54  ;;  %v5340_v52 = vld [vmem:[#allocation22 + $0xcf8] sm:$0xff]  ;;  %v10470_v54 = vpack.c.bf16 %v5252_v38, %v5251_v32  ;;  %v5590_v38 = vld [vmem:[#allocation22 + $0xe08] sm:$0xff] }
 0x798   : > { %10421 = vmatprep.subr.bf16.mxu0 %v11546_v6  ;;  %10445 = vmatprep.subr.bf16.mxu1 %v11546_v6  ;;  %v10494_v55 = vpack.c.bf16 %v5340_v52, %v5339_v49  ;;  %v5677_v49 = vld [vmem:[#allocation22 + $0xe80] sm:$0xff]  ;;  %v5678_v52 = vld [vmem:[#allocation22 + $0xe88] sm:$0xff] }
 0x79b   : > { %10423 = vmatpush3.bf16.msra.mxu0 %v10422_v19  ;;  %10447 = vmatpush3.bf16.msra.mxu1 %v10446_v2  ;;  %v10521_v2 = vpack.c.bf16 %v5502_v60, %v5501_v42  ;;  %v5679_v42 = vld [vmem:[#allocation22 + $0xe90] sm:$0xff]  ;;  %v5680_v60 = vld [vmem:[#allocation22 + $0xe98] sm:$0xff] }
 0x79c   : > { %10448 = vmatprep.subr.bf16.mxu0 %v11546_v6  ;;  %10472 = vmatprep.subr.bf16.mxu1 %v11546_v6  ;;  %v10572_v61 = vpack.c.bf16 %v5680_v60, %v5679_v42  ;;  %v5769_v42 = vld [vmem:[#allocation22 + $0xf20] sm:$0xff]  ;;  %v5770_v60 = vld [vmem:[#allocation22 + $0xf28] sm:$0xff] }
 0x79e   : > { %9044 = vmatmul.mubr.f32.vlgmr.msra.gmra.mrb[74].mxu0 %v5060_v37  ;;  %9079 = vmatmul.mubr.f32.vlgmr.msra.gmra.mrb[78].mxu1 %v5148_v8  ;;  %v5505_v37 = vld [vmem:[#allocation22 + $0xda0] sm:$0xff]  ;;  %v5506_v8 = vld [vmem:[#allocation22 + $0xda8] sm:$0xff] }
 0x79f   : > { %10450 = vmatpush3.bf16.msra.mxu0 %v10449_v56  ;;  %10474 = vmatpush3.bf16.msra.mxu1 %v10473_v10  ;;  %v5236_v56 = vld [vmem:[#allocation4 + $0x32] sm:$0x1]  ;;  %v5324_v10 = vld [vmem:[#allocation4 + $0x33] sm:$0x1] }
 0x7a0   : > { %10451 = vmatprep.subr.bf16.mxu0 %v11546_v6  ;;  %10475 = vmatprep.subr.bf16.mxu1 %v11546_v6 }
 0x7a1   : > { %9113 = vmatprep.mubr.msk.f32.mxu0 %vm11549_vm5, %v11550_v16  ;;  %9148 = vmatprep.mubr.msk.f32.mxu1 %vm11549_vm5, %v11550_v16 }
 0x7a3   : > { %10453 = vmatpush3.bf16.msra.mxu0 %v10452_v51  ;;  %10477 = vmatpush3.bf16.msra.mxu1 %v10476_v13  ;;  %v10503_v51 = vpack.c.bf16 %v5418_v7, %v5417_v62  ;;  %v10527_v13 = vpack.c.bf16 %v5506_v8, %v5505_v37  ;;  %v5595_v62 = vld [vmem:[#allocation22 + $0xe30] sm:$0xff]  ;;  %v5596_v7 = vld [vmem:[#allocation22 + $0xe38] sm:$0xff] }
 0x7a4   : > { %10454 = vmatprep.subr.bf16.mxu0 %v11546_v6  ;;  %10478 = vmatprep.subr.bf16.mxu1 %v11546_v6  ;;  %v5683_v37 = vld [vmem:[#allocation22 + $0xeb0] sm:$0xff]  ;;  %v5684_v8 = vld [vmem:[#allocation22 + $0xeb8] sm:$0xff] }
 0x7a7   : > { %10456 = vmatpush3.bf16.msra.mxu0 %v10455_v44  ;;  %10480 = vmatpush3.bf16.msra.mxu1 %v10479_v1  ;;  %v10506_v44 = vpack.c.bf16 %v5420_v50, %v5419_v11  ;;  %v10530_v1 = vpack.c.bf16 %v5508_v43, %v5507_v17  ;;  %v5597_v11 = vld [vmem:[#allocation22 + $0xe40] sm:$0xff]  ;;  %v5598_v50 = vld [vmem:[#allocation22 + $0xe48] sm:$0xff] }
 0x7a8   : > { %10457 = vmatprep.subr.bf16.mxu0 %v11546_v6  ;;  %10481 = vmatprep.subr.bf16.mxu1 %v11546_v6  ;;  %v5685_v17 = vld [vmem:[#allocation22 + $0xec0] sm:$0xff]  ;;  %v5686_v43 = vld [vmem:[#allocation22 + $0xec8] sm:$0xff] }
 0x7ab   : > { %10459 = vmatpush3.bf16.msra.mxu0 %v10458_v18  ;;  %10483 = vmatpush3.bf16.msra.mxu1 %v10482_v21  ;;  %v10509_v18 = vpack.c.bf16 %v5422_v5, %v5421_v3  ;;  %v10533_v21 = vpack.c.bf16 %v5510_v63, %v5509_v15  ;;  %v5599_v3 = vld [vmem:[#allocation22 + $0xe50] sm:$0xff]  ;;  %v5600_v5 = vld [vmem:[#allocation22 + $0xe58] sm:$0xff] }
 0x7ac   : > { %10460 = vmatprep.subr.bf16.mxu0 %v11546_v6  ;;  %10484 = vmatprep.subr.bf16.mxu1 %v11546_v6  ;;  %v5687_v15 = vld [vmem:[#allocation22 + $0xed0] sm:$0xff]  ;;  %v5688_v63 = vld [vmem:[#allocation22 + $0xed8] sm:$0xff] }
 0x7af   : > { %10462 = vmatpush3.bf16.msra.mxu0 %v10461_v24  ;;  %10486 = vmatpush3.bf16.msra.mxu1 %v10485_v27  ;;  %v10512_v24 = vpack.c.bf16 %v5424_v59, %v5423_v23  ;;  %v10536_v27 = vpack.c.bf16 %v5512_v25, %v5511_v0  ;;  %v5601_v23 = vld [vmem:[#allocation22 + $0xe60] sm:$0xff]  ;;  %v5602_v59 = vld [vmem:[#allocation22 + $0xe68] sm:$0xff] }
 0x7b0   : > { %10463 = vmatprep.subr.bf16.mxu0 %v11546_v6  ;;  %10487 = vmatprep.subr.bf16.mxu1 %v11546_v6  ;;  %v5689_v0 = vld [vmem:[#allocation22 + $0xee0] sm:$0xff]  ;;  %v5690_v25 = vld [vmem:[#allocation22 + $0xee8] sm:$0xff] }
 0x7b1   : > { %v4087_v12 = vpop.f32.mrb[62].mxu0  ;;  %v4175_v35 = vpop.f32.mrb[66].mxu1 }
 0x7b2   : > { %v4091_v53 = vadd.f32 %v4087_v12, %v13191_v57  ;;  %v8625_v40 = vpop.f32.mrb[63].mxu0  ;;  %v8660_v20 = vpop.f32.mrb[67].mxu1  ;;  %v5413_v57 = vld [vmem:[#allocation22 + $0xd00] sm:$0xff]  ;;  %v10539_v12 = vpack.c.bf16 %v5514_v14, %v5513_v29  ;;  %v10563_v14 = vpack.c.bf16 %v5602_v59, %v5601_v23 }
 0x7b3   : > { %10465 = vmatpush3.bf16.msra.mxu0 %v10464_v46  ;;  %10489 = vmatpush3.bf16.msra.mxu1 %v10488_v41  ;;  %v10497_v19 = vpack.c.bf16 %v5414_v58, %v5413_v57  ;;  %v5428_v40 = vld [vmem:[#allocation22 + $0xd78] sm:$0xff]  ;;  %v5515_v20 = vld [vmem:[#allocation22 + $0xdf0] sm:$0xff] }
 0x7b4   : > { %v13214_v45 = vadd.f32 %v4175_v35, %v4091_v53  ;;  %10466 = vmatprep.subr.bf16.mxu0 %v11546_v6  ;;  %10490 = vmatprep.subr.bf16.mxu1 %v11546_v6  ;;  %v5427_v35 = vld [vmem:[#allocation22 + $0xd70] sm:$0xff]  ;;  %v5592_v58 = vld [vmem:[#allocation22 + $0xe18] sm:$0xff] }
 0x7b5   : > { %v5591_v57 = vld [vmem:[#allocation22 + $0xe10] sm:$0xff] }
 0x7b6   : > { %v10548_v4 = vpack.c.bf16 %v5592_v58, %v5591_v57 }
 0x7b7   : > { %10468 = vmatpush3.bf16.msra.mxu0 %v10467_v22  ;;  %10492 = vmatpush3.bf16.msra.mxu1 %v10491_v47  ;;  %v5516_v22 = vld [vmem:[#allocation22 + $0xdf8] sm:$0xff]  ;;  %v10518_v47 = vpack.c.bf16 %v5428_v40, %v5427_v35  ;;  %v5766_v40 = vld [vmem:[#allocation22 + $0xf08] sm:$0xff] }
 0x7b8   : > { %10469 = vmatprep.subr.bf16.mxu0 %v11546_v6  ;;  %10493 = vmatprep.subr.bf16.mxu1 %v11546_v6  ;;  %v10542_v32 = vpack.c.bf16 %v5516_v22, %v5515_v20  ;;  %v5853_v20 = vld [vmem:[#allocation22 + $0xf80] sm:$0xff]  ;;  %v5854_v22 = vld [vmem:[#allocation22 + $0xf88] sm:$0xff] }
 0x7bb   : > { %10471 = vmatpush3.bf16.msra.mxu0 %v10470_v54  ;;  %10495 = vmatpush3.bf16.msra.mxu1 %v10494_v55  ;;  %v10569_v55 = vpack.c.bf16 %v5678_v52, %v5677_v49  ;;  %v5855_v49 = vld [vmem:[#allocation22 + $0xf90] sm:$0xff]  ;;  %v5856_v52 = vld [vmem:[#allocation22 + $0xf98] sm:$0xff] }
 0x7bc   : > { %10496 = vmatprep.subr.bf16.mxu0 %v11546_v6  ;;  %10520 = vmatprep.subr.bf16.mxu1 %v11546_v6  ;;  %v10620_v58 = vpack.c.bf16 %v5856_v52, %v5855_v49  ;;  %v5945_v49 = vld [vmem:[#allocation22 + $0x1020] sm:$0xff]  ;;  %v5946_v52 = vld [vmem:[#allocation22 + $0x1028] sm:$0xff] }
 0x7be   : > { %9114 = vmatmul.mubr.f32.vlgmr.msra.gmra.mrb[76].mxu0 %v5236_v56  ;;  %9149 = vmatmul.mubr.f32.vlgmr.msra.gmra.mrb[80].mxu1 %v5324_v10  ;;  %v5681_v56 = vld [vmem:[#allocation22 + $0xea0] sm:$0xff]  ;;  %v5682_v10 = vld [vmem:[#allocation22 + $0xea8] sm:$0xff] }
 0x7bf   : > { %10498 = vmatpush3.bf16.msra.mxu0 %v10497_v19  ;;  %10522 = vmatpush3.bf16.msra.mxu1 %v10521_v2  ;;  %v5412_v19 = vld [vmem:[#allocation4 + $0x34] sm:$0x1]  ;;  %v5500_v2 = vld [vmem:[#allocation4 + $0x35] sm:$0x1] }
 0x7c0   : > { %10499 = vmatprep.subr.bf16.mxu0 %v11546_v6  ;;  %10523 = vmatprep.subr.bf16.mxu1 %v11546_v6 }
 0x7c1   : > { %9183 = vmatprep.mubr.msk.f32.mxu0 %vm11549_vm5, %v11550_v16  ;;  %9218 = vmatprep.mubr.msk.f32.mxu1 %vm11549_vm5, %v11550_v16 }
 0x7c3   : > { %10501 = vmatpush3.bf16.msra.mxu0 %v10500_v26  ;;  %10525 = vmatpush3.bf16.msra.mxu1 %v10524_v39  ;;  %v10551_v26 = vpack.c.bf16 %v5594_v9, %v5593_v48  ;;  %v10575_v39 = vpack.c.bf16 %v5682_v10, %v5681_v56  ;;  %v5771_v48 = vld [vmem:[#allocation22 + $0xf30] sm:$0xff]  ;;  %v5772_v9 = vld [vmem:[#allocation22 + $0xf38] sm:$0xff] }
 0x7c4   : > { %10502 = vmatprep.subr.bf16.mxu0 %v11546_v6  ;;  %10526 = vmatprep.subr.bf16.mxu1 %v11546_v6  ;;  %v5859_v56 = vld [vmem:[#allocation22 + $0xfb0] sm:$0xff]  ;;  %v5860_v10 = vld [vmem:[#allocation22 + $0xfb8] sm:$0xff] }
 0x7c7   : > { %10504 = vmatpush3.bf16.msra.mxu0 %v10503_v51  ;;  %10528 = vmatpush3.bf16.msra.mxu1 %v10527_v13  ;;  %v10554_v51 = vpack.c.bf16 %v5596_v7, %v5595_v62  ;;  %v10578_v13 = vpack.c.bf16 %v5684_v8, %v5683_v37  ;;  %v5773_v62 = vld [vmem:[#allocation22 + $0xf40] sm:$0xff]  ;;  %v5774_v7 = vld [vmem:[#allocation22 + $0xf48] sm:$0xff] }
 0x7c8   : > { %10505 = vmatprep.subr.bf16.mxu0 %v11546_v6  ;;  %10529 = vmatprep.subr.bf16.mxu1 %v11546_v6  ;;  %v5861_v37 = vld [vmem:[#allocation22 + $0xfc0] sm:$0xff]  ;;  %v5862_v8 = vld [vmem:[#allocation22 + $0xfc8] sm:$0xff] }
 0x7cb   : > { %10507 = vmatpush3.bf16.msra.mxu0 %v10506_v44  ;;  %10531 = vmatpush3.bf16.msra.mxu1 %v10530_v1  ;;  %v10557_v44 = vpack.c.bf16 %v5598_v50, %v5597_v11  ;;  %v10581_v1 = vpack.c.bf16 %v5686_v43, %v5685_v17  ;;  %v5775_v11 = vld [vmem:[#allocation22 + $0xf50] sm:$0xff]  ;;  %v5776_v50 = vld [vmem:[#allocation22 + $0xf58] sm:$0xff] }
 0x7cc   : > { %10508 = vmatprep.subr.bf16.mxu0 %v11546_v6  ;;  %10532 = vmatprep.subr.bf16.mxu1 %v11546_v6  ;;  %v5863_v17 = vld [vmem:[#allocation22 + $0xfd0] sm:$0xff]  ;;  %v5864_v43 = vld [vmem:[#allocation22 + $0xfd8] sm:$0xff] }
 0x7cf   : > { %10510 = vmatpush3.bf16.msra.mxu0 %v10509_v18  ;;  %10534 = vmatpush3.bf16.msra.mxu1 %v10533_v21  ;;  %v10560_v18 = vpack.c.bf16 %v5600_v5, %v5599_v3  ;;  %v10584_v21 = vpack.c.bf16 %v5688_v63, %v5687_v15  ;;  %v5777_v3 = vld [vmem:[#allocation22 + $0xf60] sm:$0xff]  ;;  %v5778_v5 = vld [vmem:[#allocation22 + $0xf68] sm:$0xff] }
 0x7d0   : > { %10511 = vmatprep.subr.bf16.mxu0 %v11546_v6  ;;  %10535 = vmatprep.subr.bf16.mxu1 %v11546_v6  ;;  %v5865_v15 = vld [vmem:[#allocation22 + $0xfe0] sm:$0xff]  ;;  %v5866_v63 = vld [vmem:[#allocation22 + $0xfe8] sm:$0xff] }
 0x7d1   : > { %v4263_v46 = vpop.f32.mrb[64].mxu0  ;;  %v4351_v41 = vpop.f32.mrb[68].mxu1 }
 0x7d2   : > { %v4267_v31 = vadd.f32 %v4263_v46, %v13214_v45  ;;  %v8695_v34 = vpop.f32.mrb[65].mxu0  ;;  %v8730_v33 = vpop.f32.mrb[69].mxu1  ;;  %v5589_v45 = vld [vmem:[#allocation22 + $0xe00] sm:$0xff]  ;;  %v10587_v46 = vpack.c.bf16 %v5690_v25, %v5689_v0  ;;  %v10611_v25 = vpack.c.bf16 %v5778_v5, %v5777_v3 }
 0x7d3   : > { %10513 = vmatpush3.bf16.msra.mxu0 %v10512_v24  ;;  %10537 = vmatpush3.bf16.msra.mxu1 %v10536_v27  ;;  %v10545_v54 = vpack.c.bf16 %v5590_v38, %v5589_v45  ;;  %v5604_v34 = vld [vmem:[#allocation22 + $0xe78] sm:$0xff]  ;;  %v5691_v33 = vld [vmem:[#allocation22 + $0xef0] sm:$0xff] }
 0x7d4   : > { %v13237_v53 = vadd.f32 %v4351_v41, %v4267_v31  ;;  %10514 = vmatprep.subr.bf16.mxu0 %v11546_v6  ;;  %10538 = vmatprep.subr.bf16.mxu1 %v11546_v6  ;;  %v5603_v41 = vld [vmem:[#allocation22 + $0xe70] sm:$0xff]  ;;  %v5768_v38 = vld [vmem:[#allocation22 + $0xf18] sm:$0xff] }
 0x7d5   : > { %v5767_v45 = vld [vmem:[#allocation22 + $0xf10] sm:$0xff] }
 0x7d6   : > { %v10596_v57 = vpack.c.bf16 %v5768_v38, %v5767_v45 }
 0x7d7   : > { %10516 = vmatpush3.bf16.msra.mxu0 %v10515_v36  ;;  %10540 = vmatpush3.bf16.msra.mxu1 %v10539_v12  ;;  %v5692_v36 = vld [vmem:[#allocation22 + $0xef8] sm:$0xff]  ;;  %v10566_v12 = vpack.c.bf16 %v5604_v34, %v5603_v41  ;;  %v5942_v34 = vld [vmem:[#allocation22 + $0x1008] sm:$0xff] }
 0x7d8   : > { %10517 = vmatprep.subr.bf16.mxu0 %v11546_v6  ;;  %10541 = vmatprep.subr.bf16.mxu1 %v11546_v6  ;;  %v10590_v35 = vpack.c.bf16 %v5692_v36, %v5691_v33  ;;  %v6029_v33 = vld [vmem:[#allocation22 + $0x1080] sm:$0xff]  ;;  %v6030_v36 = vld [vmem:[#allocation22 + $0x1088] sm:$0xff] }
 0x7db   : > { %10519 = vmatpush3.bf16.msra.mxu0 %v10518_v47  ;;  %10543 = vmatpush3.bf16.msra.mxu1 %v10542_v32  ;;  %v10617_v32 = vpack.c.bf16 %v5854_v22, %v5853_v20  ;;  %v6031_v20 = vld [vmem:[#allocation22 + $0x1090] sm:$0xff]  ;;  %v6032_v22 = vld [vmem:[#allocation22 + $0x1098] sm:$0xff] }
 0x7dc   : > { %10544 = vmatprep.subr.bf16.mxu0 %v11546_v6  ;;  %10568 = vmatprep.subr.bf16.mxu1 %v11546_v6  ;;  %v10668_v38 = vpack.c.bf16 %v6032_v22, %v6031_v20  ;;  %v6121_v20 = vld [vmem:[#allocation22 + $0x1120] sm:$0xff]  ;;  %v6122_v22 = vld [vmem:[#allocation22 + $0x1128] sm:$0xff] }
 0x7de   : > { %9184 = vmatmul.mubr.f32.vlgmr.msra.gmra.mrb[78].mxu0 %v5412_v19  ;;  %9219 = vmatmul.mubr.f32.vlgmr.msra.gmra.mrb[82].mxu1 %v5500_v2  ;;  %v5857_v19 = vld [vmem:[#allocation22 + $0xfa0] sm:$0xff]  ;;  %v5858_v2 = vld [vmem:[#allocation22 + $0xfa8] sm:$0xff] }
 0x7df   : > { %10546 = vmatpush3.bf16.msra.mxu0 %v10545_v54  ;;  %10570 = vmatpush3.bf16.msra.mxu1 %v10569_v55  ;;  %v5588_v54 = vld [vmem:[#allocation4 + $0x38] sm:$0x1]  ;;  %v5676_v55 = vld [vmem:[#allocation4 + $0x39] sm:$0x1] }
 0x7e0   : > { %10547 = vmatprep.subr.bf16.mxu0 %v11546_v6  ;;  %10571 = vmatprep.subr.bf16.mxu1 %v11546_v6 }
 0x7e1   : > { %9253 = vmatprep.mubr.msk.f32.mxu0 %vm11549_vm5, %v11550_v16  ;;  %9288 = vmatprep.mubr.msk.f32.mxu1 %vm11549_vm5, %v11550_v16 }
 0x7e3   : > { %10549 = vmatpush3.bf16.msra.mxu0 %v10548_v4  ;;  %10573 = vmatpush3.bf16.msra.mxu1 %v10572_v61  ;;  %v10599_v4 = vpack.c.bf16 %v5770_v60, %v5769_v42  ;;  %v10623_v61 = vpack.c.bf16 %v5858_v2, %v5857_v19  ;;  %v5947_v42 = vld [vmem:[#allocation22 + $0x1030] sm:$0xff]  ;;  %v5948_v60 = vld [vmem:[#allocation22 + $0x1038] sm:$0xff] }
 0x7e4   : > { %10550 = vmatprep.subr.bf16.mxu0 %v11546_v6  ;;  %10574 = vmatprep.subr.bf16.mxu1 %v11546_v6  ;;  %v6035_v19 = vld [vmem:[#allocation22 + $0x10b0] sm:$0xff]  ;;  %v6036_v2 = vld [vmem:[#allocation22 + $0x10b8] sm:$0xff] }
 0x7e7   : > { %10552 = vmatpush3.bf16.msra.mxu0 %v10551_v26  ;;  %10576 = vmatpush3.bf16.msra.mxu1 %v10575_v39  ;;  %v10602_v26 = vpack.c.bf16 %v5772_v9, %v5771_v48  ;;  %v10626_v39 = vpack.c.bf16 %v5860_v10, %v5859_v56  ;;  %v5949_v48 = vld [vmem:[#allocation22 + $0x1040] sm:$0xff]  ;;  %v5950_v9 = vld [vmem:[#allocation22 + $0x1048] sm:$0xff] }
 0x7e8   : > { %10553 = vmatprep.subr.bf16.mxu0 %v11546_v6  ;;  %10577 = vmatprep.subr.bf16.mxu1 %v11546_v6  ;;  %v6037_v56 = vld [vmem:[#allocation22 + $0x10c0] sm:$0xff]  ;;  %v6038_v10 = vld [vmem:[#allocation22 + $0x10c8] sm:$0xff] }
 0x7eb   : > { %10555 = vmatpush3.bf16.msra.mxu0 %v10554_v51  ;;  %10579 = vmatpush3.bf16.msra.mxu1 %v10578_v13  ;;  %v10605_v51 = vpack.c.bf16 %v5774_v7, %v5773_v62  ;;  %v10629_v13 = vpack.c.bf16 %v5862_v8, %v5861_v37  ;;  %v5951_v62 = vld [vmem:[#allocation22 + $0x1050] sm:$0xff]  ;;  %v5952_v7 = vld [vmem:[#allocation22 + $0x1058] sm:$0xff] }
 0x7ec   : > { %10556 = vmatprep.subr.bf16.mxu0 %v11546_v6  ;;  %10580 = vmatprep.subr.bf16.mxu1 %v11546_v6  ;;  %v6039_v37 = vld [vmem:[#allocation22 + $0x10d0] sm:$0xff]  ;;  %v6040_v8 = vld [vmem:[#allocation22 + $0x10d8] sm:$0xff] }
 0x7ef   : > { %10558 = vmatpush3.bf16.msra.mxu0 %v10557_v44  ;;  %10582 = vmatpush3.bf16.msra.mxu1 %v10581_v1  ;;  %v10608_v44 = vpack.c.bf16 %v5776_v50, %v5775_v11  ;;  %v10632_v1 = vpack.c.bf16 %v5864_v43, %v5863_v17  ;;  %v5953_v11 = vld [vmem:[#allocation22 + $0x1060] sm:$0xff]  ;;  %v5954_v50 = vld [vmem:[#allocation22 + $0x1068] sm:$0xff] }
 0x7f0   : > { %10559 = vmatprep.subr.bf16.mxu0 %v11546_v6  ;;  %10583 = vmatprep.subr.bf16.mxu1 %v11546_v6  ;;  %v6041_v17 = vld [vmem:[#allocation22 + $0x10e0] sm:$0xff]  ;;  %v6042_v43 = vld [vmem:[#allocation22 + $0x10e8] sm:$0xff] }
 0x7f1   : > { %v4439_v24 = vpop.f32.mrb[66].mxu0  ;;  %v4527_v27 = vpop.f32.mrb[70].mxu1 }
 0x7f2   : > { %v4443_v28 = vadd.f32 %v4439_v24, %v13237_v53  ;;  %v8765_v30 = vpop.f32.mrb[67].mxu0  ;;  %v8800_v29 = vpop.f32.mrb[71].mxu1  ;;  %v5765_v53 = vld [vmem:[#allocation22 + $0xf00] sm:$0xff]  ;;  %v10635_v24 = vpack.c.bf16 %v5866_v63, %v5865_v15  ;;  %v10659_v63 = vpack.c.bf16 %v5954_v50, %v5953_v11 }
 0x7f3   : > { %10561 = vmatpush3.bf16.msra.mxu0 %v10560_v18  ;;  %10585 = vmatpush3.bf16.msra.mxu1 %v10584_v21  ;;  %v10593_v47 = vpack.c.bf16 %v5766_v40, %v5765_v53  ;;  %v5780_v30 = vld [vmem:[#allocation22 + $0xf78] sm:$0xff]  ;;  %v5867_v29 = vld [vmem:[#allocation22 + $0xff0] sm:$0xff] }
 0x7f4   : > { %v13260_v31 = vadd.f32 %v4527_v27, %v4443_v28  ;;  %10562 = vmatprep.subr.bf16.mxu0 %v11546_v6  ;;  %10586 = vmatprep.subr.bf16.mxu1 %v11546_v6  ;;  %v5779_v27 = vld [vmem:[#allocation22 + $0xf70] sm:$0xff]  ;;  %v5944_v40 = vld [vmem:[#allocation22 + $0x1018] sm:$0xff] }
 0x7f5   : > { %v5943_v53 = vld [vmem:[#allocation22 + $0x1010] sm:$0xff] }
 0x7f6   : > { %v10644_v45 = vpack.c.bf16 %v5944_v40, %v5943_v53 }
 0x7f7   : > { %10564 = vmatpush3.bf16.msra.mxu0 %v10563_v14  ;;  %10588 = vmatpush3.bf16.msra.mxu1 %v10587_v46  ;;  %v5868_v14 = vld [vmem:[#allocation22 + $0xff8] sm:$0xff]  ;;  %v10614_v46 = vpack.c.bf16 %v5780_v30, %v5779_v27  ;;  %v6118_v30 = vld [vmem:[#allocation22 + $0x1108] sm:$0xff] }
 0x7f8   : > { %10565 = vmatprep.subr.bf16.mxu0 %v11546_v6  ;;  %10589 = vmatprep.subr.bf16.mxu1 %v11546_v6  ;;  %v10638_v41 = vpack.c.bf16 %v5868_v14, %v5867_v29  ;;  %v6205_v29 = vld [vmem:[#allocation22 + $0x1180] sm:$0xff]  ;;  %v6206_v14 = vld [vmem:[#allocation22 + $0x1188] sm:$0xff] }
 0x7fb   : > { %10567 = vmatpush3.bf16.msra.mxu0 %v10566_v12  ;;  %10591 = vmatpush3.bf16.msra.mxu1 %v10590_v35  ;;  %v10665_v35 = vpack.c.bf16 %v6030_v36, %v6029_v33  ;;  %v6207_v33 = vld [vmem:[#allocation22 + $0x1190] sm:$0xff]  ;;  %v6208_v36 = vld [vmem:[#allocation22 + $0x1198] sm:$0xff] }
 0x7fc   : > { %10592 = vmatprep.subr.bf16.mxu0 %v11546_v6  ;;  %10616 = vmatprep.subr.bf16.mxu1 %v11546_v6  ;;  %v10716_v40 = vpack.c.bf16 %v6208_v36, %v6207_v33  ;;  %v6297_v33 = vld [vmem:[#allocation22 + $0x1220] sm:$0xff]  ;;  %v6298_v36 = vld [vmem:[#allocation22 + $0x1228] sm:$0xff] }
 0x7fe   : > { %9254 = vmatmul.mubr.f32.vlgmr.msra.gmra.mrb[80].mxu0 %v5588_v54  ;;  %9289 = vmatmul.mubr.f32.vlgmr.msra.gmra.mrb[84].mxu1 %v5676_v55  ;;  %v6033_v54 = vld [vmem:[#allocation22 + $0x10a0] sm:$0xff]  ;;  %v6034_v55 = vld [vmem:[#allocation22 + $0x10a8] sm:$0xff] }
 0x7ff   : > { %10594 = vmatpush3.bf16.msra.mxu0 %v10593_v47  ;;  %10618 = vmatpush3.bf16.msra.mxu1 %v10617_v32  ;;  %v5764_v47 = vld [vmem:[#allocation4 + $0x3a] sm:$0x1]  ;;  %v5852_v32 = vld [vmem:[#allocation4 + $0x3b] sm:$0x1] }
 0x800   : > { %10595 = vmatprep.subr.bf16.mxu0 %v11546_v6  ;;  %10619 = vmatprep.subr.bf16.mxu1 %v11546_v6 }
 0x801   : > { %9323 = vmatprep.mubr.msk.f32.mxu0 %vm11549_vm5, %v11550_v16  ;;  %9358 = vmatprep.mubr.msk.f32.mxu1 %vm11549_vm5, %v11550_v16 }
 0x803   : > { %10597 = vmatpush3.bf16.msra.mxu0 %v10596_v57  ;;  %10621 = vmatpush3.bf16.msra.mxu1 %v10620_v58  ;;  %v10647_v57 = vpack.c.bf16 %v5946_v52, %v5945_v49  ;;  %v10671_v58 = vpack.c.bf16 %v6034_v55, %v6033_v54  ;;  %v6123_v49 = vld [vmem:[#allocation22 + $0x1130] sm:$0xff]  ;;  %v6124_v52 = vld [vmem:[#allocation22 + $0x1138] sm:$0xff] }
 0x804   : > { %10598 = vmatprep.subr.bf16.mxu0 %v11546_v6  ;;  %10622 = vmatprep.subr.bf16.mxu1 %v11546_v6  ;;  %v6211_v54 = vld [vmem:[#allocation22 + $0x11b0] sm:$0xff]  ;;  %v6212_v55 = vld [vmem:[#allocation22 + $0x11b8] sm:$0xff] }
 0x807   : > { %10600 = vmatpush3.bf16.msra.mxu0 %v10599_v4  ;;  %10624 = vmatpush3.bf16.msra.mxu1 %v10623_v61  ;;  %v10650_v4 = vpack.c.bf16 %v5948_v60, %v5947_v42  ;;  %v10674_v61 = vpack.c.bf16 %v6036_v2, %v6035_v19  ;;  %v6125_v42 = vld [vmem:[#allocation22 + $0x1140] sm:$0xff]  ;;  %v6126_v60 = vld [vmem:[#allocation22 + $0x1148] sm:$0xff] }
 0x808   : > { %10601 = vmatprep.subr.bf16.mxu0 %v11546_v6  ;;  %10625 = vmatprep.subr.bf16.mxu1 %v11546_v6  ;;  %v6213_v19 = vld [vmem:[#allocation22 + $0x11c0] sm:$0xff]  ;;  %v6214_v2 = vld [vmem:[#allocation22 + $0x11c8] sm:$0xff] }
 0x80b   : > { %10603 = vmatpush3.bf16.msra.mxu0 %v10602_v26  ;;  %10627 = vmatpush3.bf16.msra.mxu1 %v10626_v39  ;;  %v10653_v26 = vpack.c.bf16 %v5950_v9, %v5949_v48  ;;  %v10677_v39 = vpack.c.bf16 %v6038_v10, %v6037_v56  ;;  %v6127_v48 = vld [vmem:[#allocation22 + $0x1150] sm:$0xff]  ;;  %v6128_v9 = vld [vmem:[#allocation22 + $0x1158] sm:$0xff] }
 0x80c   : > { %10604 = vmatprep.subr.bf16.mxu0 %v11546_v6  ;;  %10628 = vmatprep.subr.bf16.mxu1 %v11546_v6  ;;  %v6215_v56 = vld [vmem:[#allocation22 + $0x11d0] sm:$0xff]  ;;  %v6216_v10 = vld [vmem:[#allocation22 + $0x11d8] sm:$0xff] }
 0x80f   : > { %10606 = vmatpush3.bf16.msra.mxu0 %v10605_v51  ;;  %10630 = vmatpush3.bf16.msra.mxu1 %v10629_v13  ;;  %v10656_v51 = vpack.c.bf16 %v5952_v7, %v5951_v62  ;;  %v10680_v13 = vpack.c.bf16 %v6040_v8, %v6039_v37  ;;  %v6129_v62 = vld [vmem:[#allocation22 + $0x1160] sm:$0xff]  ;;  %v6130_v7 = vld [vmem:[#allocation22 + $0x1168] sm:$0xff] }
 0x810   : > { %10607 = vmatprep.subr.bf16.mxu0 %v11546_v6  ;;  %10631 = vmatprep.subr.bf16.mxu1 %v11546_v6  ;;  %v6217_v37 = vld [vmem:[#allocation22 + $0x11e0] sm:$0xff]  ;;  %v6218_v8 = vld [vmem:[#allocation22 + $0x11e8] sm:$0xff] }
 0x811   : > { %v4615_v18 = vpop.f32.mrb[68].mxu0  ;;  %v4703_v21 = vpop.f32.mrb[72].mxu1 }
 0x812   : > { %v4619_v23 = vadd.f32 %v4615_v18, %v13260_v31  ;;  %v8835_v59 = vpop.f32.mrb[69].mxu0  ;;  %v8870_v0 = vpop.f32.mrb[73].mxu1  ;;  %v5941_v31 = vld [vmem:[#allocation22 + $0x1000] sm:$0xff]  ;;  %v10683_v18 = vpack.c.bf16 %v6042_v43, %v6041_v17  ;;  %v10707_v43 = vpack.c.bf16 %v6130_v7, %v6129_v62 }
 0x813   : > { %10609 = vmatpush3.bf16.msra.mxu0 %v10608_v44  ;;  %10633 = vmatpush3.bf16.msra.mxu1 %v10632_v1  ;;  %v10641_v12 = vpack.c.bf16 %v5942_v34, %v5941_v31  ;;  %v5956_v59 = vld [vmem:[#allocation22 + $0x1078] sm:$0xff]  ;;  %v6043_v0 = vld [vmem:[#allocation22 + $0x10f0] sm:$0xff] }
 0x814   : > { %v13283_v28 = vadd.f32 %v4703_v21, %v4619_v23  ;;  %10610 = vmatprep.subr.bf16.mxu0 %v11546_v6  ;;  %10634 = vmatprep.subr.bf16.mxu1 %v11546_v6  ;;  %v5955_v21 = vld [vmem:[#allocation22 + $0x1070] sm:$0xff]  ;;  %v6120_v34 = vld [vmem:[#allocation22 + $0x1118] sm:$0xff] }
 0x815   : > { %v6119_v31 = vld [vmem:[#allocation22 + $0x1110] sm:$0xff] }
 0x816   : > { %v10692_v53 = vpack.c.bf16 %v6120_v34, %v6119_v31 }
 0x817   : > { %10612 = vmatpush3.bf16.msra.mxu0 %v10611_v25  ;;  %10636 = vmatpush3.bf16.msra.mxu1 %v10635_v24  ;;  %v6044_v25 = vld [vmem:[#allocation22 + $0x10f8] sm:$0xff]  ;;  %v10662_v24 = vpack.c.bf16 %v5956_v59, %v5955_v21  ;;  %v6294_v59 = vld [vmem:[#allocation22 + $0x1208] sm:$0xff] }
 0x818   : > { %10613 = vmatprep.subr.bf16.mxu0 %v11546_v6  ;;  %10637 = vmatprep.subr.bf16.mxu1 %v11546_v6  ;;  %v10686_v27 = vpack.c.bf16 %v6044_v25, %v6043_v0  ;;  %v6381_v0 = vld [vmem:[#allocation22 + $0x1280] sm:$0xff]  ;;  %v6382_v25 = vld [vmem:[#allocation22 + $0x1288] sm:$0xff] }
 0x81b   : > { %10615 = vmatpush3.bf16.msra.mxu0 %v10614_v46  ;;  %10639 = vmatpush3.bf16.msra.mxu1 %v10638_v41  ;;  %v10713_v41 = vpack.c.bf16 %v6206_v14, %v6205_v29  ;;  %v6383_v29 = vld [vmem:[#allocation22 + $0x1290] sm:$0xff]  ;;  %v6384_v14 = vld [vmem:[#allocation22 + $0x1298] sm:$0xff] }
 0x81c   : > { %10640 = vmatprep.subr.bf16.mxu0 %v11546_v6  ;;  %10664 = vmatprep.subr.bf16.mxu1 %v11546_v6  ;;  %v10764_v34 = vpack.c.bf16 %v6384_v14, %v6383_v29  ;;  %v6473_v29 = vld [vmem:[#allocation22 + $0x1320] sm:$0xff]  ;;  %v6474_v14 = vld [vmem:[#allocation22 + $0x1328] sm:$0xff] }
 0x81e   : > { %9324 = vmatmul.mubr.f32.vlgmr.msra.gmra.mrb[82].mxu0 %v5764_v47  ;;  %9359 = vmatmul.mubr.f32.vlgmr.msra.gmra.mrb[86].mxu1 %v5852_v32  ;;  %v6209_v47 = vld [vmem:[#allocation22 + $0x11a0] sm:$0xff]  ;;  %v6210_v32 = vld [vmem:[#allocation22 + $0x11a8] sm:$0xff] }
 0x81f   : > { %10642 = vmatpush3.bf16.msra.mxu0 %v10641_v12  ;;  %10666 = vmatpush3.bf16.msra.mxu1 %v10665_v35  ;;  %v5940_v12 = vld [vmem:[#allocation4 + $0x3c] sm:$0x1]  ;;  %v6028_v35 = vld [vmem:[#allocation4 + $0x3d] sm:$0x1] }
 0x820   : > { %10643 = vmatprep.subr.bf16.mxu0 %v11546_v6  ;;  %10667 = vmatprep.subr.bf16.mxu1 %v11546_v6 }
 0x821   : > { %9393 = vmatprep.mubr.msk.f32.mxu0 %vm11549_vm5, %v11550_v16  ;;  %9428 = vmatprep.mubr.msk.f32.mxu1 %vm11549_vm5, %v11550_v16 }
 0x823   : > { %10645 = vmatpush3.bf16.msra.mxu0 %v10644_v45  ;;  %10669 = vmatpush3.bf16.msra.mxu1 %v10668_v38  ;;  %v10695_v45 = vpack.c.bf16 %v6122_v22, %v6121_v20  ;;  %v10719_v38 = vpack.c.bf16 %v6210_v32, %v6209_v47  ;;  %v6299_v20 = vld [vmem:[#allocation22 + $0x1230] sm:$0xff]  ;;  %v6300_v22 = vld [vmem:[#allocation22 + $0x1238] sm:$0xff] }
 0x824   : > { %10646 = vmatprep.subr.bf16.mxu0 %v11546_v6  ;;  %10670 = vmatprep.subr.bf16.mxu1 %v11546_v6  ;;  %v6387_v47 = vld [vmem:[#allocation22 + $0x12b0] sm:$0xff]  ;;  %v6388_v32 = vld [vmem:[#allocation22 + $0x12b8] sm:$0xff] }
 0x827   : > { %10648 = vmatpush3.bf16.msra.mxu0 %v10647_v57  ;;  %10672 = vmatpush3.bf16.msra.mxu1 %v10671_v58  ;;  %v10698_v57 = vpack.c.bf16 %v6124_v52, %v6123_v49  ;;  %v10722_v58 = vpack.c.bf16 %v6212_v55, %v6211_v54  ;;  %v6301_v49 = vld [vmem:[#allocation22 + $0x1240] sm:$0xff]  ;;  %v6302_v52 = vld [vmem:[#allocation22 + $0x1248] sm:$0xff] }
 0x828   : > { %10649 = vmatprep.subr.bf16.mxu0 %v11546_v6  ;;  %10673 = vmatprep.subr.bf16.mxu1 %v11546_v6  ;;  %v6389_v54 = vld [vmem:[#allocation22 + $0x12c0] sm:$0xff]  ;;  %v6390_v55 = vld [vmem:[#allocation22 + $0x12c8] sm:$0xff] }
 0x82b   : > { %10651 = vmatpush3.bf16.msra.mxu0 %v10650_v4  ;;  %10675 = vmatpush3.bf16.msra.mxu1 %v10674_v61  ;;  %v10701_v4 = vpack.c.bf16 %v6126_v60, %v6125_v42  ;;  %v10725_v61 = vpack.c.bf16 %v6214_v2, %v6213_v19  ;;  %v6303_v42 = vld [vmem:[#allocation22 + $0x1250] sm:$0xff]  ;;  %v6304_v60 = vld [vmem:[#allocation22 + $0x1258] sm:$0xff] }
 0x82c   : > { %10652 = vmatprep.subr.bf16.mxu0 %v11546_v6  ;;  %10676 = vmatprep.subr.bf16.mxu1 %v11546_v6  ;;  %v6391_v19 = vld [vmem:[#allocation22 + $0x12d0] sm:$0xff]  ;;  %v6392_v2 = vld [vmem:[#allocation22 + $0x12d8] sm:$0xff] }
 0x82f   : > { %10654 = vmatpush3.bf16.msra.mxu0 %v10653_v26  ;;  %10678 = vmatpush3.bf16.msra.mxu1 %v10677_v39  ;;  %v10704_v26 = vpack.c.bf16 %v6128_v9, %v6127_v48  ;;  %v10728_v39 = vpack.c.bf16 %v6216_v10, %v6215_v56  ;;  %v6305_v48 = vld [vmem:[#allocation22 + $0x1260] sm:$0xff]  ;;  %v6306_v9 = vld [vmem:[#allocation22 + $0x1268] sm:$0xff] }
 0x830   : > { %10655 = vmatprep.subr.bf16.mxu0 %v11546_v6  ;;  %10679 = vmatprep.subr.bf16.mxu1 %v11546_v6  ;;  %v6393_v56 = vld [vmem:[#allocation22 + $0x12e0] sm:$0xff]  ;;  %v6394_v10 = vld [vmem:[#allocation22 + $0x12e8] sm:$0xff] }
 0x831   : > { %v4791_v44 = vpop.f32.mrb[70].mxu0  ;;  %v4879_v1 = vpop.f32.mrb[74].mxu1 }
 0x832   : > { %v4795_v3 = vadd.f32 %v4791_v44, %v13283_v28  ;;  %v8905_v5 = vpop.f32.mrb[71].mxu0  ;;  %v8940_v15 = vpop.f32.mrb[75].mxu1  ;;  %v6117_v28 = vld [vmem:[#allocation22 + $0x1100] sm:$0xff]  ;;  %v10731_v44 = vpack.c.bf16 %v6218_v8, %v6217_v37  ;;  %v10755_v8 = vpack.c.bf16 %v6306_v9, %v6305_v48 }
 0x833   : > { %10657 = vmatpush3.bf16.msra.mxu0 %v10656_v51  ;;  %10681 = vmatpush3.bf16.msra.mxu1 %v10680_v13  ;;  %v10689_v46 = vpack.c.bf16 %v6118_v30, %v6117_v28  ;;  %v6132_v5 = vld [vmem:[#allocation22 + $0x1178] sm:$0xff]  ;;  %v6219_v15 = vld [vmem:[#allocation22 + $0x11f0] sm:$0xff] }
 0x834   : > { %v13306_v23 = vadd.f32 %v4879_v1, %v4795_v3  ;;  %10658 = vmatprep.subr.bf16.mxu0 %v11546_v6  ;;  %10682 = vmatprep.subr.bf16.mxu1 %v11546_v6  ;;  %v6131_v1 = vld [vmem:[#allocation22 + $0x1170] sm:$0xff]  ;;  %v6296_v30 = vld [vmem:[#allocation22 + $0x1218] sm:$0xff] }
 0x835   : > { %v6295_v28 = vld [vmem:[#allocation22 + $0x1210] sm:$0xff] }
 0x836   : > { %v10740_v31 = vpack.c.bf16 %v6296_v30, %v6295_v28 }
 0x837   : > { %10660 = vmatpush3.bf16.msra.mxu0 %v10659_v63  ;;  %10684 = vmatpush3.bf16.msra.mxu1 %v10683_v18  ;;  %v6220_v63 = vld [vmem:[#allocation22 + $0x11f8] sm:$0xff]  ;;  %v10710_v18 = vpack.c.bf16 %v6132_v5, %v6131_v1  ;;  %v6470_v5 = vld [vmem:[#allocation22 + $0x1308] sm:$0xff] }
 0x838   : > { %10661 = vmatprep.subr.bf16.mxu0 %v11546_v6  ;;  %10685 = vmatprep.subr.bf16.mxu1 %v11546_v6  ;;  %v10734_v21 = vpack.c.bf16 %v6220_v63, %v6219_v15  ;;  %v6557_v15 = vld [vmem:[#allocation22 + $0x1380] sm:$0xff]  ;;  %v6558_v63 = vld [vmem:[#allocation22 + $0x1388] sm:$0xff] }
 0x83b   : > { %10663 = vmatpush3.bf16.msra.mxu0 %v10662_v24  ;;  %10687 = vmatpush3.bf16.msra.mxu1 %v10686_v27  ;;  %v10761_v27 = vpack.c.bf16 %v6382_v25, %v6381_v0  ;;  %v6559_v0 = vld [vmem:[#allocation22 + $0x1390] sm:$0xff]  ;;  %v6560_v25 = vld [vmem:[#allocation22 + $0x1398] sm:$0xff] }
 0x83c   : > { %10688 = vmatprep.subr.bf16.mxu0 %v11546_v6  ;;  %10712 = vmatprep.subr.bf16.mxu1 %v11546_v6  ;;  %v10812_v30 = vpack.c.bf16 %v6560_v25, %v6559_v0  ;;  %v6649_v0 = vld [vmem:[#allocation22 + $0x1420] sm:$0xff]  ;;  %v6650_v25 = vld [vmem:[#allocation22 + $0x1428] sm:$0xff] }
 0x83e   : > { %9394 = vmatmul.mubr.f32.vlgmr.msra.gmra.mrb[84].mxu0 %v5940_v12  ;;  %9429 = vmatmul.mubr.f32.vlgmr.msra.gmra.mrb[88].mxu1 %v6028_v35  ;;  %v6385_v12 = vld [vmem:[#allocation22 + $0x12a0] sm:$0xff]  ;;  %v6386_v35 = vld [vmem:[#allocation22 + $0x12a8] sm:$0xff] }
 0x83f   : > { %10690 = vmatpush3.bf16.msra.mxu0 %v10689_v46  ;;  %10714 = vmatpush3.bf16.msra.mxu1 %v10713_v41  ;;  %v6116_v46 = vld [vmem:[#allocation4 + $0x3e] sm:$0x1]  ;;  %v6204_v41 = vld [vmem:[#allocation4 + $0x41] sm:$0x1] }
 0x840   : > { %10691 = vmatprep.subr.bf16.mxu0 %v11546_v6  ;;  %10715 = vmatprep.subr.bf16.mxu1 %v11546_v6 }
 0x841   : > { %9463 = vmatprep.mubr.msk.f32.mxu0 %vm11549_vm5, %v11550_v16  ;;  %9498 = vmatprep.mubr.msk.f32.mxu1 %vm11549_vm5, %v11550_v16 }
 0x843   : > { %10693 = vmatpush3.bf16.msra.mxu0 %v10692_v53  ;;  %10717 = vmatpush3.bf16.msra.mxu1 %v10716_v40  ;;  %v10743_v53 = vpack.c.bf16 %v6298_v36, %v6297_v33  ;;  %v10767_v40 = vpack.c.bf16 %v6386_v35, %v6385_v12  ;;  %v6475_v33 = vld [vmem:[#allocation22 + $0x1330] sm:$0xff]  ;;  %v6476_v36 = vld [vmem:[#allocation22 + $0x1338] sm:$0xff] }
 0x844   : > { %10694 = vmatprep.subr.bf16.mxu0 %v11546_v6  ;;  %10718 = vmatprep.subr.bf16.mxu1 %v11546_v6  ;;  %v6563_v12 = vld [vmem:[#allocation22 + $0x13b0] sm:$0xff]  ;;  %v6564_v35 = vld [vmem:[#allocation22 + $0x13b8] sm:$0xff] }
 0x847   : > { %10696 = vmatpush3.bf16.msra.mxu0 %v10695_v45  ;;  %10720 = vmatpush3.bf16.msra.mxu1 %v10719_v38  ;;  %v10746_v45 = vpack.c.bf16 %v6300_v22, %v6299_v20  ;;  %v10770_v38 = vpack.c.bf16 %v6388_v32, %v6387_v47  ;;  %v6477_v20 = vld [vmem:[#allocation22 + $0x1340] sm:$0xff]  ;;  %v6478_v22 = vld [vmem:[#allocation22 + $0x1348] sm:$0xff] }
 0x848   : > { %10697 = vmatprep.subr.bf16.mxu0 %v11546_v6  ;;  %10721 = vmatprep.subr.bf16.mxu1 %v11546_v6  ;;  %v6565_v47 = vld [vmem:[#allocation22 + $0x13c0] sm:$0xff]  ;;  %v6566_v32 = vld [vmem:[#allocation22 + $0x13c8] sm:$0xff] }
 0x84b   : > { %10699 = vmatpush3.bf16.msra.mxu0 %v10698_v57  ;;  %10723 = vmatpush3.bf16.msra.mxu1 %v10722_v58  ;;  %v10749_v57 = vpack.c.bf16 %v6302_v52, %v6301_v49  ;;  %v10773_v58 = vpack.c.bf16 %v6390_v55, %v6389_v54  ;;  %v6479_v49 = vld [vmem:[#allocation22 + $0x1350] sm:$0xff]  ;;  %v6480_v52 = vld [vmem:[#allocation22 + $0x1358] sm:$0xff] }
 0x84c   : > { %10700 = vmatprep.subr.bf16.mxu0 %v11546_v6  ;;  %10724 = vmatprep.subr.bf16.mxu1 %v11546_v6  ;;  %v6567_v54 = vld [vmem:[#allocation22 + $0x13d0] sm:$0xff]  ;;  %v6568_v55 = vld [vmem:[#allocation22 + $0x13d8] sm:$0xff] }
 0x84f   : > { %10702 = vmatpush3.bf16.msra.mxu0 %v10701_v4  ;;  %10726 = vmatpush3.bf16.msra.mxu1 %v10725_v61  ;;  %v10752_v4 = vpack.c.bf16 %v6304_v60, %v6303_v42  ;;  %v10776_v61 = vpack.c.bf16 %v6392_v2, %v6391_v19  ;;  %v6481_v42 = vld [vmem:[#allocation22 + $0x1360] sm:$0xff]  ;;  %v6482_v60 = vld [vmem:[#allocation22 + $0x1368] sm:$0xff] }
 0x850   : > { %10703 = vmatprep.subr.bf16.mxu0 %v11546_v6  ;;  %10727 = vmatprep.subr.bf16.mxu1 %v11546_v6  ;;  %v6569_v19 = vld [vmem:[#allocation22 + $0x13e0] sm:$0xff]  ;;  %v6570_v2 = vld [vmem:[#allocation22 + $0x13e8] sm:$0xff] }
 0x851   : > { %v4967_v51 = vpop.f32.mrb[72].mxu0  ;;  %v5055_v13 = vpop.f32.mrb[76].mxu1 }
 0x852   : > { %v4971_v11 = vadd.f32 %v4967_v51, %v13306_v23  ;;  %v8975_v50 = vpop.f32.mrb[73].mxu0  ;;  %v9010_v17 = vpop.f32.mrb[77].mxu1  ;;  %v6293_v23 = vld [vmem:[#allocation22 + $0x1200] sm:$0xff]  ;;  %v10779_v51 = vpack.c.bf16 %v6394_v10, %v6393_v56  ;;  %v10803_v10 = vpack.c.bf16 %v6482_v60, %v6481_v42 }
 0x853   : > { %10705 = vmatpush3.bf16.msra.mxu0 %v10704_v26  ;;  %10729 = vmatpush3.bf16.msra.mxu1 %v10728_v39  ;;  %v10737_v24 = vpack.c.bf16 %v6294_v59, %v6293_v23  ;;  %v6308_v50 = vld [vmem:[#allocation22 + $0x1278] sm:$0xff]  ;;  %v6395_v17 = vld [vmem:[#allocation22 + $0x12f0] sm:$0xff] }
 0x854   : > { %v13329_v3 = vadd.f32 %v5055_v13, %v4971_v11  ;;  %10706 = vmatprep.subr.bf16.mxu0 %v11546_v6  ;;  %10730 = vmatprep.subr.bf16.mxu1 %v11546_v6  ;;  %v6307_v13 = vld [vmem:[#allocation22 + $0x1270] sm:$0xff]  ;;  %v6472_v59 = vld [vmem:[#allocation22 + $0x1318] sm:$0xff] }
 0x855   : > { %v6471_v23 = vld [vmem:[#allocation22 + $0x1310] sm:$0xff] }
 0x856   : > { %v10788_v28 = vpack.c.bf16 %v6472_v59, %v6471_v23 }
 0x857   : > { %10708 = vmatpush3.bf16.msra.mxu0 %v10707_v43  ;;  %10732 = vmatpush3.bf16.msra.mxu1 %v10731_v44  ;;  %v6396_v43 = vld [vmem:[#allocation22 + $0x12f8] sm:$0xff]  ;;  %v10758_v44 = vpack.c.bf16 %v6308_v50, %v6307_v13  ;;  %v6646_v50 = vld [vmem:[#allocation22 + $0x1408] sm:$0xff] }
 0x858   : > { %10709 = vmatprep.subr.bf16.mxu0 %v11546_v6  ;;  %10733 = vmatprep.subr.bf16.mxu1 %v11546_v6  ;;  %v10782_v1 = vpack.c.bf16 %v6396_v43, %v6395_v17  ;;  %v6733_v17 = vld [vmem:[#allocation22 + $0x1480] sm:$0xff]  ;;  %v6734_v43 = vld [vmem:[#allocation22 + $0x1488] sm:$0xff] }
 0x85b   : > { %10711 = vmatpush3.bf16.msra.mxu0 %v10710_v18  ;;  %10735 = vmatpush3.bf16.msra.mxu1 %v10734_v21  ;;  %v10809_v21 = vpack.c.bf16 %v6558_v63, %v6557_v15  ;;  %v6735_v15 = vld [vmem:[#allocation22 + $0x1490] sm:$0xff]  ;;  %v6736_v63 = vld [vmem:[#allocation22 + $0x1498] sm:$0xff] }
 0x85c   : > { %10736 = vmatprep.subr.bf16.mxu0 %v11546_v6  ;;  %10760 = vmatprep.subr.bf16.mxu1 %v11546_v6  ;;  %v10860_v59 = vpack.c.bf16 %v6736_v63, %v6735_v15  ;;  %v6823_v15 = vld [vmem:[#allocation25] sm:$0xff]  ;;  %v6824_v63 = vld [vmem:[#allocation25 + $0x8] sm:$0xff] }
 0x85e   : > { %9464 = vmatmul.mubr.f32.vlgmr.msra.gmra.mrb[86].mxu0 %v6116_v46  ;;  %9499 = vmatmul.mubr.f32.vlgmr.msra.gmra.mrb[90].mxu1 %v6204_v41  ;;  %v6561_v46 = vld [vmem:[#allocation22 + $0x13a0] sm:$0xff]  ;;  %v6562_v41 = vld [vmem:[#allocation22 + $0x13a8] sm:$0xff] }
 0x85f   : > { %10738 = vmatpush3.bf16.msra.mxu0 %v10737_v24  ;;  %10762 = vmatpush3.bf16.msra.mxu1 %v10761_v27  ;;  %v6292_v24 = vld [vmem:[#allocation4 + $0x42] sm:$0x1]  ;;  %v6380_v27 = vld [vmem:[#allocation4 + $0x43] sm:$0x1] }
 0x860   : > { %10739 = vmatprep.subr.bf16.mxu0 %v11546_v6  ;;  %10763 = vmatprep.subr.bf16.mxu1 %v11546_v6 }
 0x861   : > { %9533 = vmatprep.mubr.msk.f32.mxu0 %vm11549_vm5, %v11550_v16  ;;  %9568 = vmatprep.mubr.msk.f32.mxu1 %vm11549_vm5, %v11550_v16 }
 0x863   : > { %10741 = vmatpush3.bf16.msra.mxu0 %v10740_v31  ;;  %10765 = vmatpush3.bf16.msra.mxu1 %v10764_v34  ;;  %v10791_v31 = vpack.c.bf16 %v6474_v14, %v6473_v29  ;;  %v10815_v34 = vpack.c.bf16 %v6562_v41, %v6561_v46  ;;  %v6651_v29 = vld [vmem:[#allocation22 + $0x1430] sm:$0xff]  ;;  %v6652_v14 = vld [vmem:[#allocation22 + $0x1438] sm:$0xff] }
 0x864   : > { %10742 = vmatprep.subr.bf16.mxu0 %v11546_v6  ;;  %10766 = vmatprep.subr.bf16.mxu1 %v11546_v6  ;;  %v6739_v46 = vld [vmem:[#allocation22 + $0x14b0] sm:$0xff]  ;;  %v6740_v41 = vld [vmem:[#allocation22 + $0x14b8] sm:$0xff] }
 0x867   : > { %10744 = vmatpush3.bf16.msra.mxu0 %v10743_v53  ;;  %10768 = vmatpush3.bf16.msra.mxu1 %v10767_v40  ;;  %v10794_v53 = vpack.c.bf16 %v6476_v36, %v6475_v33  ;;  %v10818_v40 = vpack.c.bf16 %v6564_v35, %v6563_v12  ;;  %v6653_v33 = vld [vmem:[#allocation22 + $0x1440] sm:$0xff]  ;;  %v6654_v36 = vld [vmem:[#allocation22 + $0x1448] sm:$0xff] }
 0x868   : > { %10745 = vmatprep.subr.bf16.mxu0 %v11546_v6  ;;  %10769 = vmatprep.subr.bf16.mxu1 %v11546_v6  ;;  %v6741_v12 = vld [vmem:[#allocation22 + $0x14c0] sm:$0xff]  ;;  %v6742_v35 = vld [vmem:[#allocation22 + $0x14c8] sm:$0xff] }
 0x86b   : > { %10747 = vmatpush3.bf16.msra.mxu0 %v10746_v45  ;;  %10771 = vmatpush3.bf16.msra.mxu1 %v10770_v38  ;;  %v10797_v45 = vpack.c.bf16 %v6478_v22, %v6477_v20  ;;  %v10821_v38 = vpack.c.bf16 %v6566_v32, %v6565_v47  ;;  %v6655_v20 = vld [vmem:[#allocation22 + $0x1450] sm:$0xff]  ;;  %v6656_v22 = vld [vmem:[#allocation22 + $0x1458] sm:$0xff] }
 0x86c   : > { %10748 = vmatprep.subr.bf16.mxu0 %v11546_v6  ;;  %10772 = vmatprep.subr.bf16.mxu1 %v11546_v6  ;;  %v6743_v47 = vld [vmem:[#allocation22 + $0x14d0] sm:$0xff]  ;;  %v6744_v32 = vld [vmem:[#allocation22 + $0x14d8] sm:$0xff] }
 0x86f   : > { %10750 = vmatpush3.bf16.msra.mxu0 %v10749_v57  ;;  %10774 = vmatpush3.bf16.msra.mxu1 %v10773_v58  ;;  %v10800_v57 = vpack.c.bf16 %v6480_v52, %v6479_v49  ;;  %v10824_v58 = vpack.c.bf16 %v6568_v55, %v6567_v54  ;;  %v6657_v49 = vld [vmem:[#allocation22 + $0x1460] sm:$0xff]  ;;  %v6658_v52 = vld [vmem:[#allocation22 + $0x1468] sm:$0xff] }
 0x870   : > { %10751 = vmatprep.subr.bf16.mxu0 %v11546_v6  ;;  %10775 = vmatprep.subr.bf16.mxu1 %v11546_v6  ;;  %v6745_v54 = vld [vmem:[#allocation22 + $0x14e0] sm:$0xff]  ;;  %v6746_v55 = vld [vmem:[#allocation22 + $0x14e8] sm:$0xff] }
 0x871   : > { %v5143_v26 = vpop.f32.mrb[74].mxu0  ;;  %v5231_v39 = vpop.f32.mrb[78].mxu1 }
 0x872   : > { %v5147_v62 = vadd.f32 %v5143_v26, %v13329_v3  ;;  %v9045_v7 = vpop.f32.mrb[75].mxu0  ;;  %v9080_v37 = vpop.f32.mrb[79].mxu1  ;;  %v6469_v3 = vld [vmem:[#allocation22 + $0x1300] sm:$0xff]  ;;  %v10827_v26 = vpack.c.bf16 %v6570_v2, %v6569_v19  ;;  %v10851_v2 = vpack.c.bf16 %v6658_v52, %v6657_v49 }
 0x873   : > { %10753 = vmatpush3.bf16.msra.mxu0 %v10752_v4  ;;  %10777 = vmatpush3.bf16.msra.mxu1 %v10776_v61  ;;  %v10785_v18 = vpack.c.bf16 %v6470_v5, %v6469_v3  ;;  %v6484_v7 = vld [vmem:[#allocation22 + $0x1378] sm:$0xff]  ;;  %v6571_v37 = vld [vmem:[#allocation22 + $0x13f0] sm:$0xff] }
 0x874   : > { %v13352_v11 = vadd.f32 %v5231_v39, %v5147_v62  ;;  %10754 = vmatprep.subr.bf16.mxu0 %v11546_v6  ;;  %10778 = vmatprep.subr.bf16.mxu1 %v11546_v6  ;;  %v6483_v39 = vld [vmem:[#allocation22 + $0x1370] sm:$0xff]  ;;  %v6648_v5 = vld [vmem:[#allocation22 + $0x1418] sm:$0xff] }
 0x875   : > { %v6647_v3 = vld [vmem:[#allocation22 + $0x1410] sm:$0xff] }
 0x876   : > { %v10836_v23 = vpack.c.bf16 %v6648_v5, %v6647_v3 }
 0x877   : > { %10756 = vmatpush3.bf16.msra.mxu0 %v10755_v8  ;;  %10780 = vmatpush3.bf16.msra.mxu1 %v10779_v51  ;;  %v6572_v8 = vld [vmem:[#allocation22 + $0x13f8] sm:$0xff]  ;;  %v10806_v51 = vpack.c.bf16 %v6484_v7, %v6483_v39  ;;  %v6732_v7 = vld [vmem:[#allocation4 + $0x47] sm:$0x1] }
 0x878   : > { %10757 = vmatprep.subr.bf16.mxu0 %v11546_v6  ;;  %10781 = vmatprep.subr.bf16.mxu1 %v11546_v6  ;;  %v10830_v13 = vpack.c.bf16 %v6572_v8, %v6571_v37 }
 0x87b   : > { %10759 = vmatpush3.bf16.msra.mxu0 %v10758_v44  ;;  %10783 = vmatpush3.bf16.msra.mxu1 %v10782_v1  ;;  %v10857_v1 = vpack.c.bf16 %v6734_v43, %v6733_v17 }
 0x87c   : > { %10784 = vmatprep.subr.bf16.mxu0 %v11546_v6  ;;  %10808 = vmatprep.subr.bf16.mxu1 %v11546_v6 }
 0x87e   : > { %9534 = vmatmul.mubr.f32.vlgmr.msra.gmra.mrb[88].mxu0 %v6292_v24  ;;  %9569 = vmatmul.mubr.f32.vlgmr.msra.gmra.mrb[92].mxu1 %v6380_v27  ;;  %v6737_v24 = vld [vmem:[#allocation22 + $0x14a0] sm:$0xff]  ;;  %v6738_v27 = vld [vmem:[#allocation22 + $0x14a8] sm:$0xff] }
 0x87f   : > { %10786 = vmatpush3.bf16.msra.mxu0 %v10785_v18  ;;  %10810 = vmatpush3.bf16.msra.mxu1 %v10809_v21  ;;  %v6468_v18 = vld [vmem:[#allocation4 + $0x44] sm:$0x1]  ;;  %v6556_v21 = vld [vmem:[#allocation4 + $0x45] sm:$0x1] }
 0x880   : > { %10787 = vmatprep.subr.bf16.mxu0 %v11546_v6  ;;  %10811 = vmatprep.subr.bf16.mxu1 %v11546_v6 }
 0x881   : > { %9603 = vmatprep.mubr.msk.f32.mxu0 %vm11549_vm5, %v11550_v16  ;;  %9638 = vmatprep.mubr.msk.f32.mxu1 %vm11549_vm5, %v11550_v16 }
 0x883   : > { %10789 = vmatpush3.bf16.msra.mxu0 %v10788_v28  ;;  %10813 = vmatpush3.bf16.msra.mxu1 %v10812_v30  ;;  %v10839_v28 = vpack.c.bf16 %v6650_v25, %v6649_v0  ;;  %v10863_v30 = vpack.c.bf16 %v6738_v27, %v6737_v24  ;;  %v6828_v0 = vld [vmem:[#allocation25 + $0x28] sm:$0xff]  ;;  %v6829_v24 = vld [vmem:[#allocation25 + $0x30] sm:$0xff]  ;;  %v6830_v27 = vld [vmem:[#allocation25 + $0x38] sm:$0xff] }
 0x884   : > { %10790 = vmatprep.subr.bf16.mxu0 %v11546_v6  ;;  %10814 = vmatprep.subr.bf16.mxu1 %v11546_v6 }
 0x887   : > { %10792 = vmatpush3.bf16.msra.mxu0 %v10791_v31  ;;  %10816 = vmatpush3.bf16.msra.mxu1 %v10815_v34  ;;  %v10842_v31 = vpack.c.bf16 %v6652_v14, %v6651_v29  ;;  %v10866_v34 = vpack.c.bf16 %v6740_v41, %v6739_v46  ;;  %v6832_v29 = vld [vmem:[#allocation25 + $0x48] sm:$0xff]  ;;  %v6833_v46 = vld [vmem:[#allocation25 + $0x50] sm:$0xff]  ;;  %v6834_v41 = vld [vmem:[#allocation25 + $0x58] sm:$0xff] }
 0x888   : > { %10793 = vmatprep.subr.bf16.mxu0 %v11546_v6  ;;  %10817 = vmatprep.subr.bf16.mxu1 %v11546_v6 }
 0x88b   : > { %10795 = vmatpush3.bf16.msra.mxu0 %v10794_v53  ;;  %10819 = vmatpush3.bf16.msra.mxu1 %v10818_v40  ;;  %v10845_v53 = vpack.c.bf16 %v6654_v36, %v6653_v33  ;;  %v10869_v40 = vpack.c.bf16 %v6742_v35, %v6741_v12 }
 0x88c   : > { %10796 = vmatprep.subr.bf16.mxu0 %v11546_v6  ;;  %10820 = vmatprep.subr.bf16.mxu1 %v11546_v6 }
 0x88f   : > { %10798 = vmatpush3.bf16.msra.mxu0 %v10797_v45  ;;  %10822 = vmatpush3.bf16.msra.mxu1 %v10821_v38  ;;  %v10848_v45 = vpack.c.bf16 %v6656_v22, %v6655_v20  ;;  %v10872_v38 = vpack.c.bf16 %v6744_v32, %v6743_v47  ;;  %v6836_v20 = vld [vmem:[#allocation25 + $0x68] sm:$0xff]  ;;  %v6837_v47 = vld [vmem:[#allocation25 + $0x70] sm:$0xff]  ;;  %v6838_v32 = vld [vmem:[#allocation25 + $0x78] sm:$0xff] }
 0x890   : > { %10799 = vmatprep.subr.bf16.mxu0 %v11546_v6  ;;  %10823 = vmatprep.subr.bf16.mxu1 %v11546_v6 }
 0x891   : > { %v5319_v4 = vpop.f32.mrb[76].mxu0  ;;  %v5407_v61 = vpop.f32.mrb[80].mxu1 }
 0x892   : > { %v5323_v48 = vadd.f32 %v5319_v4, %v13352_v11  ;;  %v9115_v9 = vpop.f32.mrb[77].mxu0  ;;  %v9150_v56 = vpop.f32.mrb[81].mxu1  ;;  %v6645_v11 = vld [vmem:[#allocation22 + $0x1400] sm:$0xff]  ;;  %v10875_v4 = vpack.c.bf16 %v6746_v55, %v6745_v54 }
 0x893   : > { %10801 = vmatpush3.bf16.msra.mxu0 %v10800_v57  ;;  %10825 = vmatpush3.bf16.msra.mxu1 %v10824_v58  ;;  %v10833_v44 = vpack.c.bf16 %v6646_v50, %v6645_v11  ;;  %v6660_v9 = vld [vmem:[#allocation22 + $0x1478] sm:$0xff]  ;;  %v6747_v56 = vld [vmem:[#allocation22 + $0x14f0] sm:$0xff] }
 0x894   : > { %v13375_v62 = vadd.f32 %v5407_v61, %v5323_v48  ;;  %10802 = vmatprep.subr.bf16.mxu0 %v11546_v6  ;;  %10826 = vmatprep.subr.bf16.mxu1 %v11546_v6  ;;  %v6659_v61 = vld [vmem:[#allocation22 + $0x1470] sm:$0xff] }
 0x897   : > { %10804 = vmatpush3.bf16.msra.mxu0 %v10803_v10  ;;  %10828 = vmatpush3.bf16.msra.mxu1 %v10827_v26  ;;  %v6748_v10 = vld [vmem:[#allocation22 + $0x14f8] sm:$0xff]  ;;  %v10854_v26 = vpack.c.bf16 %v6660_v9, %v6659_v61 }
 0x898   : > { %10805 = vmatprep.subr.bf16.mxu0 %v11546_v6  ;;  %10829 = vmatprep.subr.bf16.mxu1 %v11546_v6  ;;  %v10878_v39 = vpack.c.bf16 %v6748_v10, %v6747_v56 }
 0x89b   : > { %10807 = vmatpush3.bf16.msra.mxu0 %v10806_v51  ;;  %10831 = vmatpush3.bf16.msra.mxu1 %v10830_v13 }
 0x89c   : > { %10832 = vmatprep.subr.bf16.mxu0 %v11546_v6  ;;  %10856 = vmatprep.subr.bf16.mxu1 %v11546_v6 }
 0x89e   : > { %9604 = vmatmul.mubr.f32.vlgmr.msra.gmra.mrb[90].mxu0 %v6468_v18  ;;  %9639 = vmatmul.mubr.f32.vlgmr.msra.gmra.mrb[94].mxu1 %v6556_v21  ;;  %v6825_v18 = vld [vmem:[#allocation25 + $0x10] sm:$0xff]  ;;  %v10881_v21 = vpack.c.bf16 %v6824_v63, %v6823_v15 }
 0x89f   : > { %10834 = vmatpush3.bf16.msra.mxu0 %v10833_v44  ;;  %10858 = vmatpush3.bf16.msra.mxu1 %v10857_v1 }
 0x8a0   : > { %10835 = vmatprep.subr.bf16.mxu0 %v11546_v6  ;;  %10859 = vmatprep.subr.bf16.mxu1 %v11546_v6 }
 0x8a1   : > { %9673 = vmatprep.mubr.msk.f32.mxu0 %vm11549_vm5, %v11550_v16  ;;  %9708 = vmatprep.mubr.msk.f32.mxu1 %vm11549_vm5, %v11550_v16 }
 0x8a3   : > { %10837 = vmatpush3.bf16.msra.mxu0 %v10836_v23  ;;  %10861 = vmatpush3.bf16.msra.mxu1 %v10860_v59  ;;  %v6826_v23 = vld [vmem:[#allocation25 + $0x18] sm:$0xff] }
 0x8a4   : > { %10838 = vmatprep.subr.bf16.mxu0 %v11546_v6  ;;  %10862 = vmatprep.subr.bf16.mxu1 %v11546_v6  ;;  %v10884_v59 = vpack.c.bf16 %v6826_v23, %v6825_v18 }
 0x8a7   : > { %10840 = vmatpush3.bf16.msra.mxu0 %v10839_v28  ;;  %10864 = vmatpush3.bf16.msra.mxu1 %v10863_v30  ;;  %v10890_v28 = vpack.c.bf16 %v6830_v27, %v6829_v24  ;;  %v6831_v30 = vld [vmem:[#allocation25 + $0x40] sm:$0xff] }
 0x8a8   : > { %10841 = vmatprep.subr.bf16.mxu0 %v11546_v6  ;;  %10865 = vmatprep.subr.bf16.mxu1 %v11546_v6  ;;  %v10893_v14 = vpack.c.bf16 %v6832_v29, %v6831_v30 }
 0x8ab   : > { %10843 = vmatpush3.bf16.msra.mxu0 %v10842_v31  ;;  %10867 = vmatpush3.bf16.msra.mxu1 %v10866_v34  ;;  %v10896_v31 = vpack.c.bf16 %v6834_v41, %v6833_v46 }
 0x8ac   : > { %10844 = vmatprep.subr.bf16.mxu0 %v11546_v6  ;;  %10868 = vmatprep.subr.bf16.mxu1 %v11546_v6 }
 0x8af   : > { %10846 = vmatpush3.bf16.msra.mxu0 %v10845_v53  ;;  %10870 = vmatpush3.bf16.msra.mxu1 %v10869_v40  ;;  %v6835_v40 = vld [vmem:[#allocation25 + $0x60] sm:$0xff] }
 0x8b0   : > { %10847 = vmatprep.subr.bf16.mxu0 %v11546_v6  ;;  %10871 = vmatprep.subr.bf16.mxu1 %v11546_v6  ;;  %v10899_v22 = vpack.c.bf16 %v6836_v20, %v6835_v40 }
 0x8b1   : > { %v5495_v57 = vpop.f32.mrb[78].mxu0  ;;  %v5583_v58 = vpop.f32.mrb[82].mxu1 }
 0x8b2   : > { %v5499_v42 = vadd.f32 %v5495_v57, %v13375_v62  ;;  %v9185_v60 = vpop.f32.mrb[79].mxu0  ;;  %v9220_v19 = vpop.f32.mrb[83].mxu1  ;;  %v6644_v62 = vld [vmem:[#allocation4 + $0x46] sm:$0x1] }
 0x8b3   : > { %10849 = vmatpush3.bf16.msra.mxu0 %v10848_v45  ;;  %10873 = vmatpush3.bf16.msra.mxu1 %v10872_v38  ;;  %v10902_v45 = vpack.c.bf16 %v6838_v32, %v6837_v47 }
 0x8b4   : > { %v5587_v48 = vadd.f32 %v5583_v58, %v5499_v42  ;;  %10850 = vmatprep.subr.bf16.mxu0 %v11546_v6  ;;  %10874 = vmatprep.subr.bf16.mxu1 %v11546_v6 }
 0x8b7   : > { %10852 = vmatpush3.bf16.msra.mxu0 %v10851_v2  ;;  %10876 = vmatpush3.bf16.msra.mxu1 %v10875_v4 }
 0x8b8   : > { %10853 = vmatprep.subr.bf16.mxu0 %v11546_v6  ;;  %10877 = vmatprep.subr.bf16.mxu1 %v11546_v6 }
 0x8bb   : > { %10855 = vmatpush3.bf16.msra.mxu0 %v10854_v26  ;;  %10879 = vmatpush3.bf16.msra.mxu1 %v10878_v39 }
 0x8bc   : > { %10880 = vmatprep.subr.bf16.mxu0 %v11546_v6 }
 0x8be   : > { %9674 = vmatmul.mubr.f32.vlgmr.msra.gmra.mrb[92].mxu0 %v6644_v62  ;;  %9709 = vmatmul.mubr.f32.vlgmr.msra.gmra.mrb[96].mxu1 %v6732_v7 }
 0x8bf   : > { %9743 = vmatprep.mubr.msk.f32.mxu0 %vm11549_vm5, %v11550_v16  ;;  %10882 = vmatpush3.bf16.msra.mxu0 %v10881_v21  ;;  %v6827_v16 = vld [vmem:[#allocation25 + $0x20] sm:$0xff] }
 0x8c0   : > { %10883 = vmatprep.subr.bf16.mxu0 %v11546_v6  ;;  %v10887_v25 = vpack.c.bf16 %v6828_v0, %v6827_v16 }
 0x8c3   : > { %10885 = vmatpush3.bf16.msra.mxu0 %v10884_v59 }
 0x8c4   : > { %10886 = vmatprep.subr.bf16.mxu0 %v11546_v6 }
 0x8c7   : > { %10888 = vmatpush3.bf16.msra.mxu0 %v10887_v25 }
 0x8c8   : > { %10889 = vmatprep.subr.bf16.mxu0 %v11546_v6 }
 0x8cb   : > { %10891 = vmatpush3.bf16.msra.mxu0 %v10890_v28 }
 0x8cc   : > { %10892 = vmatprep.subr.bf16.mxu0 %v11546_v6 }
 0x8cf   : > { %10894 = vmatpush3.bf16.msra.mxu0 %v10893_v14 }
 0x8d0   : > { %10895 = vmatprep.subr.bf16.mxu0 %v11546_v6 }
 0x8d1   : > { %v5671_v37 = vpop.f32.mrb[80].mxu0  ;;  %v5759_v8 = vpop.f32.mrb[84].mxu1 }
 0x8d2   : > { %v5675_v51 = vadd.f32 %v5671_v37, %v5587_v48  ;;  %v9255_v13 = vpop.f32.mrb[81].mxu0  ;;  %v9290_v11 = vpop.f32.mrb[85].mxu1 }
 0x8d3   : > { %10897 = vmatpush3.bf16.msra.mxu0 %v10896_v31 }
 0x8d4   : > { %v5763_v50 = vadd.f32 %v5759_v8, %v5675_v51  ;;  %10898 = vmatprep.subr.bf16.mxu0 %v11546_v6  ;;  %v6820_v8 = vld [vmem:[#allocation23] sm:$0x1] }
 0x8d7   : > { %10900 = vmatpush3.bf16.msra.mxu0 %v10899_v22 }
 0x8d8   : > { %10901 = vmatprep.subr.bf16.mxu0 %v11546_v6 }
 0x8db   : > { %10903 = vmatpush3.bf16.msra.mxu0 %v10902_v45 }
 0x8f1   : > { %v5847_v17 = vpop.f32.mrb[82].mxu0  ;;  %v5935_v43 = vpop.f32.mrb[86].mxu1 }
 0x8f2   : > { %v5851_v44 = vadd.f32 %v5847_v17, %v5763_v50  ;;  %v9325_v1 = vpop.f32.mrb[83].mxu0  ;;  %v9360_v3 = vpop.f32.mrb[87].mxu1  ;;  %v6839_v50 = vld [vmem:[#allocation26] sm:$0x1] }
 0x8f4   : > { %v5939_v5 = vadd.f32 %v5935_v43, %v5851_v44 }
 0x911   : > { %v6023_v34 = vpop.f32.mrb[84].mxu0  ;;  %v6111_v33 = vpop.f32.mrb[88].mxu1 }
 0x912   : > { %v6027_v36 = vadd.f32 %v6023_v34, %v5939_v5  ;;  %v9395_v12 = vpop.f32.mrb[85].mxu0  ;;  %v9430_v35 = vpop.f32.mrb[89].mxu1 }
 0x914   : > { %v6115_v53 = vadd.f32 %v6111_v33, %v6027_v36 }
 0x931   : > { %v6199_v38 = vpop.f32.mrb[86].mxu0  ;;  %v6287_v49 = vpop.f32.mrb[90].mxu1 }
 0x932   : > { %v6203_v52 = vadd.f32 %v6199_v38, %v6115_v53  ;;  %v9465_v54 = vpop.f32.mrb[87].mxu0  ;;  %v9500_v55 = vpop.f32.mrb[91].mxu1 }
 0x934   : > { %v6291_v57 = vadd.f32 %v6287_v49, %v6203_v52 }
 0x951   : > { %v6375_v58 = vpop.f32.mrb[88].mxu0  ;;  %v6463_v42 = vpop.f32.mrb[92].mxu1 }
 0x952   : > { %v6379_v60 = vadd.f32 %v6375_v58, %v6291_v57  ;;  %v9535_v19 = vpop.f32.mrb[89].mxu0  ;;  %v9570_v2 = vpop.f32.mrb[93].mxu1 }
 0x954   : > { %v6467_v4 = vadd.f32 %v6463_v42, %v6379_v60 }
 0x971   : > { %v6551_v61 = vpop.f32.mrb[90].mxu0  ;;  %v6639_v48 = vpop.f32.mrb[94].mxu1 }
 0x972   : > { %v6555_v9 = vadd.f32 %v6551_v61, %v6467_v4  ;;  %v9605_v6 = vpop.f32.mrb[91].mxu0  ;;  %v9640_v56 = vpop.f32.mrb[95].mxu1 }
 0x974   : > { %v6643_v10 = vadd.f32 %v6639_v48, %v6555_v9 }
 0x991   : > { %v6727_v26 = vpop.f32.mrb[92].mxu0  ;;  %v6815_v39 = vpop.f32.mrb[96].mxu1 }
 0x992   : > { %v6731_v62 = vadd.f32 %v6727_v26, %v6643_v10  ;;  %v9675_v7 = vpop.f32.mrb[93].mxu0  ;;  %v9710_v37 = vpop.f32.mrb[97].mxu1 }
 0x994   : > { %v6819_v51 = vadd.f32 %v6815_v39, %v6731_v62 }
 0x996   : > { %v6821_v13 = vadd.f32 %v6820_v8, %v6819_v51 }
 0x998   : > { %v6822_v11 = vmax.f32 %v6821_v13, 0.0 }
 0x99a   : > { %9744 = vmatmul.mubr.f32.vlgmr.msra.gmra.mrb[94].mxu0 %v6822_v11 }
 0xa6d   : > { %v6906_v17 = vpop.f32.mrb[94].mxu0 }
 0xa6e   : > { %v6907_v43 = vadd.f32 %v6906_v17, %v6839_v50  ;;  %v9745_v44 = vpop.f32.mrb[95].mxu0 }
 0xa70   : > { %6910 = vst [vmem:[%s11983_s2] sm:$0x1] %v6907_v43 }
 0xa71   : > { %11448 = shalt.err (!%p11445_p4)
}
 0xa72   : > { %s11449_s30 = scalar_lea.hbm %s13417_s15, 16  ;;  %s11453_s20 = scalar_lea.hbm %s13532_s16, 32 }
 0xa73   : > { %p11450_p7 = scmp.ne.s32.totalorder %s13417_s15, %s11449_s30  ;;  %p11454_p0 = scmp.lt.u32.totalorder %s13417_s15, %s13532_s16 }
 0xa74   : > { %p11455_p2 = scmp.lt.u32.totalorder %s11453_s20, %s11449_s30  ;;  %p11457_p6 = scmp.lt.u32.totalorder %s11449_s30, %s13417_s15 }
 0xa75   : > { %p11451_p8 = pnand %p11450_p7, %p13533_p5 }
 0xa76   : > { %p11456_p1 = por %p11455_p2, %p11454_p0 }
 0xa77   : > { %p11452_p12 = pneg %p11451_p8 }
 0xa78   : > { %p11458_p9 = por %p11457_p6, %p11456_p1 }
 0xa7a   : > { %p11459_p13 = pnand %p11458_p9, %p11452_p12 }
 0xa7c   : > { %11462 = shalt.err (!%p11459_p13)
}
 0xa7d   : > { %10969 = dma.vmem_to_hbm [thread:$0]  (%p13533_p5), %s13419_s23, 16, %s13417_s15, %s6912_s27  }
 0xa7e PF: > { %s13534_s26 = sld [smem:[#allocation39_spill]]  ;;  %s13535_s29 = sld [smem:[#allocation37_spill]] }
 0xa7f   : > { %s13536_s0 = sld [smem:[#allocation43_spill]] }
 0xa84   : > { %p11036_p10 = scmp.ge.s32.totalorder %s13534_s26, 2  ;;  %s6936_s18 = sand.u32 1, %s13535_s29  }
 0xa85   : > { %p13537_p11 = scmp.ne.s32.totalorder %s13536_s0, 0  ;;  %s6937_s22 = scalar_lea.sflag [#allocation10], %s6936_s18 }
 0xa87   : > { %p11009_p3 = pnand %p11036_p10, %p13537_p11 }
 0xa89   : > { %11508 = dma.done.wait (!%p11009_p3), %s6937_s22, 16  }
 0xa8a   : > { %11510 = vsyncadd (!%p11009_p3), %s6937_s22, 4294967280  ;;  %s13538_s21 = sld [smem:[#allocation40_spill]]  ;;  %s13539_s25 = sld [smem:[#allocation38_spill]] }
 0xa8b   : > { %s13540_s20 = sld [smem:[#allocation41_spill]]  ;;  %s13541_s18 = smov %s11517_s19 }
 0xa90   : > { %p32_p4 = scmp.ge.s32.totalorder %s13538_s21, 4   ;;  %s13542_s19 = smov %s13539_s25 }
 0xa92   :  { %34 = sbr.rel (!%p32_p4) target bundleno = 17 (0x11), region = 168 }
 0xa99   :  { %6941 = vsyncpa [#allocation9], 1 }
 0xa9a   :  { %6943 = vsyncpa [#allocation9 + $0x1], 1 }
 0xa9b   :  { %6944 = vsyncpa [#allocation12], 1 }
 0xa9c   :  { %6945 = vsyncpa [#allocation15], 1 }
 0xa9d   :  { %6946 = vsyncpa [#allocation18], 1 }
 0xa9e   :  { %6947 = vsyncpa [#allocation21], 1 }
 0xa9f   :  { %6948 = vsyncpa [#allocation24], 1 }
 0xaa0   :  { %6949 = vsyncpa [#allocation27], 1 }
 0xaa1   :  { %6950 = vsyncpa [#allocation10], 1 }
 0xaa2   :  { %6952 = vsyncpa [#allocation10 + $0x1], 1 }

</bundles_post_ra>
